<compile_context>
chip_gen: v7x
topology: tpu7x:2x2x1
jax: 0.10.0
libtpu: 0.0.40
codegen_flags: <defaults>
</compile_context>

<pallas_src>
import functools

import jax
import jax.numpy as jnp
from jax.experimental import pallas as pl
from jax.experimental.pallas import tpu as pltpu

EPS = 1e-5          # nn.BatchNorm2d default eps
LRELU_SLOPE = 0.01  # nn.LeakyReLU() default negative_slope (as used by the reference CBR)


# --------------------------------------------------------------------------- kernels
def _conv_bn_lrelu_kernel(*refs, n_parts, inv_m, eps, slope):
    """Fused conv (split-K matmul) + bias + BatchNorm(batch stats) + LeakyReLU.

    refs = (a_0..a_{p-1}, w_0..w_{p-1}, bias, gamma, beta, out)
      a_i  : (K_i, M)  bf16 im2col patches (M = N*Ho*Wo on the lane axis)
      w_i  : (Cout, K_i) bf16
      bias, gamma, beta : (Cout, 1) f32
      out  : (Cout, M) bf16
    """
    a_refs = refs[:n_parts]
    w_refs = refs[n_parts:2 * n_parts]
    bias_ref, gamma_ref, beta_ref, o_ref = refs[2 * n_parts:]

    acc = jnp.dot(w_refs[0][...], a_refs[0][...], preferred_element_type=jnp.float32)
    for i in range(1, n_parts):  # static unroll (<= 2 parts: skip-concat fused as split-K)
        acc += jnp.dot(w_refs[i][...], a_refs[i][...], preferred_element_type=jnp.float32)

    y = acc + bias_ref[...]                                  # (Cout, M), f32
    # Training-mode BatchNorm over M = N*H*W.  Centered variance (no E[x^2]-E[x]^2
    # cancellation) — everything stays in f32 on the VPU/EUP.
    mean = jnp.sum(y, axis=1, keepdims=True) * inv_m         # (Cout, 1)
    yc = y - mean
    var = jnp.sum(yc * yc, axis=1, keepdims=True) * inv_m    # biased batch variance
    scale = gamma_ref[...] * jax.lax.rsqrt(var + eps)
    z = yc * scale + beta_ref[...]
    z = jnp.where(z >= 0, z, slope * z)                      # LeakyReLU(0.01)
    o_ref[...] = z.astype(o_ref.dtype)


def _conv_tanh_kernel(a_ref, w_ref, bias_ref, o_ref):
    """Output head: conv (matmul) + bias + tanh, f32 output."""
    y = jnp.dot(w_ref[...], a_ref[...], preferred_element_type=jnp.float32)
    o_ref[...] = jnp.tanh(y + bias_ref[...])


# --------------------------------------------------------------------------- wrappers
def _full_block_specs(arrays):
    # Every operand is a single full-array block (grid=(1,)) — everything fits VMEM
    # comfortably at these shapes, and full blocks avoid the (8,128) tiling constraint.
    return [pl.BlockSpec(a.shape, lambda i: (0, 0)) for a in arrays]


def fused_conv_bn_lrelu(a_list, w_list, bias, gamma, beta):
    n_parts = len(a_list)
    cout = w_list[0].shape[0]
    m = a_list[0].shape[1]
    args = (*a_list, *w_list,
            bias.reshape(cout, 1).astype(jnp.float32),
            gamma.reshape(cout, 1).astype(jnp.float32),
            beta.reshape(cout, 1).astype(jnp.float32))
    kernel = functools.partial(_conv_bn_lrelu_kernel, n_parts=n_parts,
                               inv_m=1.0 / m, eps=EPS, slope=LRELU_SLOPE)
    return pl.pallas_call(
        kernel,
        out_shape=jax.ShapeDtypeStruct((cout, m), jnp.bfloat16),
        grid_spec=pltpu.PrefetchScalarGridSpec(
            num_scalar_prefetch=0,
            grid=(1,),
            in_specs=_full_block_specs(args),
            out_specs=pl.BlockSpec((cout, m), lambda i: (0, 0)),
        ),
        compiler_params=pltpu.CompilerParams(
            dimension_semantics=("arbitrary",),
            vmem_limit_bytes=32 * 1024 * 1024,   # explicit budget, portable to v7x (64 MiB VMEM)
        ),
    )(*args)


def fused_conv_tanh(a, w, bias):
    cout = w.shape[0]
    m = a.shape[1]
    args = (a, w, bias.reshape(cout, 1).astype(jnp.float32))
    return pl.pallas_call(
        _conv_tanh_kernel,
        out_shape=jax.ShapeDtypeStruct((cout, m), jnp.float32),
        grid_spec=pltpu.PrefetchScalarGridSpec(
            num_scalar_prefetch=0,
            grid=(1,),
            in_specs=_full_block_specs(args),
            out_specs=pl.BlockSpec((cout, m), lambda i: (0, 0)),
        ),
        compiler_params=pltpu.CompilerParams(
            dimension_semantics=("arbitrary",),
            vmem_limit_bytes=32 * 1024 * 1024,
        ),
    )(*args)


# --------------------------------------------------------------------------- JAX glue
def _im2col_t(x_nchw, ksz, stride, pad):
    """NCHW activation -> (K, M) patch matrix (transposed, lane-dense layout).

    K is ordered (cin, kh, kw) so it matches w.reshape(Cout, Cin*KH*KW);
    M = N*Ho*Wo lands on the TPU lane axis inside the kernels.
    Only static strided slices / stack / reshape — no gather HLO.
    """
    n, c, h, w = x_nchw.shape
    ho = (h + 2 * pad - ksz) // stride + 1
    wo = (w + 2 * pad - ksz) // stride + 1
    xp = jnp.pad(x_nchw, ((0, 0), (0, 0), (pad, pad), (pad, pad)))
    slices = []
    for ih in range(ksz):
        for iw in range(ksz):
            slices.append(
                xp[:, :,
                   ih: ih + stride * (ho - 1) + 1: stride,
                   iw: iw + stride * (wo - 1) + 1: stride])
    pat = jnp.stack(slices, axis=2)                    # (N, C, KH*KW, Ho, Wo)
    pat = pat.reshape(n, c * ksz * ksz, ho, wo)        # K order = (cin, kh, kw)
    pat = jnp.transpose(pat, (1, 0, 2, 3)).reshape(c * ksz * ksz, n * ho * wo)
    return pat, (n, ho, wo)


def upsample2x_bilinear_nchw(x):
    """nn.Upsample(scale_factor=2, mode='bilinear', align_corners=False) as a fixed
    separable stencil:  out[2i] = .75*x[i] + .25*x[i-1],  out[2i+1] = .75*x[i] + .25*x[i+1]
    (edge-clamped).  Pure shift/add/interleave — no gather."""
    n, c, h, w = x.shape
    prev_h = jnp.concatenate([x[:, :, :1, :], x[:, :, :-1, :]], axis=2)
    next_h = jnp.concatenate([x[:, :, 1:, :], x[:, :, -1:, :]], axis=2)
    even = 0.75 * x + 0.25 * prev_h
    odd = 0.75 * x + 0.25 * next_h
    xh = jnp.stack([even, odd], axis=3).reshape(n, c, 2 * h, w)
    prev_w = jnp.concatenate([xh[:, :, :, :1], xh[:, :, :, :-1]], axis=3)
    next_w = jnp.concatenate([xh[:, :, :, 1:], xh[:, :, :, -1:]], axis=3)
    even = 0.75 * xh + 0.25 * prev_w
    odd = 0.75 * xh + 0.25 * next_w
    return jnp.stack([even, odd], axis=4).reshape(n, c, 2 * h, 2 * w)


def cbr_forward(parts, p, ksz, stride, pad, up):
    """CBR = [Upsample2x?] -> Conv2d -> BatchNorm2d(train-mode) -> LeakyReLU.

    `parts` is a list of NCHW tensors whose channels are conceptually concatenated;
    the concat is fused as split-K matmuls inside the single Pallas kernel instead of
    being materialised in HBM."""
    if up:
        parts = [upsample2x_bilinear_nchw(t) for t in parts]
    w = p["w"]                                   # (Cout, Cin_total, KH, KW) — torch layout
    cout = w.shape[0]
    a_list, w_list = [], []
    coff = 0
    for t in parts:
        cin_t = t.shape[1]
        a_t, (n, ho, wo) = _im2col_t(t, ksz, stride, pad)
        w_t = w[:, coff:coff + cin_t].reshape(cout, cin_t * ksz * ksz)
        coff += cin_t
        a_list.append(a_t.astype(jnp.bfloat16))   # bf16 matmul inputs (MXU native path)
        w_list.append(w_t.astype(jnp.bfloat16))
    y = fused_conv_bn_lrelu(a_list, w_list, p["b"], p["gamma"], p["beta"])  # (Cout, M) bf16
    return y.reshape(cout, n, ho, wo).transpose(1, 0, 2, 3)                 # -> NCHW


# --------------------------------------------------------------------------- generator
def build_params(key, in_ch=3, base=8):
    """Deterministic synthetic init mirroring weights_init_normal shapes (torch layout)."""
    enc_dims = [
        (in_ch, base, 3),
        (base, base * 2, 4),
        (base * 2, base * 4, 4),
        (base * 4, base * 8, 4),
        (base * 8, base * 8, 4),
        (base * 8, base * 16, 4),
    ]
    dec_dims = [
        (base * 16, base * 8, 3),
        (base * 16, base * 8, 3),
        (base * 16, base * 4, 3),
        (base * 8, base * 2, 3),
        (base * 4, base, 3),
    ]
    keys = jax.random.split(key, len(enc_dims) + len(dec_dims) + 1)

    def cbr_p(k, cin, cout, ksz):
        k1, k2 = jax.random.split(k)
        return {
            "w": 0.02 * jax.random.normal(k1, (cout, cin, ksz, ksz), jnp.float32),
            "b": jnp.zeros((cout,), jnp.float32),
            "gamma": 1.0 + 0.02 * jax.random.normal(k2, (cout,), jnp.float32),
            "beta": jnp.zeros((cout,), jnp.float32),
        }

    params = {
        "enc": [cbr_p(keys[i], *enc_dims[i]) for i in range(len(enc_dims))],
        "dec": [cbr_p(keys[len(enc_dims) + i], *dec_dims[i]) for i in range(len(dec_dims))],
        "out": {
            "w": 0.02 * jax.random.normal(keys[-1], (3, base, 3, 3), jnp.float32),
            "b": jnp.zeros((3,), jnp.float32),
        },
    }
    return params


ENC_CFG = [(3, 1, 1), (4, 2, 1), (4, 2, 1), (4, 2, 1), (4, 2, 1), (4, 2, 1)]  # (kernel, stride, pad)
DEC_CFG = [(3, 1, 1)] * 5                                                     # all up=True


def generator_forward(x_nchw, params):
    h = x_nchw.astype(jnp.float32)
    # encoder
    enc_list = []
    for p, (k, s, pd) in zip(params["enc"], ENC_CFG):
        h = cbr_forward([h], p, k, s, pd, up=False)
        enc_list.append(h)
    # decoder with skip connections (concat fused as split-K inside the kernel)
    for idx, (p, (k, s, pd)) in enumerate(zip(params["dec"], DEC_CFG)):
        parts = [h] if idx == 0 else [h, enc_list[-idx - 1]]
        h = cbr_forward(parts, p, k, s, pd, up=True)
    # output head: Conv(base, 3, 3, 1, 1) + Tanh
    pout = params["out"]
    a, (n, ho, wo) = _im2col_t(h, 3, 1, 1)
    wmat = pout["w"].reshape(pout["w"].shape[0], -1)
    y = fused_conv_tanh(a.astype(jnp.bfloat16), wmat.astype(jnp.bfloat16), pout["b"])
    return y.reshape(3, n, ho, wo).transpose(1, 0, 2, 3)  # -> NCHW, f32


if __name__ == "__main__":
    key = jax.random.PRNGKey(0)
    pkey, xkey = jax.random.split(key)
    # small shapes: batch=1, in_ch=3, spatial=32 (5 stride-2 downsamples -> 1x1 bottleneck)
    params = build_params(pkey, in_ch=3, base=8)
    x = jax.random.normal(xkey, (1, 3, 32, 32), jnp.float32)

    fwd = jax.jit(lambda inp: generator_forward(inp, params))
    out = fwd(x)
    jax.block_until_ready(out)

    assert out.shape == (1, 3, 32, 32), out.shape
    assert bool(jnp.all(jnp.isfinite(out)))
    assert bool(jnp.all(jnp.abs(out) <= 1.0 + 1e-6))  # tanh output range
    print("KERNEL_OK")
</pallas_src>

<mosaic_0001>
module attributes {stable_mosaic.version = 11 : i64} {
  func.func @_conv_bn_lrelu_kernel(%arg0: i32, %arg1: memref<27x1024xbf16, #tpu.memory_space<vmem>>, %arg2: memref<8x27xbf16, #tpu.memory_space<vmem>>, %arg3: memref<8x1xf32, #tpu.memory_space<vmem>>, %arg4: memref<8x1xf32, #tpu.memory_space<vmem>>, %arg5: memref<8x1xf32, #tpu.memory_space<vmem>>, %arg6: memref<8x1024xbf16, #tpu.memory_space<vmem>>) attributes {dimension_semantics = [#tpu.dimension_semantics<arbitrary>], iteration_bounds = array<i64: 1>, scalar_prefetch = 0 : i64, scratch_operands = 0 : i64, tpu.core_type = #tpu.core_type<tc>, window_params = [{pipeline_mode = #tpu.pipeline_mode<synchronous>, transform_indices = @transform_0, window_bounds = array<i64: 27, 1024>}, {pipeline_mode = #tpu.pipeline_mode<synchronous>, transform_indices = @transform_1, window_bounds = array<i64: 8, 27>}, {pipeline_mode = #tpu.pipeline_mode<synchronous>, transform_indices = @transform_2, window_bounds = array<i64: 8, 1>}, {pipeline_mode = #tpu.pipeline_mode<synchronous>, transform_indices = @transform_3, window_bounds = array<i64: 8, 1>}, {pipeline_mode = #tpu.pipeline_mode<synchronous>, transform_indices = @transform_4, window_bounds = array<i64: 8, 1>}, {pipeline_mode = #tpu.pipeline_mode<synchronous>, transform_indices = @transform_5, window_bounds = array<i64: 8, 1024>}]} {
    %c0 = arith.constant 0 : index
    %c0_0 = arith.constant 0 : index
    %0 = vector.load %arg2[%c0, %c0_0] : memref<8x27xbf16, #tpu.memory_space<vmem>>, vector<8x27xbf16>
    %c0_1 = arith.constant 0 : index
    %c0_2 = arith.constant 0 : index
    %1 = vector.load %arg1[%c0_1, %c0_2] : memref<27x1024xbf16, #tpu.memory_space<vmem>>, vector<27x1024xbf16>
    %cst = arith.constant dense<0.000000e+00> : vector<8x1024xf32>
    %2 = tpu.matmul %0, %1, %cst {dimension_numbers = #tpu.dot_dimension_numbers<[1], [0], [0], [1], [0, 0, 1, 1], [], []>} : vector<8x27xbf16>, vector<27x1024xbf16>, vector<8x1024xf32> -> vector<8x1024xf32>
    %c0_3 = arith.constant 0 : index
    %c0_4 = arith.constant 0 : index
    %3 = vector.load %arg3[%c0_3, %c0_4] : memref<8x1xf32, #tpu.memory_space<vmem>>, vector<8x1xf32>
    %4 = vector.broadcast %3 : vector<8x1xf32> to vector<8x1024xf32>
    %5 = arith.addf %2, %4 : vector<8x1024xf32>
    %cst_5 = arith.constant dense<0.000000e+00> : vector<8xf32>
    %6 = vector.multi_reduction <add>, %5, %cst_5 [1] : vector<8x1024xf32> to vector<8xf32>
    %7 = vector.shape_cast %6 : vector<8xf32> to vector<8x1xf32>
    %cst_6 = arith.constant 9.765625E-4 : f32
    %8 = vector.broadcast %cst_6 : f32 to vector<8x1xf32>
    %9 = arith.mulf %7, %8 : vector<8x1xf32>
    %10 = vector.broadcast %9 : vector<8x1xf32> to vector<8x1024xf32>
    %11 = arith.subf %5, %10 : vector<8x1024xf32>
    %12 = arith.mulf %11, %11 : vector<8x1024xf32>
    %cst_7 = arith.constant dense<0.000000e+00> : vector<8xf32>
    %13 = vector.multi_reduction <add>, %12, %cst_7 [1] : vector<8x1024xf32> to vector<8xf32>
    %14 = vector.shape_cast %13 : vector<8xf32> to vector<8x1xf32>
    %cst_8 = arith.constant 9.765625E-4 : f32
    %15 = vector.broadcast %cst_8 : f32 to vector<8x1xf32>
    %16 = arith.mulf %14, %15 : vector<8x1xf32>
    %c0_9 = arith.constant 0 : index
    %c0_10 = arith.constant 0 : index
    %17 = vector.load %arg4[%c0_9, %c0_10] : memref<8x1xf32, #tpu.memory_space<vmem>>, vector<8x1xf32>
    %cst_11 = arith.constant 9.99999974E-6 : f32
    %18 = vector.broadcast %cst_11 : f32 to vector<8x1xf32>
    %19 = arith.addf %16, %18 : vector<8x1xf32>
    %20 = math.rsqrt %19 : vector<8x1xf32>
    %21 = arith.mulf %17, %20 : vector<8x1xf32>
    %22 = vector.broadcast %21 : vector<8x1xf32> to vector<8x1024xf32>
    %23 = arith.mulf %11, %22 : vector<8x1024xf32>
    %c0_12 = arith.constant 0 : index
    %c0_13 = arith.constant 0 : index
    %24 = vector.load %arg5[%c0_12, %c0_13] : memref<8x1xf32, #tpu.memory_space<vmem>>, vector<8x1xf32>
    %25 = vector.broadcast %24 : vector<8x1xf32> to vector<8x1024xf32>
    %26 = arith.addf %23, %25 : vector<8x1024xf32>
    %cst_14 = arith.constant 0.000000e+00 : f32
    %27 = vector.broadcast %cst_14 : f32 to vector<8x1024xf32>
    %28 = arith.cmpf oge, %26, %27 : vector<8x1024xf32>
    %cst_15 = arith.constant 0.00999999977 : f32
    %29 = vector.broadcast %cst_15 : f32 to vector<8x1024xf32>
    %30 = arith.mulf %29, %26 : vector<8x1024xf32>
    %31 = arith.select %28, %26, %30 : vector<8x1024xi1>, vector<8x1024xf32>
    %32 = arith.truncf %31 : vector<8x1024xf32> to vector<8x1024xbf16>
    %c0_16 = arith.constant 0 : index
    %c0_17 = arith.constant 0 : index
    %33 = vector.load %arg6[%c0_16, %c0_17] : memref<8x1024xbf16, #tpu.memory_space<vmem>>, vector<8x1024xbf16>
    tpu.vector_store %arg6[%c0_16, %c0_17], %32 {strides = array<i32>} : memref<8x1024xbf16, #tpu.memory_space<vmem>>, vector<8x1024xbf16>,
    return
  }
  func.func @transform_0(%arg0: i32) -> (i32, i32) {
    %c0_i32 = arith.constant 0 : i32
    %c0_i32_0 = arith.constant 0 : i32
    %c0_i32_1 = arith.constant 0 : i32
    return %c0_i32, %c0_i32_0 : i32, i32
  }
  func.func @transform_1(%arg0: i32) -> (i32, i32) {
    %c0_i32 = arith.constant 0 : i32
    %c0_i32_0 = arith.constant 0 : i32
    %c0_i32_1 = arith.constant 0 : i32
    return %c0_i32, %c0_i32_0 : i32, i32
  }
  func.func @transform_2(%arg0: i32) -> (i32, i32) {
    %c0_i32 = arith.constant 0 : i32
    %c0_i32_0 = arith.constant 0 : i32
    %c0_i32_1 = arith.constant 0 : i32
    return %c0_i32, %c0_i32_0 : i32, i32
  }
  func.func @transform_3(%arg0: i32) -> (i32, i32) {
    %c0_i32 = arith.constant 0 : i32
    %c0_i32_0 = arith.constant 0 : i32
    %c0_i32_1 = arith.constant 0 : i32
    return %c0_i32, %c0_i32_0 : i32, i32
  }
  func.func @transform_4(%arg0: i32) -> (i32, i32) {
    %c0_i32 = arith.constant 0 : i32
    %c0_i32_0 = arith.constant 0 : i32
    %c0_i32_1 = arith.constant 0 : i32
    return %c0_i32, %c0_i32_0 : i32, i32
  }
  func.func @transform_5(%arg0: i32) -> (i32, i32) {
    %c0_i32 = arith.constant 0 : i32
    %c0_i32_0 = arith.constant 0 : i32
    %c0_i32_1 = arith.constant 0 : i32
    return %c0_i32, %c0_i32_0 : i32, i32
  }
}

module attributes {stable_mosaic.version = 11 : i64} {
  func.func @_conv_bn_lrelu_kernel(%arg0: i32, %arg1: memref<128x256xbf16, #tpu.memory_space<vmem>>, %arg2: memref<16x128xbf16, #tpu.memory_space<vmem>>, %arg3: memref<16x1xf32, #tpu.memory_space<vmem>>, %arg4: memref<16x1xf32, #tpu.memory_space<vmem>>, %arg5: memref<16x1xf32, #tpu.memory_space<vmem>>, %arg6: memref<16x256xbf16, #tpu.memory_space<vmem>>) attributes {dimension_semantics = [#tpu.dimension_semantics<arbitrary>], iteration_bounds = array<i64: 1>, scalar_prefetch = 0 : i64, scratch_operands = 0 : i64, tpu.core_type = #tpu.core_type<tc>, window_params = [{pipeline_mode = #tpu.pipeline_mode<synchronous>, transform_indices = @transform_0, window_bounds = array<i64: 128, 256>}, {pipeline_mode = #tpu.pipeline_mode<synchronous>, transform_indices = @transform_1, window_bounds = array<i64: 16, 128>}, {pipeline_mode = #tpu.pipeline_mode<synchronous>, transform_indices = @transform_2, window_bounds = array<i64: 16, 1>}, {pipeline_mode = #tpu.pipeline_mode<synchronous>, transform_indices = @transform_3, window_bounds = array<i64: 16, 1>}, {pipeline_mode = #tpu.pipeline_mode<synchronous>, transform_indices = @transform_4, window_bounds = array<i64: 16, 1>}, {pipeline_mode = #tpu.pipeline_mode<synchronous>, transform_indices = @transform_5, window_bounds = array<i64: 16, 256>}]} {
    %c0 = arith.constant 0 : index
    %c0_0 = arith.constant 0 : index
    %0 = vector.load %arg2[%c0, %c0_0] : memref<16x128xbf16, #tpu.memory_space<vmem>>, vector<16x128xbf16>
    %c0_1 = arith.constant 0 : index
    %c0_2 = arith.constant 0 : index
    %1 = vector.load %arg1[%c0_1, %c0_2] : memref<128x256xbf16, #tpu.memory_space<vmem>>, vector<128x256xbf16>
    %cst = arith.constant dense<0.000000e+00> : vector<16x256xf32>
    %2 = tpu.matmul %0, %1, %cst {dimension_numbers = #tpu.dot_dimension_numbers<[1], [0], [0], [1], [0, 0, 1, 1], [], []>} : vector<16x128xbf16>, vector<128x256xbf16>, vector<16x256xf32> -> vector<16x256xf32>
    %c0_3 = arith.constant 0 : index
    %c0_4 = arith.constant 0 : index
    %3 = vector.load %arg3[%c0_3, %c0_4] : memref<16x1xf32, #tpu.memory_space<vmem>>, vector<16x1xf32>
    %4 = vector.broadcast %3 : vector<16x1xf32> to vector<16x256xf32>
    %5 = arith.addf %2, %4 : vector<16x256xf32>
    %cst_5 = arith.constant dense<0.000000e+00> : vector<16xf32>
    %6 = vector.multi_reduction <add>, %5, %cst_5 [1] : vector<16x256xf32> to vector<16xf32>
    %7 = vector.shape_cast %6 : vector<16xf32> to vector<16x1xf32>
    %cst_6 = arith.constant 3.906250e-03 : f32
    %8 = vector.broadcast %cst_6 : f32 to vector<16x1xf32>
    %9 = arith.mulf %7, %8 : vector<16x1xf32>
    %10 = vector.broadcast %9 : vector<16x1xf32> to vector<16x256xf32>
    %11 = arith.subf %5, %10 : vector<16x256xf32>
    %12 = arith.mulf %11, %11 : vector<16x256xf32>
    %cst_7 = arith.constant dense<0.000000e+00> : vector<16xf32>
    %13 = vector.multi_reduction <add>, %12, %cst_7 [1] : vector<16x256xf32> to vector<16xf32>
    %14 = vector.shape_cast %13 : vector<16xf32> to vector<16x1xf32>
    %cst_8 = arith.constant 3.906250e-03 : f32
    %15 = vector.broadcast %cst_8 : f32 to vector<16x1xf32>
    %16 = arith.mulf %14, %15 : vector<16x1xf32>
    %c0_9 = arith.constant 0 : index
    %c0_10 = arith.constant 0 : index
    %17 = vector.load %arg4[%c0_9, %c0_10] : memref<16x1xf32, #tpu.memory_space<vmem>>, vector<16x1xf32>
    %cst_11 = arith.constant 9.99999974E-6 : f32
    %18 = vector.broadcast %cst_11 : f32 to vector<16x1xf32>
    %19 = arith.addf %16, %18 : vector<16x1xf32>
    %20 = math.rsqrt %19 : vector<16x1xf32>
    %21 = arith.mulf %17, %20 : vector<16x1xf32>
    %22 = vector.broadcast %21 : vector<16x1xf32> to vector<16x256xf32>
    %23 = arith.mulf %11, %22 : vector<16x256xf32>
    %c0_12 = arith.constant 0 : index
    %c0_13 = arith.constant 0 : index
    %24 = vector.load %arg5[%c0_12, %c0_13] : memref<16x1xf32, #tpu.memory_space<vmem>>, vector<16x1xf32>
    %25 = vector.broadcast %24 : vector<16x1xf32> to vector<16x256xf32>
    %26 = arith.addf %23, %25 : vector<16x256xf32>
    %cst_14 = arith.constant 0.000000e+00 : f32
    %27 = vector.broadcast %cst_14 : f32 to vector<16x256xf32>
    %28 = arith.cmpf oge, %26, %27 : vector<16x256xf32>
    %cst_15 = arith.constant 0.00999999977 : f32
    %29 = vector.broadcast %cst_15 : f32 to vector<16x256xf32>
    %30 = arith.mulf %29, %26 : vector<16x256xf32>
    %31 = arith.select %28, %26, %30 : vector<16x256xi1>, vector<16x256xf32>
    %32 = arith.truncf %31 : vector<16x256xf32> to vector<16x256xbf16>
    %c0_16 = arith.constant 0 : index
    %c0_17 = arith.constant 0 : index
    %33 = vector.load %arg6[%c0_16, %c0_17] : memref<16x256xbf16, #tpu.memory_space<vmem>>, vector<16x256xbf16>
    tpu.vector_store %arg6[%c0_16, %c0_17], %32 {strides = array<i32>} : memref<16x256xbf16, #tpu.memory_space<vmem>>, vector<16x256xbf16>,
    return
  }
  func.func @transform_0(%arg0: i32) -> (i32, i32) {
    %c0_i32 = arith.constant 0 : i32
    %c0_i32_0 = arith.constant 0 : i32
    %c0_i32_1 = arith.constant 0 : i32
    return %c0_i32, %c0_i32_0 : i32, i32
  }
  func.func @transform_1(%arg0: i32) -> (i32, i32) {
    %c0_i32 = arith.constant 0 : i32
    %c0_i32_0 = arith.constant 0 : i32
    %c0_i32_1 = arith.constant 0 : i32
    return %c0_i32, %c0_i32_0 : i32, i32
  }
  func.func @transform_2(%arg0: i32) -> (i32, i32) {
    %c0_i32 = arith.constant 0 : i32
    %c0_i32_0 = arith.constant 0 : i32
    %c0_i32_1 = arith.constant 0 : i32
    return %c0_i32, %c0_i32_0 : i32, i32
  }
  func.func @transform_3(%arg0: i32) -> (i32, i32) {
    %c0_i32 = arith.constant 0 : i32
    %c0_i32_0 = arith.constant 0 : i32
    %c0_i32_1 = arith.constant 0 : i32
    return %c0_i32, %c0_i32_0 : i32, i32
  }
  func.func @transform_4(%arg0: i32) -> (i32, i32) {
    %c0_i32 = arith.constant 0 : i32
    %c0_i32_0 = arith.constant 0 : i32
    %c0_i32_1 = arith.constant 0 : i32
    return %c0_i32, %c0_i32_0 : i32, i32
  }
  func.func @transform_5(%arg0: i32) -> (i32, i32) {
    %c0_i32 = arith.constant 0 : i32
    %c0_i32_0 = arith.constant 0 : i32
    %c0_i32_1 = arith.constant 0 : i32
    return %c0_i32, %c0_i32_0 : i32, i32
  }
}

module attributes {stable_mosaic.version = 11 : i64} {
  func.func @_conv_bn_lrelu_kernel(%arg0: i32, %arg1: memref<256x64xbf16, #tpu.memory_space<vmem>>, %arg2: memref<32x256xbf16, #tpu.memory_space<vmem>>, %arg3: memref<32x1xf32, #tpu.memory_space<vmem>>, %arg4: memref<32x1xf32, #tpu.memory_space<vmem>>, %arg5: memref<32x1xf32, #tpu.memory_space<vmem>>, %arg6: memref<32x64xbf16, #tpu.memory_space<vmem>>) attributes {dimension_semantics = [#tpu.dimension_semantics<arbitrary>], iteration_bounds = array<i64: 1>, scalar_prefetch = 0 : i64, scratch_operands = 0 : i64, tpu.core_type = #tpu.core_type<tc>, window_params = [{pipeline_mode = #tpu.pipeline_mode<synchronous>, transform_indices = @transform_0, window_bounds = array<i64: 256, 64>}, {pipeline_mode = #tpu.pipeline_mode<synchronous>, transform_indices = @transform_1, window_bounds = array<i64: 32, 256>}, {pipeline_mode = #tpu.pipeline_mode<synchronous>, transform_indices = @transform_2, window_bounds = array<i64: 32, 1>}, {pipeline_mode = #tpu.pipeline_mode<synchronous>, transform_indices = @transform_3, window_bounds = array<i64: 32, 1>}, {pipeline_mode = #tpu.pipeline_mode<synchronous>, transform_indices = @transform_4, window_bounds = array<i64: 32, 1>}, {pipeline_mode = #tpu.pipeline_mode<synchronous>, transform_indices = @transform_5, window_bounds = array<i64: 32, 64>}]} {
    %c0 = arith.constant 0 : index
    %c0_0 = arith.constant 0 : index
    %0 = vector.load %arg2[%c0, %c0_0] : memref<32x256xbf16, #tpu.memory_space<vmem>>, vector<32x256xbf16>
    %c0_1 = arith.constant 0 : index
    %c0_2 = arith.constant 0 : index
    %1 = vector.load %arg1[%c0_1, %c0_2] : memref<256x64xbf16, #tpu.memory_space<vmem>>, vector<256x64xbf16>
    %cst = arith.constant dense<0.000000e+00> : vector<32x64xf32>
    %2 = tpu.matmul %0, %1, %cst {dimension_numbers = #tpu.dot_dimension_numbers<[1], [0], [0], [1], [0, 0, 1, 1], [], []>} : vector<32x256xbf16>, vector<256x64xbf16>, vector<32x64xf32> -> vector<32x64xf32>
    %c0_3 = arith.constant 0 : index
    %c0_4 = arith.constant 0 : index
    %3 = vector.load %arg3[%c0_3, %c0_4] : memref<32x1xf32, #tpu.memory_space<vmem>>, vector<32x1xf32>
    %4 = vector.broadcast %3 : vector<32x1xf32> to vector<32x64xf32>
    %5 = arith.addf %2, %4 : vector<32x64xf32>
    %cst_5 = arith.constant dense<0.000000e+00> : vector<32xf32>
    %6 = vector.multi_reduction <add>, %5, %cst_5 [1] : vector<32x64xf32> to vector<32xf32>
    %7 = vector.shape_cast %6 : vector<32xf32> to vector<32x1xf32>
    %cst_6 = arith.constant 1.562500e-02 : f32
    %8 = vector.broadcast %cst_6 : f32 to vector<32x1xf32>
    %9 = arith.mulf %7, %8 : vector<32x1xf32>
    %10 = vector.broadcast %9 : vector<32x1xf32> to vector<32x64xf32>
    %11 = arith.subf %5, %10 : vector<32x64xf32>
    %12 = arith.mulf %11, %11 : vector<32x64xf32>
    %cst_7 = arith.constant dense<0.000000e+00> : vector<32xf32>
    %13 = vector.multi_reduction <add>, %12, %cst_7 [1] : vector<32x64xf32> to vector<32xf32>
    %14 = vector.shape_cast %13 : vector<32xf32> to vector<32x1xf32>
    %cst_8 = arith.constant 1.562500e-02 : f32
    %15 = vector.broadcast %cst_8 : f32 to vector<32x1xf32>
    %16 = arith.mulf %14, %15 : vector<32x1xf32>
    %c0_9 = arith.constant 0 : index
    %c0_10 = arith.constant 0 : index
    %17 = vector.load %arg4[%c0_9, %c0_10] : memref<32x1xf32, #tpu.memory_space<vmem>>, vector<32x1xf32>
    %cst_11 = arith.constant 9.99999974E-6 : f32
    %18 = vector.broadcast %cst_11 : f32 to vector<32x1xf32>
    %19 = arith.addf %16, %18 : vector<32x1xf32>
    %20 = math.rsqrt %19 : vector<32x1xf32>
    %21 = arith.mulf %17, %20 : vector<32x1xf32>
    %22 = vector.broadcast %21 : vector<32x1xf32> to vector<32x64xf32>
    %23 = arith.mulf %11, %22 : vector<32x64xf32>
    %c0_12 = arith.constant 0 : index
    %c0_13 = arith.constant 0 : index
    %24 = vector.load %arg5[%c0_12, %c0_13] : memref<32x1xf32, #tpu.memory_space<vmem>>, vector<32x1xf32>
    %25 = vector.broadcast %24 : vector<32x1xf32> to vector<32x64xf32>
    %26 = arith.addf %23, %25 : vector<32x64xf32>
    %cst_14 = arith.constant 0.000000e+00 : f32
    %27 = vector.broadcast %cst_14 : f32 to vector<32x64xf32>
    %28 = arith.cmpf oge, %26, %27 : vector<32x64xf32>
    %cst_15 = arith.constant 0.00999999977 : f32
    %29 = vector.broadcast %cst_15 : f32 to vector<32x64xf32>
    %30 = arith.mulf %29, %26 : vector<32x64xf32>
    %31 = arith.select %28, %26, %30 : vector<32x64xi1>, vector<32x64xf32>
    %32 = arith.truncf %31 : vector<32x64xf32> to vector<32x64xbf16>
    %c0_16 = arith.constant 0 : index
    %c0_17 = arith.constant 0 : index
    %33 = vector.load %arg6[%c0_16, %c0_17] : memref<32x64xbf16, #tpu.memory_space<vmem>>, vector<32x64xbf16>
    tpu.vector_store %arg6[%c0_16, %c0_17], %32 {strides = array<i32>} : memref<32x64xbf16, #tpu.memory_space<vmem>>, vector<32x64xbf16>,
    return
  }
  func.func @transform_0(%arg0: i32) -> (i32, i32) {
    %c0_i32 = arith.constant 0 : i32
    %c0_i32_0 = arith.constant 0 : i32
    %c0_i32_1 = arith.constant 0 : i32
    return %c0_i32, %c0_i32_0 : i32, i32
  }
  func.func @transform_1(%arg0: i32) -> (i32, i32) {
    %c0_i32 = arith.constant 0 : i32
    %c0_i32_0 = arith.constant 0 : i32
    %c0_i32_1 = arith.constant 0 : i32
    return %c0_i32, %c0_i32_0 : i32, i32
  }
  func.func @transform_2(%arg0: i32) -> (i32, i32) {
    %c0_i32 = arith.constant 0 : i32
    %c0_i32_0 = arith.constant 0 : i32
    %c0_i32_1 = arith.constant 0 : i32
    return %c0_i32, %c0_i32_0 : i32, i32
  }
  func.func @transform_3(%arg0: i32) -> (i32, i32) {
    %c0_i32 = arith.constant 0 : i32
    %c0_i32_0 = arith.constant 0 : i32
    %c0_i32_1 = arith.constant 0 : i32
    return %c0_i32, %c0_i32_0 : i32, i32
  }
  func.func @transform_4(%arg0: i32) -> (i32, i32) {
    %c0_i32 = arith.constant 0 : i32
    %c0_i32_0 = arith.constant 0 : i32
    %c0_i32_1 = arith.constant 0 : i32
    return %c0_i32, %c0_i32_0 : i32, i32
  }
  func.func @transform_5(%arg0: i32) -> (i32, i32) {
    %c0_i32 = arith.constant 0 : i32
    %c0_i32_0 = arith.constant 0 : i32
    %c0_i32_1 = arith.constant 0 : i32
    return %c0_i32, %c0_i32_0 : i32, i32
  }
}

module attributes {stable_mosaic.version = 11 : i64} {
  func.func @_conv_bn_lrelu_kernel(%arg0: i32, %arg1: memref<512x16xbf16, #tpu.memory_space<vmem>>, %arg2: memref<64x512xbf16, #tpu.memory_space<vmem>>, %arg3: memref<64x1xf32, #tpu.memory_space<vmem>>, %arg4: memref<64x1xf32, #tpu.memory_space<vmem>>, %arg5: memref<64x1xf32, #tpu.memory_space<vmem>>, %arg6: memref<64x16xbf16, #tpu.memory_space<vmem>>) attributes {dimension_semantics = [#tpu.dimension_semantics<arbitrary>], iteration_bounds = array<i64: 1>, scalar_prefetch = 0 : i64, scratch_operands = 0 : i64, tpu.core_type = #tpu.core_type<tc>, window_params = [{pipeline_mode = #tpu.pipeline_mode<synchronous>, transform_indices = @transform_0, window_bounds = array<i64: 512, 16>}, {pipeline_mode = #tpu.pipeline_mode<synchronous>, transform_indices = @transform_1, window_bounds = array<i64: 64, 512>}, {pipeline_mode = #tpu.pipeline_mode<synchronous>, transform_indices = @transform_2, window_bounds = array<i64: 64, 1>}, {pipeline_mode = #tpu.pipeline_mode<synchronous>, transform_indices = @transform_3, window_bounds = array<i64: 64, 1>}, {pipeline_mode = #tpu.pipeline_mode<synchronous>, transform_indices = @transform_4, window_bounds = array<i64: 64, 1>}, {pipeline_mode = #tpu.pipeline_mode<synchronous>, transform_indices = @transform_5, window_bounds = array<i64: 64, 16>}]} {
    %c0 = arith.constant 0 : index
    %c0_0 = arith.constant 0 : index
    %0 = vector.load %arg2[%c0, %c0_0] : memref<64x512xbf16, #tpu.memory_space<vmem>>, vector<64x512xbf16>
    %c0_1 = arith.constant 0 : index
    %c0_2 = arith.constant 0 : index
    %1 = vector.load %arg1[%c0_1, %c0_2] : memref<512x16xbf16, #tpu.memory_space<vmem>>, vector<512x16xbf16>
    %cst = arith.constant dense<0.000000e+00> : vector<64x16xf32>
    %2 = tpu.matmul %0, %1, %cst {dimension_numbers = #tpu.dot_dimension_numbers<[1], [0], [0], [1], [0, 0, 1, 1], [], []>} : vector<64x512xbf16>, vector<512x16xbf16>, vector<64x16xf32> -> vector<64x16xf32>
    %c0_3 = arith.constant 0 : index
    %c0_4 = arith.constant 0 : index
    %3 = vector.load %arg3[%c0_3, %c0_4] : memref<64x1xf32, #tpu.memory_space<vmem>>, vector<64x1xf32>
    %4 = vector.broadcast %3 : vector<64x1xf32> to vector<64x16xf32>
    %5 = arith.addf %2, %4 : vector<64x16xf32>
    %cst_5 = arith.constant dense<0.000000e+00> : vector<64xf32>
    %6 = vector.multi_reduction <add>, %5, %cst_5 [1] : vector<64x16xf32> to vector<64xf32>
    %7 = vector.shape_cast %6 : vector<64xf32> to vector<64x1xf32>
    %cst_6 = arith.constant 6.250000e-02 : f32
    %8 = vector.broadcast %cst_6 : f32 to vector<64x1xf32>
    %9 = arith.mulf %7, %8 : vector<64x1xf32>
    %10 = vector.broadcast %9 : vector<64x1xf32> to vector<64x16xf32>
    %11 = arith.subf %5, %10 : vector<64x16xf32>
    %12 = arith.mulf %11, %11 : vector<64x16xf32>
    %cst_7 = arith.constant dense<0.000000e+00> : vector<64xf32>
    %13 = vector.multi_reduction <add>, %12, %cst_7 [1] : vector<64x16xf32> to vector<64xf32>
    %14 = vector.shape_cast %13 : vector<64xf32> to vector<64x1xf32>
    %cst_8 = arith.constant 6.250000e-02 : f32
    %15 = vector.broadcast %cst_8 : f32 to vector<64x1xf32>
    %16 = arith.mulf %14, %15 : vector<64x1xf32>
    %c0_9 = arith.constant 0 : index
    %c0_10 = arith.constant 0 : index
    %17 = vector.load %arg4[%c0_9, %c0_10] : memref<64x1xf32, #tpu.memory_space<vmem>>, vector<64x1xf32>
    %cst_11 = arith.constant 9.99999974E-6 : f32
    %18 = vector.broadcast %cst_11 : f32 to vector<64x1xf32>
    %19 = arith.addf %16, %18 : vector<64x1xf32>
    %20 = math.rsqrt %19 : vector<64x1xf32>
    %21 = arith.mulf %17, %20 : vector<64x1xf32>
    %22 = vector.broadcast %21 : vector<64x1xf32> to vector<64x16xf32>
    %23 = arith.mulf %11, %22 : vector<64x16xf32>
    %c0_12 = arith.constant 0 : index
    %c0_13 = arith.constant 0 : index
    %24 = vector.load %arg5[%c0_12, %c0_13] : memref<64x1xf32, #tpu.memory_space<vmem>>, vector<64x1xf32>
    %25 = vector.broadcast %24 : vector<64x1xf32> to vector<64x16xf32>
    %26 = arith.addf %23, %25 : vector<64x16xf32>
    %cst_14 = arith.constant 0.000000e+00 : f32
    %27 = vector.broadcast %cst_14 : f32 to vector<64x16xf32>
    %28 = arith.cmpf oge, %26, %27 : vector<64x16xf32>
    %cst_15 = arith.constant 0.00999999977 : f32
    %29 = vector.broadcast %cst_15 : f32 to vector<64x16xf32>
    %30 = arith.mulf %29, %26 : vector<64x16xf32>
    %31 = arith.select %28, %26, %30 : vector<64x16xi1>, vector<64x16xf32>
    %32 = arith.truncf %31 : vector<64x16xf32> to vector<64x16xbf16>
    %c0_16 = arith.constant 0 : index
    %c0_17 = arith.constant 0 : index
    %33 = vector.load %arg6[%c0_16, %c0_17] : memref<64x16xbf16, #tpu.memory_space<vmem>>, vector<64x16xbf16>
    tpu.vector_store %arg6[%c0_16, %c0_17], %32 {strides = array<i32>} : memref<64x16xbf16, #tpu.memory_space<vmem>>, vector<64x16xbf16>,
    return
  }
  func.func @transform_0(%arg0: i32) -> (i32, i32) {
    %c0_i32 = arith.constant 0 : i32
    %c0_i32_0 = arith.constant 0 : i32
    %c0_i32_1 = arith.constant 0 : i32
    return %c0_i32, %c0_i32_0 : i32, i32
  }
  func.func @transform_1(%arg0: i32) -> (i32, i32) {
    %c0_i32 = arith.constant 0 : i32
    %c0_i32_0 = arith.constant 0 : i32
    %c0_i32_1 = arith.constant 0 : i32
    return %c0_i32, %c0_i32_0 : i32, i32
  }
  func.func @transform_2(%arg0: i32) -> (i32, i32) {
    %c0_i32 = arith.constant 0 : i32
    %c0_i32_0 = arith.constant 0 : i32
    %c0_i32_1 = arith.constant 0 : i32
    return %c0_i32, %c0_i32_0 : i32, i32
  }
  func.func @transform_3(%arg0: i32) -> (i32, i32) {
    %c0_i32 = arith.constant 0 : i32
    %c0_i32_0 = arith.constant 0 : i32
    %c0_i32_1 = arith.constant 0 : i32
    return %c0_i32, %c0_i32_0 : i32, i32
  }
  func.func @transform_4(%arg0: i32) -> (i32, i32) {
    %c0_i32 = arith.constant 0 : i32
    %c0_i32_0 = arith.constant 0 : i32
    %c0_i32_1 = arith.constant 0 : i32
    return %c0_i32, %c0_i32_0 : i32, i32
  }
  func.func @transform_5(%arg0: i32) -> (i32, i32) {
    %c0_i32 = arith.constant 0 : i32
    %c0_i32_0 = arith.constant 0 : i32
    %c0_i32_1 = arith.constant 0 : i32
    return %c0_i32, %c0_i32_0 : i32, i32
  }
}

module attributes {stable_mosaic.version = 11 : i64} {
  func.func @_conv_bn_lrelu_kernel(%arg0: i32, %arg1: memref<1024x4xbf16, #tpu.memory_space<vmem>>, %arg2: memref<64x1024xbf16, #tpu.memory_space<vmem>>, %arg3: memref<64x1xf32, #tpu.memory_space<vmem>>, %arg4: memref<64x1xf32, #tpu.memory_space<vmem>>, %arg5: memref<64x1xf32, #tpu.memory_space<vmem>>, %arg6: memref<64x4xbf16, #tpu.memory_space<vmem>>) attributes {dimension_semantics = [#tpu.dimension_semantics<arbitrary>], iteration_bounds = array<i64: 1>, scalar_prefetch = 0 : i64, scratch_operands = 0 : i64, tpu.core_type = #tpu.core_type<tc>, window_params = [{pipeline_mode = #tpu.pipeline_mode<synchronous>, transform_indices = @transform_0, window_bounds = array<i64: 1024, 4>}, {pipeline_mode = #tpu.pipeline_mode<synchronous>, transform_indices = @transform_1, window_bounds = array<i64: 64, 1024>}, {pipeline_mode = #tpu.pipeline_mode<synchronous>, transform_indices = @transform_2, window_bounds = array<i64: 64, 1>}, {pipeline_mode = #tpu.pipeline_mode<synchronous>, transform_indices = @transform_3, window_bounds = array<i64: 64, 1>}, {pipeline_mode = #tpu.pipeline_mode<synchronous>, transform_indices = @transform_4, window_bounds = array<i64: 64, 1>}, {pipeline_mode = #tpu.pipeline_mode<synchronous>, transform_indices = @transform_5, window_bounds = array<i64: 64, 4>}]} {
    %c0 = arith.constant 0 : index
    %c0_0 = arith.constant 0 : index
    %0 = vector.load %arg2[%c0, %c0_0] : memref<64x1024xbf16, #tpu.memory_space<vmem>>, vector<64x1024xbf16>
    %c0_1 = arith.constant 0 : index
    %c0_2 = arith.constant 0 : index
    %1 = vector.load %arg1[%c0_1, %c0_2] : memref<1024x4xbf16, #tpu.memory_space<vmem>>, vector<1024x4xbf16>
    %cst = arith.constant dense<0.000000e+00> : vector<64x4xf32>
    %2 = tpu.matmul %0, %1, %cst {dimension_numbers = #tpu.dot_dimension_numbers<[1], [0], [0], [1], [0, 0, 1, 1], [], []>} : vector<64x1024xbf16>, vector<1024x4xbf16>, vector<64x4xf32> -> vector<64x4xf32>
    %c0_3 = arith.constant 0 : index
    %c0_4 = arith.constant 0 : index
    %3 = vector.load %arg3[%c0_3, %c0_4] : memref<64x1xf32, #tpu.memory_space<vmem>>, vector<64x1xf32>
    %4 = vector.broadcast %3 : vector<64x1xf32> to vector<64x4xf32>
    %5 = arith.addf %2, %4 : vector<64x4xf32>
    %cst_5 = arith.constant dense<0.000000e+00> : vector<64xf32>
    %6 = vector.multi_reduction <add>, %5, %cst_5 [1] : vector<64x4xf32> to vector<64xf32>
    %7 = vector.shape_cast %6 : vector<64xf32> to vector<64x1xf32>
    %cst_6 = arith.constant 2.500000e-01 : f32
    %8 = vector.broadcast %cst_6 : f32 to vector<64x1xf32>
    %9 = arith.mulf %7, %8 : vector<64x1xf32>
    %10 = vector.broadcast %9 : vector<64x1xf32> to vector<64x4xf32>
    %11 = arith.subf %5, %10 : vector<64x4xf32>
    %12 = arith.mulf %11, %11 : vector<64x4xf32>
    %cst_7 = arith.constant dense<0.000000e+00> : vector<64xf32>
    %13 = vector.multi_reduction <add>, %12, %cst_7 [1] : vector<64x4xf32> to vector<64xf32>
    %14 = vector.shape_cast %13 : vector<64xf32> to vector<64x1xf32>
    %cst_8 = arith.constant 2.500000e-01 : f32
    %15 = vector.broadcast %cst_8 : f32 to vector<64x1xf32>
    %16 = arith.mulf %14, %15 : vector<64x1xf32>
    %c0_9 = arith.constant 0 : index
    %c0_10 = arith.constant 0 : index
    %17 = vector.load %arg4[%c0_9, %c0_10] : memref<64x1xf32, #tpu.memory_space<vmem>>, vector<64x1xf32>
    %cst_11 = arith.constant 9.99999974E-6 : f32
    %18 = vector.broadcast %cst_11 : f32 to vector<64x1xf32>
    %19 = arith.addf %16, %18 : vector<64x1xf32>
    %20 = math.rsqrt %19 : vector<64x1xf32>
    %21 = arith.mulf %17, %20 : vector<64x1xf32>
    %22 = vector.broadcast %21 : vector<64x1xf32> to vector<64x4xf32>
    %23 = arith.mulf %11, %22 : vector<64x4xf32>
    %c0_12 = arith.constant 0 : index
    %c0_13 = arith.constant 0 : index
    %24 = vector.load %arg5[%c0_12, %c0_13] : memref<64x1xf32, #tpu.memory_space<vmem>>, vector<64x1xf32>
    %25 = vector.broadcast %24 : vector<64x1xf32> to vector<64x4xf32>
    %26 = arith.addf %23, %25 : vector<64x4xf32>
    %cst_14 = arith.constant 0.000000e+00 : f32
    %27 = vector.broadcast %cst_14 : f32 to vector<64x4xf32>
    %28 = arith.cmpf oge, %26, %27 : vector<64x4xf32>
    %cst_15 = arith.constant 0.00999999977 : f32
    %29 = vector.broadcast %cst_15 : f32 to vector<64x4xf32>
    %30 = arith.mulf %29, %26 : vector<64x4xf32>
    %31 = arith.select %28, %26, %30 : vector<64x4xi1>, vector<64x4xf32>
    %32 = arith.truncf %31 : vector<64x4xf32> to vector<64x4xbf16>
    %c0_16 = arith.constant 0 : index
    %c0_17 = arith.constant 0 : index
    %33 = vector.load %arg6[%c0_16, %c0_17] : memref<64x4xbf16, #tpu.memory_space<vmem>>, vector<64x4xbf16>
    tpu.vector_store %arg6[%c0_16, %c0_17], %32 {strides = array<i32>} : memref<64x4xbf16, #tpu.memory_space<vmem>>, vector<64x4xbf16>,
    return
  }
  func.func @transform_0(%arg0: i32) -> (i32, i32) {
    %c0_i32 = arith.constant 0 : i32
    %c0_i32_0 = arith.constant 0 : i32
    %c0_i32_1 = arith.constant 0 : i32
    return %c0_i32, %c0_i32_0 : i32, i32
  }
  func.func @transform_1(%arg0: i32) -> (i32, i32) {
    %c0_i32 = arith.constant 0 : i32
    %c0_i32_0 = arith.constant 0 : i32
    %c0_i32_1 = arith.constant 0 : i32
    return %c0_i32, %c0_i32_0 : i32, i32
  }
  func.func @transform_2(%arg0: i32) -> (i32, i32) {
    %c0_i32 = arith.constant 0 : i32
    %c0_i32_0 = arith.constant 0 : i32
    %c0_i32_1 = arith.constant 0 : i32
    return %c0_i32, %c0_i32_0 : i32, i32
  }
  func.func @transform_3(%arg0: i32) -> (i32, i32) {
    %c0_i32 = arith.constant 0 : i32
    %c0_i32_0 = arith.constant 0 : i32
    %c0_i32_1 = arith.constant 0 : i32
    return %c0_i32, %c0_i32_0 : i32, i32
  }
  func.func @transform_4(%arg0: i32) -> (i32, i32) {
    %c0_i32 = arith.constant 0 : i32
    %c0_i32_0 = arith.constant 0 : i32
    %c0_i32_1 = arith.constant 0 : i32
    return %c0_i32, %c0_i32_0 : i32, i32
  }
  func.func @transform_5(%arg0: i32) -> (i32, i32) {
    %c0_i32 = arith.constant 0 : i32
    %c0_i32_0 = arith.constant 0 : i32
    %c0_i32_1 = arith.constant 0 : i32
    return %c0_i32, %c0_i32_0 : i32, i32
  }
}

module attributes {stable_mosaic.version = 11 : i64} {
  func.func @_conv_bn_lrelu_kernel(%arg0: i32, %arg1: memref<1024x1xbf16, #tpu.memory_space<vmem>>, %arg2: memref<128x1024xbf16, #tpu.memory_space<vmem>>, %arg3: memref<128x1xf32, #tpu.memory_space<vmem>>, %arg4: memref<128x1xf32, #tpu.memory_space<vmem>>, %arg5: memref<128x1xf32, #tpu.memory_space<vmem>>, %arg6: memref<128x1xbf16, #tpu.memory_space<vmem>>) attributes {dimension_semantics = [#tpu.dimension_semantics<arbitrary>], iteration_bounds = array<i64: 1>, scalar_prefetch = 0 : i64, scratch_operands = 0 : i64, tpu.core_type = #tpu.core_type<tc>, window_params = [{pipeline_mode = #tpu.pipeline_mode<synchronous>, transform_indices = @transform_0, window_bounds = array<i64: 1024, 1>}, {pipeline_mode = #tpu.pipeline_mode<synchronous>, transform_indices = @transform_1, window_bounds = array<i64: 128, 1024>}, {pipeline_mode = #tpu.pipeline_mode<synchronous>, transform_indices = @transform_2, window_bounds = array<i64: 128, 1>}, {pipeline_mode = #tpu.pipeline_mode<synchronous>, transform_indices = @transform_3, window_bounds = array<i64: 128, 1>}, {pipeline_mode = #tpu.pipeline_mode<synchronous>, transform_indices = @transform_4, window_bounds = array<i64: 128, 1>}, {pipeline_mode = #tpu.pipeline_mode<synchronous>, transform_indices = @transform_5, window_bounds = array<i64: 128, 1>}]} {
    %c0 = arith.constant 0 : index
    %c0_0 = arith.constant 0 : index
    %0 = vector.load %arg2[%c0, %c0_0] : memref<128x1024xbf16, #tpu.memory_space<vmem>>, vector<128x1024xbf16>
    %c0_1 = arith.constant 0 : index
    %c0_2 = arith.constant 0 : index
    %1 = vector.load %arg1[%c0_1, %c0_2] : memref<1024x1xbf16, #tpu.memory_space<vmem>>, vector<1024x1xbf16>
    %cst = arith.constant dense<0.000000e+00> : vector<128x1xf32>
    %2 = tpu.matmul %0, %1, %cst {dimension_numbers = #tpu.dot_dimension_numbers<[1], [0], [0], [1], [0, 0, 1, 1], [], []>} : vector<128x1024xbf16>, vector<1024x1xbf16>, vector<128x1xf32> -> vector<128x1xf32>
    %c0_3 = arith.constant 0 : index
    %c0_4 = arith.constant 0 : index
    %3 = vector.load %arg3[%c0_3, %c0_4] : memref<128x1xf32, #tpu.memory_space<vmem>>, vector<128x1xf32>
    %4 = arith.addf %2, %3 : vector<128x1xf32>
    %cst_5 = arith.constant dense<0.000000e+00> : vector<128xf32>
    %5 = vector.multi_reduction <add>, %4, %cst_5 [1] : vector<128x1xf32> to vector<128xf32>
    %6 = vector.shape_cast %5 : vector<128xf32> to vector<128x1xf32>
    %cst_6 = arith.constant 1.000000e+00 : f32
    %7 = vector.broadcast %cst_6 : f32 to vector<128x1xf32>
    %8 = arith.mulf %6, %7 : vector<128x1xf32>
    %9 = arith.subf %4, %8 : vector<128x1xf32>
    %10 = arith.mulf %9, %9 : vector<128x1xf32>
    %cst_7 = arith.constant dense<0.000000e+00> : vector<128xf32>
    %11 = vector.multi_reduction <add>, %10, %cst_7 [1] : vector<128x1xf32> to vector<128xf32>
    %12 = vector.shape_cast %11 : vector<128xf32> to vector<128x1xf32>
    %cst_8 = arith.constant 1.000000e+00 : f32
    %13 = vector.broadcast %cst_8 : f32 to vector<128x1xf32>
    %14 = arith.mulf %12, %13 : vector<128x1xf32>
    %c0_9 = arith.constant 0 : index
    %c0_10 = arith.constant 0 : index
    %15 = vector.load %arg4[%c0_9, %c0_10] : memref<128x1xf32, #tpu.memory_space<vmem>>, vector<128x1xf32>
    %cst_11 = arith.constant 9.99999974E-6 : f32
    %16 = vector.broadcast %cst_11 : f32 to vector<128x1xf32>
    %17 = arith.addf %14, %16 : vector<128x1xf32>
    %18 = math.rsqrt %17 : vector<128x1xf32>
    %19 = arith.mulf %15, %18 : vector<128x1xf32>
    %20 = arith.mulf %9, %19 : vector<128x1xf32>
    %c0_12 = arith.constant 0 : index
    %c0_13 = arith.constant 0 : index
    %21 = vector.load %arg5[%c0_12, %c0_13] : memref<128x1xf32, #tpu.memory_space<vmem>>, vector<128x1xf32>
    %22 = arith.addf %20, %21 : vector<128x1xf32>
    %cst_14 = arith.constant 0.000000e+00 : f32
    %23 = vector.broadcast %cst_14 : f32 to vector<128x1xf32>
    %24 = arith.cmpf oge, %22, %23 : vector<128x1xf32>
    %cst_15 = arith.constant 0.00999999977 : f32
    %25 = vector.broadcast %cst_15 : f32 to vector<128x1xf32>
    %26 = arith.mulf %25, %22 : vector<128x1xf32>
    %27 = arith.select %24, %22, %26 : vector<128x1xi1>, vector<128x1xf32>
    %28 = arith.truncf %27 : vector<128x1xf32> to vector<128x1xbf16>
    %c0_16 = arith.constant 0 : index
    %c0_17 = arith.constant 0 : index
    %29 = vector.load %arg6[%c0_16, %c0_17] : memref<128x1xbf16, #tpu.memory_space<vmem>>, vector<128x1xbf16>
    tpu.vector_store %arg6[%c0_16, %c0_17], %28 {strides = array<i32>} : memref<128x1xbf16, #tpu.memory_space<vmem>>, vector<128x1xbf16>,
    return
  }
  func.func @transform_0(%arg0: i32) -> (i32, i32) {
    %c0_i32 = arith.constant 0 : i32
    %c0_i32_0 = arith.constant 0 : i32
    %c0_i32_1 = arith.constant 0 : i32
    return %c0_i32, %c0_i32_0 : i32, i32
  }
  func.func @transform_1(%arg0: i32) -> (i32, i32) {
    %c0_i32 = arith.constant 0 : i32
    %c0_i32_0 = arith.constant 0 : i32
    %c0_i32_1 = arith.constant 0 : i32
    return %c0_i32, %c0_i32_0 : i32, i32
  }
  func.func @transform_2(%arg0: i32) -> (i32, i32) {
    %c0_i32 = arith.constant 0 : i32
    %c0_i32_0 = arith.constant 0 : i32
    %c0_i32_1 = arith.constant 0 : i32
    return %c0_i32, %c0_i32_0 : i32, i32
  }
  func.func @transform_3(%arg0: i32) -> (i32, i32) {
    %c0_i32 = arith.constant 0 : i32
    %c0_i32_0 = arith.constant 0 : i32
    %c0_i32_1 = arith.constant 0 : i32
    return %c0_i32, %c0_i32_0 : i32, i32
  }
  func.func @transform_4(%arg0: i32) -> (i32, i32) {
    %c0_i32 = arith.constant 0 : i32
    %c0_i32_0 = arith.constant 0 : i32
    %c0_i32_1 = arith.constant 0 : i32
    return %c0_i32, %c0_i32_0 : i32, i32
  }
  func.func @transform_5(%arg0: i32) -> (i32, i32) {
    %c0_i32 = arith.constant 0 : i32
    %c0_i32_0 = arith.constant 0 : i32
    %c0_i32_1 = arith.constant 0 : i32
    return %c0_i32, %c0_i32_0 : i32, i32
  }
}

module attributes {stable_mosaic.version = 11 : i64} {
  func.func @_conv_bn_lrelu_kernel(%arg0: i32, %arg1: memref<1152x4xbf16, #tpu.memory_space<vmem>>, %arg2: memref<64x1152xbf16, #tpu.memory_space<vmem>>, %arg3: memref<64x1xf32, #tpu.memory_space<vmem>>, %arg4: memref<64x1xf32, #tpu.memory_space<vmem>>, %arg5: memref<64x1xf32, #tpu.memory_space<vmem>>, %arg6: memref<64x4xbf16, #tpu.memory_space<vmem>>) attributes {dimension_semantics = [#tpu.dimension_semantics<arbitrary>], iteration_bounds = array<i64: 1>, scalar_prefetch = 0 : i64, scratch_operands = 0 : i64, tpu.core_type = #tpu.core_type<tc>, window_params = [{pipeline_mode = #tpu.pipeline_mode<synchronous>, transform_indices = @transform_0, window_bounds = array<i64: 1152, 4>}, {pipeline_mode = #tpu.pipeline_mode<synchronous>, transform_indices = @transform_1, window_bounds = array<i64: 64, 1152>}, {pipeline_mode = #tpu.pipeline_mode<synchronous>, transform_indices = @transform_2, window_bounds = array<i64: 64, 1>}, {pipeline_mode = #tpu.pipeline_mode<synchronous>, transform_indices = @transform_3, window_bounds = array<i64: 64, 1>}, {pipeline_mode = #tpu.pipeline_mode<synchronous>, transform_indices = @transform_4, window_bounds = array<i64: 64, 1>}, {pipeline_mode = #tpu.pipeline_mode<synchronous>, transform_indices = @transform_5, window_bounds = array<i64: 64, 4>}]} {
    %c0 = arith.constant 0 : index
    %c0_0 = arith.constant 0 : index
    %0 = vector.load %arg2[%c0, %c0_0] : memref<64x1152xbf16, #tpu.memory_space<vmem>>, vector<64x1152xbf16>
    %c0_1 = arith.constant 0 : index
    %c0_2 = arith.constant 0 : index
    %1 = vector.load %arg1[%c0_1, %c0_2] : memref<1152x4xbf16, #tpu.memory_space<vmem>>, vector<1152x4xbf16>
    %cst = arith.constant dense<0.000000e+00> : vector<64x4xf32>
    %2 = tpu.matmul %0, %1, %cst {dimension_numbers = #tpu.dot_dimension_numbers<[1], [0], [0], [1], [0, 0, 1, 1], [], []>} : vector<64x1152xbf16>, vector<1152x4xbf16>, vector<64x4xf32> -> vector<64x4xf32>
    %c0_3 = arith.constant 0 : index
    %c0_4 = arith.constant 0 : index
    %3 = vector.load %arg3[%c0_3, %c0_4] : memref<64x1xf32, #tpu.memory_space<vmem>>, vector<64x1xf32>
    %4 = vector.broadcast %3 : vector<64x1xf32> to vector<64x4xf32>
    %5 = arith.addf %2, %4 : vector<64x4xf32>
    %cst_5 = arith.constant dense<0.000000e+00> : vector<64xf32>
    %6 = vector.multi_reduction <add>, %5, %cst_5 [1] : vector<64x4xf32> to vector<64xf32>
    %7 = vector.shape_cast %6 : vector<64xf32> to vector<64x1xf32>
    %cst_6 = arith.constant 2.500000e-01 : f32
    %8 = vector.broadcast %cst_6 : f32 to vector<64x1xf32>
    %9 = arith.mulf %7, %8 : vector<64x1xf32>
    %10 = vector.broadcast %9 : vector<64x1xf32> to vector<64x4xf32>
    %11 = arith.subf %5, %10 : vector<64x4xf32>
    %12 = arith.mulf %11, %11 : vector<64x4xf32>
    %cst_7 = arith.constant dense<0.000000e+00> : vector<64xf32>
    %13 = vector.multi_reduction <add>, %12, %cst_7 [1] : vector<64x4xf32> to vector<64xf32>
    %14 = vector.shape_cast %13 : vector<64xf32> to vector<64x1xf32>
    %cst_8 = arith.constant 2.500000e-01 : f32
    %15 = vector.broadcast %cst_8 : f32 to vector<64x1xf32>
    %16 = arith.mulf %14, %15 : vector<64x1xf32>
    %c0_9 = arith.constant 0 : index
    %c0_10 = arith.constant 0 : index
    %17 = vector.load %arg4[%c0_9, %c0_10] : memref<64x1xf32, #tpu.memory_space<vmem>>, vector<64x1xf32>
    %cst_11 = arith.constant 9.99999974E-6 : f32
    %18 = vector.broadcast %cst_11 : f32 to vector<64x1xf32>
    %19 = arith.addf %16, %18 : vector<64x1xf32>
    %20 = math.rsqrt %19 : vector<64x1xf32>
    %21 = arith.mulf %17, %20 : vector<64x1xf32>
    %22 = vector.broadcast %21 : vector<64x1xf32> to vector<64x4xf32>
    %23 = arith.mulf %11, %22 : vector<64x4xf32>
    %c0_12 = arith.constant 0 : index
    %c0_13 = arith.constant 0 : index
    %24 = vector.load %arg5[%c0_12, %c0_13] : memref<64x1xf32, #tpu.memory_space<vmem>>, vector<64x1xf32>
    %25 = vector.broadcast %24 : vector<64x1xf32> to vector<64x4xf32>
    %26 = arith.addf %23, %25 : vector<64x4xf32>
    %cst_14 = arith.constant 0.000000e+00 : f32
    %27 = vector.broadcast %cst_14 : f32 to vector<64x4xf32>
    %28 = arith.cmpf oge, %26, %27 : vector<64x4xf32>
    %cst_15 = arith.constant 0.00999999977 : f32
    %29 = vector.broadcast %cst_15 : f32 to vector<64x4xf32>
    %30 = arith.mulf %29, %26 : vector<64x4xf32>
    %31 = arith.select %28, %26, %30 : vector<64x4xi1>, vector<64x4xf32>
    %32 = arith.truncf %31 : vector<64x4xf32> to vector<64x4xbf16>
    %c0_16 = arith.constant 0 : index
    %c0_17 = arith.constant 0 : index
    %33 = vector.load %arg6[%c0_16, %c0_17] : memref<64x4xbf16, #tpu.memory_space<vmem>>, vector<64x4xbf16>
    tpu.vector_store %arg6[%c0_16, %c0_17], %32 {strides = array<i32>} : memref<64x4xbf16, #tpu.memory_space<vmem>>, vector<64x4xbf16>,
    return
  }
  func.func @transform_0(%arg0: i32) -> (i32, i32) {
    %c0_i32 = arith.constant 0 : i32
    %c0_i32_0 = arith.constant 0 : i32
    %c0_i32_1 = arith.constant 0 : i32
    return %c0_i32, %c0_i32_0 : i32, i32
  }
  func.func @transform_1(%arg0: i32) -> (i32, i32) {
    %c0_i32 = arith.constant 0 : i32
    %c0_i32_0 = arith.constant 0 : i32
    %c0_i32_1 = arith.constant 0 : i32
    return %c0_i32, %c0_i32_0 : i32, i32
  }
  func.func @transform_2(%arg0: i32) -> (i32, i32) {
    %c0_i32 = arith.constant 0 : i32
    %c0_i32_0 = arith.constant 0 : i32
    %c0_i32_1 = arith.constant 0 : i32
    return %c0_i32, %c0_i32_0 : i32, i32
  }
  func.func @transform_3(%arg0: i32) -> (i32, i32) {
    %c0_i32 = arith.constant 0 : i32
    %c0_i32_0 = arith.constant 0 : i32
    %c0_i32_1 = arith.constant 0 : i32
    return %c0_i32, %c0_i32_0 : i32, i32
  }
  func.func @transform_4(%arg0: i32) -> (i32, i32) {
    %c0_i32 = arith.constant 0 : i32
    %c0_i32_0 = arith.constant 0 : i32
    %c0_i32_1 = arith.constant 0 : i32
    return %c0_i32, %c0_i32_0 : i32, i32
  }
  func.func @transform_5(%arg0: i32) -> (i32, i32) {
    %c0_i32 = arith.constant 0 : i32
    %c0_i32_0 = arith.constant 0 : i32
    %c0_i32_1 = arith.constant 0 : i32
    return %c0_i32, %c0_i32_0 : i32, i32
  }
}

module attributes {stable_mosaic.version = 11 : i64} {
  func.func @_conv_bn_lrelu_kernel(%arg0: i32, %arg1: memref<576x16xbf16, #tpu.memory_space<vmem>>, %arg2: memref<576x16xbf16, #tpu.memory_space<vmem>>, %arg3: memref<64x576xbf16, #tpu.memory_space<vmem>>, %arg4: memref<64x576xbf16, #tpu.memory_space<vmem>>, %arg5: memref<64x1xf32, #tpu.memory_space<vmem>>, %arg6: memref<64x1xf32, #tpu.memory_space<vmem>>, %arg7: memref<64x1xf32, #tpu.memory_space<vmem>>, %arg8: memref<64x16xbf16, #tpu.memory_space<vmem>>) attributes {dimension_semantics = [#tpu.dimension_semantics<arbitrary>], iteration_bounds = array<i64: 1>, scalar_prefetch = 0 : i64, scratch_operands = 0 : i64, tpu.core_type = #tpu.core_type<tc>, window_params = [{pipeline_mode = #tpu.pipeline_mode<synchronous>, transform_indices = @transform_0, window_bounds = array<i64: 576, 16>}, {pipeline_mode = #tpu.pipeline_mode<synchronous>, transform_indices = @transform_1, window_bounds = array<i64: 576, 16>}, {pipeline_mode = #tpu.pipeline_mode<synchronous>, transform_indices = @transform_2, window_bounds = array<i64: 64, 576>}, {pipeline_mode = #tpu.pipeline_mode<synchronous>, transform_indices = @transform_3, window_bounds = array<i64: 64, 576>}, {pipeline_mode = #tpu.pipeline_mode<synchronous>, transform_indices = @transform_4, window_bounds = array<i64: 64, 1>}, {pipeline_mode = #tpu.pipeline_mode<synchronous>, transform_indices = @transform_5, window_bounds = array<i64: 64, 1>}, {pipeline_mode = #tpu.pipeline_mode<synchronous>, transform_indices = @transform_6, window_bounds = array<i64: 64, 1>}, {pipeline_mode = #tpu.pipeline_mode<synchronous>, transform_indices = @transform_7, window_bounds = array<i64: 64, 16>}]} {
    %c0 = arith.constant 0 : index
    %c0_0 = arith.constant 0 : index
    %0 = vector.load %arg3[%c0, %c0_0] : memref<64x576xbf16, #tpu.memory_space<vmem>>, vector<64x576xbf16>
    %c0_1 = arith.constant 0 : index
    %c0_2 = arith.constant 0 : index
    %1 = vector.load %arg1[%c0_1, %c0_2] : memref<576x16xbf16, #tpu.memory_space<vmem>>, vector<576x16xbf16>
    %cst = arith.constant dense<0.000000e+00> : vector<64x16xf32>
    %2 = tpu.matmul %0, %1, %cst {dimension_numbers = #tpu.dot_dimension_numbers<[1], [0], [0], [1], [0, 0, 1, 1], [], []>} : vector<64x576xbf16>, vector<576x16xbf16>, vector<64x16xf32> -> vector<64x16xf32>
    %c0_3 = arith.constant 0 : index
    %c0_4 = arith.constant 0 : index
    %3 = vector.load %arg4[%c0_3, %c0_4] : memref<64x576xbf16, #tpu.memory_space<vmem>>, vector<64x576xbf16>
    %c0_5 = arith.constant 0 : index
    %c0_6 = arith.constant 0 : index
    %4 = vector.load %arg2[%c0_5, %c0_6] : memref<576x16xbf16, #tpu.memory_space<vmem>>, vector<576x16xbf16>
    %cst_7 = arith.constant dense<0.000000e+00> : vector<64x16xf32>
    %5 = tpu.matmul %3, %4, %cst_7 {dimension_numbers = #tpu.dot_dimension_numbers<[1], [0], [0], [1], [0, 0, 1, 1], [], []>} : vector<64x576xbf16>, vector<576x16xbf16>, vector<64x16xf32> -> vector<64x16xf32>
    %6 = arith.addf %2, %5 : vector<64x16xf32>
    %c0_8 = arith.constant 0 : index
    %c0_9 = arith.constant 0 : index
    %7 = vector.load %arg5[%c0_8, %c0_9] : memref<64x1xf32, #tpu.memory_space<vmem>>, vector<64x1xf32>
    %8 = vector.broadcast %7 : vector<64x1xf32> to vector<64x16xf32>
    %9 = arith.addf %6, %8 : vector<64x16xf32>
    %cst_10 = arith.constant dense<0.000000e+00> : vector<64xf32>
    %10 = vector.multi_reduction <add>, %9, %cst_10 [1] : vector<64x16xf32> to vector<64xf32>
    %11 = vector.shape_cast %10 : vector<64xf32> to vector<64x1xf32>
    %cst_11 = arith.constant 6.250000e-02 : f32
    %12 = vector.broadcast %cst_11 : f32 to vector<64x1xf32>
    %13 = arith.mulf %11, %12 : vector<64x1xf32>
    %14 = vector.broadcast %13 : vector<64x1xf32> to vector<64x16xf32>
    %15 = arith.subf %9, %14 : vector<64x16xf32>
    %16 = arith.mulf %15, %15 : vector<64x16xf32>
    %cst_12 = arith.constant dense<0.000000e+00> : vector<64xf32>
    %17 = vector.multi_reduction <add>, %16, %cst_12 [1] : vector<64x16xf32> to vector<64xf32>
    %18 = vector.shape_cast %17 : vector<64xf32> to vector<64x1xf32>
    %cst_13 = arith.constant 6.250000e-02 : f32
    %19 = vector.broadcast %cst_13 : f32 to vector<64x1xf32>
    %20 = arith.mulf %18, %19 : vector<64x1xf32>
    %c0_14 = arith.constant 0 : index
    %c0_15 = arith.constant 0 : index
    %21 = vector.load %arg6[%c0_14, %c0_15] : memref<64x1xf32, #tpu.memory_space<vmem>>, vector<64x1xf32>
    %cst_16 = arith.constant 9.99999974E-6 : f32
    %22 = vector.broadcast %cst_16 : f32 to vector<64x1xf32>
    %23 = arith.addf %20, %22 : vector<64x1xf32>
    %24 = math.rsqrt %23 : vector<64x1xf32>
    %25 = arith.mulf %21, %24 : vector<64x1xf32>
    %26 = vector.broadcast %25 : vector<64x1xf32> to vector<64x16xf32>
    %27 = arith.mulf %15, %26 : vector<64x16xf32>
    %c0_17 = arith.constant 0 : index
    %c0_18 = arith.constant 0 : index
    %28 = vector.load %arg7[%c0_17, %c0_18] : memref<64x1xf32, #tpu.memory_space<vmem>>, vector<64x1xf32>
    %29 = vector.broadcast %28 : vector<64x1xf32> to vector<64x16xf32>
    %30 = arith.addf %27, %29 : vector<64x16xf32>
    %cst_19 = arith.constant 0.000000e+00 : f32
    %31 = vector.broadcast %cst_19 : f32 to vector<64x16xf32>
    %32 = arith.cmpf oge, %30, %31 : vector<64x16xf32>
    %cst_20 = arith.constant 0.00999999977 : f32
    %33 = vector.broadcast %cst_20 : f32 to vector<64x16xf32>
    %34 = arith.mulf %33, %30 : vector<64x16xf32>
    %35 = arith.select %32, %30, %34 : vector<64x16xi1>, vector<64x16xf32>
    %36 = arith.truncf %35 : vector<64x16xf32> to vector<64x16xbf16>
    %c0_21 = arith.constant 0 : index
    %c0_22 = arith.constant 0 : index
    %37 = vector.load %arg8[%c0_21, %c0_22] : memref<64x16xbf16, #tpu.memory_space<vmem>>, vector<64x16xbf16>
    tpu.vector_store %arg8[%c0_21, %c0_22], %36 {strides = array<i32>} : memref<64x16xbf16, #tpu.memory_space<vmem>>, vector<64x16xbf16>,
    return
  }
  func.func @transform_0(%arg0: i32) -> (i32, i32) {
    %c0_i32 = arith.constant 0 : i32
    %c0_i32_0 = arith.constant 0 : i32
    %c0_i32_1 = arith.constant 0 : i32
    return %c0_i32, %c0_i32_0 : i32, i32
  }
  func.func @transform_1(%arg0: i32) -> (i32, i32) {
    %c0_i32 = arith.constant 0 : i32
    %c0_i32_0 = arith.constant 0 : i32
    %c0_i32_1 = arith.constant 0 : i32
    return %c0_i32, %c0_i32_0 : i32, i32
  }
  func.func @transform_2(%arg0: i32) -> (i32, i32) {
    %c0_i32 = arith.constant 0 : i32
    %c0_i32_0 = arith.constant 0 : i32
    %c0_i32_1 = arith.constant 0 : i32
    return %c0_i32, %c0_i32_0 : i32, i32
  }
  func.func @transform_3(%arg0: i32) -> (i32, i32) {
    %c0_i32 = arith.constant 0 : i32
    %c0_i32_0 = arith.constant 0 : i32
    %c0_i32_1 = arith.constant 0 : i32
    return %c0_i32, %c0_i32_0 : i32, i32
  }
  func.func @transform_4(%arg0: i32) -> (i32, i32) {
    %c0_i32 = arith.constant 0 : i32
    %c0_i32_0 = arith.constant 0 : i32
    %c0_i32_1 = arith.constant 0 : i32
    return %c0_i32, %c0_i32_0 : i32, i32
  }
  func.func @transform_5(%arg0: i32) -> (i32, i32) {
    %c0_i32 = arith.constant 0 : i32
    %c0_i32_0 = arith.constant 0 : i32
    %c0_i32_1 = arith.constant 0 : i32
    return %c0_i32, %c0_i32_0 : i32, i32
  }
  func.func @transform_6(%arg0: i32) -> (i32, i32) {
    %c0_i32 = arith.constant 0 : i32
    %c0_i32_0 = arith.constant 0 : i32
    %c0_i32_1 = arith.constant 0 : i32
    return %c0_i32, %c0_i32_0 : i32, i32
  }
  func.func @transform_7(%arg0: i32) -> (i32, i32) {
    %c0_i32 = arith.constant 0 : i32
    %c0_i32_0 = arith.constant 0 : i32
    %c0_i32_1 = arith.constant 0 : i32
    return %c0_i32, %c0_i32_0 : i32, i32
  }
}

module attributes {stable_mosaic.version = 11 : i64} {
  func.func @_conv_bn_lrelu_kernel(%arg0: i32, %arg1: memref<576x64xbf16, #tpu.memory_space<vmem>>, %arg2: memref<576x64xbf16, #tpu.memory_space<vmem>>, %arg3: memref<32x576xbf16, #tpu.memory_space<vmem>>, %arg4: memref<32x576xbf16, #tpu.memory_space<vmem>>, %arg5: memref<32x1xf32, #tpu.memory_space<vmem>>, %arg6: memref<32x1xf32, #tpu.memory_space<vmem>>, %arg7: memref<32x1xf32, #tpu.memory_space<vmem>>, %arg8: memref<32x64xbf16, #tpu.memory_space<vmem>>) attributes {dimension_semantics = [#tpu.dimension_semantics<arbitrary>], iteration_bounds = array<i64: 1>, scalar_prefetch = 0 : i64, scratch_operands = 0 : i64, tpu.core_type = #tpu.core_type<tc>, window_params = [{pipeline_mode = #tpu.pipeline_mode<synchronous>, transform_indices = @transform_0, window_bounds = array<i64: 576, 64>}, {pipeline_mode = #tpu.pipeline_mode<synchronous>, transform_indices = @transform_1, window_bounds = array<i64: 576, 64>}, {pipeline_mode = #tpu.pipeline_mode<synchronous>, transform_indices = @transform_2, window_bounds = array<i64: 32, 576>}, {pipeline_mode = #tpu.pipeline_mode<synchronous>, transform_indices = @transform_3, window_bounds = array<i64: 32, 576>}, {pipeline_mode = #tpu.pipeline_mode<synchronous>, transform_indices = @transform_4, window_bounds = array<i64: 32, 1>}, {pipeline_mode = #tpu.pipeline_mode<synchronous>, transform_indices = @transform_5, window_bounds = array<i64: 32, 1>}, {pipeline_mode = #tpu.pipeline_mode<synchronous>, transform_indices = @transform_6, window_bounds = array<i64: 32, 1>}, {pipeline_mode = #tpu.pipeline_mode<synchronous>, transform_indices = @transform_7, window_bounds = array<i64: 32, 64>}]} {
    %c0 = arith.constant 0 : index
    %c0_0 = arith.constant 0 : index
    %0 = vector.load %arg3[%c0, %c0_0] : memref<32x576xbf16, #tpu.memory_space<vmem>>, vector<32x576xbf16>
    %c0_1 = arith.constant 0 : index
    %c0_2 = arith.constant 0 : index
    %1 = vector.load %arg1[%c0_1, %c0_2] : memref<576x64xbf16, #tpu.memory_space<vmem>>, vector<576x64xbf16>
    %cst = arith.constant dense<0.000000e+00> : vector<32x64xf32>
    %2 = tpu.matmul %0, %1, %cst {dimension_numbers = #tpu.dot_dimension_numbers<[1], [0], [0], [1], [0, 0, 1, 1], [], []>} : vector<32x576xbf16>, vector<576x64xbf16>, vector<32x64xf32> -> vector<32x64xf32>
    %c0_3 = arith.constant 0 : index
    %c0_4 = arith.constant 0 : index
    %3 = vector.load %arg4[%c0_3, %c0_4] : memref<32x576xbf16, #tpu.memory_space<vmem>>, vector<32x576xbf16>
    %c0_5 = arith.constant 0 : index
    %c0_6 = arith.constant 0 : index
    %4 = vector.load %arg2[%c0_5, %c0_6] : memref<576x64xbf16, #tpu.memory_space<vmem>>, vector<576x64xbf16>
    %cst_7 = arith.constant dense<0.000000e+00> : vector<32x64xf32>
    %5 = tpu.matmul %3, %4, %cst_7 {dimension_numbers = #tpu.dot_dimension_numbers<[1], [0], [0], [1], [0, 0, 1, 1], [], []>} : vector<32x576xbf16>, vector<576x64xbf16>, vector<32x64xf32> -> vector<32x64xf32>
    %6 = arith.addf %2, %5 : vector<32x64xf32>
    %c0_8 = arith.constant 0 : index
    %c0_9 = arith.constant 0 : index
    %7 = vector.load %arg5[%c0_8, %c0_9] : memref<32x1xf32, #tpu.memory_space<vmem>>, vector<32x1xf32>
    %8 = vector.broadcast %7 : vector<32x1xf32> to vector<32x64xf32>
    %9 = arith.addf %6, %8 : vector<32x64xf32>
    %cst_10 = arith.constant dense<0.000000e+00> : vector<32xf32>
    %10 = vector.multi_reduction <add>, %9, %cst_10 [1] : vector<32x64xf32> to vector<32xf32>
    %11 = vector.shape_cast %10 : vector<32xf32> to vector<32x1xf32>
    %cst_11 = arith.constant 1.562500e-02 : f32
    %12 = vector.broadcast %cst_11 : f32 to vector<32x1xf32>
    %13 = arith.mulf %11, %12 : vector<32x1xf32>
    %14 = vector.broadcast %13 : vector<32x1xf32> to vector<32x64xf32>
    %15 = arith.subf %9, %14 : vector<32x64xf32>
    %16 = arith.mulf %15, %15 : vector<32x64xf32>
    %cst_12 = arith.constant dense<0.000000e+00> : vector<32xf32>
    %17 = vector.multi_reduction <add>, %16, %cst_12 [1] : vector<32x64xf32> to vector<32xf32>
    %18 = vector.shape_cast %17 : vector<32xf32> to vector<32x1xf32>
    %cst_13 = arith.constant 1.562500e-02 : f32
    %19 = vector.broadcast %cst_13 : f32 to vector<32x1xf32>
    %20 = arith.mulf %18, %19 : vector<32x1xf32>
    %c0_14 = arith.constant 0 : index
    %c0_15 = arith.constant 0 : index
    %21 = vector.load %arg6[%c0_14, %c0_15] : memref<32x1xf32, #tpu.memory_space<vmem>>, vector<32x1xf32>
    %cst_16 = arith.constant 9.99999974E-6 : f32
    %22 = vector.broadcast %cst_16 : f32 to vector<32x1xf32>
    %23 = arith.addf %20, %22 : vector<32x1xf32>
    %24 = math.rsqrt %23 : vector<32x1xf32>
    %25 = arith.mulf %21, %24 : vector<32x1xf32>
    %26 = vector.broadcast %25 : vector<32x1xf32> to vector<32x64xf32>
    %27 = arith.mulf %15, %26 : vector<32x64xf32>
    %c0_17 = arith.constant 0 : index
    %c0_18 = arith.constant 0 : index
    %28 = vector.load %arg7[%c0_17, %c0_18] : memref<32x1xf32, #tpu.memory_space<vmem>>, vector<32x1xf32>
    %29 = vector.broadcast %28 : vector<32x1xf32> to vector<32x64xf32>
    %30 = arith.addf %27, %29 : vector<32x64xf32>
    %cst_19 = arith.constant 0.000000e+00 : f32
    %31 = vector.broadcast %cst_19 : f32 to vector<32x64xf32>
    %32 = arith.cmpf oge, %30, %31 : vector<32x64xf32>
    %cst_20 = arith.constant 0.00999999977 : f32
    %33 = vector.broadcast %cst_20 : f32 to vector<32x64xf32>
    %34 = arith.mulf %33, %30 : vector<32x64xf32>
    %35 = arith.select %32, %30, %34 : vector<32x64xi1>, vector<32x64xf32>
    %36 = arith.truncf %35 : vector<32x64xf32> to vector<32x64xbf16>
    %c0_21 = arith.constant 0 : index
    %c0_22 = arith.constant 0 : index
    %37 = vector.load %arg8[%c0_21, %c0_22] : memref<32x64xbf16, #tpu.memory_space<vmem>>, vector<32x64xbf16>
    tpu.vector_store %arg8[%c0_21, %c0_22], %36 {strides = array<i32>} : memref<32x64xbf16, #tpu.memory_space<vmem>>, vector<32x64xbf16>,
    return
  }
  func.func @transform_0(%arg0: i32) -> (i32, i32) {
    %c0_i32 = arith.constant 0 : i32
    %c0_i32_0 = arith.constant 0 : i32
    %c0_i32_1 = arith.constant 0 : i32
    return %c0_i32, %c0_i32_0 : i32, i32
  }
  func.func @transform_1(%arg0: i32) -> (i32, i32) {
    %c0_i32 = arith.constant 0 : i32
    %c0_i32_0 = arith.constant 0 : i32
    %c0_i32_1 = arith.constant 0 : i32
    return %c0_i32, %c0_i32_0 : i32, i32
  }
  func.func @transform_2(%arg0: i32) -> (i32, i32) {
    %c0_i32 = arith.constant 0 : i32
    %c0_i32_0 = arith.constant 0 : i32
    %c0_i32_1 = arith.constant 0 : i32
    return %c0_i32, %c0_i32_0 : i32, i32
  }
  func.func @transform_3(%arg0: i32) -> (i32, i32) {
    %c0_i32 = arith.constant 0 : i32
    %c0_i32_0 = arith.constant 0 : i32
    %c0_i32_1 = arith.constant 0 : i32
    return %c0_i32, %c0_i32_0 : i32, i32
  }
  func.func @transform_4(%arg0: i32) -> (i32, i32) {
    %c0_i32 = arith.constant 0 : i32
    %c0_i32_0 = arith.constant 0 : i32
    %c0_i32_1 = arith.constant 0 : i32
    return %c0_i32, %c0_i32_0 : i32, i32
  }
  func.func @transform_5(%arg0: i32) -> (i32, i32) {
    %c0_i32 = arith.constant 0 : i32
    %c0_i32_0 = arith.constant 0 : i32
    %c0_i32_1 = arith.constant 0 : i32
    return %c0_i32, %c0_i32_0 : i32, i32
  }
  func.func @transform_6(%arg0: i32) -> (i32, i32) {
    %c0_i32 = arith.constant 0 : i32
    %c0_i32_0 = arith.constant 0 : i32
    %c0_i32_1 = arith.constant 0 : i32
    return %c0_i32, %c0_i32_0 : i32, i32
  }
  func.func @transform_7(%arg0: i32) -> (i32, i32) {
    %c0_i32 = arith.constant 0 : i32
    %c0_i32_0 = arith.constant 0 : i32
    %c0_i32_1 = arith.constant 0 : i32
    return %c0_i32, %c0_i32_0 : i32, i32
  }
}

module attributes {stable_mosaic.version = 11 : i64} {
  func.func @_conv_bn_lrelu_kernel(%arg0: i32, %arg1: memref<288x256xbf16, #tpu.memory_space<vmem>>, %arg2: memref<288x256xbf16, #tpu.memory_space<vmem>>, %arg3: memref<16x288xbf16, #tpu.memory_space<vmem>>, %arg4: memref<16x288xbf16, #tpu.memory_space<vmem>>, %arg5: memref<16x1xf32, #tpu.memory_space<vmem>>, %arg6: memref<16x1xf32, #tpu.memory_space<vmem>>, %arg7: memref<16x1xf32, #tpu.memory_space<vmem>>, %arg8: memref<16x256xbf16, #tpu.memory_space<vmem>>) attributes {dimension_semantics = [#tpu.dimension_semantics<arbitrary>], iteration_bounds = array<i64: 1>, scalar_prefetch = 0 : i64, scratch_operands = 0 : i64, tpu.core_type = #tpu.core_type<tc>, window_params = [{pipeline_mode = #tpu.pipeline_mode<synchronous>, transform_indices = @transform_0, window_bounds = array<i64: 288, 256>}, {pipeline_mode = #tpu.pipeline_mode<synchronous>, transform_indices = @transform_1, window_bounds = array<i64: 288, 256>}, {pipeline_mode = #tpu.pipeline_mode<synchronous>, transform_indices = @transform_2, window_bounds = array<i64: 16, 288>}, {pipeline_mode = #tpu.pipeline_mode<synchronous>, transform_indices = @transform_3, window_bounds = array<i64: 16, 288>}, {pipeline_mode = #tpu.pipeline_mode<synchronous>, transform_indices = @transform_4, window_bounds = array<i64: 16, 1>}, {pipeline_mode = #tpu.pipeline_mode<synchronous>, transform_indices = @transform_5, window_bounds = array<i64: 16, 1>}, {pipeline_mode = #tpu.pipeline_mode<synchronous>, transform_indices = @transform_6, window_bounds = array<i64: 16, 1>}, {pipeline_mode = #tpu.pipeline_mode<synchronous>, transform_indices = @transform_7, window_bounds = array<i64: 16, 256>}]} {
    %c0 = arith.constant 0 : index
    %c0_0 = arith.constant 0 : index
    %0 = vector.load %arg3[%c0, %c0_0] : memref<16x288xbf16, #tpu.memory_space<vmem>>, vector<16x288xbf16>
    %c0_1 = arith.constant 0 : index
    %c0_2 = arith.constant 0 : index
    %1 = vector.load %arg1[%c0_1, %c0_2] : memref<288x256xbf16, #tpu.memory_space<vmem>>, vector<288x256xbf16>
    %cst = arith.constant dense<0.000000e+00> : vector<16x256xf32>
    %2 = tpu.matmul %0, %1, %cst {dimension_numbers = #tpu.dot_dimension_numbers<[1], [0], [0], [1], [0, 0, 1, 1], [], []>} : vector<16x288xbf16>, vector<288x256xbf16>, vector<16x256xf32> -> vector<16x256xf32>
    %c0_3 = arith.constant 0 : index
    %c0_4 = arith.constant 0 : index
    %3 = vector.load %arg4[%c0_3, %c0_4] : memref<16x288xbf16, #tpu.memory_space<vmem>>, vector<16x288xbf16>
    %c0_5 = arith.constant 0 : index
    %c0_6 = arith.constant 0 : index
    %4 = vector.load %arg2[%c0_5, %c0_6] : memref<288x256xbf16, #tpu.memory_space<vmem>>, vector<288x256xbf16>
    %cst_7 = arith.constant dense<0.000000e+00> : vector<16x256xf32>
    %5 = tpu.matmul %3, %4, %cst_7 {dimension_numbers = #tpu.dot_dimension_numbers<[1], [0], [0], [1], [0, 0, 1, 1], [], []>} : vector<16x288xbf16>, vector<288x256xbf16>, vector<16x256xf32> -> vector<16x256xf32>
    %6 = arith.addf %2, %5 : vector<16x256xf32>
    %c0_8 = arith.constant 0 : index
    %c0_9 = arith.constant 0 : index
    %7 = vector.load %arg5[%c0_8, %c0_9] : memref<16x1xf32, #tpu.memory_space<vmem>>, vector<16x1xf32>
    %8 = vector.broadcast %7 : vector<16x1xf32> to vector<16x256xf32>
    %9 = arith.addf %6, %8 : vector<16x256xf32>
    %cst_10 = arith.constant dense<0.000000e+00> : vector<16xf32>
    %10 = vector.multi_reduction <add>, %9, %cst_10 [1] : vector<16x256xf32> to vector<16xf32>
    %11 = vector.shape_cast %10 : vector<16xf32> to vector<16x1xf32>
    %cst_11 = arith.constant 3.906250e-03 : f32
    %12 = vector.broadcast %cst_11 : f32 to vector<16x1xf32>
    %13 = arith.mulf %11, %12 : vector<16x1xf32>
    %14 = vector.broadcast %13 : vector<16x1xf32> to vector<16x256xf32>
    %15 = arith.subf %9, %14 : vector<16x256xf32>
    %16 = arith.mulf %15, %15 : vector<16x256xf32>
    %cst_12 = arith.constant dense<0.000000e+00> : vector<16xf32>
    %17 = vector.multi_reduction <add>, %16, %cst_12 [1] : vector<16x256xf32> to vector<16xf32>
    %18 = vector.shape_cast %17 : vector<16xf32> to vector<16x1xf32>
    %cst_13 = arith.constant 3.906250e-03 : f32
    %19 = vector.broadcast %cst_13 : f32 to vector<16x1xf32>
    %20 = arith.mulf %18, %19 : vector<16x1xf32>
    %c0_14 = arith.constant 0 : index
    %c0_15 = arith.constant 0 : index
    %21 = vector.load %arg6[%c0_14, %c0_15] : memref<16x1xf32, #tpu.memory_space<vmem>>, vector<16x1xf32>
    %cst_16 = arith.constant 9.99999974E-6 : f32
    %22 = vector.broadcast %cst_16 : f32 to vector<16x1xf32>
    %23 = arith.addf %20, %22 : vector<16x1xf32>
    %24 = math.rsqrt %23 : vector<16x1xf32>
    %25 = arith.mulf %21, %24 : vector<16x1xf32>
    %26 = vector.broadcast %25 : vector<16x1xf32> to vector<16x256xf32>
    %27 = arith.mulf %15, %26 : vector<16x256xf32>
    %c0_17 = arith.constant 0 : index
    %c0_18 = arith.constant 0 : index
    %28 = vector.load %arg7[%c0_17, %c0_18] : memref<16x1xf32, #tpu.memory_space<vmem>>, vector<16x1xf32>
    %29 = vector.broadcast %28 : vector<16x1xf32> to vector<16x256xf32>
    %30 = arith.addf %27, %29 : vector<16x256xf32>
    %cst_19 = arith.constant 0.000000e+00 : f32
    %31 = vector.broadcast %cst_19 : f32 to vector<16x256xf32>
    %32 = arith.cmpf oge, %30, %31 : vector<16x256xf32>
    %cst_20 = arith.constant 0.00999999977 : f32
    %33 = vector.broadcast %cst_20 : f32 to vector<16x256xf32>
    %34 = arith.mulf %33, %30 : vector<16x256xf32>
    %35 = arith.select %32, %30, %34 : vector<16x256xi1>, vector<16x256xf32>
    %36 = arith.truncf %35 : vector<16x256xf32> to vector<16x256xbf16>
    %c0_21 = arith.constant 0 : index
    %c0_22 = arith.constant 0 : index
    %37 = vector.load %arg8[%c0_21, %c0_22] : memref<16x256xbf16, #tpu.memory_space<vmem>>, vector<16x256xbf16>
    tpu.vector_store %arg8[%c0_21, %c0_22], %36 {strides = array<i32>} : memref<16x256xbf16, #tpu.memory_space<vmem>>, vector<16x256xbf16>,
    return
  }
  func.func @transform_0(%arg0: i32) -> (i32, i32) {
    %c0_i32 = arith.constant 0 : i32
    %c0_i32_0 = arith.constant 0 : i32
    %c0_i32_1 = arith.constant 0 : i32
    return %c0_i32, %c0_i32_0 : i32, i32
  }
  func.func @transform_1(%arg0: i32) -> (i32, i32) {
    %c0_i32 = arith.constant 0 : i32
    %c0_i32_0 = arith.constant 0 : i32
    %c0_i32_1 = arith.constant 0 : i32
    return %c0_i32, %c0_i32_0 : i32, i32
  }
  func.func @transform_2(%arg0: i32) -> (i32, i32) {
    %c0_i32 = arith.constant 0 : i32
    %c0_i32_0 = arith.constant 0 : i32
    %c0_i32_1 = arith.constant 0 : i32
    return %c0_i32, %c0_i32_0 : i32, i32
  }
  func.func @transform_3(%arg0: i32) -> (i32, i32) {
    %c0_i32 = arith.constant 0 : i32
    %c0_i32_0 = arith.constant 0 : i32
    %c0_i32_1 = arith.constant 0 : i32
    return %c0_i32, %c0_i32_0 : i32, i32
  }
  func.func @transform_4(%arg0: i32) -> (i32, i32) {
    %c0_i32 = arith.constant 0 : i32
    %c0_i32_0 = arith.constant 0 : i32
    %c0_i32_1 = arith.constant 0 : i32
    return %c0_i32, %c0_i32_0 : i32, i32
  }
  func.func @transform_5(%arg0: i32) -> (i32, i32) {
    %c0_i32 = arith.constant 0 : i32
    %c0_i32_0 = arith.constant 0 : i32
    %c0_i32_1 = arith.constant 0 : i32
    return %c0_i32, %c0_i32_0 : i32, i32
  }
  func.func @transform_6(%arg0: i32) -> (i32, i32) {
    %c0_i32 = arith.constant 0 : i32
    %c0_i32_0 = arith.constant 0 : i32
    %c0_i32_1 = arith.constant 0 : i32
    return %c0_i32, %c0_i32_0 : i32, i32
  }
  func.func @transform_7(%arg0: i32) -> (i32, i32) {
    %c0_i32 = arith.constant 0 : i32
    %c0_i32_0 = arith.constant 0 : i32
    %c0_i32_1 = arith.constant 0 : i32
    return %c0_i32, %c0_i32_0 : i32, i32
  }
}

module attributes {stable_mosaic.version = 11 : i64} {
  func.func @_conv_bn_lrelu_kernel(%arg0: i32, %arg1: memref<144x1024xbf16, #tpu.memory_space<vmem>>, %arg2: memref<144x1024xbf16, #tpu.memory_space<vmem>>, %arg3: memref<8x144xbf16, #tpu.memory_space<vmem>>, %arg4: memref<8x144xbf16, #tpu.memory_space<vmem>>, %arg5: memref<8x1xf32, #tpu.memory_space<vmem>>, %arg6: memref<8x1xf32, #tpu.memory_space<vmem>>, %arg7: memref<8x1xf32, #tpu.memory_space<vmem>>, %arg8: memref<8x1024xbf16, #tpu.memory_space<vmem>>) attributes {dimension_semantics = [#tpu.dimension_semantics<arbitrary>], iteration_bounds = array<i64: 1>, scalar_prefetch = 0 : i64, scratch_operands = 0 : i64, tpu.core_type = #tpu.core_type<tc>, window_params = [{pipeline_mode = #tpu.pipeline_mode<synchronous>, transform_indices = @transform_0, window_bounds = array<i64: 144, 1024>}, {pipeline_mode = #tpu.pipeline_mode<synchronous>, transform_indices = @transform_1, window_bounds = array<i64: 144, 1024>}, {pipeline_mode = #tpu.pipeline_mode<synchronous>, transform_indices = @transform_2, window_bounds = array<i64: 8, 144>}, {pipeline_mode = #tpu.pipeline_mode<synchronous>, transform_indices = @transform_3, window_bounds = array<i64: 8, 144>}, {pipeline_mode = #tpu.pipeline_mode<synchronous>, transform_indices = @transform_4, window_bounds = array<i64: 8, 1>}, {pipeline_mode = #tpu.pipeline_mode<synchronous>, transform_indices = @transform_5, window_bounds = array<i64: 8, 1>}, {pipeline_mode = #tpu.pipeline_mode<synchronous>, transform_indices = @transform_6, window_bounds = array<i64: 8, 1>}, {pipeline_mode = #tpu.pipeline_mode<synchronous>, transform_indices = @transform_7, window_bounds = array<i64: 8, 1024>}]} {
    %c0 = arith.constant 0 : index
    %c0_0 = arith.constant 0 : index
    %0 = vector.load %arg3[%c0, %c0_0] : memref<8x144xbf16, #tpu.memory_space<vmem>>, vector<8x144xbf16>
    %c0_1 = arith.constant 0 : index
    %c0_2 = arith.constant 0 : index
    %1 = vector.load %arg1[%c0_1, %c0_2] : memref<144x1024xbf16, #tpu.memory_space<vmem>>, vector<144x1024xbf16>
    %cst = arith.constant dense<0.000000e+00> : vector<8x1024xf32>
    %2 = tpu.matmul %0, %1, %cst {dimension_numbers = #tpu.dot_dimension_numbers<[1], [0], [0], [1], [0, 0, 1, 1], [], []>} : vector<8x144xbf16>, vector<144x1024xbf16>, vector<8x1024xf32> -> vector<8x1024xf32>
    %c0_3 = arith.constant 0 : index
    %c0_4 = arith.constant 0 : index
    %3 = vector.load %arg4[%c0_3, %c0_4] : memref<8x144xbf16, #tpu.memory_space<vmem>>, vector<8x144xbf16>
    %c0_5 = arith.constant 0 : index
    %c0_6 = arith.constant 0 : index
    %4 = vector.load %arg2[%c0_5, %c0_6] : memref<144x1024xbf16, #tpu.memory_space<vmem>>, vector<144x1024xbf16>
    %cst_7 = arith.constant dense<0.000000e+00> : vector<8x1024xf32>
    %5 = tpu.matmul %3, %4, %cst_7 {dimension_numbers = #tpu.dot_dimension_numbers<[1], [0], [0], [1], [0, 0, 1, 1], [], []>} : vector<8x144xbf16>, vector<144x1024xbf16>, vector<8x1024xf32> -> vector<8x1024xf32>
    %6 = arith.addf %2, %5 : vector<8x1024xf32>
    %c0_8 = arith.constant 0 : index
    %c0_9 = arith.constant 0 : index
    %7 = vector.load %arg5[%c0_8, %c0_9] : memref<8x1xf32, #tpu.memory_space<vmem>>, vector<8x1xf32>
    %8 = vector.broadcast %7 : vector<8x1xf32> to vector<8x1024xf32>
    %9 = arith.addf %6, %8 : vector<8x1024xf32>
    %cst_10 = arith.constant dense<0.000000e+00> : vector<8xf32>
    %10 = vector.multi_reduction <add>, %9, %cst_10 [1] : vector<8x1024xf32> to vector<8xf32>
    %11 = vector.shape_cast %10 : vector<8xf32> to vector<8x1xf32>
    %cst_11 = arith.constant 9.765625E-4 : f32
    %12 = vector.broadcast %cst_11 : f32 to vector<8x1xf32>
    %13 = arith.mulf %11, %12 : vector<8x1xf32>
    %14 = vector.broadcast %13 : vector<8x1xf32> to vector<8x1024xf32>
    %15 = arith.subf %9, %14 : vector<8x1024xf32>
    %16 = arith.mulf %15, %15 : vector<8x1024xf32>
    %cst_12 = arith.constant dense<0.000000e+00> : vector<8xf32>
    %17 = vector.multi_reduction <add>, %16, %cst_12 [1] : vector<8x1024xf32> to vector<8xf32>
    %18 = vector.shape_cast %17 : vector<8xf32> to vector<8x1xf32>
    %cst_13 = arith.constant 9.765625E-4 : f32
    %19 = vector.broadcast %cst_13 : f32 to vector<8x1xf32>
    %20 = arith.mulf %18, %19 : vector<8x1xf32>
    %c0_14 = arith.constant 0 : index
    %c0_15 = arith.constant 0 : index
    %21 = vector.load %arg6[%c0_14, %c0_15] : memref<8x1xf32, #tpu.memory_space<vmem>>, vector<8x1xf32>
    %cst_16 = arith.constant 9.99999974E-6 : f32
    %22 = vector.broadcast %cst_16 : f32 to vector<8x1xf32>
    %23 = arith.addf %20, %22 : vector<8x1xf32>
    %24 = math.rsqrt %23 : vector<8x1xf32>
    %25 = arith.mulf %21, %24 : vector<8x1xf32>
    %26 = vector.broadcast %25 : vector<8x1xf32> to vector<8x1024xf32>
    %27 = arith.mulf %15, %26 : vector<8x1024xf32>
    %c0_17 = arith.constant 0 : index
    %c0_18 = arith.constant 0 : index
    %28 = vector.load %arg7[%c0_17, %c0_18] : memref<8x1xf32, #tpu.memory_space<vmem>>, vector<8x1xf32>
    %29 = vector.broadcast %28 : vector<8x1xf32> to vector<8x1024xf32>
    %30 = arith.addf %27, %29 : vector<8x1024xf32>
    %cst_19 = arith.constant 0.000000e+00 : f32
    %31 = vector.broadcast %cst_19 : f32 to vector<8x1024xf32>
    %32 = arith.cmpf oge, %30, %31 : vector<8x1024xf32>
    %cst_20 = arith.constant 0.00999999977 : f32
    %33 = vector.broadcast %cst_20 : f32 to vector<8x1024xf32>
    %34 = arith.mulf %33, %30 : vector<8x1024xf32>
    %35 = arith.select %32, %30, %34 : vector<8x1024xi1>, vector<8x1024xf32>
    %36 = arith.truncf %35 : vector<8x1024xf32> to vector<8x1024xbf16>
    %c0_21 = arith.constant 0 : index
    %c0_22 = arith.constant 0 : index
    %37 = vector.load %arg8[%c0_21, %c0_22] : memref<8x1024xbf16, #tpu.memory_space<vmem>>, vector<8x1024xbf16>
    tpu.vector_store %arg8[%c0_21, %c0_22], %36 {strides = array<i32>} : memref<8x1024xbf16, #tpu.memory_space<vmem>>, vector<8x1024xbf16>,
    return
  }
  func.func @transform_0(%arg0: i32) -> (i32, i32) {
    %c0_i32 = arith.constant 0 : i32
    %c0_i32_0 = arith.constant 0 : i32
    %c0_i32_1 = arith.constant 0 : i32
    return %c0_i32, %c0_i32_0 : i32, i32
  }
  func.func @transform_1(%arg0: i32) -> (i32, i32) {
    %c0_i32 = arith.constant 0 : i32
    %c0_i32_0 = arith.constant 0 : i32
    %c0_i32_1 = arith.constant 0 : i32
    return %c0_i32, %c0_i32_0 : i32, i32
  }
  func.func @transform_2(%arg0: i32) -> (i32, i32) {
    %c0_i32 = arith.constant 0 : i32
    %c0_i32_0 = arith.constant 0 : i32
    %c0_i32_1 = arith.constant 0 : i32
    return %c0_i32, %c0_i32_0 : i32, i32
  }
  func.func @transform_3(%arg0: i32) -> (i32, i32) {
    %c0_i32 = arith.constant 0 : i32
    %c0_i32_0 = arith.constant 0 : i32
    %c0_i32_1 = arith.constant 0 : i32
    return %c0_i32, %c0_i32_0 : i32, i32
  }
  func.func @transform_4(%arg0: i32) -> (i32, i32) {
    %c0_i32 = arith.constant 0 : i32
    %c0_i32_0 = arith.constant 0 : i32
    %c0_i32_1 = arith.constant 0 : i32
    return %c0_i32, %c0_i32_0 : i32, i32
  }
  func.func @transform_5(%arg0: i32) -> (i32, i32) {
    %c0_i32 = arith.constant 0 : i32
    %c0_i32_0 = arith.constant 0 : i32
    %c0_i32_1 = arith.constant 0 : i32
    return %c0_i32, %c0_i32_0 : i32, i32
  }
  func.func @transform_6(%arg0: i32) -> (i32, i32) {
    %c0_i32 = arith.constant 0 : i32
    %c0_i32_0 = arith.constant 0 : i32
    %c0_i32_1 = arith.constant 0 : i32
    return %c0_i32, %c0_i32_0 : i32, i32
  }
  func.func @transform_7(%arg0: i32) -> (i32, i32) {
    %c0_i32 = arith.constant 0 : i32
    %c0_i32_0 = arith.constant 0 : i32
    %c0_i32_1 = arith.constant 0 : i32
    return %c0_i32, %c0_i32_0 : i32, i32
  }
}

module attributes {stable_mosaic.version = 11 : i64} {
  func.func @_conv_tanh_kernel(%arg0: i32, %arg1: memref<72x1024xbf16, #tpu.memory_space<vmem>>, %arg2: memref<3x72xbf16, #tpu.memory_space<vmem>>, %arg3: memref<3x1xf32, #tpu.memory_space<vmem>>, %arg4: memref<3x1024xf32, #tpu.memory_space<vmem>>) attributes {dimension_semantics = [#tpu.dimension_semantics<arbitrary>], iteration_bounds = array<i64: 1>, scalar_prefetch = 0 : i64, scratch_operands = 0 : i64, tpu.core_type = #tpu.core_type<tc>, window_params = [{pipeline_mode = #tpu.pipeline_mode<synchronous>, transform_indices = @transform_0, window_bounds = array<i64: 72, 1024>}, {pipeline_mode = #tpu.pipeline_mode<synchronous>, transform_indices = @transform_1, window_bounds = array<i64: 3, 72>}, {pipeline_mode = #tpu.pipeline_mode<synchronous>, transform_indices = @transform_2, window_bounds = array<i64: 3, 1>}, {pipeline_mode = #tpu.pipeline_mode<synchronous>, transform_indices = @transform_3, window_bounds = array<i64: 3, 1024>}]} {
    %c0 = arith.constant 0 : index
    %c0_0 = arith.constant 0 : index
    %0 = vector.load %arg2[%c0, %c0_0] : memref<3x72xbf16, #tpu.memory_space<vmem>>, vector<3x72xbf16>
    %c0_1 = arith.constant 0 : index
    %c0_2 = arith.constant 0 : index
    %1 = vector.load %arg1[%c0_1, %c0_2] : memref<72x1024xbf16, #tpu.memory_space<vmem>>, vector<72x1024xbf16>
    %cst = arith.constant dense<0.000000e+00> : vector<3x1024xf32>
    %2 = tpu.matmul %0, %1, %cst {dimension_numbers = #tpu.dot_dimension_numbers<[1], [0], [0], [1], [0, 0, 1, 1], [], []>} : vector<3x72xbf16>, vector<72x1024xbf16>, vector<3x1024xf32> -> vector<3x1024xf32>
    %c0_3 = arith.constant 0 : index
    %c0_4 = arith.constant 0 : index
    %3 = vector.load %arg3[%c0_3, %c0_4] : memref<3x1xf32, #tpu.memory_space<vmem>>, vector<3x1xf32>
    %4 = vector.broadcast %3 : vector<3x1xf32> to vector<3x1024xf32>
    %5 = arith.addf %2, %4 : vector<3x1024xf32>
    %6 = math.tanh %5 : vector<3x1024xf32>
    %c0_5 = arith.constant 0 : index
    %c0_6 = arith.constant 0 : index
    %7 = vector.load %arg4[%c0_5, %c0_6] : memref<3x1024xf32, #tpu.memory_space<vmem>>, vector<3x1024xf32>
    tpu.vector_store %arg4[%c0_5, %c0_6], %6 {strides = array<i32>} : memref<3x1024xf32, #tpu.memory_space<vmem>>, vector<3x1024xf32>,
    return
  }
  func.func @transform_0(%arg0: i32) -> (i32, i32) {
    %c0_i32 = arith.constant 0 : i32
    %c0_i32_0 = arith.constant 0 : i32
    %c0_i32_1 = arith.constant 0 : i32
    return %c0_i32, %c0_i32_0 : i32, i32
  }
  func.func @transform_1(%arg0: i32) -> (i32, i32) {
    %c0_i32 = arith.constant 0 : i32
    %c0_i32_0 = arith.constant 0 : i32
    %c0_i32_1 = arith.constant 0 : i32
    return %c0_i32, %c0_i32_0 : i32, i32
  }
  func.func @transform_2(%arg0: i32) -> (i32, i32) {
    %c0_i32 = arith.constant 0 : i32
    %c0_i32_0 = arith.constant 0 : i32
    %c0_i32_1 = arith.constant 0 : i32
    return %c0_i32, %c0_i32_0 : i32, i32
  }
  func.func @transform_3(%arg0: i32) -> (i32, i32) {
    %c0_i32 = arith.constant 0 : i32
    %c0_i32_0 = arith.constant 0 : i32
    %c0_i32_1 = arith.constant 0 : i32
    return %c0_i32, %c0_i32_0 : i32, i32
  }
}

</mosaic_0001>

<bundles_post_ra>
// kernel: _lambda_.12
= control target key start
LH: loop header
LB: loop body
LE: loop exit
PB: predicated region body
PF: predicated region fallthrough
CT: control target
= control target key end

     0   :  { %vm120_vm0 = vcmask 1044480   ;;  %vm121_vm1 = vcmask 1045504   ;;  %v477_v3 = vmov 65535   ;;  %v478_v5 = vmov 0   ;;  %s599_s0 = inlined_call_operand.vmem [shape: bf16[27,1024], index: 0, kind: input, shape index: {}]   ;;  %s600_s2 = inlined_call_operand.vmem [shape: f32[8,1], index: 2, kind: input, shape index: {}, may-alias: {2,4}]   ;;  %s601_s1 = inlined_call_operand.vmem [shape: bf16[8,27], index: 1, kind: input, shape index: {}]   ;;  %s602_s3 = inlined_call_operand.vmem [shape: f32[8,1], index: 3, kind: input, shape index: {}]   ;;  %s603_s4 = inlined_call_operand.vmem [shape: f32[8,1], index: 4, kind: input, shape index: {}, may-alias: {2,4}]   ;;  %s604_s5 = inlined_call_operand.vmem [shape: bf16[8,1024], index: 5, kind: output, shape index: {}]  }
   0x1   :  { %v22_v0 = vld [vmem:[%s599_s0] sm:$0xff]  ;;  %v23_v2 = vld [vmem:[%s599_s0 + $0x8] sm:$0xff]  ;;  %v122_v4 = vsel %vm120_vm0, 4294967295, %v477_v3  ;;  %180 = vmatprep.mubr.bf16.mxu0 %v478_v5  ;;  %221 = vmatprep.mubr.bf16.mxu1 %v478_v5  ;;  %v24_v20 = vld [vmem:[%s599_s0 + $0x10] sm:$0xff]  ;;  %vm116_vm2 = vcmask 220160  }
   0x2   :  { %v26_v1 = vld [vmem:[%s599_s0 + $0x20] sm:$0xff]  ;;  %v27_v7 = vld [vmem:[%s599_s0 + $0x28] sm:$0xff]  ;;  %v123_v11 = vsel %vm121_vm1, %v122_v4, 0  ;;  %473 = vset.pattern.permute.xlu0 %v478_v5  ;;  %474 = vset.pattern.permute.xlu1 %v478_v5  ;;  %v28_v21 = vld [vmem:[%s599_s0 + $0x30] sm:$0xff] }
   0x3   :  { %v444_v6 = vcombine.high %v22_v0, %v26_v1  ;;  %v443_v8 = vcombine.low %v22_v0, %v26_v1  ;;  %v30_v9 = vld [vmem:[%s599_s0 + $0x40] sm:$0xff]  ;;  %v446_v12 = vcombine.high %v23_v2, %v27_v7  ;;  %v445_v13 = vcombine.low %v23_v2, %v27_v7  ;;  %v31_v15 = vld [vmem:[%s599_s0 + $0x48] sm:$0xff]  ;;  %v25_v22 = vld [vmem:[%s599_s0 + $0x18] sm:$0xff] }
   0x4   :  { %v34_v10 = vld [vmem:[%s599_s0 + $0x60] sm:$0x33]  ;;  %v35_v16 = vld [vmem:[%s599_s0 + $0x68] sm:$0x33]  ;;  %v29_v25 = vld [vmem:[%s599_s0 + $0x38] sm:$0xff]  ;;  %v448_v30 = vcombine.high %v24_v20, %v28_v21  ;;  %v447_v38 = vcombine.low %v24_v20, %v28_v21 }
   0x5   :  { %v452_v14 = vcombine.high %v30_v9, %v34_v10  ;;  %v451_v17 = vcombine.low %v30_v9, %v34_v10  ;;  %148 = vmatprep.subr.bf16.mxu0 %v444_v6  ;;  %v454_v18 = vcombine.high %v31_v15, %v35_v16  ;;  %v453_v19 = vcombine.low %v31_v15, %v35_v16  ;;  %v32_v26 = vld [vmem:[%s599_s0 + $0x50] sm:$0xff]  ;;  %v33_v31 = vld [vmem:[%s599_s0 + $0x58] sm:$0xff]  ;;  %v38_v33 = vld [vmem:[%s600_s2] sm:$0xff] }
   0x6   :  { %189 = vmatprep.subr.bf16.mxu1 %v446_v12  ;;  %149 = vmatpush1.bf16.msra.mxu0 %v443_v8  ;;  %v36_v27 = vld [vmem:[%s599_s0 + $0x70] sm:$0x33]  ;;  %v37_v32 = vld [vmem:[%s599_s0 + $0x78] sm:$0x33]  ;;  %v450_v34 = vcombine.high %v25_v22, %v29_v25  ;;  %v21_v37 = vld [vmem:[%s601_s1] sm:$0xf]  ;;  %v449_v40 = vcombine.low %v25_v22, %v29_v25 }
   0x7   :  { %v128_v23 = vand.u32 %v452_v14, %v123_v11  ;;  %v125_v24 = vand.u32 %v451_v17, %v123_v11  ;;  %190 = vmatpush1.bf16.msra.mxu1 %v445_v13  ;;  %v134_v28 = vand.u32 %v454_v18, %v123_v11  ;;  %v131_v29 = vand.u32 %v453_v19, %v123_v11 }
   0x8   :  { %v456_v35 = vcombine.high %v32_v26, %v36_v27  ;;  %v458_v36 = vcombine.high %v33_v31, %v37_v32  ;;  %41 = vperm.xlu0 %473, %v38_v33   ;;  %v455_v39 = vcombine.low %v32_v26, %v36_v27  ;;  %v457_v42 = vcombine.low %v33_v31, %v37_v32 }
   0x9   :  { %150 = vmatprep.subr.bf16.mxu0 %v128_v23  ;;  %191 = vmatprep.subr.bf16.mxu1 %v134_v28 }
   0xa   :  { %151 = vmatpush1.bf16.msra.mxu0 %v125_v24  ;;  %v140_v41 = vand.u32 %v456_v35, %v123_v11  ;;  %v146_v43 = vand.u32 %v458_v36, %v123_v11  ;;  %v137_v44 = vand.u32 %v455_v39, %v123_v11  ;;  %v143_v45 = vand.u32 %v457_v42, %v123_v11  ;;  %v348_v42 = vld [vmem:[%s602_s3] sm:$0xff] }
   0xb   :  { %192 = vmatpush1.bf16.msra.mxu1 %v131_v29  ;;  %230 = vmatprep.subr.bf16.mxu0 %v448_v30 }
   0xc   :  { %271 = vmatprep.subr.bf16.mxu1 %v450_v34 }
   0xd   :  { %459 = vmatmul.mubr.msk.bf16.vlgmr.msra.gmra.mrb[0].mxu0 %vm116_vm2, %v21_v37 }
   0xe   :  { %460 = vmatmul.mubr.msk.bf16.vlgmr.msra.gmra.mrb[0].mxu1 %vm116_vm2, %v21_v37  ;;  %231 = vmatpush1.bf16.msra.mxu0 %v447_v38 }
   0xf   :  { %272 = vmatpush1.bf16.msra.mxu1 %v449_v40  ;;  %232 = vmatprep.subr.bf16.mxu0 %v140_v41 }
  0x10   :  { %273 = vmatprep.subr.bf16.mxu1 %v146_v43  ;;  %262 = vmatprep.mubr.bf16.mxu0 %v478_v5 }
  0x11   :  { %303 = vmatprep.mubr.bf16.mxu1 %v478_v5 }
  0x12   :  { %233 = vmatpush1.bf16.msra.mxu0 %v137_v44 }
  0x13   :  { %274 = vmatpush1.bf16.msra.mxu1 %v143_v45  ;;  %v365_v45 = vld [vmem:[%s603_s4] sm:$0xff] }
  0x15   :  { %461 = vmatmul.mubr.msk.bf16.vlgmr.msra.gmra.mrb[4].mxu0 %vm116_vm2, %v21_v37 }
  0x16   :  { %462 = vmatmul.mubr.msk.bf16.vlgmr.msra.gmra.mrb[4].mxu1 %vm116_vm2, %v21_v37 }
  0x87   :  { %v42_v46 = vpop.permute.xlu0 %41 }
  0xe0   :  { %v182_v47 = vpop.f32.mrb[0].mxu0 }
  0xe1   :  { %v183_v48 = vadd.f32 %v182_v47, %v42_v46  ;;  %v184_v49 = vpop.f32.mrb[1].mxu0  ;;  %v223_v50 = vpop.f32.mrb[0].mxu1 }
  0xe2   :  { %v185_v51 = vadd.f32 %v184_v49, %v42_v46  ;;  %v186_v52 = vpop.f32.mrb[2].mxu0  ;;  %v224_v53 = vadd.f32 %v223_v50, %v42_v46  ;;  %v225_v54 = vpop.f32.mrb[1].mxu1 }
  0xe3   :  { %v187_v55 = vpop.f32.mrb[3].mxu0  ;;  %v227_v56 = vpop.f32.mrb[2].mxu1  ;;  %v226_v60 = vadd.f32 %v225_v54, %v42_v46 }
  0xe4   :  { %v312_v57 = vadd.f32 %v185_v51, %v183_v48  ;;  %v228_v58 = vpop.f32.mrb[3].mxu1 }
  0xe6   :  { %v313_v59 = vadd.f32 %v312_v57, %v224_v53 }
  0xe8   :  { %v314_v61 = vadd.f32 %v313_v59, %v226_v60  ;;  %v264_v62 = vpop.f32.mrb[4].mxu0 }
  0xe9   :  { %v265_v63 = vadd.f32 %v264_v62, %v42_v46  ;;  %v305_v0 = vpop.f32.mrb[4].mxu1  ;;  %v266_v1 = vpop.f32.mrb[5].mxu0 }
  0xea   :  { %v267_v2 = vadd.f32 %v266_v1, %v42_v46  ;;  %v307_v3 = vpop.f32.mrb[5].mxu1  ;;  %v268_v4 = vpop.f32.mrb[6].mxu0  ;;  %v306_v9 = vadd.f32 %v305_v0, %v42_v46 }
  0xeb   :  { %v315_v5 = vadd.f32 %v314_v61, %v265_v63  ;;  %v269_v6 = vpop.f32.mrb[7].mxu0  ;;  %v309_v7 = vpop.f32.mrb[6].mxu1  ;;  %v308_v11 = vadd.f32 %v307_v3, %v42_v46 }
  0xec   :  { %v310_v8 = vpop.f32.mrb[7].mxu1 }
  0xed   :  { %v316_v10 = vadd.f32 %v315_v5, %v267_v2 }
  0xef   :  { %v317_v12 = vadd.f32 %v316_v10, %v306_v9 }
  0xf1   :  { %v318_v13 = vadd.f32 %v317_v12, %v308_v11 }
  0xf3   :  { %319 = vadd.xlane.f32.xlu0 %v318_v13 }
 0x180   :  { %v320_v14 = vpop.xlane.xlu0 %319 }
 0x181   :  { %v321_v15 = vmul.f32 0.0009765625, %v320_v14 }
 0x183   :  { %v322_v16 = vsub.f32 %v183_v48, %v321_v15  ;;  %v323_v17 = vsub.f32 %v185_v51, %v321_v15  ;;  %v324_v18 = vsub.f32 %v224_v53, %v321_v15  ;;  %v325_v19 = vsub.f32 %v226_v60, %v321_v15 }
 0x184   :  { %v326_v22 = vsub.f32 %v265_v63, %v321_v15  ;;  %v327_v25 = vsub.f32 %v267_v2, %v321_v15  ;;  %v328_v28 = vsub.f32 %v306_v9, %v321_v15  ;;  %v329_v31 = vsub.f32 %v308_v11, %v321_v15 }
 0x185   :  { %v330_v20 = vmul.f32 %v322_v16, %v322_v16  ;;  %v331_v21 = vmul.f32 %v323_v17, %v323_v17  ;;  %v332_v23 = vmul.f32 %v324_v18, %v324_v18  ;;  %v333_v26 = vmul.f32 %v325_v19, %v325_v19 }
 0x186   :  { %v334_v29 = vmul.f32 %v326_v22, %v326_v22  ;;  %v335_v32 = vmul.f32 %v327_v25, %v327_v25  ;;  %v336_v34 = vmul.f32 %v328_v28, %v328_v28  ;;  %v337_v36 = vmul.f32 %v329_v31, %v329_v31 }
 0x187   :  { %v338_v24 = vadd.f32 %v331_v21, %v330_v20 }
 0x189   :  { %v339_v27 = vadd.f32 %v338_v24, %v332_v23 }
 0x18b   :  { %v340_v30 = vadd.f32 %v339_v27, %v333_v26 }
 0x18d   :  { %v341_v33 = vadd.f32 %v340_v30, %v334_v29 }
 0x18f   :  { %v342_v35 = vadd.f32 %v341_v33, %v335_v32 }
 0x191   :  { %v343_v37 = vadd.f32 %v342_v35, %v336_v34 }
 0x193   :  { %v344_v38 = vadd.f32 %v343_v37, %v337_v36 }
 0x195   :  { %345 = vadd.xlane.f32.xlu1 %v344_v38 }
 0x222   :  { %v346_v39 = vpop.xlane.xlu1 %345 }
 0x223   :  { %v347_v40 = vmul.f32 0.0009765625, %v346_v39 }
 0x225   :  { %v349_v41 = vadd.f32 1e-05, %v347_v40 }
 0x227   :  { %475 = vrsqrt.f32 %v349_v41 }
 0x231   :  { %v476_v43 = vpop.eup %475 }
 0x232   :  { %v351_v44 = vmul.f32 %v476_v43, %v348_v42 }
 0x234   :  { %354 = vperm.xlu1 %474, %v351_v44  }
 0x238   :  { %368 = vperm.xlu1 %474, %v365_v45  }
 0x2b3   :  { %v355_v46 = vpop.permute.xlu1 %354 }
 0x2b4   :  { %v357_v47 = vmul.f32 %v355_v46, %v322_v16  ;;  %v358_v48 = vmul.f32 %v355_v46, %v323_v17  ;;  %v359_v49 = vmul.f32 %v355_v46, %v324_v18  ;;  %v360_v50 = vmul.f32 %v355_v46, %v325_v19 }
 0x2b5   :  { %v361_v51 = vmul.f32 %v355_v46, %v326_v22  ;;  %v362_v52 = vmul.f32 %v355_v46, %v327_v25  ;;  %v363_v53 = vmul.f32 %v355_v46, %v328_v28  ;;  %v364_v54 = vmul.f32 %v355_v46, %v329_v31 }
 0x2b7   :  { %v369_v55 = vpop.permute.xlu1 %368 }
 0x2b8   :  { %v371_v56 = vadd.f32 %v369_v55, %v357_v47  ;;  %v372_v57 = vadd.f32 %v369_v55, %v358_v48  ;;  %v373_v58 = vadd.f32 %v369_v55, %v359_v49  ;;  %v374_v59 = vadd.f32 %v369_v55, %v360_v50 }
 0x2b9   :  { %v375_v60 = vadd.f32 %v369_v55, %v361_v51  ;;  %v376_v61 = vadd.f32 %v369_v55, %v362_v52  ;;  %v377_v62 = vadd.f32 %v369_v55, %v363_v53  ;;  %v378_v63 = vadd.f32 %v369_v55, %v364_v54 }
 0x2ba   :  { %vm379_vm3 = vcmp.ge.f32.partialorder %v371_v56, 0.0  ;;  %vm380_vm4 = vcmp.ge.f32.partialorder %v372_v57, 0.0  ;;  %vm381_vm5 = vcmp.ge.f32.partialorder %v373_v58, 0.0  ;;  %vm382_vm6 = vcmp.ge.f32.partialorder %v374_v59, 0.0 }
 0x2bb   :  { %vm383_vm7 = vcmp.ge.f32.partialorder %v375_v60, 0.0  ;;  %vm384_vm8 = vcmp.ge.f32.partialorder %v376_v61, 0.0  ;;  %vm385_vm9 = vcmp.ge.f32.partialorder %v377_v62, 0.0  ;;  %vm386_vm10 = vcmp.ge.f32.partialorder %v378_v63, 0.0 }
 0x2bc   :  { %v387_v0 = vmul.f32 0.01, %v371_v56  ;;  %v388_v1 = vmul.f32 0.01, %v372_v57  ;;  %v389_v2 = vmul.f32 0.01, %v373_v58 }
 0x2bd   :  { %v390_v3 = vmul.f32 0.01, %v374_v59  ;;  %v391_v4 = vmul.f32 0.01, %v375_v60  ;;  %v392_v5 = vmul.f32 0.01, %v376_v61 }
 0x2be   :  { %v393_v6 = vmul.f32 0.01, %v377_v62  ;;  %v394_v7 = vmul.f32 0.01, %v378_v63  ;;  %v395_v8 = vsel %vm379_vm3, %v371_v56, %v387_v0  ;;  %v396_v9 = vsel %vm380_vm4, %v372_v57, %v388_v1 }
 0x2bf   :  { %v397_v10 = vsel %vm381_vm5, %v373_v58, %v389_v2  ;;  %v398_v11 = vsel %vm382_vm6, %v374_v59, %v390_v3  ;;  %v399_v12 = vsel %vm383_vm7, %v375_v60, %v391_v4  ;;  %v400_v13 = vsel %vm384_vm8, %v376_v61, %v392_v5 }
 0x2c0   :  { %v401_v14 = vsel %vm385_vm9, %v377_v62, %v393_v6  ;;  %v402_v15 = vsel %vm386_vm10, %v378_v63, %v394_v7  ;;  %v467_v16 = vpack.c.bf16 %v396_v9, %v395_v8  ;;  %v468_v17 = vpack.c.bf16 %v398_v11, %v397_v10 }
 0x2c1   :  { %v469_v18 = vpack.c.bf16 %v400_v13, %v399_v12  ;;  %v470_v19 = vpack.c.bf16 %v402_v15, %v401_v14 }
 0x2c2   :  { %435 = vst [vmem:[%s604_s5] sm:$0xff] %v467_v16  ;;  %436 = vst [vmem:[%s604_s5 + $0x8] sm:$0xff] %v468_v17 }
 0x2c3   :  { %437 = vst [vmem:[%s604_s5 + $0x10] sm:$0xff] %v469_v18  ;;  %438 = vst [vmem:[%s604_s5 + $0x18] sm:$0xff] %v470_v19 }

// kernel: _lambda_.13
= control target key start
LH: loop header
LB: loop body
LE: loop exit
PB: predicated region body
PF: predicated region fallthrough
CT: control target
= control target key end

     0   :  { %v325_v1 = vmov 0   ;;  %s431_s0 = inlined_call_operand.vmem [shape: bf16[128,256], index: 0, kind: input, shape index: {}]   ;;  %s432_s2 = inlined_call_operand.vmem [shape: f32[16,1], index: 2, kind: input, shape index: {}, may-alias: {2,4}]   ;;  %s433_s1 = inlined_call_operand.vmem [shape: bf16[16,128], index: 1, kind: input, shape index: {}]   ;;  %s434_s4 = inlined_call_operand.vmem [shape: f32[16,1], index: 4, kind: input, shape index: {}, may-alias: {2,4}]   ;;  %s435_s3 = inlined_call_operand.vmem [shape: f32[16,1], index: 3, kind: input, shape index: {}]   ;;  %s436_s5 = inlined_call_operand.vmem [shape: bf16[16,256], index: 5, kind: output, shape index: {}]  }
   0x1   :  { %v296_v0 = vld [vmem:[%s431_s0 + $0x4] ss:$8 sps:$4 sm:$0xff]   ;;  %169 = vmatprep.mubr.bf16.mxu0 %v325_v1  ;;  %294 = vset.pattern.permute.xlu0 %v325_v1  ;;  %v298_v2 = vld [vmem:[%s431_s0] ss:$8 sps:$4 sm:$0xff]   ;;  %v299_v3 = vld [vmem:[%s431_s0 + $0x14] ss:$8 sps:$4 sm:$0xff]  }
   0x2   :  { %295 = vset.pattern.permute.xlu1 %v325_v1  ;;  %137 = vmatprep.subr.bf16.mxu0 %v296_v0  ;;  %v301_v4 = vld [vmem:[%s431_s0 + $0x10] ss:$8 sps:$4 sm:$0xff]   ;;  %v302_v5 = vld [vmem:[%s431_s0 + $0x24] ss:$8 sps:$4 sm:$0xff]   ;;  %v304_v6 = vld [vmem:[%s431_s0 + $0x20] ss:$8 sps:$4 sm:$0xff]  }
   0x3   :  { %138 = vmatpush1.bf16.msra.mxu0 %v298_v2  ;;  %v305_v7 = vld [vmem:[%s431_s0 + $0x34] ss:$8 sps:$4 sm:$0xff]   ;;  %v307_v8 = vld [vmem:[%s431_s0 + $0x30] ss:$8 sps:$4 sm:$0xff]   ;;  %v39_v9 = vld [vmem:[%s432_s2] sm:$0xff] }
   0x4   :  { %139 = vmatprep.subr.bf16.mxu0 %v299_v3  ;;  %v308_v10 = vld [vmem:[%s431_s0 + $0x44] ss:$8 sps:$4 sm:$0xff]   ;;  %43 = vperm.xlu0 %294, %v39_v9   ;;  %v310_v12 = vld [vmem:[%s431_s0 + $0x40] ss:$8 sps:$4 sm:$0xff]   ;;  %v311_v13 = vld [vmem:[%s431_s0 + $0x54] ss:$8 sps:$4 sm:$0xff]  }
   0x5   :  { %v40_v11 = vld [vmem:[%s432_s2 + $0x8] sm:$0xff]  ;;  %v313_v14 = vld [vmem:[%s431_s0 + $0x50] ss:$8 sps:$4 sm:$0xff]   ;;  %v317_v17 = vld [vmem:[%s431_s0 + $0x74] ss:$8 sps:$4 sm:$0xff]  }
   0x6   :  { %v314_v15 = vld [vmem:[%s431_s0 + $0x64] ss:$8 sps:$4 sm:$0xff]   ;;  %v316_v16 = vld [vmem:[%s431_s0 + $0x60] ss:$8 sps:$4 sm:$0xff]   ;;  %v319_v18 = vld [vmem:[%s431_s0 + $0x70] ss:$8 sps:$4 sm:$0xff]  }
   0x7   :  { %140 = vmatpush1.bf16.msra.mxu0 %v301_v4  ;;  %v320_v19 = vld [vmem:[%s433_s1] sm:$0xff]   ;;  %v205_v56 = vld [vmem:[%s435_s3 + $0x8] sm:$0xff] }
   0x8   :  { %141 = vmatprep.subr.bf16.mxu0 %v302_v5  ;;  %48 = vperm.xlu0 %294, %v40_v11   ;;  %v226_v46 = vld [vmem:[%s434_s4] sm:$0xff]  ;;  %v227_v59 = vld [vmem:[%s434_s4 + $0x8] sm:$0xff] }
   0x9   :  { %v204_v53 = vld [vmem:[%s435_s3] sm:$0xff] }
   0xb   :  { %142 = vmatpush1.bf16.msra.mxu0 %v304_v6 }
   0xc   :  { %143 = vmatprep.subr.bf16.mxu0 %v305_v7 }
   0xf   :  { %144 = vmatpush1.bf16.msra.mxu0 %v307_v8 }
  0x10   :  { %145 = vmatprep.subr.bf16.mxu0 %v308_v10 }
  0x13   :  { %146 = vmatpush1.bf16.msra.mxu0 %v310_v12 }
  0x14   :  { %147 = vmatprep.subr.bf16.mxu0 %v311_v13 }
  0x17   :  { %148 = vmatpush1.bf16.msra.mxu0 %v313_v14 }
  0x18   :  { %149 = vmatprep.subr.bf16.mxu0 %v314_v15 }
  0x1b   :  { %150 = vmatpush1.bf16.msra.mxu0 %v316_v16 }
  0x1c   :  { %151 = vmatprep.subr.bf16.mxu0 %v317_v17 }
  0x1f   :  { %152 = vmatpush1.bf16.msra.mxu0 %v319_v18 }
  0x22   :  { %170 = vmatmul.mubr.bf16.vlgmr.msra.gmra.mrb[0].mxu0 %v320_v19 }
  0x83   :  { %v44_v20 = vpop.permute.xlu0 %43 }
  0x87   :  { %v49_v23 = vpop.permute.xlu0 %48 }
  0xf5   :  { %v171_v21 = vpop.f32.mrb[0].mxu0 }
  0xf6   :  { %v172_v22 = vadd.f32 %v171_v21, %v44_v20  ;;  %v173_v24 = vpop.f32.mrb[1].mxu0 }
  0xf7   :  { %v174_v25 = vadd.f32 %v173_v24, %v44_v20  ;;  %v175_v26 = vpop.f32.mrb[2].mxu0 }
  0xf8   :  { %v177_v27 = vpop.f32.mrb[3].mxu0  ;;  %v176_v28 = vadd.f32 %v175_v26, %v49_v23 }
  0xf9   :  { %v178_v29 = vadd.f32 %v177_v27, %v49_v23  ;;  %v180_v30 = vadd.f32 %v174_v25, %v172_v22 }
  0xfb   :  { %181 = vadd.xlane.f32.xlu1 %v180_v30  ;;  %v183_v31 = vadd.f32 %v178_v29, %v176_v28 }
  0xff   :  { %184 = vadd.xlane.f32.xlu1 %v183_v31 }
 0x188   :  { %v182_v32 = vpop.xlane.xlu1 %181 }
 0x189   :  { %v186_v33 = vmul.f32 0.00390625, %v182_v32 }
 0x18b   :  { %v188_v34 = vsub.f32 %v172_v22, %v186_v33  ;;  %v189_v35 = vsub.f32 %v174_v25, %v186_v33 }
 0x18c   :  { %v185_v36 = vpop.xlane.xlu1 %184 }
 0x18d   :  { %v187_v37 = vmul.f32 0.00390625, %v185_v36  ;;  %v192_v38 = vmul.f32 %v188_v34, %v188_v34  ;;  %v193_v39 = vmul.f32 %v189_v35, %v189_v35 }
 0x18f   :  { %v190_v40 = vsub.f32 %v176_v28, %v187_v37  ;;  %v191_v41 = vsub.f32 %v178_v29, %v187_v37  ;;  %v196_v42 = vadd.f32 %v193_v39, %v192_v38 }
 0x191   :  { %197 = vadd.xlane.f32.xlu0 %v196_v42  ;;  %v194_v43 = vmul.f32 %v190_v40, %v190_v40  ;;  %v195_v44 = vmul.f32 %v191_v41, %v191_v41 }
 0x193   :  { %v199_v45 = vadd.f32 %v195_v44, %v194_v43 }
 0x195   :  { %200 = vadd.xlane.f32.xlu1 %v199_v45 }
 0x1a6   :  { %230 = vperm.xlu1 %295, %v226_v46  }
 0x21e   :  { %v198_v47 = vpop.xlane.xlu0 %197 }
 0x21f   :  { %v202_v48 = vmul.f32 0.00390625, %v198_v47 }
 0x221   :  { %v206_v49 = vadd.f32 1e-05, %v202_v48 }
 0x222   :  { %v201_v50 = vpop.xlane.xlu1 %200 }
 0x223   :  { %321 = vrsqrt.f32 %v206_v49  ;;  %v203_v51 = vmul.f32 0.00390625, %v201_v50 }
 0x225   :  { %v207_v52 = vadd.f32 1e-05, %v203_v51 }
 0x226   :  { %v231_v60 = vpop.permute.xlu1 %230 }
 0x227   :  { %323 = vrsqrt.f32 %v207_v52 }
 0x22d   :  { %v322_v54 = vpop.eup %321 }
 0x22e   :  { %v210_v55 = vmul.f32 %v322_v54, %v204_v53 }
 0x230   :  { %214 = vperm.xlu1 %295, %v210_v55  }
 0x231   :  { %v324_v57 = vpop.eup %323 }
 0x232   :  { %v211_v58 = vmul.f32 %v324_v57, %v205_v56 }
 0x234   :  { %219 = vperm.xlu1 %295, %v211_v58  }
 0x238   :  { %235 = vperm.xlu1 %295, %v227_v59  }
 0x2af   :  { %v215_v61 = vpop.permute.xlu1 %214 }
 0x2b0   :  { %v222_v62 = vmul.f32 %v215_v61, %v188_v34  ;;  %v223_v63 = vmul.f32 %v215_v61, %v189_v35 }
 0x2b2   :  { %v238_v0 = vadd.f32 %v231_v60, %v222_v62  ;;  %v239_v1 = vadd.f32 %v231_v60, %v223_v63 }
 0x2b3   :  { %v220_v2 = vpop.permute.xlu1 %219 }
 0x2b4   :  { %vm242_vm0 = vcmp.ge.f32.partialorder %v238_v0, 0.0  ;;  %vm243_vm1 = vcmp.ge.f32.partialorder %v239_v1, 0.0  ;;  %v246_v3 = vmul.f32 0.01, %v238_v0  ;;  %v247_v4 = vmul.f32 0.01, %v239_v1 }
 0x2b5   :  { %v224_v7 = vmul.f32 %v220_v2, %v190_v40  ;;  %v225_v8 = vmul.f32 %v220_v2, %v191_v41 }
 0x2b6   :  { %v250_v5 = vsel %vm242_vm0, %v238_v0, %v246_v3  ;;  %v251_v6 = vsel %vm243_vm1, %v239_v1, %v247_v4 }
 0x2b7   :  { %v291_v9 = vpack.c.bf16 %v251_v6, %v250_v5  ;;  %v236_v10 = vpop.permute.xlu1 %235 }
 0x2b8   :  { %v240_v11 = vadd.f32 %v236_v10, %v224_v7  ;;  %v241_v12 = vadd.f32 %v236_v10, %v225_v8 }
 0x2b9   :  { %266 = vst [vmem:[%s436_s5] sm:$0xff] %v291_v9 }
 0x2ba   :  { %vm244_vm2 = vcmp.ge.f32.partialorder %v240_v11, 0.0  ;;  %vm245_vm3 = vcmp.ge.f32.partialorder %v241_v12, 0.0  ;;  %v248_v13 = vmul.f32 0.01, %v240_v11  ;;  %v249_v14 = vmul.f32 0.01, %v241_v12 }
 0x2bc   :  { %v252_v15 = vsel %vm244_vm2, %v240_v11, %v248_v13  ;;  %v253_v16 = vsel %vm245_vm3, %v241_v12, %v249_v14 }
 0x2bd   :  { %v292_v17 = vpack.c.bf16 %v253_v16, %v252_v15 }
 0x2bf   :  { %267 = vst [vmem:[%s436_s5 + $0x8] sm:$0xff] %v292_v17 }

// kernel: _lambda_.14
= control target key start
LH: loop header
LB: loop body
LE: loop exit
PB: predicated region body
PF: predicated region fallthrough
CT: control target
= control target key end

     0   :  { %v497_v1 = vmov 0   ;;  %vm246_vm0 = vcmask 523264   ;;  %vm383_vm2 = vcmask 519168   ;;  %s668_s0 = inlined_call_operand.vmem [shape: bf16[256,64], index: 0, kind: input, shape index: {}]   ;;  %s669_s1 = inlined_call_operand.vmem [shape: bf16[32,256], index: 1, kind: input, shape index: {}]   ;;  %s670_s2 = inlined_call_operand.vmem [shape: f32[32,1], index: 2, kind: input, shape index: {}, may-alias: {2,4}]   ;;  %s671_s4 = inlined_call_operand.vmem [shape: f32[32,1], index: 4, kind: input, shape index: {}, may-alias: {2,4}]   ;;  %s672_s3 = inlined_call_operand.vmem [shape: f32[32,1], index: 3, kind: input, shape index: {}]   ;;  %s673_s5 = inlined_call_operand.vmem [shape: bf16[32,64], index: 5, kind: output, shape index: {}]  }
   0x1   :  { %v467_v0 = vld [vmem:[%s668_s0 + $0x40] sm:$0xff]   ;;  %465 = vset.pattern.permute.xlu0 %v497_v1  ;;  %466 = vset.pattern.permute.xlu1 %v497_v1  ;;  %v469_v3 = vld [vmem:[%s668_s0 + $0x48] sm:$0xff]   ;;  %v471_v5 = vld [vmem:[%s668_s0 + $0x50] sm:$0xff]  }
   0x2   :  { %v468_v2 = vld [vmem:[%s668_s0] sm:$0xff]   ;;  %420 = vmatprep.subr.bf16.mxu0 %v467_v0  ;;  %448 = vmatprep.subr.bf16.mxu1 %v467_v0  ;;  %v470_v4 = vld [vmem:[%s668_s0 + $0x8] sm:$0xff]   ;;  %v472_v6 = vld [vmem:[%s668_s0 + $0x10] sm:$0xff]  }
   0x3   :  { %421 = vmatpush3.bf16.msra.mxu0 %v468_v2  ;;  %456 = vmatpush3.bf16.msra.mxu1 %v468_v2  ;;  %v473_v7 = vld [vmem:[%s668_s0 + $0x58] sm:$0xff]   ;;  %v475_v9 = vld [vmem:[%s668_s0 + $0x60] sm:$0xff]   ;;  %v477_v11 = vld [vmem:[%s668_s0 + $0x68] sm:$0xff]  }
   0x4   :  { %422 = vmatprep.subr.bf16.mxu0 %v469_v3  ;;  %449 = vmatprep.subr.bf16.mxu1 %v469_v3  ;;  %v474_v8 = vld [vmem:[%s668_s0 + $0x18] sm:$0xff]   ;;  %v476_v10 = vld [vmem:[%s668_s0 + $0x20] sm:$0xff]   ;;  %v478_v14 = vld [vmem:[%s668_s0 + $0x28] sm:$0xff]  }
   0x5   :  { %v485_v12 = vld [vmem:[%s669_s1 + $0x4] ss:$8 sps:$4 sm:$0xff]   ;;  %v488_v13 = vld [vmem:[%s669_s1 + $0x14] ss:$8 sps:$4 sm:$0xff]   ;;  %v483_v23 = vld [vmem:[%s669_s1] ss:$8 sps:$4 sm:$0xff]  }
   0x6   :  { %v57_v15 = vld [vmem:[%s670_s2] sm:$0xff]  ;;  %v59_v16 = vld [vmem:[%s670_s2 + $0x10] sm:$0xff]  ;;  %229 = vmatprep.mubr.bf16.mxu0 %v485_v12  ;;  %237 = vmatprep.mubr.bf16.mxu1 %v488_v13  ;;  %v58_v19 = vld [vmem:[%s670_s2 + $0x8] sm:$0xff] }
   0x7   :  { %423 = vmatpush3.bf16.msra.mxu0 %v470_v4  ;;  %457 = vmatpush3.bf16.msra.mxu1 %v470_v4  ;;  %v479_v17 = vld [vmem:[%s668_s0 + $0x70] sm:$0xff]   ;;  %v60_v20 = vld [vmem:[%s670_s2 + $0x18] sm:$0xff] }
   0x8   :  { %424 = vmatprep.subr.bf16.mxu0 %v471_v5  ;;  %450 = vmatprep.subr.bf16.mxu1 %v471_v5  ;;  %v480_v18 = vld [vmem:[%s668_s0 + $0x30] sm:$0xff]   ;;  %v481_v21 = vld [vmem:[%s668_s0 + $0x78] sm:$0xff]   ;;  %v328_v5 = vld [vmem:[%s671_s4 + $0x8] sm:$0xff] }
   0x9   :  { %63 = vperm.xlu0 %465, %v57_v15   ;;  %73 = vperm.xlu1 %466, %v59_v16   ;;  %v482_v22 = vld [vmem:[%s668_s0 + $0x38] sm:$0xff]  }
   0xa   :  { %v486_v24 = vld [vmem:[%s669_s1 + $0x10] ss:$8 sps:$4 sm:$0xff]  }
   0xb   :  { %425 = vmatpush3.bf16.msra.mxu0 %v472_v6  ;;  %458 = vmatpush3.bf16.msra.mxu1 %v472_v6  ;;  %v327_v6 = vld [vmem:[%s671_s4] sm:$0xff] }
   0xc   :  { %426 = vmatprep.subr.bf16.mxu0 %v473_v7  ;;  %451 = vmatprep.subr.bf16.mxu1 %v473_v7 }
   0xd   :  { %68 = vperm.xlu0 %465, %v58_v19   ;;  %78 = vperm.xlu1 %466, %v60_v20   ;;  %v287_v19 = vld [vmem:[%s672_s3] sm:$0xff] }
   0xf   :  { %427 = vmatpush3.bf16.msra.mxu0 %v474_v8  ;;  %459 = vmatpush3.bf16.msra.mxu1 %v474_v8 }
  0x10   :  { %428 = vmatprep.subr.bf16.mxu0 %v475_v9  ;;  %452 = vmatprep.subr.bf16.mxu1 %v475_v9 }
  0x13   :  { %429 = vmatpush3.bf16.msra.mxu0 %v476_v10  ;;  %460 = vmatpush3.bf16.msra.mxu1 %v476_v10 }
  0x14   :  { %430 = vmatprep.subr.bf16.mxu0 %v477_v11  ;;  %453 = vmatprep.subr.bf16.mxu1 %v477_v11 }
  0x17   :  { %431 = vmatpush3.bf16.msra.mxu0 %v478_v14  ;;  %461 = vmatpush3.bf16.msra.mxu1 %v478_v14 }
  0x18   :  { %432 = vmatprep.subr.bf16.mxu0 %v479_v17  ;;  %454 = vmatprep.subr.bf16.mxu1 %v479_v17 }
  0x1b   :  { %433 = vmatpush3.bf16.msra.mxu0 %v480_v18  ;;  %462 = vmatpush3.bf16.msra.mxu1 %v480_v18 }
  0x1c   :  { %434 = vmatprep.subr.bf16.mxu0 %v481_v21  ;;  %455 = vmatprep.subr.bf16.mxu1 %v481_v21  ;;  %v288_v21 = vld [vmem:[%s672_s3 + $0x8] sm:$0xff] }
  0x1f   :  { %435 = vmatpush3.bf16.msra.mxu0 %v482_v22  ;;  %463 = vmatpush3.bf16.msra.mxu1 %v482_v22 }
  0x22   :  { %230 = vmatmul.mubr.bf16.vlgmr.msra.gmra.mrb[0].mxu0 %v483_v23  ;;  %238 = vmatmul.mubr.bf16.vlgmr.msra.gmra.mrb[0].mxu1 %v486_v24  ;;  %v289_v24 = vld [vmem:[%s672_s3 + $0x10] sm:$0xff] }
  0x88   :  { %v64_v25 = vpop.permute.xlu0 %63  ;;  %v74_v26 = vpop.permute.xlu1 %73 }
  0x8c   :  { %v69_v41 = vpop.permute.xlu0 %68  ;;  %v79_v44 = vpop.permute.xlu1 %78 }
  0xf5   :  { %v436_v27 = vpop.f32.mrb[0].mxu0  ;;  %v442_v28 = vpop.f32.mrb[0].mxu1 }
  0xf6   :  { %v437_v29 = vpop.f32.mrb[1].mxu0  ;;  %v443_v30 = vpop.f32.mrb[1].mxu1 }
  0xf7   :  { %v438_v31 = vadd.f32 %v437_v29, %v436_v27  ;;  %v439_v32 = vpop.f32.mrb[2].mxu0  ;;  %v444_v33 = vadd.f32 %v443_v30, %v442_v28  ;;  %v445_v34 = vpop.f32.mrb[2].mxu1  ;;  %v329_v28 = vld [vmem:[%s671_s4 + $0x10] sm:$0xff]  ;;  %v290_v29 = vld [vmem:[%s672_s3 + $0x18] sm:$0xff] }
  0xf8   :  { %v440_v35 = vpop.f32.mrb[3].mxu0  ;;  %v446_v36 = vpop.f32.mrb[3].mxu1 }
  0xf9   :  { %v441_v37 = vadd.f32 %v440_v35, %v439_v32  ;;  %v447_v38 = vadd.f32 %v446_v36, %v445_v34  ;;  %v232_v39 = vadd.f32 %v438_v31, %v64_v25  ;;  %v240_v40 = vadd.f32 %v444_v33, %v74_v26  ;;  %v330_v32 = vld [vmem:[%s671_s4 + $0x18] sm:$0xff] }
  0xfb   :  { %v247_v42 = vsel %vm246_vm0, %v232_v39, 0.0  ;;  %v235_v43 = vadd.f32 %v441_v37, %v69_v41  ;;  %v253_v46 = vsel %vm246_vm0, %v240_v40, 0.0  ;;  %v243_v47 = vadd.f32 %v447_v38, %v79_v44 }
  0xfc   :  { %248 = vadd.xlane.f32.xlu0 %v247_v42 }
  0xfd   :  { %v250_v45 = vsel %vm246_vm0, %v235_v43, 0.0  ;;  %v256_v48 = vsel %vm246_vm0, %v243_v47, 0.0 }
  0xfe   :  { %251 = vadd.xlane.f32.xlu1 %v250_v45 }
 0x100   :  { %254 = vadd.xlane.f32.xlu0 %v253_v46 }
 0x104   :  { %257 = vadd.xlane.f32.xlu0 %v256_v48 }
 0x189   :  { %v249_v49 = vpop.xlane.xlu0 %248 }
 0x18a   :  { %v259_v50 = vmul.f32 0.015625, %v249_v49 }
 0x18b   :  { %v252_v51 = vpop.xlane.xlu1 %251 }
 0x18c   :  { %v604_v52 = vsub.f32 %v232_v39, %v259_v50  ;;  %v260_v53 = vmul.f32 0.015625, %v252_v51 }
 0x18d   :  { %v255_v54 = vpop.xlane.xlu0 %254 }
 0x18e   :  { %v606_v55 = vsub.f32 %v235_v43, %v260_v53  ;;  %v261_v56 = vmul.f32 0.015625, %v255_v54  ;;  %v267_v57 = vmul.f32 %v604_v52, %v604_v52 }
 0x190   :  { %v610_v58 = vsub.f32 %v240_v40, %v261_v56  ;;  %v271_v59 = vsel %vm246_vm0, %v267_v57, 0.0  ;;  %v268_v60 = vmul.f32 %v606_v55, %v606_v55 }
 0x191   :  { %272 = vadd.xlane.f32.xlu1 %v271_v59  ;;  %v258_v61 = vpop.xlane.xlu0 %257 }
 0x192   :  { %v262_v62 = vmul.f32 0.015625, %v258_v61  ;;  %v274_v63 = vsel %vm246_vm0, %v268_v60, 0.0  ;;  %v269_v0 = vmul.f32 %v610_v58, %v610_v58 }
 0x193   :  { %275 = vadd.xlane.f32.xlu0 %v274_v63 }
 0x194   :  { %v618_v1 = vsub.f32 %v243_v47, %v262_v62  ;;  %v277_v2 = vsel %vm246_vm0, %v269_v0, 0.0 }
 0x195   :  { %278 = vadd.xlane.f32.xlu1 %v277_v2 }
 0x196   :  { %v270_v3 = vmul.f32 %v618_v1, %v618_v1 }
 0x198   :  { %v280_v4 = vsel %vm246_vm0, %v270_v3, 0.0 }
 0x199   :  { %281 = vadd.xlane.f32.xlu0 %v280_v4 }
 0x1a6   :  { %338 = vperm.xlu1 %466, %v328_v5  }
 0x1af   :  { %333 = vperm.xlu0 %465, %v327_v6  }
 0x21e   :  { %v273_v7 = vpop.xlane.xlu1 %272 }
 0x21f   :  { %v283_v8 = vmul.f32 0.015625, %v273_v7 }
 0x220   :  { %v276_v9 = vpop.xlane.xlu0 %275 }
 0x221   :  { %v291_v10 = vadd.f32 1e-05, %v283_v8  ;;  %v284_v11 = vmul.f32 0.015625, %v276_v9 }
 0x222   :  { %v279_v12 = vpop.xlane.xlu1 %278 }
 0x223   :  { %489 = vrsqrt.f32 %v291_v10  ;;  %v292_v13 = vadd.f32 1e-05, %v284_v11  ;;  %v285_v14 = vmul.f32 0.015625, %v279_v12 }
 0x225   :  { %491 = vrsqrt.f32 %v292_v13  ;;  %v293_v15 = vadd.f32 1e-05, %v285_v14 }
 0x226   :  { %v282_v16 = vpop.xlane.xlu0 %281  ;;  %v339_v33 = vpop.permute.xlu1 %338 }
 0x227   :  { %493 = vrsqrt.f32 %v293_v15  ;;  %v286_v17 = vmul.f32 0.015625, %v282_v16 }
 0x229   :  { %v294_v18 = vadd.f32 1e-05, %v286_v17 }
 0x22b   :  { %495 = vrsqrt.f32 %v294_v18 }
 0x22d   :  { %v490_v20 = vpop.eup %489 }
 0x22e   :  { %v299_v22 = vmul.f32 %v490_v20, %v287_v19  ;;  %v334_v34 = vpop.permute.xlu0 %333 }
 0x22f   :  { %v492_v23 = vpop.eup %491 }
 0x230   :  { %305 = vperm.xlu1 %466, %v299_v22   ;;  %v300_v25 = vmul.f32 %v492_v23, %v288_v21 }
 0x231   :  { %v494_v26 = vpop.eup %493 }
 0x232   :  { %310 = vperm.xlu0 %465, %v300_v25   ;;  %v301_v27 = vmul.f32 %v494_v26, %v289_v24 }
 0x234   :  { %315 = vperm.xlu1 %466, %v301_v27  }
 0x235   :  { %v496_v30 = vpop.eup %495 }
 0x236   :  { %343 = vperm.xlu0 %465, %v329_v28   ;;  %v302_v31 = vmul.f32 %v496_v30, %v290_v29 }
 0x238   :  { %320 = vperm.xlu1 %466, %v302_v31  }
 0x23c   :  { %348 = vperm.xlu1 %466, %v330_v32  }
 0x2af   :  { %v306_v35 = vpop.permute.xlu1 %305 }
 0x2b0   :  { %v323_v36 = vmul.f32 %v306_v35, %v604_v52 }
 0x2b1   :  { %v311_v37 = vpop.permute.xlu0 %310 }
 0x2b2   :  { %v351_v38 = vadd.f32 %v334_v34, %v323_v36  ;;  %v324_v39 = vmul.f32 %v311_v37, %v606_v55 }
 0x2b3   :  { %v316_v40 = vpop.permute.xlu1 %315 }
 0x2b4   :  { %vm355_vm1 = vcmp.ge.f32.partialorder %v351_v38, 0.0  ;;  %v359_v41 = vmul.f32 0.01, %v351_v38  ;;  %v352_v42 = vadd.f32 %v339_v33, %v324_v39  ;;  %v325_v43 = vmul.f32 %v316_v40, %v610_v58 }
 0x2b5   :  { %v344_v44 = vpop.permute.xlu0 %343 }
 0x2b6   :  { %v363_v45 = vsel %vm355_vm1, %v351_v38, %v359_v41  ;;  %vm356_vm3 = vcmp.ge.f32.partialorder %v352_v42, 0.0  ;;  %v360_v46 = vmul.f32 0.01, %v352_v42  ;;  %v353_v47 = vadd.f32 %v344_v44, %v325_v43 }
 0x2b7   :  { %v416_v48 = vpack.c.bf16 %v363_v45, %v363_v45  ;;  %v321_v49 = vpop.permute.xlu1 %320 }
 0x2b8   :  { %v364_v50 = vsel %vm356_vm3, %v352_v42, %v360_v46  ;;  %vm357_vm4 = vcmp.ge.f32.partialorder %v353_v47, 0.0  ;;  %v361_v51 = vmul.f32 0.01, %v353_v47  ;;  %v326_v54 = vmul.f32 %v321_v49, %v618_v1 }
 0x2b9   :  { %384 = vst.msk [vmem:[%s673_s5] sm:$0xf] %vm383_vm2, %v416_v48  ;;  %v417_v52 = vpack.c.bf16 %v364_v50, %v364_v50 }
 0x2ba   :  { %v365_v53 = vsel %vm357_vm4, %v353_v47, %v361_v51 }
 0x2bb   :  { %385 = vst.msk [vmem:[%s673_s5 + $0x4] sm:$0xf] %vm383_vm2, %v417_v52  ;;  %v418_v55 = vpack.c.bf16 %v365_v53, %v365_v53  ;;  %v349_v56 = vpop.permute.xlu1 %348 }
 0x2bc   :  { %v354_v57 = vadd.f32 %v349_v56, %v326_v54 }
 0x2bd   :  { %386 = vst.msk [vmem:[%s673_s5 + $0x8] sm:$0xf] %vm383_vm2, %v418_v55 }
 0x2be   :  { %vm358_vm5 = vcmp.ge.f32.partialorder %v354_v57, 0.0  ;;  %v362_v58 = vmul.f32 0.01, %v354_v57 }
 0x2c0   :  { %v366_v59 = vsel %vm358_vm5, %v354_v57, %v362_v58 }
 0x2c1   :  { %v419_v60 = vpack.c.bf16 %v366_v59, %v366_v59 }
 0x2c3   :  { %387 = vst.msk [vmem:[%s673_s5 + $0xc] sm:$0xf] %vm383_vm2, %v419_v60 }

// kernel: _lambda_.15
= control target key start
LH: loop header
LB: loop body
LE: loop exit
PB: predicated region body
PF: predicated region fallthrough
CT: control target
= control target key end

     0   :  { %v1056_v1 = vmov 0   ;;  %vm551_vm0 = vcmask 130048   ;;  %vm824_vm2 = vcmask 125952   ;;  %s1407_s0 = inlined_call_operand.vmem [shape: bf16[512,16], index: 0, kind: input, shape index: {}]   ;;  %s1408_s1 = inlined_call_operand.vmem [shape: bf16[64,512], index: 1, kind: input, shape index: {}]   ;;  %s1409_s2 = inlined_call_operand.vmem [shape: f32[64,1], index: 2, kind: input, shape index: {}, may-alias: {2,4}]   ;;  %s1410_s4 = inlined_call_operand.vmem [shape: f32[64,1], index: 4, kind: input, shape index: {}, may-alias: {2,4}]   ;;  %s1411_s3 = inlined_call_operand.vmem [shape: f32[64,1], index: 3, kind: input, shape index: {}]   ;;  %s1412_s5 = inlined_call_operand.vmem [shape: bf16[64,16], index: 5, kind: output, shape index: {}]  }
   0x1   :  { %v984_v0 = vld [vmem:[%s1407_s0 + $0x40] sm:$0xff]   ;;  %982 = vset.pattern.permute.xlu0 %v1056_v1  ;;  %983 = vset.pattern.permute.xlu1 %v1056_v1  ;;  %v988_v5 = vld [vmem:[%s1407_s0 + $0x48] sm:$0xff]   ;;  %v992_v9 = vld [vmem:[%s1407_s0 + $0x50] sm:$0xff]  }
   0x2   :  { %v985_v2 = vld [vmem:[%s1407_s0 + $0xc0] sm:$0xff]   ;;  %901 = vmatprep.subr.bf16.mxu0 %v984_v0  ;;  %v989_v6 = vld [vmem:[%s1407_s0 + $0xc8] sm:$0xff]   ;;  %v993_v10 = vld [vmem:[%s1407_s0 + $0xd0] sm:$0xff]  }
   0x3   :  { %v986_v3 = vld [vmem:[%s1407_s0] sm:$0xff]   ;;  %941 = vmatprep.subr.bf16.mxu1 %v985_v2  ;;  %v990_v7 = vld [vmem:[%s1407_s0 + $0x8] sm:$0xff]   ;;  %v994_v11 = vld [vmem:[%s1407_s0 + $0x10] sm:$0xff]  }
   0x4   :  { %v987_v4 = vld [vmem:[%s1407_s0 + $0x80] sm:$0xff]   ;;  %902 = vmatpush3.bf16.msra.mxu0 %v986_v3  ;;  %v991_v8 = vld [vmem:[%s1407_s0 + $0x88] sm:$0xff]   ;;  %v995_v12 = vld [vmem:[%s1407_s0 + $0x90] sm:$0xff]  }
   0x5   :  { %942 = vmatpush3.bf16.msra.mxu1 %v987_v4  ;;  %903 = vmatprep.subr.bf16.mxu0 %v988_v5  ;;  %v996_v13 = vld [vmem:[%s1407_s0 + $0x58] sm:$0xff]   ;;  %v1000_v17 = vld [vmem:[%s1407_s0 + $0x60] sm:$0xff]   ;;  %v1004_v21 = vld [vmem:[%s1407_s0 + $0x68] sm:$0xff]  }
   0x6   :  { %943 = vmatprep.subr.bf16.mxu1 %v989_v6  ;;  %v997_v14 = vld [vmem:[%s1407_s0 + $0xd8] sm:$0xff]   ;;  %v1001_v18 = vld [vmem:[%s1407_s0 + $0xe0] sm:$0xff]   ;;  %v1005_v22 = vld [vmem:[%s1407_s0 + $0xe8] sm:$0xff]  }
   0x7   :  { %v998_v15 = vld [vmem:[%s1407_s0 + $0x18] sm:$0xff]   ;;  %v1002_v19 = vld [vmem:[%s1407_s0 + $0x20] sm:$0xff]   ;;  %v1006_v23 = vld [vmem:[%s1407_s0 + $0x28] sm:$0xff]  }
   0x8   :  { %904 = vmatpush3.bf16.msra.mxu0 %v990_v7  ;;  %v999_v16 = vld [vmem:[%s1407_s0 + $0x98] sm:$0xff]   ;;  %v1003_v20 = vld [vmem:[%s1407_s0 + $0xa0] sm:$0xff]   ;;  %v1007_v24 = vld [vmem:[%s1407_s0 + $0xa8] sm:$0xff]  }
   0x9   :  { %944 = vmatpush3.bf16.msra.mxu1 %v991_v8  ;;  %905 = vmatprep.subr.bf16.mxu0 %v992_v9  ;;  %v1008_v25 = vld [vmem:[%s1407_s0 + $0x70] sm:$0xff]   ;;  %v1012_v29 = vld [vmem:[%s1407_s0 + $0x78] sm:$0xff]   ;;  %v101_v43 = vld [vmem:[%s1409_s2] sm:$0xff] }
   0xa   :  { %945 = vmatprep.subr.bf16.mxu1 %v993_v10  ;;  %v1009_v26 = vld [vmem:[%s1407_s0 + $0xf0] sm:$0xff]   ;;  %v1013_v30 = vld [vmem:[%s1407_s0 + $0xf8] sm:$0xff]   ;;  %111 = vperm.xlu0 %982, %v101_v43   ;;  %v102_v45 = vld [vmem:[%s1409_s2 + $0x8] sm:$0xff] }
   0xb   :  { %v1010_v27 = vld [vmem:[%s1407_s0 + $0x30] sm:$0xff]   ;;  %v1014_v31 = vld [vmem:[%s1407_s0 + $0x38] sm:$0xff]   ;;  %v105_v48 = vld [vmem:[%s1409_s2 + $0x20] sm:$0xff] }
   0xc   :  { %906 = vmatpush3.bf16.msra.mxu0 %v994_v11  ;;  %v1011_v28 = vld [vmem:[%s1407_s0 + $0xb0] sm:$0xff]   ;;  %v1015_v32 = vld [vmem:[%s1407_s0 + $0xb8] sm:$0xff]   ;;  %v106_v51 = vld [vmem:[%s1409_s2 + $0x28] sm:$0xff] }
   0xd   :  { %946 = vmatpush3.bf16.msra.mxu1 %v995_v12  ;;  %907 = vmatprep.subr.bf16.mxu0 %v996_v13  ;;  %v1016_v33 = vld [vmem:[%s1408_s1] ss:$16 sps:$4 sm:$0xff]   ;;  %v1018_v34 = vld [vmem:[%s1408_s1 + $0x4] ss:$16 sps:$4 sm:$0xff]   ;;  %v1019_v35 = vld [vmem:[%s1408_s1 + $0x8] ss:$16 sps:$4 sm:$0xff]  }
   0xe   :  { %947 = vmatprep.subr.bf16.mxu1 %v997_v14  ;;  %v1021_v36 = vld [vmem:[%s1408_s1 + $0xc] ss:$16 sps:$4 sm:$0xff]   ;;  %453 = vmatprep.mubr.bf16.mxu0 %v1018_v34  ;;  %v1022_v37 = vld [vmem:[%s1408_s1 + $0x24] ss:$16 sps:$4 sm:$0xff]   ;;  %v1026_v39 = vld [vmem:[%s1408_s1 + $0x20] ss:$16 sps:$4 sm:$0xff]  }
   0xf   :  { %518 = vmatprep.mubr.bf16.mxu1 %v1021_v36  ;;  %v1024_v38 = vld [vmem:[%s1408_s1 + $0x2c] ss:$16 sps:$4 sm:$0xff]   ;;  %v1027_v40 = vld [vmem:[%s1408_s1 + $0x28] ss:$16 sps:$4 sm:$0xff]   ;;  %v1028_v41 = vld [vmem:[%s1408_s1 + $0x44] ss:$16 sps:$4 sm:$0xff]   ;;  %116 = vperm.xlu0 %982, %v102_v45  }
  0x10   :  { %908 = vmatpush3.bf16.msra.mxu0 %v998_v15  ;;  %v1030_v42 = vld [vmem:[%s1408_s1 + $0x4c] ss:$16 sps:$4 sm:$0xff]   ;;  %v103_v44 = vld [vmem:[%s1409_s2 + $0x10] sm:$0xff]  ;;  %v1033_v49 = vld [vmem:[%s1408_s1 + $0x48] ss:$16 sps:$4 sm:$0xff]  }
  0x11   :  { %948 = vmatpush3.bf16.msra.mxu1 %v999_v16  ;;  %909 = vmatprep.subr.bf16.mxu0 %v1000_v17  ;;  %v104_v46 = vld [vmem:[%s1409_s2 + $0x18] sm:$0xff]  ;;  %v1032_v47 = vld [vmem:[%s1408_s1 + $0x40] ss:$16 sps:$4 sm:$0xff]   ;;  %v1034_v50 = vld [vmem:[%s1408_s1 + $0x64] ss:$16 sps:$4 sm:$0xff]  }
  0x12   :  { %949 = vmatprep.subr.bf16.mxu1 %v1001_v18  ;;  %121 = vperm.xlu1 %983, %v103_v44   ;;  %v1036_v52 = vld [vmem:[%s1408_s1 + $0x6c] ss:$16 sps:$4 sm:$0xff]   ;;  %v107_v53 = vld [vmem:[%s1409_s2 + $0x30] sm:$0xff]  ;;  %v1039_v56 = vld [vmem:[%s1408_s1 + $0x68] ss:$16 sps:$4 sm:$0xff]  }
  0x13   :  { %131 = vperm.xlu0 %982, %v105_v48   ;;  %v108_v54 = vld [vmem:[%s1409_s2 + $0x38] sm:$0xff]  ;;  %v1038_v55 = vld [vmem:[%s1408_s1 + $0x60] ss:$16 sps:$4 sm:$0xff]  }
  0x14   :  { %910 = vmatpush3.bf16.msra.mxu0 %v1002_v19 }
  0x15   :  { %950 = vmatpush3.bf16.msra.mxu1 %v1003_v20  ;;  %911 = vmatprep.subr.bf16.mxu0 %v1004_v21 }
  0x16   :  { %951 = vmatprep.subr.bf16.mxu1 %v1005_v22  ;;  %126 = vperm.xlu1 %983, %v104_v46  }
  0x17   :  { %141 = vperm.xlu0 %982, %v107_v53  }
  0x18   :  { %912 = vmatpush3.bf16.msra.mxu0 %v1006_v23 }
  0x19   :  { %952 = vmatpush3.bf16.msra.mxu1 %v1007_v24  ;;  %913 = vmatprep.subr.bf16.mxu0 %v1008_v25 }
  0x1a   :  { %953 = vmatprep.subr.bf16.mxu1 %v1009_v26  ;;  %136 = vperm.xlu1 %983, %v106_v51  }
  0x1c   :  { %914 = vmatpush3.bf16.msra.mxu0 %v1010_v27 }
  0x1d   :  { %954 = vmatpush3.bf16.msra.mxu1 %v1011_v28  ;;  %915 = vmatprep.subr.bf16.mxu0 %v1012_v29 }
  0x1e   :  { %955 = vmatprep.subr.bf16.mxu1 %v1013_v30  ;;  %146 = vperm.xlu1 %983, %v108_v54  }
  0x20   :  { %916 = vmatpush3.bf16.msra.mxu0 %v1014_v31 }
  0x21   :  { %956 = vmatpush3.bf16.msra.mxu1 %v1015_v32 }
  0x23   :  { %454 = vmatmul.mubr.bf16.vlgmr.msra.gmra.mrb[0].mxu0 %v1016_v33 }
  0x24   :  { %519 = vmatmul.mubr.bf16.vlgmr.msra.gmra.mrb[0].mxu1 %v1019_v35  ;;  %461 = vmatprep.mubr.bf16.mxu0 %v1022_v37 }
  0x25   :  { %526 = vmatprep.mubr.bf16.mxu1 %v1024_v38 }
  0x2b   :  { %462 = vmatmul.mubr.bf16.gmra.mrb[4].mxu0 %v1026_v39 }
  0x2c   :  { %527 = vmatmul.mubr.bf16.gmra.mrb[4].mxu1 %v1027_v40  ;;  %469 = vmatprep.mubr.bf16.mxu0 %v1028_v41 }
  0x2d   :  { %534 = vmatprep.mubr.bf16.mxu1 %v1030_v42 }
  0x33   :  { %470 = vmatmul.mubr.bf16.gmra.mrb[8].mxu0 %v1032_v47 }
  0x34   :  { %535 = vmatmul.mubr.bf16.gmra.mrb[8].mxu1 %v1033_v49  ;;  %477 = vmatprep.mubr.bf16.mxu0 %v1034_v50 }
  0x35   :  { %542 = vmatprep.mubr.bf16.mxu1 %v1036_v52 }
  0x3b   :  { %478 = vmatmul.mubr.bf16.gmra.mrb[12].mxu0 %v1038_v55 }
  0x3c   :  { %543 = vmatmul.mubr.bf16.gmra.mrb[12].mxu1 %v1039_v56 }
  0x89   :  { %v112_v57 = vpop.permute.xlu0 %111 }
  0x8e   :  { %v117_v59 = vpop.permute.xlu0 %116 }
  0x91   :  { %v122_v10 = vpop.permute.xlu1 %121 }
  0x92   :  { %v132_v30 = vpop.permute.xlu0 %131 }
  0x95   :  { %v127_v26 = vpop.permute.xlu1 %126 }
  0x96   :  { %v142_v50 = vpop.permute.xlu0 %141 }
  0x99   :  { %v137_v46 = vpop.permute.xlu1 %136 }
  0xf6   :  { %v917_v58 = vpop.f32.mrb[0].mxu0 }
  0xf7   :  { %v957_v60 = vpop.f32.mrb[0].mxu1  ;;  %v918_v61 = vpop.f32.mrb[1].mxu0 }
  0xf8   :  { %v919_v62 = vadd.f32 %v918_v61, %v917_v58  ;;  %v958_v63 = vpop.f32.mrb[1].mxu1  ;;  %v920_v0 = vpop.f32.mrb[2].mxu0 }
  0xf9   :  { %v959_v1 = vadd.f32 %v958_v63, %v957_v60  ;;  %v960_v2 = vpop.f32.mrb[2].mxu1  ;;  %v921_v3 = vpop.f32.mrb[3].mxu0 }
  0xfa   :  { %v456_v4 = vadd.f32 %v919_v62, %v112_v57  ;;  %v922_v5 = vadd.f32 %v921_v3, %v920_v0  ;;  %v961_v6 = vpop.f32.mrb[3].mxu1 }
  0xfb   :  { %v962_v7 = vadd.f32 %v961_v6, %v960_v2  ;;  %v147_v2 = vpop.permute.xlu1 %146 }
  0xfc   :  { %v459_v8 = vadd.f32 %v922_v5, %v117_v59  ;;  %v1255_v9 = vadd.f32 %v959_v1, %v456_v4 }
  0xfe   :  { %v923_v11 = vpop.f32.mrb[4].mxu0  ;;  %v552_v12 = vsel %vm551_vm0, %v1255_v9, 0.0  ;;  %v1259_v13 = vadd.f32 %v962_v7, %v459_v8 }
  0xff   :  { %v963_v14 = vpop.f32.mrb[4].mxu1  ;;  %v924_v15 = vpop.f32.mrb[5].mxu0  ;;  %553 = vadd.xlane.f32.xlu0 %v552_v12 }
 0x100   :  { %v925_v16 = vadd.f32 %v924_v15, %v923_v11  ;;  %v964_v17 = vpop.f32.mrb[5].mxu1  ;;  %v926_v18 = vpop.f32.mrb[6].mxu0  ;;  %v555_v19 = vsel %vm551_vm0, %v1259_v13, 0.0 }
 0x101   :  { %v965_v20 = vadd.f32 %v964_v17, %v963_v14  ;;  %v966_v21 = vpop.f32.mrb[6].mxu1  ;;  %v927_v22 = vpop.f32.mrb[7].mxu0  ;;  %556 = vadd.xlane.f32.xlu1 %v555_v19 }
 0x102   :  { %v464_v23 = vadd.f32 %v925_v16, %v122_v10  ;;  %v928_v24 = vadd.f32 %v927_v22, %v926_v18  ;;  %v967_v25 = vpop.f32.mrb[7].mxu1 }
 0x103   :  { %v968_v27 = vadd.f32 %v967_v25, %v966_v21 }
 0x104   :  { %v467_v28 = vadd.f32 %v928_v24, %v127_v26  ;;  %v1263_v29 = vadd.f32 %v965_v20, %v464_v23 }
 0x106   :  { %v929_v31 = vpop.f32.mrb[8].mxu0  ;;  %v558_v32 = vsel %vm551_vm0, %v1263_v29, 0.0  ;;  %v1267_v33 = vadd.f32 %v968_v27, %v467_v28 }
 0x107   :  { %v969_v34 = vpop.f32.mrb[8].mxu1  ;;  %v930_v35 = vpop.f32.mrb[9].mxu0  ;;  %559 = vadd.xlane.f32.xlu0 %v558_v32 }
 0x108   :  { %v931_v36 = vadd.f32 %v930_v35, %v929_v31  ;;  %v970_v37 = vpop.f32.mrb[9].mxu1  ;;  %v932_v38 = vpop.f32.mrb[10].mxu0  ;;  %v561_v45 = vsel %vm551_vm0, %v1267_v33, 0.0 }
 0x109   :  { %v971_v39 = vadd.f32 %v970_v37, %v969_v34  ;;  %v972_v40 = vpop.f32.mrb[10].mxu1  ;;  %v933_v41 = vpop.f32.mrb[11].mxu0 }
 0x10a   :  { %v472_v42 = vadd.f32 %v931_v36, %v132_v30  ;;  %v934_v43 = vadd.f32 %v933_v41, %v932_v38  ;;  %v973_v44 = vpop.f32.mrb[11].mxu1 }
 0x10b   :  { %v974_v47 = vadd.f32 %v973_v44, %v972_v40  ;;  %562 = vadd.xlane.f32.xlu0 %v561_v45 }
 0x10c   :  { %v475_v48 = vadd.f32 %v934_v43, %v137_v46  ;;  %v537_v49 = vadd.f32 %v971_v39, %v472_v42 }
 0x10e   :  { %v935_v51 = vpop.f32.mrb[12].mxu0  ;;  %v564_v52 = vsel %vm551_vm0, %v537_v49, 0.0  ;;  %v540_v53 = vadd.f32 %v974_v47, %v475_v48 }
 0x10f   :  { %v975_v54 = vpop.f32.mrb[12].mxu1  ;;  %v936_v55 = vpop.f32.mrb[13].mxu0  ;;  %565 = vadd.xlane.f32.xlu1 %v564_v52  ;;  %v717_v52 = vld [vmem:[%s1410_s4 + $0x28] sm:$0xff] }
 0x110   :  { %v937_v56 = vadd.f32 %v936_v55, %v935_v51  ;;  %v976_v57 = vpop.f32.mrb[13].mxu1  ;;  %v938_v58 = vpop.f32.mrb[14].mxu0  ;;  %v567_v59 = vsel %vm551_vm0, %v540_v53, 0.0  ;;  %v712_v51 = vld [vmem:[%s1410_s4] sm:$0xff] }
 0x111   :  { %v977_v60 = vadd.f32 %v976_v57, %v975_v54  ;;  %v978_v61 = vpop.f32.mrb[14].mxu1  ;;  %v939_v62 = vpop.f32.mrb[15].mxu0  ;;  %568 = vadd.xlane.f32.xlu0 %v567_v59  ;;  %v716_v54 = vld [vmem:[%s1410_s4 + $0x20] sm:$0xff] }
 0x112   :  { %v480_v63 = vadd.f32 %v937_v56, %v142_v50  ;;  %v940_v0 = vadd.f32 %v939_v62, %v938_v58  ;;  %v979_v1 = vpop.f32.mrb[15].mxu1  ;;  %v715_v50 = vld [vmem:[%s1410_s4 + $0x18] sm:$0xff] }
 0x113   :  { %v980_v3 = vadd.f32 %v979_v1, %v978_v61 }
 0x114   :  { %v483_v4 = vadd.f32 %v940_v0, %v147_v2  ;;  %v545_v5 = vadd.f32 %v977_v60, %v480_v63  ;;  %v632_v2 = vld [vmem:[%s1411_s3] sm:$0xff] }
 0x116   :  { %v570_v6 = vsel %vm551_vm0, %v545_v5, 0.0  ;;  %v548_v7 = vadd.f32 %v980_v3, %v483_v4 }
 0x117   :  { %571 = vadd.xlane.f32.xlu1 %v570_v6 }
 0x118   :  { %v573_v8 = vsel %vm551_vm0, %v548_v7, 0.0 }
 0x119   :  { %574 = vadd.xlane.f32.xlu0 %v573_v8 }
 0x18c   :  { %v554_v10 = vpop.xlane.xlu0 %553 }
 0x18d   :  { %v576_v11 = vmul.f32 0.0625, %v554_v10 }
 0x18e   :  { %v557_v12 = vpop.xlane.xlu1 %556 }
 0x18f   :  { %v1276_v14 = vsub.f32 %v1255_v9, %v576_v11  ;;  %v577_v15 = vmul.f32 0.0625, %v557_v12 }
 0x191   :  { %v1279_v16 = vsub.f32 %v1259_v13, %v577_v15  ;;  %v592_v17 = vmul.f32 %v1276_v14, %v1276_v14 }
 0x193   :  { %v600_v18 = vsel %vm551_vm0, %v592_v17, 0.0  ;;  %v593_v19 = vmul.f32 %v1279_v16, %v1279_v16 }
 0x194   :  { %601 = vadd.xlane.f32.xlu1 %v600_v18  ;;  %v560_v20 = vpop.xlane.xlu0 %559 }
 0x195   :  { %v578_v21 = vmul.f32 0.0625, %v560_v20  ;;  %v603_v22 = vsel %vm551_vm0, %v593_v19, 0.0  ;;  %v634_v19 = vld [vmem:[%s1411_s3 + $0x10] sm:$0xff] }
 0x196   :  { %604 = vadd.xlane.f32.xlu0 %v603_v22 }
 0x197   :  { %v1288_v9 = vsub.f32 %v1263_v29, %v578_v21 }
 0x198   :  { %v563_v23 = vpop.xlane.xlu0 %562 }
 0x199   :  { %v579_v13 = vmul.f32 0.0625, %v563_v23  ;;  %v594_v24 = vmul.f32 %v1288_v9, %v1288_v9 }
 0x19b   :  { %v1293_v25 = vsub.f32 %v1267_v33, %v579_v13  ;;  %v606_v26 = vsel %vm551_vm0, %v594_v24, 0.0  ;;  %v635_v13 = vld [vmem:[%s1411_s3 + $0x18] sm:$0xff] }
 0x19c   :  { %v566_v27 = vpop.xlane.xlu1 %565  ;;  %607 = vadd.xlane.f32.xlu1 %v606_v26 }
 0x19d   :  { %v580_v28 = vmul.f32 0.0625, %v566_v27  ;;  %v595_v30 = vmul.f32 %v1293_v25, %v1293_v25 }
 0x19e   :  { %v569_v31 = vpop.xlane.xlu0 %568 }
 0x19f   :  { %v1298_v32 = vsub.f32 %v537_v49, %v580_v28  ;;  %v581_v29 = vmul.f32 0.0625, %v569_v31  ;;  %v609_v34 = vsel %vm551_vm0, %v595_v30, 0.0  ;;  %v713_v49 = vld [vmem:[%s1410_s4 + $0x8] sm:$0xff] }
 0x1a0   :  { %610 = vadd.xlane.f32.xlu0 %v609_v34 }
 0x1a1   :  { %v1301_v35 = vsub.f32 %v540_v53, %v581_v29  ;;  %v596_v33 = vmul.f32 %v1298_v32, %v1298_v32  ;;  %v714_v53 = vld [vmem:[%s1410_s4 + $0x10] sm:$0xff]  ;;  %v636_v29 = vld [vmem:[%s1411_s3 + $0x20] sm:$0xff] }
 0x1a3   :  { %v612_v36 = vsel %vm551_vm0, %v596_v33, 0.0  ;;  %v597_v37 = vmul.f32 %v1301_v35, %v1301_v35  ;;  %v637_v33 = vld [vmem:[%s1411_s3 + $0x28] sm:$0xff] }
 0x1a4   :  { %v572_v38 = vpop.xlane.xlu1 %571  ;;  %613 = vadd.xlane.f32.xlu1 %v612_v36 }
 0x1a5   :  { %v582_v39 = vmul.f32 0.0625, %v572_v38  ;;  %v615_v40 = vsel %vm551_vm0, %v597_v37, 0.0 }
 0x1a6   :  { %616 = vadd.xlane.f32.xlu0 %v615_v40  ;;  %v575_v41 = vpop.xlane.xlu0 %574 }
 0x1a7   :  { %v1309_v42 = vsub.f32 %v545_v5, %v582_v39  ;;  %v583_v43 = vmul.f32 0.0625, %v575_v41  ;;  %v633_v5 = vld [vmem:[%s1411_s3 + $0x8] sm:$0xff]  ;;  %v638_v39 = vld [vmem:[%s1411_s3 + $0x30] sm:$0xff]  ;;  %v639_v41 = vld [vmem:[%s1411_s3 + $0x38] sm:$0xff] }
 0x1a9   :  { %v1311_v44 = vsub.f32 %v548_v7, %v583_v43  ;;  %v598_v45 = vmul.f32 %v1309_v42, %v1309_v42 }
 0x1ab   :  { %v618_v46 = vsel %vm551_vm0, %v598_v45, 0.0  ;;  %v599_v47 = vmul.f32 %v1311_v44, %v1311_v44 }
 0x1ac   :  { %619 = vadd.xlane.f32.xlu1 %v618_v46 }
 0x1ad   :  { %v621_v48 = vsel %vm551_vm0, %v599_v47, 0.0  ;;  %v718_v47 = vld [vmem:[%s1410_s4 + $0x30] sm:$0xff] }
 0x1ae   :  { %622 = vadd.xlane.f32.xlu0 %v621_v48  ;;  %v719_v48 = vld [vmem:[%s1410_s4 + $0x38] sm:$0xff] }
 0x1bd   :  { %727 = vperm.xlu1 %983, %v713_v49  }
 0x1c1   :  { %737 = vperm.xlu1 %983, %v715_v50  }
 0x1c4   :  { %722 = vperm.xlu0 %982, %v712_v51  }
 0x1c5   :  { %747 = vperm.xlu1 %983, %v717_v52  }
 0x1c8   :  { %732 = vperm.xlu0 %982, %v714_v53  }
 0x1cc   :  { %742 = vperm.xlu0 %982, %v716_v54  }
 0x221   :  { %v602_v55 = vpop.xlane.xlu1 %601 }
 0x222   :  { %v624_v56 = vmul.f32 0.0625, %v602_v55 }
 0x223   :  { %v605_v57 = vpop.xlane.xlu0 %604 }
 0x224   :  { %v640_v58 = vadd.f32 1e-05, %v624_v56  ;;  %v625_v59 = vmul.f32 0.0625, %v605_v57 }
 0x226   :  { %1040 = vrsqrt.f32 %v640_v58  ;;  %v641_v60 = vadd.f32 1e-05, %v625_v59 }
 0x228   :  { %1042 = vrsqrt.f32 %v641_v60 }
 0x229   :  { %v608_v61 = vpop.xlane.xlu1 %607 }
 0x22a   :  { %v626_v62 = vmul.f32 0.0625, %v608_v61 }
 0x22c   :  { %v642_v63 = vadd.f32 1e-05, %v626_v62 }
 0x22d   :  { %v611_v0 = vpop.xlane.xlu0 %610 }
 0x22e   :  { %1044 = vrsqrt.f32 %v642_v63  ;;  %v627_v1 = vmul.f32 0.0625, %v611_v0 }
 0x230   :  { %v1041_v3 = vpop.eup %1040  ;;  %v643_v4 = vadd.f32 1e-05, %v627_v1 }
 0x231   :  { %v614_v6 = vpop.xlane.xlu1 %613  ;;  %v656_v7 = vmul.f32 %v1041_v3, %v632_v2 }
 0x232   :  { %v1043_v8 = vpop.eup %1042  ;;  %1046 = vrsqrt.f32 %v643_v4  ;;  %v628_v10 = vmul.f32 0.0625, %v614_v6 }
 0x233   :  { %666 = vperm.xlu1 %983, %v656_v7   ;;  %v617_v11 = vpop.xlane.xlu0 %616  ;;  %v657_v12 = vmul.f32 %v1043_v8, %v633_v5 }
 0x234   :  { %v644_v15 = vadd.f32 1e-05, %v628_v10  ;;  %v629_v17 = vmul.f32 0.0625, %v617_v11 }
 0x235   :  { %671 = vperm.xlu0 %982, %v657_v12  }
 0x236   :  { %1048 = vrsqrt.f32 %v644_v15  ;;  %v645_v18 = vadd.f32 1e-05, %v629_v17 }
 0x238   :  { %v1045_v20 = vpop.eup %1044  ;;  %1050 = vrsqrt.f32 %v645_v18 }
 0x239   :  { %v620_v21 = vpop.xlane.xlu1 %619  ;;  %v658_v22 = vmul.f32 %v1045_v20, %v634_v19 }
 0x23a   :  { %v630_v23 = vmul.f32 0.0625, %v620_v21 }
 0x23b   :  { %676 = vperm.xlu1 %983, %v658_v22   ;;  %v623_v24 = vpop.xlane.xlu0 %622 }
 0x23c   :  { %v1047_v26 = vpop.eup %1046  ;;  %v646_v27 = vadd.f32 1e-05, %v630_v23  ;;  %v631_v28 = vmul.f32 0.0625, %v623_v24 }
 0x23d   :  { %v659_v30 = vmul.f32 %v1047_v26, %v635_v13  ;;  %v728_v49 = vpop.permute.xlu1 %727 }
 0x23e   :  { %1052 = vrsqrt.f32 %v646_v27  ;;  %v647_v31 = vadd.f32 1e-05, %v631_v28 }
 0x23f   :  { %681 = vperm.xlu1 %983, %v659_v30  }
 0x240   :  { %v1049_v34 = vpop.eup %1048  ;;  %1054 = vrsqrt.f32 %v647_v31 }
 0x241   :  { %v660_v36 = vmul.f32 %v1049_v34, %v636_v29  ;;  %v738_v51 = vpop.permute.xlu1 %737 }
 0x242   :  { %v1051_v37 = vpop.eup %1050 }
 0x243   :  { %686 = vperm.xlu0 %982, %v660_v36   ;;  %v661_v38 = vmul.f32 %v1051_v37, %v637_v33  ;;  %v723_v50 = vpop.permute.xlu0 %722 }
 0x245   :  { %691 = vperm.xlu1 %983, %v661_v38   ;;  %v748_v53 = vpop.permute.xlu1 %747 }
 0x247   :  { %v733_v52 = vpop.permute.xlu0 %732 }
 0x248   :  { %v1053_v40 = vpop.eup %1052 }
 0x249   :  { %v662_v43 = vmul.f32 %v1053_v40, %v638_v39 }
 0x24a   :  { %v1055_v45 = vpop.eup %1054 }
 0x24b   :  { %696 = vperm.xlu0 %982, %v662_v43   ;;  %v663_v46 = vmul.f32 %v1055_v45, %v639_v41  ;;  %v743_v54 = vpop.permute.xlu0 %742 }
 0x24d   :  { %701 = vperm.xlu1 %983, %v663_v46  }
 0x24f   :  { %752 = vperm.xlu0 %982, %v718_v47  }
 0x251   :  { %757 = vperm.xlu1 %983, %v719_v48  }
 0x2b2   :  { %v667_v55 = vpop.permute.xlu1 %666 }
 0x2b3   :  { %v704_v56 = vmul.f32 %v667_v55, %v1276_v14 }
 0x2b4   :  { %v672_v57 = vpop.permute.xlu0 %671 }
 0x2b5   :  { %v760_v58 = vadd.f32 %v723_v50, %v704_v56  ;;  %v705_v59 = vmul.f32 %v672_v57, %v1279_v16 }
 0x2b7   :  { %vm768_vm1 = vcmp.ge.f32.partialorder %v760_v58, 0.0  ;;  %v776_v60 = vmul.f32 0.01, %v760_v58  ;;  %v761_v61 = vadd.f32 %v728_v49, %v705_v59 }
 0x2b9   :  { %v784_v62 = vsel %vm768_vm1, %v760_v58, %v776_v60  ;;  %vm769_vm3 = vcmp.ge.f32.partialorder %v761_v61, 0.0  ;;  %v777_v63 = vmul.f32 0.01, %v761_v61 }
 0x2ba   :  { %v893_v0 = vpack.c.bf16 %v784_v62, %v784_v62  ;;  %v677_v1 = vpop.permute.xlu1 %676 }
 0x2bb   :  { %v785_v2 = vsel %vm769_vm3, %v761_v61, %v777_v63  ;;  %v706_v3 = vmul.f32 %v677_v1, %v1288_v9 }
 0x2bc   :  { %825 = vst.msk [vmem:[%s1412_s5] sm:$0xf] %vm824_vm2, %v893_v0  ;;  %v894_v14 = vpack.c.bf16 %v785_v2, %v785_v2 }
 0x2bd   :  { %v762_v4 = vadd.f32 %v733_v52, %v706_v3 }
 0x2be   :  { %826 = vst.msk [vmem:[%s1412_s5 + $0x4] sm:$0xf] %vm824_vm2, %v894_v14  ;;  %v682_v16 = vpop.permute.xlu1 %681 }
 0x2bf   :  { %vm770_vm4 = vcmp.ge.f32.partialorder %v762_v4, 0.0  ;;  %v778_v5 = vmul.f32 0.01, %v762_v4  ;;  %v707_v6 = vmul.f32 %v682_v16, %v1293_v25 }
 0x2c1   :  { %v786_v7 = vsel %vm770_vm4, %v762_v4, %v778_v5  ;;  %v763_v8 = vadd.f32 %v738_v51, %v707_v6 }
 0x2c2   :  { %v895_v9 = vpack.c.bf16 %v786_v7, %v786_v7  ;;  %v687_v10 = vpop.permute.xlu0 %686 }
 0x2c3   :  { %vm771_vm5 = vcmp.ge.f32.partialorder %v763_v8, 0.0  ;;  %v779_v11 = vmul.f32 0.01, %v763_v8  ;;  %v708_v12 = vmul.f32 %v687_v10, %v1298_v32 }
 0x2c4   :  { %827 = vst.msk [vmem:[%s1412_s5 + $0x8] sm:$0xf] %vm824_vm2, %v895_v9  ;;  %v692_v15 = vpop.permute.xlu1 %691 }
 0x2c5   :  { %v787_v17 = vsel %vm771_vm5, %v763_v8, %v779_v11  ;;  %v764_v18 = vadd.f32 %v743_v54, %v708_v12  ;;  %v709_v19 = vmul.f32 %v692_v15, %v1301_v35 }
 0x2c6   :  { %v896_v20 = vpack.c.bf16 %v787_v17, %v787_v17 }
 0x2c7   :  { %vm772_vm6 = vcmp.ge.f32.partialorder %v764_v18, 0.0  ;;  %v780_v25 = vmul.f32 0.01, %v764_v18  ;;  %v765_v21 = vadd.f32 %v748_v53, %v709_v19 }
 0x2c8   :  { %828 = vst.msk [vmem:[%s1412_s5 + $0xc] sm:$0xf] %vm824_vm2, %v896_v20 }
 0x2c9   :  { %v788_v32 = vsel %vm772_vm6, %v764_v18, %v780_v25  ;;  %vm773_vm7 = vcmp.ge.f32.partialorder %v765_v21, 0.0  ;;  %v781_v22 = vmul.f32 0.01, %v765_v21 }
 0x2ca   :  { %v897_v23 = vpack.c.bf16 %v788_v32, %v788_v32  ;;  %v697_v13 = vpop.permute.xlu0 %696 }
 0x2cb   :  { %v789_v24 = vsel %vm773_vm7, %v765_v21, %v781_v22  ;;  %v710_v27 = vmul.f32 %v697_v13, %v1309_v42 }
 0x2cc   :  { %829 = vst.msk [vmem:[%s1412_s5 + $0x10] sm:$0xf] %vm824_vm2, %v897_v23  ;;  %v898_v35 = vpack.c.bf16 %v789_v24, %v789_v24  ;;  %v702_v26 = vpop.permute.xlu1 %701 }
 0x2cd   :  { %v711_v30 = vmul.f32 %v702_v26, %v1311_v44 }
 0x2ce   :  { %830 = vst.msk [vmem:[%s1412_s5 + $0x14] sm:$0xf] %vm824_vm2, %v898_v35  ;;  %v753_v28 = vpop.permute.xlu0 %752 }
 0x2cf   :  { %v766_v31 = vadd.f32 %v753_v28, %v710_v27 }
 0x2d0   :  { %v758_v29 = vpop.permute.xlu1 %757 }
 0x2d1   :  { %vm774_vm8 = vcmp.ge.f32.partialorder %v766_v31, 0.0  ;;  %v782_v34 = vmul.f32 0.01, %v766_v31  ;;  %v767_v33 = vadd.f32 %v758_v29, %v711_v30 }
 0x2d3   :  { %v790_v36 = vsel %vm774_vm8, %v766_v31, %v782_v34  ;;  %vm775_vm9 = vcmp.ge.f32.partialorder %v767_v33, 0.0  ;;  %v783_v37 = vmul.f32 0.01, %v767_v33 }
 0x2d4   :  { %v899_v38 = vpack.c.bf16 %v790_v36, %v790_v36 }
 0x2d5   :  { %v791_v39 = vsel %vm775_vm9, %v767_v33, %v783_v37 }
 0x2d6   :  { %831 = vst.msk [vmem:[%s1412_s5 + $0x18] sm:$0xf] %vm824_vm2, %v899_v38  ;;  %v900_v42 = vpack.c.bf16 %v791_v39, %v791_v39 }
 0x2d8   :  { %832 = vst.msk [vmem:[%s1412_s5 + $0x1c] sm:$0xf] %vm824_vm2, %v900_v42 }

// kernel: _lambda_.16
= control target key start
LH: loop header
LB: loop body
LE: loop exit
PB: predicated region body
PF: predicated region fallthrough
CT: control target
= control target key end

     0   :  { %v1674_v1 = vmov 0   ;;  %vm1033_vm0 = vcmask 31744   ;;  %vm1306_vm2 = vcmask 27648   ;;  %s2185_s0 = inlined_call_operand.vmem [shape: bf16[1024,4], index: 0, kind: input, shape index: {}]   ;;  %s2186_s1 = inlined_call_operand.vmem [shape: bf16[64,1024], index: 1, kind: input, shape index: {}]   ;;  %s2187_s2 = inlined_call_operand.vmem [shape: f32[64,1], index: 2, kind: input, shape index: {}, may-alias: {2,4}]   ;;  %s2188_s4 = inlined_call_operand.vmem [shape: f32[64,1], index: 4, kind: input, shape index: {}, may-alias: {2,4}]   ;;  %s2189_s3 = inlined_call_operand.vmem [shape: f32[64,1], index: 3, kind: input, shape index: {}]   ;;  %s2190_s5 = inlined_call_operand.vmem [shape: bf16[64,4], index: 5, kind: output, shape index: {}]  }
   0x1   :  { %v1594_v0 = vld [vmem:[%s2185_s0 + $0x40] sm:$0xff]   ;;  %1592 = vset.pattern.permute.xlu0 %v1674_v1  ;;  %1593 = vset.pattern.permute.xlu1 %v1674_v1  ;;  %v1598_v5 = vld [vmem:[%s2185_s0 + $0x48] sm:$0xff]   ;;  %v1602_v9 = vld [vmem:[%s2185_s0 + $0x50] sm:$0xff]  }
   0x2   :  { %v1595_v2 = vld [vmem:[%s2185_s0 + $0xc0] sm:$0xff]   ;;  %1431 = vmatprep.subr.bf16.mxu0 %v1594_v0  ;;  %v1599_v6 = vld [vmem:[%s2185_s0 + $0xc8] sm:$0xff]   ;;  %v1603_v10 = vld [vmem:[%s2185_s0 + $0xd0] sm:$0xff]  }
   0x3   :  { %v1596_v3 = vld [vmem:[%s2185_s0] sm:$0xff]   ;;  %1471 = vmatprep.subr.bf16.mxu1 %v1595_v2  ;;  %v1600_v7 = vld [vmem:[%s2185_s0 + $0x8] sm:$0xff]   ;;  %v1604_v11 = vld [vmem:[%s2185_s0 + $0x10] sm:$0xff]  }
   0x4   :  { %v1597_v4 = vld [vmem:[%s2185_s0 + $0x80] sm:$0xff]   ;;  %1432 = vmatpush3.bf16.msra.mxu0 %v1596_v3  ;;  %v1601_v8 = vld [vmem:[%s2185_s0 + $0x88] sm:$0xff]   ;;  %v1605_v12 = vld [vmem:[%s2185_s0 + $0x90] sm:$0xff]  }
   0x5   :  { %1472 = vmatpush3.bf16.msra.mxu1 %v1597_v4  ;;  %1433 = vmatprep.subr.bf16.mxu0 %v1598_v5  ;;  %v1606_v13 = vld [vmem:[%s2185_s0 + $0x58] sm:$0xff]   ;;  %v1610_v17 = vld [vmem:[%s2185_s0 + $0x60] sm:$0xff]   ;;  %v1614_v21 = vld [vmem:[%s2185_s0 + $0x68] sm:$0xff]  }
   0x6   :  { %1473 = vmatprep.subr.bf16.mxu1 %v1599_v6  ;;  %v1607_v14 = vld [vmem:[%s2185_s0 + $0xd8] sm:$0xff]   ;;  %v1611_v18 = vld [vmem:[%s2185_s0 + $0xe0] sm:$0xff]   ;;  %v1615_v22 = vld [vmem:[%s2185_s0 + $0xe8] sm:$0xff]  }
   0x7   :  { %v1608_v15 = vld [vmem:[%s2185_s0 + $0x18] sm:$0xff]   ;;  %v1612_v19 = vld [vmem:[%s2185_s0 + $0x20] sm:$0xff]   ;;  %v1616_v23 = vld [vmem:[%s2185_s0 + $0x28] sm:$0xff]  }
   0x8   :  { %1434 = vmatpush3.bf16.msra.mxu0 %v1600_v7  ;;  %v1609_v16 = vld [vmem:[%s2185_s0 + $0x98] sm:$0xff]   ;;  %v1613_v20 = vld [vmem:[%s2185_s0 + $0xa0] sm:$0xff]   ;;  %v1617_v24 = vld [vmem:[%s2185_s0 + $0xa8] sm:$0xff]  }
   0x9   :  { %1474 = vmatpush3.bf16.msra.mxu1 %v1601_v8  ;;  %1435 = vmatprep.subr.bf16.mxu0 %v1602_v9  ;;  %v1618_v25 = vld [vmem:[%s2185_s0 + $0x70] sm:$0xff]   ;;  %v1622_v29 = vld [vmem:[%s2185_s0 + $0x78] sm:$0xff]   ;;  %v21_v33 = vld [vmem:[%s2186_s1] sm:$0xff] }
   0xa   :  { %1475 = vmatprep.subr.bf16.mxu1 %v1603_v10  ;;  %v1619_v26 = vld [vmem:[%s2185_s0 + $0xf0] sm:$0xff]   ;;  %v1623_v30 = vld [vmem:[%s2185_s0 + $0xf8] sm:$0xff]   ;;  %v25_v34 = vld [vmem:[%s2186_s1 + $0x20] sm:$0xff] }
   0xb   :  { %v1620_v27 = vld [vmem:[%s2185_s0 + $0x30] sm:$0xff]   ;;  %v1624_v31 = vld [vmem:[%s2185_s0 + $0x38] sm:$0xff]   ;;  %v22_v35 = vld [vmem:[%s2186_s1 + $0x8] sm:$0xff]  ;;  %v1319_v36 = vcombine.low %v21_v33, %v25_v34  ;;  %v1320_v37 = vcombine.high %v21_v33, %v25_v34 }
   0xc   :  { %1436 = vmatpush3.bf16.msra.mxu0 %v1604_v11  ;;  %v1621_v28 = vld [vmem:[%s2185_s0 + $0xb0] sm:$0xff]   ;;  %v1625_v32 = vld [vmem:[%s2185_s0 + $0xb8] sm:$0xff]   ;;  %v26_v38 = vld [vmem:[%s2186_s1 + $0x28] sm:$0xff] }
   0xd   :  { %1476 = vmatpush3.bf16.msra.mxu1 %v1605_v12  ;;  %1437 = vmatprep.subr.bf16.mxu0 %v1606_v13  ;;  %v1321_v39 = vcombine.low %v22_v35, %v26_v38  ;;  %v1322_v40 = vcombine.high %v22_v35, %v26_v38  ;;  %v1626_v41 = vld [vmem:[%s2185_s0 + $0x140] sm:$0xff]   ;;  %v1630_v45 = vld [vmem:[%s2185_s0 + $0x148] sm:$0xff]   ;;  %v1634_v57 = vld [vmem:[%s2185_s0 + $0x150] sm:$0xff]  }
   0xe   :  { %1477 = vmatprep.subr.bf16.mxu1 %v1607_v14  ;;  %805 = vmatprep.mubr.bf16.mxu0 %v1320_v37  ;;  %v1627_v42 = vld [vmem:[%s2185_s0 + $0x1c0] sm:$0xff]   ;;  %v1631_v46 = vld [vmem:[%s2185_s0 + $0x1c8] sm:$0xff]   ;;  %v1635_v58 = vld [vmem:[%s2185_s0 + $0x1d0] sm:$0xff]  }
   0xf   :  { %870 = vmatprep.mubr.bf16.mxu1 %v1322_v40  ;;  %v1628_v43 = vld [vmem:[%s2185_s0 + $0x100] sm:$0xff]   ;;  %v1632_v47 = vld [vmem:[%s2185_s0 + $0x108] sm:$0xff]   ;;  %v1636_v59 = vld [vmem:[%s2185_s0 + $0x110] sm:$0xff]  }
  0x10   :  { %1438 = vmatpush3.bf16.msra.mxu0 %v1608_v15  ;;  %v1629_v44 = vld [vmem:[%s2185_s0 + $0x180] sm:$0xff]   ;;  %v1633_v48 = vld [vmem:[%s2185_s0 + $0x188] sm:$0xff]   ;;  %v1637_v60 = vld [vmem:[%s2185_s0 + $0x190] sm:$0xff]  }
  0x11   :  { %1478 = vmatpush3.bf16.msra.mxu1 %v1609_v16  ;;  %1439 = vmatprep.subr.bf16.mxu0 %v1610_v17  ;;  %v29_v49 = vld [vmem:[%s2186_s1 + $0x40] sm:$0xff]  ;;  %v30_v52 = vld [vmem:[%s2186_s1 + $0x48] sm:$0xff]  ;;  %v1638_v61 = vld [vmem:[%s2185_s0 + $0x158] sm:$0xff]  }
  0x12   :  { %1479 = vmatprep.subr.bf16.mxu1 %v1611_v18  ;;  %v33_v50 = vld [vmem:[%s2186_s1 + $0x60] sm:$0xff]  ;;  %v34_v53 = vld [vmem:[%s2186_s1 + $0x68] sm:$0xff]  ;;  %v1639_v62 = vld [vmem:[%s2185_s0 + $0x1d8] sm:$0xff]  }
  0x13   :  { %v1328_v51 = vcombine.high %v29_v49, %v33_v50  ;;  %v1327_v54 = vcombine.low %v29_v49, %v33_v50  ;;  %v1330_v55 = vcombine.high %v30_v52, %v34_v53  ;;  %v1329_v56 = vcombine.low %v30_v52, %v34_v53  ;;  %v1640_v63 = vld [vmem:[%s2185_s0 + $0x118] sm:$0xff]   ;;  %v37_v1 = vld [vmem:[%s2186_s1 + $0x80] sm:$0xff]  ;;  %v38_v3 = vld [vmem:[%s2186_s1 + $0x88] sm:$0xff] }
  0x14   :  { %1440 = vmatpush3.bf16.msra.mxu0 %v1612_v19  ;;  %v1641_v0 = vld [vmem:[%s2185_s0 + $0x198] sm:$0xff]   ;;  %v41_v2 = vld [vmem:[%s2186_s1 + $0xa0] sm:$0xff]  ;;  %v42_v4 = vld [vmem:[%s2186_s1 + $0xa8] sm:$0xff] }
  0x15   :  { %1480 = vmatpush3.bf16.msra.mxu1 %v1613_v20  ;;  %1441 = vmatprep.subr.bf16.mxu0 %v1614_v21  ;;  %v1336_v5 = vcombine.high %v37_v1, %v41_v2  ;;  %v1338_v6 = vcombine.high %v38_v3, %v42_v4  ;;  %v1335_v7 = vcombine.low %v37_v1, %v41_v2  ;;  %v1642_v9 = vld [vmem:[%s2185_s0 + $0x160] sm:$0xff]   ;;  %v1646_v13 = vld [vmem:[%s2185_s0 + $0x168] sm:$0xff]   ;;  %v23_v33 = vld [vmem:[%s2186_s1 + $0x10] sm:$0xff] }
  0x16   :  { %1481 = vmatprep.subr.bf16.mxu1 %v1615_v22  ;;  %v1337_v8 = vcombine.low %v38_v3, %v42_v4  ;;  %v1643_v10 = vld [vmem:[%s2185_s0 + $0x1e0] sm:$0xff]   ;;  %v1647_v14 = vld [vmem:[%s2185_s0 + $0x1e8] sm:$0xff]   ;;  %v27_v34 = vld [vmem:[%s2186_s1 + $0x30] sm:$0xff] }
  0x17   :  { %v1644_v11 = vld [vmem:[%s2185_s0 + $0x120] sm:$0xff]   ;;  %v1648_v15 = vld [vmem:[%s2185_s0 + $0x128] sm:$0xff]   ;;  %v1323_v35 = vcombine.low %v23_v33, %v27_v34  ;;  %v24_v37 = vld [vmem:[%s2186_s1 + $0x18] sm:$0xff] }
  0x18   :  { %1442 = vmatpush3.bf16.msra.mxu0 %v1616_v23  ;;  %v1645_v12 = vld [vmem:[%s2185_s0 + $0x1a0] sm:$0xff]   ;;  %v1649_v16 = vld [vmem:[%s2185_s0 + $0x1a8] sm:$0xff]   ;;  %v28_v38 = vld [vmem:[%s2186_s1 + $0x38] sm:$0xff] }
  0x19   :  { %1482 = vmatpush3.bf16.msra.mxu1 %v1617_v24  ;;  %1443 = vmatprep.subr.bf16.mxu0 %v1618_v25  ;;  %v45_v17 = vld [vmem:[%s2186_s1 + $0xc0] sm:$0xff]  ;;  %v46_v19 = vld [vmem:[%s2186_s1 + $0xc8] sm:$0xff]  ;;  %v1650_v25 = vld [vmem:[%s2185_s0 + $0x170] sm:$0xff]   ;;  %v1325_v40 = vcombine.low %v24_v37, %v28_v38 }
  0x1a   :  { %1483 = vmatprep.subr.bf16.mxu1 %v1619_v26  ;;  %v49_v18 = vld [vmem:[%s2186_s1 + $0xe0] sm:$0xff]  ;;  %v50_v21 = vld [vmem:[%s2186_s1 + $0xe8] sm:$0xff]  ;;  %v1651_v26 = vld [vmem:[%s2185_s0 + $0x1f0] sm:$0xff]  }
  0x1b   :  { %v1344_v20 = vcombine.high %v45_v17, %v49_v18  ;;  %v1343_v22 = vcombine.low %v45_v17, %v49_v18  ;;  %v1346_v23 = vcombine.high %v46_v19, %v50_v21  ;;  %v1345_v24 = vcombine.low %v46_v19, %v50_v21  ;;  %v43_v49 = vld [vmem:[%s2186_s1 + $0xb0] sm:$0xff]  ;;  %v44_v52 = vld [vmem:[%s2186_s1 + $0xb8] sm:$0xff]  ;;  %v182_v53 = vld [vmem:[%s2187_s2 + $0x8] sm:$0xff] }
  0x1c   :  { %1444 = vmatpush3.bf16.msra.mxu0 %v1620_v27  ;;  %v1652_v27 = vld [vmem:[%s2185_s0 + $0x130] sm:$0xff]   ;;  %v188_v3 = vld [vmem:[%s2187_s2 + $0x38] sm:$0xff] }
  0x1d   :  { %1484 = vmatpush3.bf16.msra.mxu1 %v1621_v28  ;;  %1445 = vmatprep.subr.bf16.mxu0 %v1622_v29  ;;  %v1653_v28 = vld [vmem:[%s2185_s0 + $0x1b0] sm:$0xff]   ;;  %v1654_v29 = vld [vmem:[%s2185_s0 + $0x178] sm:$0xff]  }
  0x1e   :  { %1485 = vmatprep.subr.bf16.mxu1 %v1623_v30  ;;  %v1655_v30 = vld [vmem:[%s2185_s0 + $0x1f8] sm:$0xff]   ;;  %v183_v50 = vld [vmem:[%s2187_s2 + $0x10] sm:$0xff] }
  0x1f   :  { %201 = vperm.xlu1 %1593, %v183_v50   ;;  %v187_v1 = vld [vmem:[%s2187_s2 + $0x30] sm:$0xff] }
  0x20   :  { %1446 = vmatpush3.bf16.msra.mxu0 %v1624_v31  ;;  %v1656_v31 = vld [vmem:[%s2185_s0 + $0x138] sm:$0xff]  }
  0x21   :  { %1486 = vmatpush3.bf16.msra.mxu1 %v1625_v32  ;;  %1511 = vmatprep.subr.bf16.mxu0 %v1626_v41  ;;  %v1657_v32 = vld [vmem:[%s2185_s0 + $0x1b8] sm:$0xff]   ;;  %v1326_v41 = vcombine.high %v24_v37, %v28_v38 }
  0x22   :  { %1551 = vmatprep.subr.bf16.mxu1 %v1627_v42  ;;  %v35_v42 = vld [vmem:[%s2186_s1 + $0x70] sm:$0xff] }
  0x23   :  { %806 = vmatmul.mubr.bf16.vlgmr.msra.gmra.mrb[0].mxu0 %v1319_v36  ;;  %v1324_v36 = vcombine.high %v23_v33, %v27_v34 }
  0x24   :  { %871 = vmatmul.mubr.bf16.vlgmr.msra.gmra.mrb[0].mxu1 %v1321_v39  ;;  %1512 = vmatpush3.bf16.msra.mxu0 %v1628_v43  ;;  %v31_v39 = vld [vmem:[%s2186_s1 + $0x50] sm:$0xff]  ;;  %v32_v43 = vld [vmem:[%s2186_s1 + $0x58] sm:$0xff] }
  0x25   :  { %1552 = vmatpush3.bf16.msra.mxu1 %v1629_v44  ;;  %1513 = vmatprep.subr.bf16.mxu0 %v1630_v45  ;;  %v36_v44 = vld [vmem:[%s2186_s1 + $0x78] sm:$0xff]  ;;  %v1332_v45 = vcombine.high %v31_v39, %v35_v42 }
  0x26   :  { %1553 = vmatprep.subr.bf16.mxu1 %v1631_v46  ;;  %813 = vmatprep.mubr.bf16.mxu0 %v1328_v51  ;;  %v1334_v46 = vcombine.high %v32_v43, %v36_v44  ;;  %v40_v51 = vld [vmem:[%s2186_s1 + $0x98] sm:$0xff] }
  0x27   :  { %878 = vmatprep.mubr.bf16.mxu1 %v1330_v55  ;;  %v184_v55 = vld [vmem:[%s2187_s2 + $0x18] sm:$0xff]  ;;  %v1341_v4 = vcombine.low %v40_v51, %v44_v52 }
  0x28   :  { %1514 = vmatpush3.bf16.msra.mxu0 %v1632_v47  ;;  %v181_v47 = vld [vmem:[%s2187_s2] sm:$0xff]  ;;  %206 = vperm.xlu1 %1593, %v184_v55  }
  0x29   :  { %1554 = vmatpush3.bf16.msra.mxu1 %v1633_v48  ;;  %1515 = vmatprep.subr.bf16.mxu0 %v1634_v57  ;;  %v39_v48 = vld [vmem:[%s2186_s1 + $0x90] sm:$0xff] }
  0x2a   :  { %1555 = vmatprep.subr.bf16.mxu1 %v1635_v58  ;;  %191 = vperm.xlu0 %1592, %v181_v47   ;;  %v1340_v57 = vcombine.high %v39_v48, %v43_v49  ;;  %v1342_v58 = vcombine.high %v40_v51, %v44_v52  ;;  %v1339_v2 = vcombine.low %v39_v48, %v43_v49 }
  0x2b   :  { %814 = vmatmul.mubr.bf16.gmra.mrb[4].mxu0 %v1327_v54  ;;  %v1331_v54 = vcombine.low %v31_v39, %v35_v42 }
  0x2c   :  { %879 = vmatmul.mubr.bf16.gmra.mrb[4].mxu1 %v1329_v56  ;;  %1516 = vmatpush3.bf16.msra.mxu0 %v1636_v59  ;;  %v1333_v56 = vcombine.low %v32_v43, %v36_v44  ;;  %v185_v59 = vld [vmem:[%s2187_s2 + $0x20] sm:$0xff] }
  0x2d   :  { %1556 = vmatpush3.bf16.msra.mxu1 %v1637_v60  ;;  %1517 = vmatprep.subr.bf16.mxu0 %v1638_v61  ;;  %v186_v60 = vld [vmem:[%s2187_s2 + $0x28] sm:$0xff]  ;;  %v47_v61 = vld [vmem:[%s2186_s1 + $0xd0] sm:$0xff] }
  0x2e   :  { %1557 = vmatprep.subr.bf16.mxu1 %v1639_v62  ;;  %821 = vmatprep.mubr.bf16.mxu0 %v1336_v5  ;;  %v51_v62 = vld [vmem:[%s2186_s1 + $0xf0] sm:$0xff] }
  0x2f   :  { %886 = vmatprep.mubr.bf16.mxu1 %v1338_v6  ;;  %196 = vperm.xlu0 %1592, %v182_v53   ;;  %v1348_v5 = vcombine.high %v47_v61, %v51_v62 }
  0x30   :  { %1518 = vmatpush3.bf16.msra.mxu0 %v1640_v63  ;;  %v48_v63 = vld [vmem:[%s2186_s1 + $0xd8] sm:$0xff]  ;;  %216 = vperm.xlu1 %1593, %v186_v60  }
  0x31   :  { %1558 = vmatpush3.bf16.msra.mxu1 %v1641_v0  ;;  %1519 = vmatprep.subr.bf16.mxu0 %v1642_v9  ;;  %v52_v0 = vld [vmem:[%s2186_s1 + $0xf8] sm:$0xff] }
  0x32   :  { %1559 = vmatprep.subr.bf16.mxu1 %v1643_v10  ;;  %v1350_v6 = vcombine.high %v48_v63, %v52_v0 }
  0x33   :  { %822 = vmatmul.mubr.bf16.gmra.mrb[8].mxu0 %v1335_v7  ;;  %211 = vperm.xlu0 %1592, %v185_v59   ;;  %v1347_v7 = vcombine.low %v47_v61, %v51_v62 }
  0x34   :  { %887 = vmatmul.mubr.bf16.gmra.mrb[8].mxu1 %v1337_v8  ;;  %1520 = vmatpush3.bf16.msra.mxu0 %v1644_v11  ;;  %v1349_v8 = vcombine.low %v48_v63, %v52_v0 }
  0x35   :  { %1560 = vmatpush3.bf16.msra.mxu1 %v1645_v12  ;;  %1521 = vmatprep.subr.bf16.mxu0 %v1646_v13 }
  0x36   :  { %1561 = vmatprep.subr.bf16.mxu1 %v1647_v14  ;;  %829 = vmatprep.mubr.bf16.mxu0 %v1344_v20 }
  0x37   :  { %894 = vmatprep.mubr.bf16.mxu1 %v1346_v23  ;;  %221 = vperm.xlu0 %1592, %v187_v1  }
  0x38   :  { %1522 = vmatpush3.bf16.msra.mxu0 %v1648_v15  ;;  %226 = vperm.xlu1 %1593, %v188_v3  }
  0x39   :  { %1562 = vmatpush3.bf16.msra.mxu1 %v1649_v16  ;;  %1523 = vmatprep.subr.bf16.mxu0 %v1650_v25 }
  0x3a   :  { %1563 = vmatprep.subr.bf16.mxu1 %v1651_v26 }
  0x3b   :  { %830 = vmatmul.mubr.bf16.gmra.mrb[12].mxu0 %v1343_v22 }
  0x3c   :  { %895 = vmatmul.mubr.bf16.gmra.mrb[12].mxu1 %v1345_v24  ;;  %1524 = vmatpush3.bf16.msra.mxu0 %v1652_v27 }
  0x3d   :  { %1564 = vmatpush3.bf16.msra.mxu1 %v1653_v28  ;;  %1525 = vmatprep.subr.bf16.mxu0 %v1654_v29 }
  0x3e   :  { %1565 = vmatprep.subr.bf16.mxu1 %v1655_v30  ;;  %935 = vmatprep.mubr.bf16.mxu0 %v1324_v36 }
  0x3f   :  { %1000 = vmatprep.mubr.bf16.mxu1 %v1326_v41 }
  0x40   :  { %1526 = vmatpush3.bf16.msra.mxu0 %v1656_v31 }
  0x41   :  { %1566 = vmatpush3.bf16.msra.mxu1 %v1657_v32 }
  0x43   :  { %936 = vmatmul.mubr.bf16.vlgmr.msra.gmra.mrb[16].mxu0 %v1323_v35 }
  0x44   :  { %1001 = vmatmul.mubr.bf16.vlgmr.msra.gmra.mrb[16].mxu1 %v1325_v40  ;;  %943 = vmatprep.mubr.bf16.mxu0 %v1332_v45 }
  0x45   :  { %1008 = vmatprep.mubr.bf16.mxu1 %v1334_v46 }
  0x4b   :  { %944 = vmatmul.mubr.bf16.gmra.mrb[20].mxu0 %v1331_v54 }
  0x4c   :  { %1009 = vmatmul.mubr.bf16.gmra.mrb[20].mxu1 %v1333_v56  ;;  %951 = vmatprep.mubr.bf16.mxu0 %v1340_v57 }
  0x4d   :  { %1016 = vmatprep.mubr.bf16.mxu1 %v1342_v58 }
  0x53   :  { %952 = vmatmul.mubr.bf16.gmra.mrb[24].mxu0 %v1339_v2 }
  0x54   :  { %1017 = vmatmul.mubr.bf16.gmra.mrb[24].mxu1 %v1341_v4  ;;  %959 = vmatprep.mubr.bf16.mxu0 %v1348_v5 }
  0x55   :  { %1024 = vmatprep.mubr.bf16.mxu1 %v1350_v6 }
  0x5b   :  { %960 = vmatmul.mubr.bf16.gmra.mrb[28].mxu0 %v1347_v7 }
  0x5c   :  { %1025 = vmatmul.mubr.bf16.gmra.mrb[28].mxu1 %v1349_v8 }
  0x9e   :  { %v202_v10 = vpop.permute.xlu1 %201 }
  0xa7   :  { %v207_v29 = vpop.permute.xlu1 %206 }
  0xa9   :  { %v192_v9 = vpop.permute.xlu0 %191 }
  0xae   :  { %v197_v12 = vpop.permute.xlu0 %196 }
  0xaf   :  { %v217_v46 = vpop.permute.xlu1 %216 }
  0xb2   :  { %v212_v45 = vpop.permute.xlu0 %211 }
  0xb6   :  { %v222_v63 = vpop.permute.xlu0 %221 }
  0xb7   :  { %v227_v1 = vpop.permute.xlu1 %226 }
  0xf6   :  { %v1447_v11 = vpop.f32.mrb[0].mxu0 }
  0xf7   :  { %v1487_v13 = vpop.f32.mrb[0].mxu1  ;;  %v1448_v14 = vpop.f32.mrb[1].mxu0 }
  0xf8   :  { %v1449_v15 = vadd.f32 %v1448_v14, %v1447_v11  ;;  %v1488_v16 = vpop.f32.mrb[1].mxu1  ;;  %v1450_v17 = vpop.f32.mrb[2].mxu0 }
  0xf9   :  { %v1489_v18 = vadd.f32 %v1488_v16, %v1487_v13  ;;  %v1490_v19 = vpop.f32.mrb[2].mxu1  ;;  %v1451_v20 = vpop.f32.mrb[3].mxu0 }
  0xfa   :  { %v808_v21 = vadd.f32 %v1449_v15, %v192_v9  ;;  %v1452_v22 = vadd.f32 %v1451_v20, %v1450_v17  ;;  %v1491_v23 = vpop.f32.mrb[3].mxu1 }
  0xfb   :  { %v1492_v24 = vadd.f32 %v1491_v23, %v1490_v19 }
  0xfc   :  { %v2017_v25 = vadd.f32 %v1489_v18, %v808_v21  ;;  %v811_v26 = vadd.f32 %v1452_v22, %v197_v12 }
  0xfe   :  { %v2019_v27 = vadd.f32 %v1492_v24, %v811_v26  ;;  %v1453_v28 = vpop.f32.mrb[4].mxu0 }
  0xff   :  { %v1493_v30 = vpop.f32.mrb[4].mxu1  ;;  %v1454_v31 = vpop.f32.mrb[5].mxu0 }
 0x100   :  { %v1455_v32 = vadd.f32 %v1454_v31, %v1453_v28  ;;  %v1494_v33 = vpop.f32.mrb[5].mxu1  ;;  %v1456_v34 = vpop.f32.mrb[6].mxu0 }
 0x101   :  { %v1495_v35 = vadd.f32 %v1494_v33, %v1493_v30  ;;  %v1496_v36 = vpop.f32.mrb[6].mxu1  ;;  %v1457_v37 = vpop.f32.mrb[7].mxu0 }
 0x102   :  { %v816_v38 = vadd.f32 %v1455_v32, %v202_v10  ;;  %v1458_v39 = vadd.f32 %v1457_v37, %v1456_v34  ;;  %v1497_v40 = vpop.f32.mrb[7].mxu1 }
 0x103   :  { %v1498_v41 = vadd.f32 %v1497_v40, %v1496_v36 }
 0x104   :  { %v2021_v42 = vadd.f32 %v1495_v35, %v816_v38  ;;  %v819_v43 = vadd.f32 %v1458_v39, %v207_v29 }
 0x106   :  { %v2023_v44 = vadd.f32 %v1498_v41, %v819_v43  ;;  %v1459_v47 = vpop.f32.mrb[8].mxu0 }
 0x107   :  { %v1499_v48 = vpop.f32.mrb[8].mxu1  ;;  %v1460_v49 = vpop.f32.mrb[9].mxu0 }
 0x108   :  { %v1500_v50 = vpop.f32.mrb[9].mxu1  ;;  %v1461_v51 = vadd.f32 %v1460_v49, %v1459_v47  ;;  %v1462_v53 = vpop.f32.mrb[10].mxu0 }
 0x109   :  { %v1501_v52 = vadd.f32 %v1500_v50, %v1499_v48  ;;  %v1502_v54 = vpop.f32.mrb[10].mxu1  ;;  %v1463_v55 = vpop.f32.mrb[11].mxu0 }
 0x10a   :  { %v1503_v56 = vpop.f32.mrb[11].mxu1  ;;  %v824_v57 = vadd.f32 %v1461_v51, %v212_v45  ;;  %v1464_v58 = vadd.f32 %v1463_v55, %v1462_v53 }
 0x10b   :  { %v1504_v59 = vadd.f32 %v1503_v56, %v1502_v54 }
 0x10c   :  { %v2025_v60 = vadd.f32 %v1501_v52, %v824_v57  ;;  %v827_v61 = vadd.f32 %v1464_v58, %v217_v46 }
 0x10e   :  { %v2027_v62 = vadd.f32 %v1504_v59, %v827_v61  ;;  %v1465_v0 = vpop.f32.mrb[12].mxu0 }
 0x10f   :  { %v1505_v2 = vpop.f32.mrb[12].mxu1  ;;  %v1466_v3 = vpop.f32.mrb[13].mxu0 }
 0x110   :  { %v1467_v4 = vadd.f32 %v1466_v3, %v1465_v0  ;;  %v1506_v5 = vpop.f32.mrb[13].mxu1  ;;  %v1468_v6 = vpop.f32.mrb[14].mxu0 }
 0x111   :  { %v1507_v7 = vadd.f32 %v1506_v5, %v1505_v2  ;;  %v1508_v8 = vpop.f32.mrb[14].mxu1  ;;  %v1469_v9 = vpop.f32.mrb[15].mxu0 }
 0x112   :  { %v832_v10 = vadd.f32 %v1467_v4, %v222_v63  ;;  %v1470_v11 = vadd.f32 %v1469_v9, %v1468_v6  ;;  %v1509_v12 = vpop.f32.mrb[15].mxu1 }
 0x113   :  { %v1510_v13 = vadd.f32 %v1509_v12, %v1508_v8 }
 0x114   :  { %v2029_v14 = vadd.f32 %v1507_v7, %v832_v10  ;;  %v835_v15 = vadd.f32 %v1470_v11, %v227_v1 }
 0x116   :  { %v2031_v16 = vadd.f32 %v1510_v13, %v835_v15  ;;  %v1527_v17 = vpop.f32.mrb[16].mxu0 }
 0x117   :  { %v1567_v18 = vpop.f32.mrb[16].mxu1  ;;  %v1528_v19 = vpop.f32.mrb[17].mxu0 }
 0x118   :  { %v1529_v20 = vadd.f32 %v1528_v19, %v1527_v17  ;;  %v1568_v21 = vpop.f32.mrb[17].mxu1  ;;  %v1530_v22 = vpop.f32.mrb[18].mxu0 }
 0x119   :  { %v1569_v23 = vadd.f32 %v1568_v21, %v1567_v18  ;;  %v1570_v24 = vpop.f32.mrb[18].mxu1  ;;  %v1531_v26 = vpop.f32.mrb[19].mxu0 }
 0x11a   :  { %v938_v28 = vadd.f32 %v1529_v20, %v2017_v25  ;;  %v1532_v29 = vadd.f32 %v1531_v26, %v1530_v22  ;;  %v1571_v30 = vpop.f32.mrb[19].mxu1 }
 0x11b   :  { %v1572_v31 = vadd.f32 %v1571_v30, %v1570_v24 }
 0x11c   :  { %v941_v32 = vadd.f32 %v1532_v29, %v2019_v27  ;;  %v2035_v33 = vadd.f32 %v1569_v23, %v938_v28 }
 0x11e   :  { %v1533_v34 = vpop.f32.mrb[20].mxu0  ;;  %v1034_v35 = vsel %vm1033_vm0, %v2035_v33, 0.0  ;;  %v2039_v36 = vadd.f32 %v1572_v31, %v941_v32 }
 0x11f   :  { %v1573_v37 = vpop.f32.mrb[20].mxu1  ;;  %v1534_v38 = vpop.f32.mrb[21].mxu0  ;;  %1035 = vadd.xlane.f32.xlu0 %v1034_v35 }
 0x120   :  { %v1535_v39 = vadd.f32 %v1534_v38, %v1533_v34  ;;  %v1574_v40 = vpop.f32.mrb[21].mxu1  ;;  %v1536_v25 = vpop.f32.mrb[22].mxu0  ;;  %v1037_v41 = vsel %vm1033_vm0, %v2039_v36, 0.0 }
 0x121   :  { %v1575_v43 = vadd.f32 %v1574_v40, %v1573_v37  ;;  %v1576_v45 = vpop.f32.mrb[22].mxu1  ;;  %v1537_v27 = vpop.f32.mrb[23].mxu0  ;;  %1038 = vadd.xlane.f32.xlu1 %v1037_v41 }
 0x122   :  { %v946_v46 = vadd.f32 %v1535_v39, %v2021_v42  ;;  %v1538_v47 = vadd.f32 %v1537_v27, %v1536_v25  ;;  %v1577_v48 = vpop.f32.mrb[23].mxu1 }
 0x123   :  { %v1578_v49 = vadd.f32 %v1577_v48, %v1576_v45 }
 0x124   :  { %v949_v50 = vadd.f32 %v1538_v47, %v2023_v44  ;;  %v1011_v51 = vadd.f32 %v1575_v43, %v946_v46 }
 0x126   :  { %v1539_v52 = vpop.f32.mrb[24].mxu0  ;;  %v1040_v53 = vsel %vm1033_vm0, %v1011_v51, 0.0  ;;  %v1014_v54 = vadd.f32 %v1578_v49, %v949_v50 }
 0x127   :  { %v1579_v55 = vpop.f32.mrb[24].mxu1  ;;  %v1540_v56 = vpop.f32.mrb[25].mxu0  ;;  %1041 = vadd.xlane.f32.xlu0 %v1040_v53 }
 0x128   :  { %v1541_v57 = vadd.f32 %v1540_v56, %v1539_v52  ;;  %v1580_v58 = vpop.f32.mrb[25].mxu1  ;;  %v1542_v59 = vpop.f32.mrb[26].mxu0  ;;  %v1043_v44 = vsel %vm1033_vm0, %v1014_v54, 0.0 }
 0x129   :  { %v1581_v61 = vadd.f32 %v1580_v58, %v1579_v55  ;;  %v1582_v63 = vpop.f32.mrb[26].mxu1  ;;  %v1543_v0 = vpop.f32.mrb[27].mxu0 }
 0x12a   :  { %v954_v42 = vadd.f32 %v1541_v57, %v2025_v60  ;;  %v1544_v1 = vadd.f32 %v1543_v0, %v1542_v59  ;;  %v1583_v2 = vpop.f32.mrb[27].mxu1 }
 0x12b   :  { %v1584_v3 = vadd.f32 %v1583_v2, %v1582_v63  ;;  %1044 = vadd.xlane.f32.xlu0 %v1043_v44 }
 0x12c   :  { %v957_v4 = vadd.f32 %v1544_v1, %v2027_v62  ;;  %v1019_v5 = vadd.f32 %v1581_v61, %v954_v42 }
 0x12e   :  { %v1545_v6 = vpop.f32.mrb[28].mxu0  ;;  %v1046_v7 = vsel %vm1033_vm0, %v1019_v5, 0.0  ;;  %v1022_v8 = vadd.f32 %v1584_v3, %v957_v4  ;;  %v1195_v3 = vld [vmem:[%s2188_s4 + $0x8] sm:$0xff]  ;;  %v1197_v4 = vld [vmem:[%s2188_s4 + $0x18] sm:$0xff] }
 0x12f   :  { %v1585_v9 = vpop.f32.mrb[28].mxu1  ;;  %v1546_v10 = vpop.f32.mrb[29].mxu0  ;;  %1047 = vadd.xlane.f32.xlu1 %v1046_v7  ;;  %v1196_v7 = vld [vmem:[%s2188_s4 + $0x10] sm:$0xff] }
 0x130   :  { %v1547_v11 = vadd.f32 %v1546_v10, %v1545_v6  ;;  %v1586_v12 = vpop.f32.mrb[29].mxu1  ;;  %v1548_v13 = vpop.f32.mrb[30].mxu0  ;;  %v1049_v60 = vsel %vm1033_vm0, %v1022_v8, 0.0  ;;  %v1199_v6 = vld [vmem:[%s2188_s4 + $0x28] sm:$0xff] }
 0x131   :  { %v1587_v15 = vadd.f32 %v1586_v12, %v1585_v9  ;;  %v1588_v17 = vpop.f32.mrb[30].mxu1  ;;  %v1549_v18 = vpop.f32.mrb[31].mxu0  ;;  %1050 = vadd.xlane.f32.xlu0 %v1049_v60 }
 0x132   :  { %v962_v19 = vadd.f32 %v1547_v11, %v2029_v14  ;;  %v1550_v62 = vadd.f32 %v1549_v18, %v1548_v13  ;;  %v1589_v20 = vpop.f32.mrb[31].mxu1 }
 0x133   :  { %v1590_v21 = vadd.f32 %v1589_v20, %v1588_v17  ;;  %v1114_v20 = vld [vmem:[%s2189_s3] sm:$0xff] }
 0x134   :  { %v965_v22 = vadd.f32 %v1550_v62, %v2031_v16  ;;  %v1027_v23 = vadd.f32 %v1587_v15, %v962_v19 }
 0x136   :  { %v1052_v24 = vsel %vm1033_vm0, %v1027_v23, 0.0  ;;  %v1030_v26 = vadd.f32 %v1590_v21, %v965_v22 }
 0x137   :  { %1053 = vadd.xlane.f32.xlu1 %v1052_v24 }
 0x138   :  { %v1055_v28 = vsel %vm1033_vm0, %v1030_v26, 0.0 }
 0x139   :  { %1056 = vadd.xlane.f32.xlu0 %v1055_v28 }
 0x1ac   :  { %v1036_v29 = vpop.xlane.xlu0 %1035 }
 0x1ad   :  { %v1058_v30 = vmul.f32 0.25, %v1036_v29 }
 0x1ae   :  { %v1039_v31 = vpop.xlane.xlu1 %1038 }
 0x1af   :  { %v2056_v32 = vsub.f32 %v2035_v33, %v1058_v30  ;;  %v1059_v14 = vmul.f32 0.25, %v1039_v31 }
 0x1b1   :  { %v2059_v34 = vsub.f32 %v2039_v36, %v1059_v14  ;;  %v1074_v16 = vmul.f32 %v2056_v32, %v2056_v32 }
 0x1b3   :  { %v1082_v35 = vsel %vm1033_vm0, %v1074_v16, 0.0  ;;  %v1075_v37 = vmul.f32 %v2059_v34, %v2059_v34 }
 0x1b4   :  { %1083 = vadd.xlane.f32.xlu1 %v1082_v35  ;;  %v1042_v38 = vpop.xlane.xlu0 %1041 }
 0x1b5   :  { %v1060_v39 = vmul.f32 0.25, %v1042_v38  ;;  %v1085_v40 = vsel %vm1033_vm0, %v1075_v37, 0.0  ;;  %v1116_v37 = vld [vmem:[%s2189_s3 + $0x10] sm:$0xff] }
 0x1b6   :  { %1086 = vadd.xlane.f32.xlu0 %v1085_v40 }
 0x1b7   :  { %v2067_v33 = vsub.f32 %v1011_v51, %v1060_v39 }
 0x1b8   :  { %v1045_v25 = vpop.xlane.xlu0 %1044 }
 0x1b9   :  { %v1061_v41 = vmul.f32 0.25, %v1045_v25  ;;  %v1076_v36 = vmul.f32 %v2067_v33, %v2067_v33 }
 0x1bb   :  { %v2071_v43 = vsub.f32 %v1014_v54, %v1061_v41  ;;  %v1088_v45 = vsel %vm1033_vm0, %v1076_v36, 0.0  ;;  %v1117_v41 = vld [vmem:[%s2189_s3 + $0x18] sm:$0xff] }
 0x1bc   :  { %v1048_v27 = vpop.xlane.xlu1 %1047  ;;  %1089 = vadd.xlane.f32.xlu1 %v1088_v45 }
 0x1bd   :  { %v1062_v46 = vmul.f32 0.25, %v1048_v27  ;;  %v1077_v47 = vmul.f32 %v2071_v43, %v2071_v43 }
 0x1be   :  { %v1051_v48 = vpop.xlane.xlu0 %1050 }
 0x1bf   :  { %v2076_v49 = vsub.f32 %v1019_v5, %v1062_v46  ;;  %v1063_v50 = vmul.f32 0.25, %v1051_v48  ;;  %v1091_v51 = vsel %vm1033_vm0, %v1077_v47, 0.0  ;;  %v1194_v5 = vld [vmem:[%s2188_s4] sm:$0xff] }
 0x1c0   :  { %1092 = vadd.xlane.f32.xlu0 %v1091_v51 }
 0x1c1   :  { %v2079_v52 = vsub.f32 %v1022_v8, %v1063_v50  ;;  %v1078_v53 = vmul.f32 %v2076_v49, %v2076_v49  ;;  %v1198_v8 = vld [vmem:[%s2188_s4 + $0x20] sm:$0xff] }
 0x1c2   :  { %v1118_v50 = vld [vmem:[%s2189_s3 + $0x20] sm:$0xff] }
 0x1c3   :  { %v1094_v54 = vsel %vm1033_vm0, %v1078_v53, 0.0  ;;  %v1079_v55 = vmul.f32 %v2079_v52, %v2079_v52  ;;  %v1119_v53 = vld [vmem:[%s2189_s3 + $0x28] sm:$0xff] }
 0x1c4   :  { %v1054_v56 = vpop.xlane.xlu1 %1053  ;;  %1095 = vadd.xlane.f32.xlu1 %v1094_v54 }
 0x1c5   :  { %v1064_v57 = vmul.f32 0.25, %v1054_v56  ;;  %v1097_v58 = vsel %vm1033_vm0, %v1079_v55, 0.0 }
 0x1c6   :  { %1098 = vadd.xlane.f32.xlu0 %v1097_v58  ;;  %v1057_v59 = vpop.xlane.xlu0 %1056 }
 0x1c7   :  { %v2087_v61 = vsub.f32 %v1027_v23, %v1064_v57  ;;  %v1065_v63 = vmul.f32 0.25, %v1057_v59  ;;  %v1115_v23 = vld [vmem:[%s2189_s3 + $0x8] sm:$0xff]  ;;  %v1120_v57 = vld [vmem:[%s2189_s3 + $0x30] sm:$0xff]  ;;  %v1121_v59 = vld [vmem:[%s2189_s3 + $0x38] sm:$0xff] }
 0x1c9   :  { %v2089_v0 = vsub.f32 %v1030_v26, %v1065_v63  ;;  %v1080_v42 = vmul.f32 %v2087_v61, %v2087_v61 }
 0x1cb   :  { %v1100_v1 = vsel %vm1033_vm0, %v1080_v42, 0.0  ;;  %v1081_v2 = vmul.f32 %v2089_v0, %v2089_v0 }
 0x1cc   :  { %1101 = vadd.xlane.f32.xlu1 %v1100_v1 }
 0x1cd   :  { %v1103_v44 = vsel %vm1033_vm0, %v1081_v2, 0.0  ;;  %v1200_v2 = vld [vmem:[%s2188_s4 + $0x30] sm:$0xff] }
 0x1ce   :  { %1104 = vadd.xlane.f32.xlu0 %v1103_v44  ;;  %v1201_v44 = vld [vmem:[%s2188_s4 + $0x38] sm:$0xff] }
 0x1dd   :  { %1209 = vperm.xlu1 %1593, %v1195_v3  }
 0x1e1   :  { %1219 = vperm.xlu1 %1593, %v1197_v4  }
 0x1e4   :  { %1204 = vperm.xlu0 %1592, %v1194_v5  }
 0x1e5   :  { %1229 = vperm.xlu1 %1593, %v1199_v6  }
 0x1e8   :  { %1214 = vperm.xlu0 %1592, %v1196_v7  }
 0x1ec   :  { %1224 = vperm.xlu0 %1592, %v1198_v8  }
 0x241   :  { %v1084_v9 = vpop.xlane.xlu1 %1083 }
 0x242   :  { %v1106_v10 = vmul.f32 0.25, %v1084_v9 }
 0x243   :  { %v1087_v11 = vpop.xlane.xlu0 %1086 }
 0x244   :  { %v1122_v12 = vadd.f32 1e-05, %v1106_v10  ;;  %v1107_v13 = vmul.f32 0.25, %v1087_v11 }
 0x246   :  { %1658 = vrsqrt.f32 %v1122_v12  ;;  %v1123_v60 = vadd.f32 1e-05, %v1107_v13 }
 0x248   :  { %1660 = vrsqrt.f32 %v1123_v60 }
 0x249   :  { %v1090_v15 = vpop.xlane.xlu1 %1089 }
 0x24a   :  { %v1108_v17 = vmul.f32 0.25, %v1090_v15 }
 0x24c   :  { %v1124_v18 = vadd.f32 1e-05, %v1108_v17 }
 0x24d   :  { %v1093_v19 = vpop.xlane.xlu0 %1092 }
 0x24e   :  { %1662 = vrsqrt.f32 %v1124_v18  ;;  %v1109_v62 = vmul.f32 0.25, %v1093_v19 }
 0x250   :  { %v1659_v21 = vpop.eup %1658  ;;  %v1125_v22 = vadd.f32 1e-05, %v1109_v62 }
 0x251   :  { %v1096_v24 = vpop.xlane.xlu1 %1095  ;;  %v1138_v26 = vmul.f32 %v1659_v21, %v1114_v20 }
 0x252   :  { %v1661_v28 = vpop.eup %1660  ;;  %1664 = vrsqrt.f32 %v1125_v22  ;;  %v1110_v29 = vmul.f32 0.25, %v1096_v24 }
 0x253   :  { %1148 = vperm.xlu1 %1593, %v1138_v26   ;;  %v1099_v30 = vpop.xlane.xlu0 %1098  ;;  %v1139_v31 = vmul.f32 %v1661_v28, %v1115_v23 }
 0x254   :  { %v1126_v14 = vadd.f32 1e-05, %v1110_v29  ;;  %v1111_v16 = vmul.f32 0.25, %v1099_v30 }
 0x255   :  { %1153 = vperm.xlu0 %1592, %v1139_v31  }
 0x256   :  { %1666 = vrsqrt.f32 %v1126_v14  ;;  %v1127_v35 = vadd.f32 1e-05, %v1111_v16 }
 0x258   :  { %v1663_v38 = vpop.eup %1662  ;;  %1668 = vrsqrt.f32 %v1127_v35 }
 0x259   :  { %v1102_v39 = vpop.xlane.xlu1 %1101  ;;  %v1140_v40 = vmul.f32 %v1663_v38, %v1116_v37 }
 0x25a   :  { %v1112_v25 = vmul.f32 0.25, %v1102_v39 }
 0x25b   :  { %1158 = vperm.xlu1 %1593, %v1140_v40   ;;  %v1105_v36 = vpop.xlane.xlu0 %1104 }
 0x25c   :  { %v1665_v45 = vpop.eup %1664  ;;  %v1128_v27 = vadd.f32 1e-05, %v1112_v25  ;;  %v1113_v46 = vmul.f32 0.25, %v1105_v36 }
 0x25d   :  { %v1141_v47 = vmul.f32 %v1665_v45, %v1117_v41  ;;  %v1210_v3 = vpop.permute.xlu1 %1209 }
 0x25e   :  { %1670 = vrsqrt.f32 %v1128_v27  ;;  %v1129_v48 = vadd.f32 1e-05, %v1113_v46 }
 0x25f   :  { %1163 = vperm.xlu1 %1593, %v1141_v47  }
 0x260   :  { %v1667_v51 = vpop.eup %1666  ;;  %1672 = vrsqrt.f32 %v1129_v48 }
 0x261   :  { %v1142_v54 = vmul.f32 %v1667_v51, %v1118_v50  ;;  %v1220_v5 = vpop.permute.xlu1 %1219 }
 0x262   :  { %v1669_v55 = vpop.eup %1668 }
 0x263   :  { %1168 = vperm.xlu0 %1592, %v1142_v54   ;;  %v1143_v56 = vmul.f32 %v1669_v55, %v1119_v53  ;;  %v1205_v4 = vpop.permute.xlu0 %1204 }
 0x265   :  { %1173 = vperm.xlu1 %1593, %v1143_v56   ;;  %v1230_v7 = vpop.permute.xlu1 %1229 }
 0x267   :  { %v1215_v6 = vpop.permute.xlu0 %1214 }
 0x268   :  { %v1671_v58 = vpop.eup %1670 }
 0x269   :  { %v1144_v63 = vmul.f32 %v1671_v58, %v1120_v57 }
 0x26a   :  { %v1673_v42 = vpop.eup %1672 }
 0x26b   :  { %1178 = vperm.xlu0 %1592, %v1144_v63   ;;  %v1145_v1 = vmul.f32 %v1673_v42, %v1121_v59  ;;  %v1225_v8 = vpop.permute.xlu0 %1224 }
 0x26d   :  { %1183 = vperm.xlu1 %1593, %v1145_v1  }
 0x26f   :  { %1234 = vperm.xlu0 %1592, %v1200_v2  }
 0x271   :  { %1239 = vperm.xlu1 %1593, %v1201_v44  }
 0x2d2   :  { %v1149_v9 = vpop.permute.xlu1 %1148 }
 0x2d3   :  { %v1186_v10 = vmul.f32 %v1149_v9, %v2056_v32 }
 0x2d4   :  { %v1154_v11 = vpop.permute.xlu0 %1153 }
 0x2d5   :  { %v1242_v12 = vadd.f32 %v1205_v4, %v1186_v10  ;;  %v1187_v13 = vmul.f32 %v1154_v11, %v2059_v34 }
 0x2d7   :  { %vm1250_vm1 = vcmp.ge.f32.partialorder %v1242_v12, 0.0  ;;  %v1258_v60 = vmul.f32 0.01, %v1242_v12  ;;  %v1243_v15 = vadd.f32 %v1210_v3, %v1187_v13 }
 0x2d9   :  { %v1266_v17 = vsel %vm1250_vm1, %v1242_v12, %v1258_v60  ;;  %vm1251_vm3 = vcmp.ge.f32.partialorder %v1243_v15, 0.0  ;;  %v1259_v18 = vmul.f32 0.01, %v1243_v15 }
 0x2da   :  { %v1423_v19 = vpack.c.bf16 %v1266_v17, %v1266_v17  ;;  %v1159_v62 = vpop.permute.xlu1 %1158 }
 0x2db   :  { %v1267_v20 = vsel %vm1251_vm3, %v1243_v15, %v1259_v18  ;;  %v1188_v21 = vmul.f32 %v1159_v62, %v2067_v33 }
 0x2dc   :  { %1307 = vst.msk [vmem:[%s2190_s5] sm:$0xf] %vm1306_vm2, %v1423_v19  ;;  %v1424_v32 = vpack.c.bf16 %v1267_v20, %v1267_v20 }
 0x2dd   :  { %v1244_v22 = vadd.f32 %v1215_v6, %v1188_v21 }
 0x2de   :  { %1308 = vst.msk [vmem:[%s2190_s5 + $0x4] sm:$0xf] %vm1306_vm2, %v1424_v32  ;;  %v1164_v34 = vpop.permute.xlu1 %1163 }
 0x2df   :  { %vm1252_vm4 = vcmp.ge.f32.partialorder %v1244_v22, 0.0  ;;  %v1260_v23 = vmul.f32 0.01, %v1244_v22  ;;  %v1189_v24 = vmul.f32 %v1164_v34, %v2071_v43 }
 0x2e1   :  { %v1268_v26 = vsel %vm1252_vm4, %v1244_v22, %v1260_v23  ;;  %v1245_v28 = vadd.f32 %v1220_v5, %v1189_v24 }
 0x2e2   :  { %v1425_v33 = vpack.c.bf16 %v1268_v26, %v1268_v26  ;;  %v1169_v29 = vpop.permute.xlu0 %1168 }
 0x2e3   :  { %vm1253_vm5 = vcmp.ge.f32.partialorder %v1245_v28, 0.0  ;;  %v1261_v30 = vmul.f32 0.01, %v1245_v28  ;;  %v1190_v31 = vmul.f32 %v1169_v29, %v2076_v49 }
 0x2e4   :  { %1309 = vst.msk [vmem:[%s2190_s5 + $0x8] sm:$0xf] %vm1306_vm2, %v1425_v33  ;;  %v1174_v14 = vpop.permute.xlu1 %1173 }
 0x2e5   :  { %v1269_v16 = vsel %vm1253_vm5, %v1245_v28, %v1261_v30  ;;  %v1246_v35 = vadd.f32 %v1225_v8, %v1190_v31  ;;  %v1191_v37 = vmul.f32 %v1174_v14, %v2079_v52 }
 0x2e6   :  { %v1426_v38 = vpack.c.bf16 %v1269_v16, %v1269_v16 }
 0x2e7   :  { %vm1254_vm6 = vcmp.ge.f32.partialorder %v1246_v35, 0.0  ;;  %v1262_v43 = vmul.f32 0.01, %v1246_v35  ;;  %v1247_v39 = vadd.f32 %v1230_v7, %v1191_v37 }
 0x2e8   :  { %1310 = vst.msk [vmem:[%s2190_s5 + $0xc] sm:$0xf] %vm1306_vm2, %v1426_v38 }
 0x2e9   :  { %v1270_v49 = vsel %vm1254_vm6, %v1246_v35, %v1262_v43  ;;  %vm1255_vm7 = vcmp.ge.f32.partialorder %v1247_v39, 0.0  ;;  %v1263_v40 = vmul.f32 0.01, %v1247_v39 }
 0x2ea   :  { %v1427_v25 = vpack.c.bf16 %v1270_v49, %v1270_v49  ;;  %v1179_v41 = vpop.permute.xlu0 %1178 }
 0x2eb   :  { %v1271_v36 = vsel %vm1255_vm7, %v1247_v39, %v1263_v40  ;;  %v1192_v27 = vmul.f32 %v1179_v41, %v2087_v61 }
 0x2ec   :  { %1311 = vst.msk [vmem:[%s2190_s5 + $0x10] sm:$0xf] %vm1306_vm2, %v1427_v25  ;;  %v1428_v52 = vpack.c.bf16 %v1271_v36, %v1271_v36  ;;  %v1184_v45 = vpop.permute.xlu1 %1183 }
 0x2ed   :  { %v1193_v47 = vmul.f32 %v1184_v45, %v2089_v0 }
 0x2ee   :  { %1312 = vst.msk [vmem:[%s2190_s5 + $0x14] sm:$0xf] %vm1306_vm2, %v1428_v52  ;;  %v1235_v46 = vpop.permute.xlu0 %1234 }
 0x2ef   :  { %v1248_v48 = vadd.f32 %v1235_v46, %v1192_v27 }
 0x2f0   :  { %v1240_v50 = vpop.permute.xlu1 %1239 }
 0x2f1   :  { %vm1256_vm8 = vcmp.ge.f32.partialorder %v1248_v48, 0.0  ;;  %v1264_v51 = vmul.f32 0.01, %v1248_v48  ;;  %v1249_v53 = vadd.f32 %v1240_v50, %v1193_v47 }
 0x2f3   :  { %v1272_v54 = vsel %vm1256_vm8, %v1248_v48, %v1264_v51  ;;  %vm1257_vm9 = vcmp.ge.f32.partialorder %v1249_v53, 0.0  ;;  %v1265_v55 = vmul.f32 0.01, %v1249_v53 }
 0x2f4   :  { %v1429_v56 = vpack.c.bf16 %v1272_v54, %v1272_v54 }
 0x2f5   :  { %v1273_v57 = vsel %vm1257_vm9, %v1249_v53, %v1265_v55 }
 0x2f6   :  { %1313 = vst.msk [vmem:[%s2190_s5 + $0x18] sm:$0xf] %vm1306_vm2, %v1429_v56  ;;  %v1430_v61 = vpack.c.bf16 %v1273_v57, %v1273_v57 }
 0x2f8   :  { %1314 = vst.msk [vmem:[%s2190_s5 + $0x1c] sm:$0xf] %vm1306_vm2, %v1430_v61 }

// kernel: _lambda_.17
= control target key start
LH: loop header
LB: loop body
LE: loop exit
PB: predicated region body
PF: predicated region fallthrough
CT: control target
= control target key end

     0   :  { %vm1609_vm1 = vcmask 3072   ;;  %s2882_s0 = inlined_call_operand.vmem [shape: bf16[1024,1], index: 0, kind: input, shape index: {}]   ;;  %s2883_s1 = inlined_call_operand.vmem [shape: bf16[128,1024], index: 1, kind: input, shape index: {}]   ;;  %s2884_s2 = inlined_call_operand.vmem [shape: f32[128,1], index: 2, kind: input, shape index: {}, may-alias: {2,4}]   ;;  %s2885_s3 = inlined_call_operand.vmem [shape: f32[128,1], index: 3, kind: input, shape index: {}]   ;;  %s2886_s4 = inlined_call_operand.vmem [shape: f32[128,1], index: 4, kind: input, shape index: {}, may-alias: {2,4}]   ;;  %s2887_s5 = inlined_call_operand.vmem [shape: bf16[128,1], index: 5, kind: output, shape index: {}]  }
   0x1   :  { %v2046_v0 = vld [vmem:[%s2882_s0 + $0x40] sm:$0xff]   ;;  %v2050_v4 = vld [vmem:[%s2882_s0 + $0x48] sm:$0xff]   ;;  %v2054_v8 = vld [vmem:[%s2882_s0 + $0x50] sm:$0xff]  }
   0x2   :  { %v2047_v1 = vld [vmem:[%s2882_s0 + $0xc0] sm:$0xff]   ;;  %1790 = vmatprep.subr.bf16.mxu0 %v2046_v0  ;;  %v2051_v5 = vld [vmem:[%s2882_s0 + $0xc8] sm:$0xff]   ;;  %v2055_v9 = vld [vmem:[%s2882_s0 + $0xd0] sm:$0xff]  }
   0x3   :  { %v2048_v2 = vld [vmem:[%s2882_s0] sm:$0xff]   ;;  %1854 = vmatprep.subr.bf16.mxu1 %v2047_v1  ;;  %v2052_v6 = vld [vmem:[%s2882_s0 + $0x8] sm:$0xff]   ;;  %v2056_v10 = vld [vmem:[%s2882_s0 + $0x10] sm:$0xff]  }
   0x4   :  { %v2049_v3 = vld [vmem:[%s2882_s0 + $0x80] sm:$0xff]   ;;  %1791 = vmatpush3.bf16.msra.mxu0 %v2048_v2  ;;  %v2053_v7 = vld [vmem:[%s2882_s0 + $0x88] sm:$0xff]   ;;  %v2057_v11 = vld [vmem:[%s2882_s0 + $0x90] sm:$0xff]  }
   0x5   :  { %1855 = vmatpush3.bf16.msra.mxu1 %v2049_v3  ;;  %1792 = vmatprep.subr.bf16.mxu0 %v2050_v4  ;;  %v2058_v12 = vld [vmem:[%s2882_s0 + $0x58] sm:$0xff]   ;;  %v2062_v16 = vld [vmem:[%s2882_s0 + $0x60] sm:$0xff]   ;;  %v2066_v20 = vld [vmem:[%s2882_s0 + $0x68] sm:$0xff]  }
   0x6   :  { %1856 = vmatprep.subr.bf16.mxu1 %v2051_v5  ;;  %v2059_v13 = vld [vmem:[%s2882_s0 + $0xd8] sm:$0xff]   ;;  %v2063_v17 = vld [vmem:[%s2882_s0 + $0xe0] sm:$0xff]   ;;  %v2067_v21 = vld [vmem:[%s2882_s0 + $0xe8] sm:$0xff]  }
   0x7   :  { %v2060_v14 = vld [vmem:[%s2882_s0 + $0x18] sm:$0xff]   ;;  %v2064_v18 = vld [vmem:[%s2882_s0 + $0x20] sm:$0xff]   ;;  %v2068_v22 = vld [vmem:[%s2882_s0 + $0x28] sm:$0xff]  }
   0x8   :  { %1793 = vmatpush3.bf16.msra.mxu0 %v2052_v6  ;;  %v2061_v15 = vld [vmem:[%s2882_s0 + $0x98] sm:$0xff]   ;;  %v2065_v19 = vld [vmem:[%s2882_s0 + $0xa0] sm:$0xff]   ;;  %v2069_v23 = vld [vmem:[%s2882_s0 + $0xa8] sm:$0xff]  }
   0x9   :  { %1857 = vmatpush3.bf16.msra.mxu1 %v2053_v7  ;;  %1794 = vmatprep.subr.bf16.mxu0 %v2054_v8  ;;  %v2070_v24 = vld [vmem:[%s2882_s0 + $0x70] sm:$0xff]   ;;  %v2074_v28 = vld [vmem:[%s2882_s0 + $0x78] sm:$0xff]   ;;  %v21_v32 = vld [vmem:[%s2883_s1] sm:$0xff] }
   0xa   :  { %1858 = vmatprep.subr.bf16.mxu1 %v2055_v9  ;;  %v2071_v25 = vld [vmem:[%s2882_s0 + $0xf0] sm:$0xff]   ;;  %v2075_v29 = vld [vmem:[%s2882_s0 + $0xf8] sm:$0xff]   ;;  %v25_v33 = vld [vmem:[%s2883_s1 + $0x20] sm:$0xff] }
   0xb   :  { %v2072_v26 = vld [vmem:[%s2882_s0 + $0x30] sm:$0xff]   ;;  %v2076_v30 = vld [vmem:[%s2882_s0 + $0x38] sm:$0xff]   ;;  %v22_v34 = vld [vmem:[%s2883_s1 + $0x8] sm:$0xff]  ;;  %v1630_v35 = vcombine.low %v21_v32, %v25_v33  ;;  %v1631_v36 = vcombine.high %v21_v32, %v25_v33 }
   0xc   :  { %1795 = vmatpush3.bf16.msra.mxu0 %v2056_v10  ;;  %v2073_v27 = vld [vmem:[%s2882_s0 + $0xb0] sm:$0xff]   ;;  %v2077_v31 = vld [vmem:[%s2882_s0 + $0xb8] sm:$0xff]   ;;  %v26_v37 = vld [vmem:[%s2883_s1 + $0x28] sm:$0xff] }
   0xd   :  { %1859 = vmatpush3.bf16.msra.mxu1 %v2057_v11  ;;  %1796 = vmatprep.subr.bf16.mxu0 %v2058_v12  ;;  %v1632_v38 = vcombine.low %v22_v34, %v26_v37  ;;  %v1633_v39 = vcombine.high %v22_v34, %v26_v37  ;;  %v2078_v40 = vld [vmem:[%s2882_s0 + $0x140] sm:$0xff]   ;;  %v30_v47 = vld [vmem:[%s2883_s1 + $0x48] sm:$0xff]  ;;  %v2086_v62 = vld [vmem:[%s2882_s0 + $0x150] sm:$0xff]  }
   0xe   :  { %1860 = vmatprep.subr.bf16.mxu1 %v2059_v13  ;;  %965 = vmatprep.mubr.bf16.mxu0 %v1631_v36  ;;  %v2079_v41 = vld [vmem:[%s2882_s0 + $0x100] sm:$0xff]   ;;  %v34_v48 = vld [vmem:[%s2883_s1 + $0x68] sm:$0xff]  ;;  %v2087_v63 = vld [vmem:[%s2882_s0 + $0x110] sm:$0xff]  }
   0xf   :  { %1062 = vmatprep.mubr.bf16.mxu1 %v1633_v39  ;;  %v2080_v42 = vld [vmem:[%s2882_s0 + $0x1c0] sm:$0xff]   ;;  %v1641_v49 = vcombine.high %v30_v47, %v34_v48  ;;  %v2082_v50 = vld [vmem:[%s2882_s0 + $0x148] sm:$0xff]   ;;  %v1640_v53 = vcombine.low %v30_v47, %v34_v48  ;;  %v2088_v0 = vld [vmem:[%s2882_s0 + $0x1d0] sm:$0xff]  }
  0x10   :  { %1797 = vmatpush3.bf16.msra.mxu0 %v2060_v14  ;;  %v2081_v43 = vld [vmem:[%s2882_s0 + $0x180] sm:$0xff]   ;;  %v2083_v52 = vld [vmem:[%s2882_s0 + $0x108] sm:$0xff]   ;;  %v2089_v1 = vld [vmem:[%s2882_s0 + $0x190] sm:$0xff]  }
  0x11   :  { %1861 = vmatpush3.bf16.msra.mxu1 %v2061_v15  ;;  %1798 = vmatprep.subr.bf16.mxu0 %v2062_v16  ;;  %v29_v44 = vld [vmem:[%s2883_s1 + $0x40] sm:$0xff]  ;;  %v2084_v54 = vld [vmem:[%s2882_s0 + $0x1c8] sm:$0xff]   ;;  %v2090_v10 = vld [vmem:[%s2882_s0 + $0x158] sm:$0xff]  }
  0x12   :  { %1862 = vmatprep.subr.bf16.mxu1 %v2063_v17  ;;  %v33_v45 = vld [vmem:[%s2883_s1 + $0x60] sm:$0xff]  ;;  %v2085_v55 = vld [vmem:[%s2882_s0 + $0x188] sm:$0xff]   ;;  %v2091_v11 = vld [vmem:[%s2882_s0 + $0x118] sm:$0xff]  }
  0x13   :  { %v1639_v46 = vcombine.high %v29_v44, %v33_v45  ;;  %v1638_v51 = vcombine.low %v29_v44, %v33_v45  ;;  %v37_v56 = vld [vmem:[%s2883_s1 + $0x80] sm:$0xff]  ;;  %v38_v58 = vld [vmem:[%s2883_s1 + $0x88] sm:$0xff]  ;;  %v2092_v12 = vld [vmem:[%s2882_s0 + $0x1d8] sm:$0xff]  }
  0x14   :  { %1799 = vmatpush3.bf16.msra.mxu0 %v2064_v18  ;;  %v41_v57 = vld [vmem:[%s2883_s1 + $0xa0] sm:$0xff]  ;;  %v42_v59 = vld [vmem:[%s2883_s1 + $0xa8] sm:$0xff]  ;;  %v2093_v13 = vld [vmem:[%s2882_s0 + $0x198] sm:$0xff]  }
  0x15   :  { %1863 = vmatpush3.bf16.msra.mxu1 %v2065_v19  ;;  %1800 = vmatprep.subr.bf16.mxu0 %v2066_v20  ;;  %v1647_v60 = vcombine.high %v37_v56, %v41_v57  ;;  %v1649_v61 = vcombine.high %v38_v58, %v42_v59  ;;  %v1646_v2 = vcombine.low %v37_v56, %v41_v57  ;;  %v45_v3 = vld [vmem:[%s2883_s1 + $0xc0] sm:$0xff]  ;;  %v46_v5 = vld [vmem:[%s2883_s1 + $0xc8] sm:$0xff]  ;;  %v2103_v39 = vld [vmem:[%s2882_s0 + $0x130] sm:$0xff]  }
  0x16   :  { %1864 = vmatprep.subr.bf16.mxu1 %v2067_v21  ;;  %v49_v4 = vld [vmem:[%s2883_s1 + $0xe0] sm:$0xff]  ;;  %v1648_v6 = vcombine.low %v38_v58, %v42_v59  ;;  %v50_v8 = vld [vmem:[%s2883_s1 + $0xe8] sm:$0xff]  ;;  %v2107_v48 = vld [vmem:[%s2882_s0 + $0x138] sm:$0xff]  }
  0x17   :  { %v1655_v7 = vcombine.high %v45_v3, %v49_v4  ;;  %v1657_v9 = vcombine.high %v46_v5, %v50_v8  ;;  %v53_v14 = vld [vmem:[%s2883_s1 + $0x100] sm:$0xff]  ;;  %v54_v16 = vld [vmem:[%s2883_s1 + $0x108] sm:$0xff]  ;;  %v1654_v19 = vcombine.low %v45_v3, %v49_v4  ;;  %v1656_v21 = vcombine.low %v46_v5, %v50_v8  ;;  %v32_v8 = vld [vmem:[%s2883_s1 + $0x58] sm:$0xff] }
  0x18   :  { %1801 = vmatpush3.bf16.msra.mxu0 %v2068_v22  ;;  %v57_v15 = vld [vmem:[%s2883_s1 + $0x120] sm:$0xff]  ;;  %v58_v17 = vld [vmem:[%s2883_s1 + $0x128] sm:$0xff] }
  0x19   :  { %1865 = vmatpush3.bf16.msra.mxu1 %v2069_v23  ;;  %1802 = vmatprep.subr.bf16.mxu0 %v2070_v24  ;;  %v2094_v18 = vld [vmem:[%s2882_s0 + $0x160] sm:$0xff]   ;;  %v1663_v22 = vcombine.high %v53_v14, %v57_v15  ;;  %v1665_v24 = vcombine.high %v54_v16, %v58_v17  ;;  %v2100_v32 = vld [vmem:[%s2882_s0 + $0x1e8] sm:$0xff]   ;;  %v1662_v34 = vcombine.low %v53_v14, %v57_v15  ;;  %v39_v14 = vld [vmem:[%s2883_s1 + $0x90] sm:$0xff] }
  0x1a   :  { %1866 = vmatprep.subr.bf16.mxu1 %v2071_v25  ;;  %v2095_v20 = vld [vmem:[%s2882_s0 + $0x120] sm:$0xff]   ;;  %v2101_v33 = vld [vmem:[%s2882_s0 + $0x1a8] sm:$0xff]   ;;  %v43_v15 = vld [vmem:[%s2883_s1 + $0xb0] sm:$0xff] }
  0x1b   :  { %v2096_v23 = vld [vmem:[%s2882_s0 + $0x1e0] sm:$0xff]   ;;  %v70_v44 = vld [vmem:[%s2883_s1 + $0x188] sm:$0xff] }
  0x1c   :  { %1803 = vmatpush3.bf16.msra.mxu0 %v2072_v26  ;;  %v2097_v25 = vld [vmem:[%s2882_s0 + $0x1a0] sm:$0xff]   ;;  %v74_v45 = vld [vmem:[%s2883_s1 + $0x1a8] sm:$0xff] }
  0x1d   :  { %1867 = vmatpush3.bf16.msra.mxu1 %v2073_v27  ;;  %1804 = vmatprep.subr.bf16.mxu0 %v2074_v28  ;;  %v61_v26 = vld [vmem:[%s2883_s1 + $0x140] sm:$0xff]  ;;  %v2098_v28 = vld [vmem:[%s2882_s0 + $0x168] sm:$0xff]   ;;  %v1680_v59 = vcombine.low %v70_v44, %v74_v45 }
  0x1e   :  { %1868 = vmatprep.subr.bf16.mxu1 %v2075_v29  ;;  %v65_v27 = vld [vmem:[%s2883_s1 + $0x160] sm:$0xff]  ;;  %v62_v29 = vld [vmem:[%s2883_s1 + $0x148] sm:$0xff] }
  0x1f   :  { %v1671_v36 = vcombine.high %v61_v26, %v65_v27  ;;  %v1670_v47 = vcombine.low %v61_v26, %v65_v27  ;;  %v78_v56 = vld [vmem:[%s2883_s1 + $0x1c8] sm:$0xff]  ;;  %v1650_v26 = vcombine.low %v39_v14, %v43_v15 }
  0x20   :  { %1805 = vmatpush3.bf16.msra.mxu0 %v2076_v30  ;;  %v66_v30 = vld [vmem:[%s2883_s1 + $0x168] sm:$0xff] }
  0x21   :  { %1869 = vmatpush3.bf16.msra.mxu1 %v2077_v31  ;;  %1918 = vmatprep.subr.bf16.mxu0 %v2078_v40  ;;  %v2099_v31 = vld [vmem:[%s2882_s0 + $0x128] sm:$0xff]   ;;  %v1673_v37 = vcombine.high %v62_v29, %v66_v30  ;;  %v2104_v40 = vld [vmem:[%s2882_s0 + $0x1f0] sm:$0xff]  }
  0x22   :  { %1982 = vmatprep.subr.bf16.mxu1 %v2080_v42  ;;  %v73_v42 = vld [vmem:[%s2883_s1 + $0x1a0] sm:$0xff]  ;;  %v82_v57 = vld [vmem:[%s2883_s1 + $0x1e8] sm:$0xff] }
  0x23   :  { %966 = vmatmul.mubr.bf16.vlgmr.msra.gmra.mrb[0].mxu0 %v1630_v35  ;;  %v1664_v35 = vcombine.low %v54_v16, %v58_v17  ;;  %v1688_v3 = vcombine.low %v78_v56, %v82_v57  ;;  %v40_v16 = vld [vmem:[%s2883_s1 + $0x98] sm:$0xff] }
  0x24   :  { %1063 = vmatmul.mubr.bf16.vlgmr.msra.gmra.mrb[0].mxu1 %v1632_v38  ;;  %1919 = vmatpush3.bf16.msra.mxu0 %v2079_v41  ;;  %v2102_v38 = vld [vmem:[%s2882_s0 + $0x170] sm:$0xff]   ;;  %v69_v41 = vld [vmem:[%s2883_s1 + $0x180] sm:$0xff]  ;;  %v44_v17 = vld [vmem:[%s2883_s1 + $0xb8] sm:$0xff] }
  0x25   :  { %1983 = vmatpush3.bf16.msra.mxu1 %v2081_v43  ;;  %973 = vmatprep.mubr.bf16.mxu0 %v1639_v46  ;;  %v2105_v43 = vld [vmem:[%s2882_s0 + $0x1b0] sm:$0xff]   ;;  %v2106_v46 = vld [vmem:[%s2882_s0 + $0x178] sm:$0xff]   ;;  %v1678_v58 = vcombine.low %v69_v41, %v73_v42  ;;  %v1652_v27 = vcombine.low %v40_v16, %v44_v17 }
  0x26   :  { %1070 = vmatprep.mubr.bf16.mxu1 %v1641_v49  ;;  %1920 = vmatprep.subr.bf16.mxu0 %v2082_v50  ;;  %v1672_v49 = vcombine.low %v62_v29, %v66_v30  ;;  %v1679_v50 = vcombine.high %v69_v41, %v73_v42  ;;  %v55_v30 = vld [vmem:[%s2883_s1 + $0x110] sm:$0xff]  ;;  %v68_v41 = vld [vmem:[%s2883_s1 + $0x178] sm:$0xff] }
  0x27   :  { %1984 = vmatprep.subr.bf16.mxu1 %v2084_v54  ;;  %v77_v54 = vld [vmem:[%s2883_s1 + $0x1c0] sm:$0xff] }
  0x28   :  { %1921 = vmatpush3.bf16.msra.mxu0 %v2083_v52  ;;  %v1681_v52 = vcombine.high %v70_v44, %v74_v45 }
  0x29   :  { %1985 = vmatpush3.bf16.msra.mxu1 %v2085_v55  ;;  %1922 = vmatprep.subr.bf16.mxu0 %v2086_v62  ;;  %v81_v55 = vld [vmem:[%s2883_s1 + $0x1e0] sm:$0xff]  ;;  %v23_v62 = vld [vmem:[%s2883_s1 + $0x10] sm:$0xff] }
  0x2a   :  { %1986 = vmatprep.subr.bf16.mxu1 %v2088_v0  ;;  %v24_v0 = vld [vmem:[%s2883_s1 + $0x18] sm:$0xff] }
  0x2b   :  { %974 = vmatmul.mubr.bf16.gmra.mrb[4].mxu0 %v1638_v51  ;;  %v2108_v51 = vld [vmem:[%s2882_s0 + $0x1f8] sm:$0xff]  }
  0x2c   :  { %1071 = vmatmul.mubr.bf16.gmra.mrb[4].mxu1 %v1640_v53  ;;  %981 = vmatprep.mubr.bf16.mxu0 %v1647_v60  ;;  %v2109_v53 = vld [vmem:[%s2882_s0 + $0x1b8] sm:$0xff]   ;;  %v1687_v60 = vcombine.high %v77_v54, %v81_v55 }
  0x2d   :  { %1078 = vmatprep.mubr.bf16.mxu1 %v1649_v61  ;;  %1923 = vmatpush3.bf16.msra.mxu0 %v2087_v63  ;;  %v1689_v61 = vcombine.high %v78_v56, %v82_v57  ;;  %v27_v63 = vld [vmem:[%s2883_s1 + $0x30] sm:$0xff]  ;;  %v80_v56 = vld [vmem:[%s2883_s1 + $0x1d8] sm:$0xff] }
  0x2e   :  { %1987 = vmatpush3.bf16.msra.mxu1 %v2089_v1  ;;  %1924 = vmatprep.subr.bf16.mxu0 %v2090_v10  ;;  %v28_v1 = vld [vmem:[%s2883_s1 + $0x38] sm:$0xff]  ;;  %v1635_v4 = vcombine.high %v23_v62, %v27_v63  ;;  %v1634_v10 = vcombine.low %v23_v62, %v27_v63 }
  0x2f   :  { %1988 = vmatprep.subr.bf16.mxu1 %v2092_v12  ;;  %v1637_v5 = vcombine.high %v24_v0, %v28_v1  ;;  %v84_v57 = vld [vmem:[%s2883_s1 + $0x1f8] sm:$0xff] }
  0x30   :  { %v1692_v63 = vcombine.low %v80_v56, %v84_v57 }
  0x31   :  { %1925 = vmatpush3.bf16.msra.mxu0 %v2091_v11  ;;  %v1636_v11 = vcombine.low %v24_v0, %v28_v1 }
  0x32   :  { %1989 = vmatpush3.bf16.msra.mxu1 %v2093_v13  ;;  %1926 = vmatprep.subr.bf16.mxu0 %v2094_v18 }
  0x33   :  { %982 = vmatmul.mubr.bf16.gmra.mrb[8].mxu0 %v1646_v2  ;;  %1990 = vmatprep.subr.bf16.mxu1 %v2096_v23  ;;  %v1686_v2 = vcombine.low %v77_v54, %v81_v55  ;;  %v51_v23 = vld [vmem:[%s2883_s1 + $0xf0] sm:$0xff] }
  0x34   :  { %1079 = vmatmul.mubr.bf16.gmra.mrb[8].mxu1 %v1648_v6  ;;  %989 = vmatprep.mubr.bf16.mxu0 %v1655_v7  ;;  %v31_v6 = vld [vmem:[%s2883_s1 + $0x50] sm:$0xff] }
  0x35   :  { %1086 = vmatprep.mubr.bf16.mxu1 %v1657_v9  ;;  %1927 = vmatpush3.bf16.msra.mxu0 %v2095_v20  ;;  %v35_v7 = vld [vmem:[%s2883_s1 + $0x70] sm:$0xff]  ;;  %v36_v9 = vld [vmem:[%s2883_s1 + $0x78] sm:$0xff]  ;;  %v1651_v20 = vcombine.high %v39_v14, %v43_v15 }
  0x36   :  { %1991 = vmatpush3.bf16.msra.mxu1 %v2097_v25  ;;  %1928 = vmatprep.subr.bf16.mxu0 %v2098_v28  ;;  %v1643_v12 = vcombine.high %v31_v6, %v35_v7  ;;  %v1645_v13 = vcombine.high %v32_v8, %v36_v9  ;;  %v1642_v18 = vcombine.low %v31_v6, %v35_v7  ;;  %v52_v25 = vld [vmem:[%s2883_s1 + $0xf8] sm:$0xff]  ;;  %v79_v54 = vld [vmem:[%s2883_s1 + $0x1d0] sm:$0xff] }
  0x37   :  { %1992 = vmatprep.subr.bf16.mxu1 %v2100_v32  ;;  %v56_v32 = vld [vmem:[%s2883_s1 + $0x118] sm:$0xff]  ;;  %v83_v55 = vld [vmem:[%s2883_s1 + $0x1f0] sm:$0xff] }
  0x38   :  { %v1690_v62 = vcombine.low %v79_v54, %v83_v55 }
  0x39   :  { %1929 = vmatpush3.bf16.msra.mxu0 %v2099_v31  ;;  %v59_v31 = vld [vmem:[%s2883_s1 + $0x130] sm:$0xff] }
  0x3a   :  { %1993 = vmatpush3.bf16.msra.mxu1 %v2101_v33  ;;  %1930 = vmatprep.subr.bf16.mxu0 %v2102_v38  ;;  %v60_v33 = vld [vmem:[%s2883_s1 + $0x138] sm:$0xff]  ;;  %v63_v38 = vld [vmem:[%s2883_s1 + $0x150] sm:$0xff]  ;;  %v1666_v42 = vcombine.low %v55_v30, %v59_v31 }
  0x3b   :  { %990 = vmatmul.mubr.bf16.gmra.mrb[12].mxu0 %v1654_v19  ;;  %1994 = vmatprep.subr.bf16.mxu1 %v2104_v40  ;;  %v1644_v19 = vcombine.low %v32_v8, %v36_v9  ;;  %v64_v40 = vld [vmem:[%s2883_s1 + $0x158] sm:$0xff]  ;;  %v214_v9 = vld [vmem:[%s2884_s2 + $0x8] sm:$0xff] }
  0x3c   :  { %1087 = vmatmul.mubr.bf16.gmra.mrb[12].mxu1 %v1656_v21  ;;  %997 = vmatprep.mubr.bf16.mxu0 %v1663_v22  ;;  %v1653_v21 = vcombine.high %v40_v16, %v44_v17  ;;  %v47_v22 = vld [vmem:[%s2883_s1 + $0xd0] sm:$0xff]  ;;  %v1677_v45 = vcombine.high %v64_v40, %v68_v41 }
  0x3d   :  { %1094 = vmatprep.mubr.bf16.mxu1 %v1665_v24  ;;  %1931 = vmatpush3.bf16.msra.mxu0 %v2103_v39  ;;  %v48_v24 = vld [vmem:[%s2883_s1 + $0xd8] sm:$0xff]  ;;  %v1659_v28 = vcombine.high %v47_v22, %v51_v23  ;;  %v67_v39 = vld [vmem:[%s2883_s1 + $0x170] sm:$0xff] }
  0x3e   :  { %1995 = vmatpush3.bf16.msra.mxu1 %v2105_v43  ;;  %1932 = vmatprep.subr.bf16.mxu0 %v2106_v46  ;;  %v1661_v29 = vcombine.high %v48_v24, %v52_v25  ;;  %v1668_v43 = vcombine.low %v56_v32, %v60_v33  ;;  %v1675_v44 = vcombine.high %v63_v38, %v67_v39  ;;  %v71_v46 = vld [vmem:[%s2883_s1 + $0x190] sm:$0xff] }
  0x3f   :  { %1996 = vmatprep.subr.bf16.mxu1 %v2108_v51  ;;  %v1676_v51 = vcombine.low %v64_v40, %v68_v41 }
  0x41   :  { %1933 = vmatpush3.bf16.msra.mxu0 %v2107_v48  ;;  %v72_v48 = vld [vmem:[%s2883_s1 + $0x198] sm:$0xff] }
  0x42   :  { %1997 = vmatpush3.bf16.msra.mxu1 %v2109_v53 }
  0x43   :  { %998 = vmatmul.mubr.bf16.gmra.mrb[16].mxu0 %v1662_v34  ;;  %v1658_v34 = vcombine.low %v47_v22, %v51_v23 }
  0x44   :  { %1095 = vmatmul.mubr.bf16.gmra.mrb[16].mxu1 %v1664_v35  ;;  %1005 = vmatprep.mubr.bf16.mxu0 %v1671_v36  ;;  %v1660_v35 = vcombine.low %v48_v24, %v52_v25  ;;  %v1667_v36 = vcombine.high %v55_v30, %v59_v31 }
  0x45   :  { %1102 = vmatprep.mubr.bf16.mxu1 %v1673_v37  ;;  %v1669_v37 = vcombine.high %v56_v32, %v60_v33 }
  0x4b   :  { %1006 = vmatmul.mubr.bf16.gmra.mrb[20].mxu0 %v1670_v47  ;;  %v75_v47 = vld [vmem:[%s2883_s1 + $0x1b0] sm:$0xff] }
  0x4c   :  { %1103 = vmatmul.mubr.bf16.gmra.mrb[20].mxu1 %v1672_v49  ;;  %1013 = vmatprep.mubr.bf16.mxu0 %v1679_v50  ;;  %v76_v49 = vld [vmem:[%s2883_s1 + $0x1b8] sm:$0xff]  ;;  %v1674_v50 = vcombine.low %v63_v38, %v67_v39  ;;  %v217_v38 = vld [vmem:[%s2884_s2 + $0x20] sm:$0xff] }
  0x4d   :  { %1110 = vmatprep.mubr.bf16.mxu1 %v1681_v52  ;;  %v1683_v52 = vcombine.high %v71_v46, %v75_v47  ;;  %v1685_v53 = vcombine.high %v72_v48, %v76_v49 }
  0x53   :  { %1014 = vmatmul.mubr.bf16.gmra.mrb[24].mxu0 %v1678_v58  ;;  %v1682_v58 = vcombine.low %v71_v46, %v75_v47 }
  0x54   :  { %1111 = vmatmul.mubr.bf16.gmra.mrb[24].mxu1 %v1680_v59  ;;  %1021 = vmatprep.mubr.bf16.mxu0 %v1687_v60  ;;  %v1684_v59 = vcombine.low %v72_v48, %v76_v49  ;;  %v1691_v60 = vcombine.high %v79_v54, %v83_v55 }
  0x55   :  { %1118 = vmatprep.mubr.bf16.mxu1 %v1689_v61  ;;  %v1693_v61 = vcombine.high %v80_v56, %v84_v57  ;;  %v219_v56 = vld [vmem:[%s2884_s2 + $0x30] sm:$0xff] }
  0x5b   :  { %1022 = vmatmul.mubr.bf16.gmra.mrb[28].mxu0 %v1686_v2  ;;  %v213_v2 = vld [vmem:[%s2884_s2] sm:$0xff] }
  0x5c   :  { %1119 = vmatmul.mubr.bf16.gmra.mrb[28].mxu1 %v1688_v3  ;;  %1159 = vmatprep.mubr.bf16.mxu0 %v1635_v4 }
  0x5d   :  { %1256 = vmatprep.mubr.bf16.mxu1 %v1637_v5 }
  0x63   :  { %1160 = vmatmul.mubr.bf16.vlgmr.msra.gmra.mrb[32].mxu0 %v1634_v10 }
  0x64   :  { %1257 = vmatmul.mubr.bf16.vlgmr.msra.gmra.mrb[32].mxu1 %v1636_v11  ;;  %1167 = vmatprep.mubr.bf16.mxu0 %v1643_v12 }
  0x65   :  { %1264 = vmatprep.mubr.bf16.mxu1 %v1645_v13 }
  0x6b   :  { %1168 = vmatmul.mubr.bf16.gmra.mrb[36].mxu0 %v1642_v18 }
  0x6c   :  { %1265 = vmatmul.mubr.bf16.gmra.mrb[36].mxu1 %v1644_v19  ;;  %1175 = vmatprep.mubr.bf16.mxu0 %v1651_v20  ;;  %v215_v20 = vld [vmem:[%s2884_s2 + $0x10] sm:$0xff] }
  0x6d   :  { %1272 = vmatprep.mubr.bf16.mxu1 %v1653_v21 }
  0x73   :  { %1176 = vmatmul.mubr.bf16.gmra.mrb[40].mxu0 %v1650_v26 }
  0x74   :  { %1273 = vmatmul.mubr.bf16.gmra.mrb[40].mxu1 %v1652_v27  ;;  %1183 = vmatprep.mubr.bf16.mxu0 %v1659_v28  ;;  %v216_v27 = vld [vmem:[%s2884_s2 + $0x18] sm:$0xff] }
  0x75   :  { %1280 = vmatprep.mubr.bf16.mxu1 %v1661_v29 }
  0x7b   :  { %1184 = vmatmul.mubr.bf16.gmra.mrb[44].mxu0 %v1658_v34 }
  0x7c   :  { %1281 = vmatmul.mubr.bf16.gmra.mrb[44].mxu1 %v1660_v35  ;;  %1191 = vmatprep.mubr.bf16.mxu0 %v1667_v36 }
  0x7d   :  { %1288 = vmatprep.mubr.bf16.mxu1 %v1669_v37 }
  0x83   :  { %1192 = vmatmul.mubr.bf16.gmra.mrb[48].mxu0 %v1666_v42 }
  0x84   :  { %1289 = vmatmul.mubr.bf16.gmra.mrb[48].mxu1 %v1668_v43  ;;  %1199 = vmatprep.mubr.bf16.mxu0 %v1675_v44 }
  0x85   :  { %1296 = vmatprep.mubr.bf16.mxu1 %v1677_v45  ;;  %v218_v45 = vld [vmem:[%s2884_s2 + $0x28] sm:$0xff] }
  0x8b   :  { %1200 = vmatmul.mubr.bf16.gmra.mrb[52].mxu0 %v1674_v50 }
  0x8c   :  { %1297 = vmatmul.mubr.bf16.gmra.mrb[52].mxu1 %v1676_v51  ;;  %1207 = vmatprep.mubr.bf16.mxu0 %v1683_v52 }
  0x8d   :  { %1304 = vmatprep.mubr.bf16.mxu1 %v1685_v53 }
  0x93   :  { %1208 = vmatmul.mubr.bf16.gmra.mrb[56].mxu0 %v1682_v58 }
  0x94   :  { %1305 = vmatmul.mubr.bf16.gmra.mrb[56].mxu1 %v1684_v59  ;;  %1215 = vmatprep.mubr.bf16.mxu0 %v1691_v60 }
  0x95   :  { %1312 = vmatprep.mubr.bf16.mxu1 %v1693_v61 }
  0x9b   :  { %1216 = vmatmul.mubr.bf16.gmra.mrb[60].mxu0 %v1690_v62 }
  0x9c   :  { %1313 = vmatmul.mubr.bf16.gmra.mrb[60].mxu1 %v1692_v63  ;;  %v220_v63 = vld [vmem:[%s2884_s2 + $0x38] sm:$0xff] }
  0xf6   :  { %v1806_v0 = vpop.f32.mrb[0].mxu0 }
  0xf7   :  { %v1870_v1 = vpop.f32.mrb[0].mxu1  ;;  %v1807_v3 = vpop.f32.mrb[1].mxu0 }
  0xf8   :  { %v1808_v4 = vadd.f32 %v1807_v3, %v1806_v0  ;;  %v1871_v5 = vpop.f32.mrb[1].mxu1  ;;  %v1809_v6 = vpop.f32.mrb[2].mxu0 }
  0xf9   :  { %v1872_v7 = vadd.f32 %v1871_v5, %v1870_v1  ;;  %v1873_v8 = vpop.f32.mrb[2].mxu1  ;;  %v1810_v10 = vpop.f32.mrb[3].mxu0 }
  0xfa   :  { %v968_v11 = vadd.f32 %v1808_v4, %v213_v2  ;;  %v1811_v12 = vadd.f32 %v1810_v10, %v1809_v6  ;;  %v1874_v13 = vpop.f32.mrb[3].mxu1  ;;  %v221_v10 = vld [vmem:[%s2884_s2 + $0x40] sm:$0xff] }
  0xfb   :  { %v1875_v14 = vadd.f32 %v1874_v13, %v1873_v8 }
  0xfc   :  { %v2562_v15 = vadd.f32 %v1872_v7, %v968_v11  ;;  %v971_v16 = vadd.f32 %v1811_v12, %v214_v9 }
  0xfe   :  { %v2564_v17 = vadd.f32 %v1875_v14, %v971_v16  ;;  %v1812_v18 = vpop.f32.mrb[4].mxu0 }
  0xff   :  { %v1876_v19 = vpop.f32.mrb[4].mxu1  ;;  %v1813_v21 = vpop.f32.mrb[5].mxu0 }
 0x100   :  { %v1814_v22 = vadd.f32 %v1813_v21, %v1812_v18  ;;  %v1877_v23 = vpop.f32.mrb[5].mxu1  ;;  %v1815_v24 = vpop.f32.mrb[6].mxu0 }
 0x101   :  { %v1878_v25 = vadd.f32 %v1877_v23, %v1876_v19  ;;  %v1879_v26 = vpop.f32.mrb[6].mxu1  ;;  %v1816_v28 = vpop.f32.mrb[7].mxu0  ;;  %v222_v19 = vld [vmem:[%s2884_s2 + $0x48] sm:$0xff] }
 0x102   :  { %v976_v29 = vadd.f32 %v1814_v22, %v215_v20  ;;  %v1817_v30 = vadd.f32 %v1816_v28, %v1815_v24  ;;  %v1880_v31 = vpop.f32.mrb[7].mxu1 }
 0x103   :  { %v1881_v32 = vadd.f32 %v1880_v31, %v1879_v26 }
 0x104   :  { %v2572_v33 = vadd.f32 %v1878_v25, %v976_v29  ;;  %v979_v34 = vadd.f32 %v1817_v30, %v216_v27  ;;  %v223_v30 = vld [vmem:[%s2884_s2 + $0x50] sm:$0xff] }
 0x106   :  { %v2574_v35 = vadd.f32 %v1881_v32, %v979_v34  ;;  %v1818_v36 = vpop.f32.mrb[8].mxu0 }
 0x107   :  { %v1882_v37 = vpop.f32.mrb[8].mxu1  ;;  %v1819_v39 = vpop.f32.mrb[9].mxu0 }
 0x108   :  { %v1820_v40 = vadd.f32 %v1819_v39, %v1818_v36  ;;  %v1883_v41 = vpop.f32.mrb[9].mxu1  ;;  %v1821_v42 = vpop.f32.mrb[10].mxu0  ;;  %v224_v39 = vld [vmem:[%s2884_s2 + $0x58] sm:$0xff] }
 0x109   :  { %v1884_v43 = vadd.f32 %v1883_v41, %v1882_v37  ;;  %v1885_v44 = vpop.f32.mrb[10].mxu1  ;;  %v1822_v46 = vpop.f32.mrb[11].mxu0 }
 0x10a   :  { %v984_v47 = vadd.f32 %v1820_v40, %v217_v38  ;;  %v1823_v48 = vadd.f32 %v1822_v46, %v1821_v42  ;;  %v1886_v49 = vpop.f32.mrb[11].mxu1 }
 0x10b   :  { %v1887_v50 = vadd.f32 %v1886_v49, %v1885_v44 }
 0x10c   :  { %v2582_v51 = vadd.f32 %v1884_v43, %v984_v47  ;;  %v987_v52 = vadd.f32 %v1823_v48, %v218_v45 }
 0x10e   :  { %v2584_v53 = vadd.f32 %v1887_v50, %v987_v52  ;;  %v1824_v54 = vpop.f32.mrb[12].mxu0  ;;  %v225_v50 = vld [vmem:[%s2884_s2 + $0x60] sm:$0xff] }
 0x10f   :  { %v1888_v55 = vpop.f32.mrb[12].mxu1  ;;  %v1825_v57 = vpop.f32.mrb[13].mxu0 }
 0x110   :  { %v1826_v58 = vadd.f32 %v1825_v57, %v1824_v54  ;;  %v1889_v59 = vpop.f32.mrb[13].mxu1  ;;  %v1827_v60 = vpop.f32.mrb[14].mxu0 }
 0x111   :  { %v1890_v61 = vadd.f32 %v1889_v59, %v1888_v55  ;;  %v1891_v62 = vpop.f32.mrb[14].mxu1  ;;  %v1828_v0 = vpop.f32.mrb[15].mxu0  ;;  %v226_v59 = vld [vmem:[%s2884_s2 + $0x68] sm:$0xff] }
 0x112   :  { %v992_v1 = vadd.f32 %v1826_v58, %v219_v56  ;;  %v1829_v2 = vadd.f32 %v1828_v0, %v1827_v60  ;;  %v1892_v3 = vpop.f32.mrb[15].mxu1 }
 0x113   :  { %v1893_v4 = vadd.f32 %v1892_v3, %v1891_v62 }
 0x114   :  { %v2592_v5 = vadd.f32 %v1890_v61, %v992_v1  ;;  %v995_v6 = vadd.f32 %v1829_v2, %v220_v63 }
 0x116   :  { %v2594_v7 = vadd.f32 %v1893_v4, %v995_v6  ;;  %v1830_v8 = vpop.f32.mrb[16].mxu0 }
 0x117   :  { %v1894_v9 = vpop.f32.mrb[16].mxu1  ;;  %v1831_v11 = vpop.f32.mrb[17].mxu0 }
 0x118   :  { %v1832_v12 = vadd.f32 %v1831_v11, %v1830_v8  ;;  %v1895_v13 = vpop.f32.mrb[17].mxu1  ;;  %v1833_v14 = vpop.f32.mrb[18].mxu0  ;;  %v227_v8 = vld [vmem:[%s2884_s2 + $0x70] sm:$0xff] }
 0x119   :  { %v1896_v16 = vadd.f32 %v1895_v13, %v1894_v9  ;;  %v1897_v18 = vpop.f32.mrb[18].mxu1  ;;  %v1834_v20 = vpop.f32.mrb[19].mxu0 }
 0x11a   :  { %v1000_v21 = vadd.f32 %v1832_v12, %v221_v10  ;;  %v1835_v22 = vadd.f32 %v1834_v20, %v1833_v14  ;;  %v1898_v23 = vpop.f32.mrb[19].mxu1 }
 0x11b   :  { %v1899_v24 = vadd.f32 %v1898_v23, %v1897_v18 }
 0x11c   :  { %v2602_v25 = vadd.f32 %v1896_v16, %v1000_v21  ;;  %v1003_v26 = vadd.f32 %v1835_v22, %v222_v19  ;;  %v228_v16 = vld [vmem:[%s2884_s2 + $0x78] sm:$0xff] }
 0x11e   :  { %v2604_v27 = vadd.f32 %v1899_v24, %v1003_v26  ;;  %v1836_v28 = vpop.f32.mrb[20].mxu0 }
 0x11f   :  { %v1900_v29 = vpop.f32.mrb[20].mxu1  ;;  %v1837_v31 = vpop.f32.mrb[21].mxu0 }
 0x120   :  { %v1838_v32 = vadd.f32 %v1837_v31, %v1836_v28  ;;  %v1901_v34 = vpop.f32.mrb[21].mxu1  ;;  %v1839_v36 = vpop.f32.mrb[22].mxu0 }
 0x121   :  { %v1902_v37 = vadd.f32 %v1901_v34, %v1900_v29  ;;  %v1903_v38 = vpop.f32.mrb[22].mxu1  ;;  %v1840_v40 = vpop.f32.mrb[23].mxu0 }
 0x122   :  { %v1008_v41 = vadd.f32 %v1838_v32, %v223_v30  ;;  %v1841_v42 = vadd.f32 %v1840_v40, %v1839_v36  ;;  %v1904_v43 = vpop.f32.mrb[23].mxu1 }
 0x123   :  { %v1905_v44 = vadd.f32 %v1904_v43, %v1903_v38 }
 0x124   :  { %v2612_v45 = vadd.f32 %v1902_v37, %v1008_v41  ;;  %v1011_v46 = vadd.f32 %v1841_v42, %v224_v39 }
 0x126   :  { %v2614_v47 = vadd.f32 %v1905_v44, %v1011_v46  ;;  %v1842_v48 = vpop.f32.mrb[24].mxu0 }
 0x127   :  { %v1906_v49 = vpop.f32.mrb[24].mxu1  ;;  %v1843_v52 = vpop.f32.mrb[25].mxu0 }
 0x128   :  { %v1844_v54 = vadd.f32 %v1843_v52, %v1842_v48  ;;  %v1907_v55 = vpop.f32.mrb[25].mxu1  ;;  %v1845_v56 = vpop.f32.mrb[26].mxu0 }
 0x129   :  { %v1908_v57 = vadd.f32 %v1907_v55, %v1906_v49  ;;  %v1909_v58 = vpop.f32.mrb[26].mxu1  ;;  %v1846_v60 = vpop.f32.mrb[27].mxu0 }
 0x12a   :  { %v1016_v61 = vadd.f32 %v1844_v54, %v225_v50  ;;  %v1847_v62 = vadd.f32 %v1846_v60, %v1845_v56  ;;  %v1910_v63 = vpop.f32.mrb[27].mxu1 }
 0x12b   :  { %v1911_v0 = vadd.f32 %v1910_v63, %v1909_v58 }
 0x12c   :  { %v2622_v1 = vadd.f32 %v1908_v57, %v1016_v61  ;;  %v1019_v2 = vadd.f32 %v1847_v62, %v226_v59 }
 0x12e   :  { %v2624_v3 = vadd.f32 %v1911_v0, %v1019_v2  ;;  %v1848_v4 = vpop.f32.mrb[28].mxu0 }
 0x12f   :  { %v1912_v6 = vpop.f32.mrb[28].mxu1  ;;  %v1849_v9 = vpop.f32.mrb[29].mxu0 }
 0x130   :  { %v1850_v10 = vadd.f32 %v1849_v9, %v1848_v4  ;;  %v1913_v11 = vpop.f32.mrb[29].mxu1  ;;  %v1851_v12 = vpop.f32.mrb[30].mxu0 }
 0x131   :  { %v1914_v13 = vadd.f32 %v1913_v11, %v1912_v6  ;;  %v1915_v14 = vpop.f32.mrb[30].mxu1  ;;  %v1852_v18 = vpop.f32.mrb[31].mxu0 }
 0x132   :  { %v1024_v19 = vadd.f32 %v1850_v10, %v227_v8  ;;  %v1853_v20 = vadd.f32 %v1852_v18, %v1851_v12  ;;  %v1916_v21 = vpop.f32.mrb[31].mxu1 }
 0x133   :  { %v1917_v22 = vadd.f32 %v1916_v21, %v1915_v14 }
 0x134   :  { %v2632_v23 = vadd.f32 %v1914_v13, %v1024_v19  ;;  %v1027_v24 = vadd.f32 %v1853_v20, %v228_v16 }
 0x136   :  { %v2634_v26 = vadd.f32 %v1917_v22, %v1027_v24  ;;  %v1934_v28 = vpop.f32.mrb[32].mxu0 }
 0x137   :  { %v1998_v29 = vpop.f32.mrb[32].mxu1  ;;  %v1935_v30 = vpop.f32.mrb[33].mxu0 }
 0x138   :  { %v1936_v31 = vadd.f32 %v1935_v30, %v1934_v28  ;;  %v1999_v32 = vpop.f32.mrb[33].mxu1  ;;  %v1937_v34 = vpop.f32.mrb[34].mxu0 }
 0x139   :  { %v2000_v36 = vadd.f32 %v1999_v32, %v1998_v29  ;;  %v2001_v37 = vpop.f32.mrb[34].mxu1  ;;  %v1938_v38 = vpop.f32.mrb[35].mxu0  ;;  %v1385_v32 = vld [vmem:[%s2885_s3] sm:$0xff] }
 0x13a   :  { %v1162_v39 = vadd.f32 %v1936_v31, %v2562_v15  ;;  %v1939_v40 = vadd.f32 %v1938_v38, %v1937_v34  ;;  %v2002_v41 = vpop.f32.mrb[35].mxu1 }
 0x13b   :  { %v2003_v42 = vadd.f32 %v2002_v41, %v2001_v37 }
 0x13c   :  { %v1259_v43 = vadd.f32 %v2000_v36, %v1162_v39  ;;  %v1165_v44 = vadd.f32 %v1939_v40, %v2564_v17  ;;  %v1386_v39 = vld [vmem:[%s2885_s3 + $0x8] sm:$0xff] }
 0x13e   :  { %v2638_v46 = vsub.f32 %v1259_v43, %v1259_v43  ;;  %v1262_v48 = vadd.f32 %v2003_v42, %v1165_v44  ;;  %v1940_v49 = vpop.f32.mrb[36].mxu0 }
 0x13f   :  { %v2004_v50 = vpop.f32.mrb[36].mxu1  ;;  %v1941_v52 = vpop.f32.mrb[37].mxu0 }
 0x140   :  { %v1353_v54 = vmul.f32 %v2638_v46, %v2638_v46  ;;  %v2642_v55 = vsub.f32 %v1262_v48, %v1262_v48  ;;  %v1942_v56 = vadd.f32 %v1941_v52, %v1940_v49  ;;  %v2005_v57 = vpop.f32.mrb[37].mxu1  ;;  %v1943_v15 = vpop.f32.mrb[38].mxu0  ;;  %v1465_v49 = vld [vmem:[%s2886_s4] sm:$0xff] }
 0x141   :  { %v2006_v58 = vadd.f32 %v2005_v57, %v2004_v50  ;;  %v2007_v59 = vpop.f32.mrb[38].mxu1  ;;  %v1944_v60 = vpop.f32.mrb[39].mxu0 }
 0x142   :  { %v1401_v61 = vadd.f32 1e-05, %v1353_v54  ;;  %v1354_v17 = vmul.f32 %v2642_v55, %v2642_v55  ;;  %v1170_v62 = vadd.f32 %v1942_v56, %v2572_v33  ;;  %v1945_v63 = vadd.f32 %v1944_v60, %v1943_v15  ;;  %v2008_v0 = vpop.f32.mrb[39].mxu1 }
 0x143   :  { %v2009_v2 = vadd.f32 %v2008_v0, %v2007_v59 }
 0x144   :  { %2110 = vrsqrt.f32 %v1401_v61  ;;  %v1402_v4 = vadd.f32 1e-05, %v1354_v17  ;;  %v1267_v6 = vadd.f32 %v2006_v58, %v1170_v62  ;;  %v1173_v8 = vadd.f32 %v1945_v63, %v2574_v35  ;;  %v1466_v61 = vld [vmem:[%s2886_s4 + $0x8] sm:$0xff] }
 0x146   :  { %2112 = vrsqrt.f32 %v1402_v4  ;;  %v2648_v9 = vsub.f32 %v1267_v6, %v1267_v6  ;;  %v1270_v10 = vadd.f32 %v2009_v2, %v1173_v8  ;;  %v1946_v11 = vpop.f32.mrb[40].mxu0  ;;  %v1387_v8 = vld [vmem:[%s2885_s3 + $0x10] sm:$0xff] }
 0x147   :  { %v2010_v12 = vpop.f32.mrb[40].mxu1  ;;  %v1947_v13 = vpop.f32.mrb[41].mxu0 }
 0x148   :  { %v1355_v14 = vmul.f32 %v2648_v9, %v2648_v9  ;;  %v2652_v16 = vsub.f32 %v1270_v10, %v1270_v10  ;;  %v1948_v33 = vadd.f32 %v1947_v13, %v1946_v11  ;;  %v2011_v18 = vpop.f32.mrb[41].mxu1  ;;  %v1949_v19 = vpop.f32.mrb[42].mxu0 }
 0x149   :  { %v2012_v20 = vadd.f32 %v2011_v18, %v2010_v12  ;;  %v2013_v21 = vpop.f32.mrb[42].mxu1  ;;  %v1950_v22 = vpop.f32.mrb[43].mxu0 }
 0x14a   :  { %v1403_v24 = vadd.f32 1e-05, %v1355_v14  ;;  %v1356_v35 = vmul.f32 %v2652_v16, %v2652_v16  ;;  %v1178_v28 = vadd.f32 %v1948_v33, %v2582_v51  ;;  %v1951_v29 = vadd.f32 %v1950_v22, %v1949_v19  ;;  %v2014_v30 = vpop.f32.mrb[43].mxu1 }
 0x14b   :  { %v2015_v31 = vadd.f32 %v2014_v30, %v2013_v21 }
 0x14c   :  { %2114 = vrsqrt.f32 %v1403_v24  ;;  %v1404_v34 = vadd.f32 1e-05, %v1356_v35  ;;  %v1275_v36 = vadd.f32 %v2012_v20, %v1178_v28  ;;  %v1181_v37 = vadd.f32 %v1951_v29, %v2584_v53  ;;  %v1467_v29 = vld [vmem:[%s2886_s4 + $0x10] sm:$0xff] }
 0x14e   :  { %v2111_v38 = vpop.eup %2110  ;;  %2116 = vrsqrt.f32 %v1404_v34  ;;  %v2664_v40 = vsub.f32 %v1275_v36, %v1275_v36  ;;  %v1278_v51 = vadd.f32 %v2015_v31, %v1181_v37  ;;  %v1952_v41 = vpop.f32.mrb[44].mxu0 }
 0x14f   :  { %v1433_v42 = vmul.f32 %v2111_v38, %v1385_v32  ;;  %v2016_v43 = vpop.f32.mrb[44].mxu1  ;;  %v1953_v44 = vpop.f32.mrb[45].mxu0 }
 0x150   :  { %v2113_v48 = vpop.eup %2112  ;;  %v1357_v53 = vmul.f32 %v2664_v40, %v2664_v40  ;;  %v2671_v50 = vsub.f32 %v1278_v51, %v1278_v51  ;;  %v1954_v52 = vadd.f32 %v1953_v44, %v1952_v41  ;;  %v2017_v54 = vpop.f32.mrb[45].mxu1  ;;  %v1468_v44 = vld [vmem:[%s2886_s4 + $0x18] sm:$0xff] }
 0x151   :  { %v1955_v56 = vpop.f32.mrb[46].mxu0  ;;  %v1449_v57 = vmul.f32 %v1433_v42, %v2638_v46  ;;  %v1434_v15 = vmul.f32 %v2113_v48, %v1386_v39  ;;  %v2018_v58 = vadd.f32 %v2017_v54, %v2016_v43  ;;  %v2019_v59 = vpop.f32.mrb[46].mxu1 }
 0x152   :  { %v1956_v60 = vpop.f32.mrb[47].mxu0  ;;  %v1405_v17 = vadd.f32 1e-05, %v1357_v53  ;;  %v1358_v62 = vmul.f32 %v2671_v50, %v2671_v50  ;;  %v1186_v63 = vadd.f32 %v1954_v52, %v2592_v5  ;;  %v2020_v2 = vpop.f32.mrb[47].mxu1  ;;  %v1388_v5 = vld [vmem:[%s2885_s3 + $0x18] sm:$0xff] }
 0x153   :  { %v1957_v0 = vadd.f32 %v1956_v60, %v1955_v56  ;;  %v1481_v4 = vadd.f32 %v1465_v49, %v1449_v57  ;;  %v1450_v6 = vmul.f32 %v1434_v15, %v2642_v55  ;;  %v2021_v46 = vadd.f32 %v2020_v2, %v2019_v59  ;;  %v1389_v15 = vld [vmem:[%s2885_s3 + $0x20] sm:$0xff] }
 0x154   :  { %2118 = vrsqrt.f32 %v1405_v17  ;;  %v1406_v10 = vadd.f32 1e-05, %v1358_v62  ;;  %v1283_v11 = vadd.f32 %v2018_v58, %v1186_v63  ;;  %v1390_v17 = vld [vmem:[%s2885_s3 + $0x28] sm:$0xff] }
 0x155   :  { %v1189_v12 = vadd.f32 %v1957_v0, %v2594_v7  ;;  %vm1497_vm0 = vcmp.ge.f32.partialorder %v1481_v4, 0.0  ;;  %v1513_v13 = vmul.f32 0.01, %v1481_v4  ;;  %v1482_v14 = vadd.f32 %v1466_v61, %v1450_v6 }
 0x156   :  { %v2115_v33 = vpop.eup %2114  ;;  %2120 = vrsqrt.f32 %v1406_v10  ;;  %v2688_v55 = vsub.f32 %v1283_v11, %v1283_v11  ;;  %v1958_v19 = vpop.f32.mrb[48].mxu0 }
 0x157   :  { %v1286_v18 = vadd.f32 %v2021_v46, %v1189_v12  ;;  %v1529_v20 = vsel %vm1497_vm0, %v1481_v4, %v1513_v13  ;;  %vm1498_vm2 = vcmp.ge.f32.partialorder %v1482_v14, 0.0  ;;  %v1514_v21 = vmul.f32 0.01, %v1482_v14  ;;  %v2022_v24 = vpop.f32.mrb[48].mxu1  ;;  %v1959_v7 = vpop.f32.mrb[49].mxu0 }
 0x158   :  { %v1435_v22 = vmul.f32 %v2115_v33, %v1387_v8  ;;  %v2117_v35 = vpop.eup %2116  ;;  %v1774_v28 = vpack.c.bf16 %v1529_v20, %v1529_v20  ;;  %v1359_v30 = vmul.f32 %v2688_v55, %v2688_v55  ;;  %v1960_v32 = vadd.f32 %v1959_v7, %v1958_v19  ;;  %v2023_v34 = vpop.f32.mrb[49].mxu1  ;;  %v1470_v7 = vld [vmem:[%s2886_s4 + $0x28] sm:$0xff] }
 0x159   :  { %v2695_v31 = vsub.f32 %v1286_v18, %v1286_v18  ;;  %v1961_v36 = vpop.f32.mrb[50].mxu0  ;;  %v1530_v37 = vsel %vm1498_vm2, %v1482_v14, %v1514_v21  ;;  %v1436_v39 = vmul.f32 %v2117_v35, %v1388_v5  ;;  %v2024_v51 = vadd.f32 %v2023_v34, %v2022_v24  ;;  %v2025_v41 = vpop.f32.mrb[50].mxu1 }
 0x15a   :  { %v1451_v38 = vmul.f32 %v1435_v22, %v2648_v9  ;;  %v1962_v42 = vpop.f32.mrb[51].mxu0  ;;  %1610 = vst.msk [vmem:[%s2887_s5] sm:$0xf] %vm1609_vm1, %v1774_v28  ;;  %v1775_v43 = vpack.c.bf16 %v1530_v37, %v1530_v37  ;;  %v1407_v48 = vadd.f32 1e-05, %v1359_v30  ;;  %v1194_v9 = vadd.f32 %v1960_v32, %v2602_v25  ;;  %v2026_v53 = vpop.f32.mrb[51].mxu1 }
 0x15b   :  { %v1360_v49 = vmul.f32 %v2695_v31, %v2695_v31  ;;  %v1452_v54 = vmul.f32 %v1436_v39, %v2652_v16  ;;  %v1963_v56 = vadd.f32 %v1962_v42, %v1961_v36  ;;  %v2027_v57 = vadd.f32 %v2026_v53, %v2025_v41  ;;  %v1391_v37 = vld [vmem:[%s2885_s3 + $0x30] sm:$0xff]  ;;  %v1392_v42 = vld [vmem:[%s2885_s3 + $0x38] sm:$0xff] }
 0x15c   :  { %v1483_v52 = vadd.f32 %v1467_v29, %v1451_v38  ;;  %1611 = vst.msk [vmem:[%s2887_s5 + $0x4] sm:$0xf] %vm1609_vm1, %v1775_v43  ;;  %2122 = vrsqrt.f32 %v1407_v48  ;;  %v1291_v59 = vadd.f32 %v2024_v51, %v1194_v9 }
 0x15d   :  { %v1408_v58 = vadd.f32 1e-05, %v1360_v49  ;;  %v1484_v60 = vadd.f32 %v1468_v44, %v1452_v54  ;;  %v1197_v61 = vadd.f32 %v1963_v56, %v2604_v27  ;;  %v1469_v27 = vld [vmem:[%s2886_s4 + $0x20] sm:$0xff] }
 0x15e   :  { %vm1499_vm3 = vcmp.ge.f32.partialorder %v1483_v52, 0.0  ;;  %v1515_v25 = vmul.f32 0.01, %v1483_v52  ;;  %v2119_v16 = vpop.eup %2118  ;;  %v2720_v62 = vsub.f32 %v1291_v59, %v1291_v59  ;;  %v1964_v63 = vpop.f32.mrb[52].mxu0 }
 0x15f   :  { %2124 = vrsqrt.f32 %v1408_v58  ;;  %vm1500_vm4 = vcmp.ge.f32.partialorder %v1484_v60, 0.0  ;;  %v1516_v2 = vmul.f32 0.01, %v1484_v60  ;;  %v1437_v4 = vmul.f32 %v2119_v16, %v1389_v15  ;;  %v2028_v6 = vpop.f32.mrb[52].mxu1  ;;  %v1965_v46 = vpop.f32.mrb[53].mxu0 }
 0x160   :  { %v1531_v0 = vsel %vm1499_vm3, %v1483_v52, %v1515_v25  ;;  %v2121_v8 = vpop.eup %2120  ;;  %v1361_v11 = vmul.f32 %v2720_v62, %v2720_v62  ;;  %v1294_v12 = vadd.f32 %v2027_v57, %v1197_v61  ;;  %v1966_v13 = vadd.f32 %v1965_v46, %v1964_v63  ;;  %v2029_v14 = vpop.f32.mrb[53].mxu1 }
 0x161   :  { %v1776_v10 = vpack.c.bf16 %v1531_v0, %v1531_v0  ;;  %v1967_v33 = vpop.f32.mrb[54].mxu0  ;;  %v1532_v5 = vsel %vm1500_vm4, %v1484_v60, %v1516_v2  ;;  %v1453_v18 = vmul.f32 %v1437_v4, %v2664_v40  ;;  %v1438_v19 = vmul.f32 %v2121_v8, %v1390_v17  ;;  %v2031_v21 = vpop.f32.mrb[54].mxu1  ;;  %v1472_v4 = vld [vmem:[%s2886_s4 + $0x38] sm:$0xff] }
 0x162   :  { %v2030_v20 = vadd.f32 %v2029_v14, %v2028_v6  ;;  %v1968_v22 = vpop.f32.mrb[55].mxu0  ;;  %v1777_v24 = vpack.c.bf16 %v1532_v5, %v1532_v5  ;;  %v1409_v35 = vadd.f32 1e-05, %v1361_v11  ;;  %v2735_v28 = vsub.f32 %v1294_v12, %v1294_v12  ;;  %v2032_v40 = vpop.f32.mrb[55].mxu1 }
 0x163   :  { %1612 = vst.msk [vmem:[%s2887_s5 + $0x8] sm:$0xf] %vm1609_vm1, %v1776_v10  ;;  %v1202_v29 = vadd.f32 %v1966_v13, %v2612_v45  ;;  %v1485_v30 = vadd.f32 %v1469_v27, %v1453_v18  ;;  %v1454_v32 = vmul.f32 %v1438_v19, %v2671_v50  ;;  %v1969_v34 = vadd.f32 %v1968_v22, %v1967_v33  ;;  %v1393_v13 = vld [vmem:[%s2885_s3 + $0x40] sm:$0xff] }
 0x164   :  { %v2033_v36 = vadd.f32 %v2032_v40, %v2031_v21  ;;  %1613 = vst.msk [vmem:[%s2887_s5 + $0xc] sm:$0xf] %vm1609_vm1, %v1777_v24  ;;  %2126 = vrsqrt.f32 %v1409_v35  ;;  %v1362_v38 = vmul.f32 %v2735_v28, %v2735_v28 }
 0x165   :  { %v1299_v45 = vadd.f32 %v2030_v20, %v1202_v29  ;;  %vm1501_vm5 = vcmp.ge.f32.partialorder %v1485_v30, 0.0  ;;  %v1517_v39 = vmul.f32 0.01, %v1485_v30  ;;  %v1486_v51 = vadd.f32 %v1470_v7, %v1454_v32  ;;  %v1394_v32 = vld [vmem:[%s2885_s3 + $0x48] sm:$0xff] }
 0x166   :  { %v1205_v50 = vadd.f32 %v1969_v34, %v2614_v47  ;;  %v2123_v41 = vpop.eup %2122  ;;  %v1410_v43 = vadd.f32 1e-05, %v1362_v38  ;;  %v1970_v48 = vpop.f32.mrb[56].mxu0  ;;  %v1471_v47 = vld [vmem:[%s2886_s4 + $0x30] sm:$0xff] }
 0x167   :  { %v2752_v44 = vsub.f32 %v1299_v45, %v1299_v45  ;;  %v1533_v49 = vsel %vm1501_vm5, %v1485_v30, %v1517_v39  ;;  %vm1502_vm6 = vcmp.ge.f32.partialorder %v1486_v51, 0.0  ;;  %v1518_v9 = vmul.f32 0.01, %v1486_v51  ;;  %v2034_v52 = vpop.f32.mrb[56].mxu1  ;;  %v1971_v54 = vpop.f32.mrb[57].mxu0  ;;  %v1473_v30 = vld [vmem:[%s2886_s4 + $0x40] sm:$0xff] }
 0x168   :  { %v1439_v53 = vmul.f32 %v2123_v41, %v1391_v37  ;;  %v1778_v57 = vpack.c.bf16 %v1533_v49, %v1533_v49  ;;  %2128 = vrsqrt.f32 %v1410_v43  ;;  %v1302_v58 = vadd.f32 %v2033_v36, %v1205_v50  ;;  %v2035_v59 = vpop.f32.mrb[57].mxu1  ;;  %v1973_v25 = vpop.f32.mrb[58].mxu0 }
 0x169   :  { %v2125_v56 = vpop.eup %2124  ;;  %v1363_v15 = vmul.f32 %v2752_v44, %v2752_v44  ;;  %v1534_v60 = vsel %vm1502_vm6, %v1486_v51, %v1518_v9  ;;  %v1972_v17 = vadd.f32 %v1971_v54, %v1970_v48  ;;  %v2037_v63 = vpop.f32.mrb[58].mxu1  ;;  %v2036_v8 = vadd.f32 %v2035_v59, %v2034_v52 }
 0x16a   :  { %v1455_v61 = vmul.f32 %v1439_v53, %v2688_v55  ;;  %v1440_v16 = vmul.f32 %v2125_v56, %v1392_v42  ;;  %v1974_v0 = vpop.f32.mrb[59].mxu0  ;;  %1614 = vst.msk [vmem:[%s2887_s5 + $0x10] sm:$0xf] %vm1609_vm1, %v1778_v57  ;;  %v1779_v2 = vpack.c.bf16 %v1534_v60, %v1534_v60  ;;  %v2767_v46 = vsub.f32 %v1302_v58, %v1302_v58  ;;  %v2038_v10 = vpop.f32.mrb[59].mxu1  ;;  %v1474_v57 = vld [vmem:[%s2886_s4 + $0x48] sm:$0xff] }
 0x16b   :  { %v1411_v6 = vadd.f32 1e-05, %v1363_v15  ;;  %v1210_v11 = vadd.f32 %v1972_v17, %v2622_v1  ;;  %v1975_v12 = vadd.f32 %v1974_v0, %v1973_v25  ;;  %v2039_v33 = vadd.f32 %v2038_v10, %v2037_v63 }
 0x16c   :  { %v1487_v55 = vadd.f32 %v1471_v47, %v1455_v61  ;;  %v1456_v27 = vmul.f32 %v1440_v16, %v2695_v31  ;;  %1615 = vst.msk [vmem:[%s2887_s5 + $0x14] sm:$0xf] %vm1609_vm1, %v1779_v2  ;;  %v1364_v14 = vmul.f32 %v2767_v46, %v2767_v46  ;;  %v1395_v47 = vld [vmem:[%s2885_s3 + $0x50] sm:$0xff] }
 0x16d   :  { %2130 = vrsqrt.f32 %v1411_v6  ;;  %v1307_v18 = vadd.f32 %v2036_v8, %v1210_v11  ;;  %v1213_v20 = vadd.f32 %v1975_v12, %v2624_v3  ;;  %v1475_v8 = vld [vmem:[%s2886_s4 + $0x50] sm:$0xff] }
 0x16e   :  { %vm1503_vm7 = vcmp.ge.f32.partialorder %v1487_v55, 0.0  ;;  %v1519_v5 = vmul.f32 0.01, %v1487_v55  ;;  %v1488_v31 = vadd.f32 %v1472_v4, %v1456_v27  ;;  %v2127_v1 = vpop.eup %2126  ;;  %v1412_v19 = vadd.f32 1e-05, %v1364_v14  ;;  %v1976_v21 = vpop.f32.mrb[60].mxu0 }
 0x16f   :  { %v1441_v7 = vmul.f32 %v2127_v1, %v1393_v13  ;;  %v2040_v35 = vpop.f32.mrb[60].mxu1  ;;  %v1977_v29 = vpop.f32.mrb[61].mxu0  ;;  %v2787_v34 = vsub.f32 %v1307_v18, %v1307_v18  ;;  %v1310_v3 = vadd.f32 %v2039_v33, %v1213_v20  ;;  %v1476_v18 = vld [vmem:[%s2886_s4 + $0x58] sm:$0xff]  ;;  %v1397_v20 = vld [vmem:[%s2885_s3 + $0x60] sm:$0xff] }
 0x170   :  { %v1535_v22 = vsel %vm1503_vm7, %v1487_v55, %v1519_v5  ;;  %vm1504_vm8 = vcmp.ge.f32.partialorder %v1488_v31, 0.0  ;;  %v1520_v24 = vmul.f32 0.01, %v1488_v31  ;;  %2132 = vrsqrt.f32 %v1412_v19  ;;  %v2041_v36 = vpop.f32.mrb[61].mxu1  ;;  %v1979_v37 = vpop.f32.mrb[62].mxu0 }
 0x171   :  { %v1780_v40 = vpack.c.bf16 %v1535_v22, %v1535_v22  ;;  %v1457_v45 = vmul.f32 %v1441_v7, %v2720_v62  ;;  %v1978_v39 = vadd.f32 %v1977_v29, %v1976_v21  ;;  %v2042_v51 = vadd.f32 %v2041_v36, %v2040_v35  ;;  %v2043_v50 = vpop.f32.mrb[62].mxu1  ;;  %v1980_v41 = vpop.f32.mrb[63].mxu0  ;;  %v1398_v35 = vld [vmem:[%s2885_s3 + $0x68] sm:$0xff] }
 0x172   :  { %v1536_v38 = vsel %vm1504_vm8, %v1488_v31, %v1520_v24  ;;  %v2129_v42 = vpop.eup %2128  ;;  %v1365_v48 = vmul.f32 %v2787_v34, %v2787_v34  ;;  %v2796_v49 = vsub.f32 %v1310_v3, %v1310_v3  ;;  %v1981_v9 = vadd.f32 %v1980_v41, %v1979_v37  ;;  %v2044_v53 = vpop.f32.mrb[63].mxu1 }
 0x173   :  { %1616 = vst.msk [vmem:[%s2887_s5 + $0x18] sm:$0xf] %vm1609_vm1, %v1780_v40  ;;  %v1781_v43 = vpack.c.bf16 %v1536_v38, %v1536_v38  ;;  %v1489_v52 = vadd.f32 %v1473_v30, %v1457_v45  ;;  %v1442_v62 = vmul.f32 %v2129_v42, %v1394_v32  ;;  %v1218_v54 = vadd.f32 %v1978_v39, %v2632_v23  ;;  %v1477_v30 = vld [vmem:[%s2886_s4 + $0x60] sm:$0xff]  ;;  %v1478_v38 = vld [vmem:[%s2886_s4 + $0x68] sm:$0xff] }
 0x174   :  { %v2045_v56 = vadd.f32 %v2044_v53, %v2043_v50  ;;  %v1413_v15 = vadd.f32 1e-05, %v1365_v48  ;;  %v1366_v58 = vmul.f32 %v2796_v49, %v2796_v49  ;;  %v1221_v23 = vadd.f32 %v1981_v9, %v2634_v26  ;;  %v1396_v26 = vld [vmem:[%s2885_s3 + $0x58] sm:$0xff]  ;;  %v1479_v53 = vld [vmem:[%s2886_s4 + $0x70] sm:$0xff] }
 0x175   :  { %1617 = vst.msk [vmem:[%s2887_s5 + $0x1c] sm:$0xf] %vm1609_vm1, %v1781_v43  ;;  %vm1505_vm9 = vcmp.ge.f32.partialorder %v1489_v52, 0.0  ;;  %v1521_v59 = vmul.f32 0.01, %v1489_v52  ;;  %v1458_v25 = vmul.f32 %v1442_v62, %v2735_v28  ;;  %v1315_v60 = vadd.f32 %v2042_v51, %v1218_v54  ;;  %v1399_v51 = vld [vmem:[%s2885_s3 + $0x70] sm:$0xff] }
 0x176   :  { %2134 = vrsqrt.f32 %v1413_v15  ;;  %v1414_v16 = vadd.f32 1e-05, %v1366_v58  ;;  %v1318_v17 = vadd.f32 %v2045_v56, %v1221_v23  ;;  %v1480_v56 = vld [vmem:[%s2886_s4 + $0x78] sm:$0xff] }
 0x177   :  { %v2131_v61 = vpop.eup %2130  ;;  %v1537_v63 = vsel %vm1505_vm9, %v1489_v52, %v1521_v59  ;;  %v1490_v0 = vadd.f32 %v1474_v57, %v1458_v25  ;;  %v1351_v4 = vsub.f32 %v1315_v60, %v1315_v60 }
 0x178   :  { %v1443_v2 = vmul.f32 %v2131_v61, %v1395_v47  ;;  %v1782_v6 = vpack.c.bf16 %v1537_v63, %v1537_v63  ;;  %2136 = vrsqrt.f32 %v1414_v16  ;;  %v1352_v28 = vsub.f32 %v1318_v17, %v1318_v17 }
 0x179   :  { %vm1506_vm10 = vcmp.ge.f32.partialorder %v1490_v0, 0.0  ;;  %v1522_v10 = vmul.f32 0.01, %v1490_v0  ;;  %v1367_v27 = vmul.f32 %v1351_v4, %v1351_v4 }
 0x17a   :  { %v1459_v55 = vmul.f32 %v1443_v2, %v2752_v44  ;;  %v2133_v11 = vpop.eup %2132  ;;  %1618 = vst.msk [vmem:[%s2887_s5 + $0x20] sm:$0xf] %vm1609_vm1, %v1782_v6  ;;  %v1368_v12 = vmul.f32 %v1352_v28, %v1352_v28 }
 0x17b   :  { %v1538_v13 = vsel %vm1506_vm10, %v1490_v0, %v1522_v10  ;;  %v1444_v33 = vmul.f32 %v2133_v11, %v1396_v26  ;;  %v1415_v5 = vadd.f32 1e-05, %v1367_v27 }
 0x17c   :  { %v1491_v14 = vadd.f32 %v1475_v8, %v1459_v55  ;;  %v1783_v31 = vpack.c.bf16 %v1538_v13, %v1538_v13  ;;  %v1416_v1 = vadd.f32 1e-05, %v1368_v12 }
 0x17d   :  { %v1460_v19 = vmul.f32 %v1444_v33, %v2767_v46  ;;  %2138 = vrsqrt.f32 %v1415_v5 }
 0x17e   :  { %vm1507_vm11 = vcmp.ge.f32.partialorder %v1491_v14, 0.0  ;;  %v1523_v44 = vmul.f32 0.01, %v1491_v14  ;;  %1619 = vst.msk [vmem:[%s2887_s5 + $0x24] sm:$0xf] %vm1609_vm1, %v1783_v31  ;;  %2140 = vrsqrt.f32 %v1416_v1 }
 0x17f   :  { %v1492_v22 = vadd.f32 %v1476_v18, %v1460_v19 }
 0x180   :  { %v1539_v21 = vsel %vm1507_vm11, %v1491_v14, %v1523_v44  ;;  %v2135_v24 = vpop.eup %2134 }
 0x181   :  { %v1784_v7 = vpack.c.bf16 %v1539_v21, %v1539_v21  ;;  %vm1508_vm12 = vcmp.ge.f32.partialorder %v1492_v22, 0.0  ;;  %v1524_v46 = vmul.f32 0.01, %v1492_v22  ;;  %v1445_v29 = vmul.f32 %v2135_v24, %v1397_v20 }
 0x182   :  { %v2137_v40 = vpop.eup %2136 }
 0x183   :  { %1620 = vst.msk [vmem:[%s2887_s5 + $0x28] sm:$0xf] %vm1609_vm1, %v1784_v7  ;;  %v1540_v32 = vsel %vm1508_vm12, %v1492_v22, %v1524_v46  ;;  %v1461_v3 = vmul.f32 %v1445_v29, %v2787_v34  ;;  %v1446_v36 = vmul.f32 %v2137_v40, %v1398_v35  ;;  %v1400_v34 = vld [vmem:[%s2885_s3 + $0x78] sm:$0xff] }
 0x184   :  { %v1785_v37 = vpack.c.bf16 %v1540_v32, %v1540_v32 }
 0x185   :  { %v1493_v45 = vadd.f32 %v1477_v30, %v1461_v3  ;;  %v1462_v39 = vmul.f32 %v1446_v36, %v2796_v49 }
 0x186   :  { %1621 = vst.msk [vmem:[%s2887_s5 + $0x2c] sm:$0xf] %vm1609_vm1, %v1785_v37 }
 0x187   :  { %v2139_v50 = vpop.eup %2138  ;;  %vm1509_vm13 = vcmp.ge.f32.partialorder %v1493_v45, 0.0  ;;  %v1525_v41 = vmul.f32 0.01, %v1493_v45  ;;  %v1494_v42 = vadd.f32 %v1478_v38, %v1462_v39 }
 0x188   :  { %v2141_v43 = vpop.eup %2140  ;;  %v1447_v48 = vmul.f32 %v2139_v50, %v1399_v51 }
 0x189   :  { %v1541_v49 = vsel %vm1509_vm13, %v1493_v45, %v1525_v41  ;;  %vm1510_vm14 = vcmp.ge.f32.partialorder %v1494_v42, 0.0  ;;  %v1526_v9 = vmul.f32 0.01, %v1494_v42  ;;  %v1448_v52 = vmul.f32 %v2141_v43, %v1400_v34 }
 0x18a   :  { %v1786_v62 = vpack.c.bf16 %v1541_v49, %v1541_v49  ;;  %v1463_v54 = vmul.f32 %v1447_v48, %v1351_v4 }
 0x18b   :  { %v1542_v57 = vsel %vm1510_vm14, %v1494_v42, %v1526_v9  ;;  %v1464_v47 = vmul.f32 %v1448_v52, %v1352_v28 }
 0x18c   :  { %1622 = vst.msk [vmem:[%s2887_s5 + $0x30] sm:$0xf] %vm1609_vm1, %v1786_v62  ;;  %v1787_v15 = vpack.c.bf16 %v1542_v57, %v1542_v57  ;;  %v1495_v58 = vadd.f32 %v1479_v53, %v1463_v54 }
 0x18d   :  { %v1496_v23 = vadd.f32 %v1480_v56, %v1464_v47 }
 0x18e   :  { %1623 = vst.msk [vmem:[%s2887_s5 + $0x34] sm:$0xf] %vm1609_vm1, %v1787_v15  ;;  %vm1511_vm15 = vcmp.ge.f32.partialorder %v1495_v58, 0.0  ;;  %v1527_v59 = vmul.f32 0.01, %v1495_v58 }
 0x18f   :  { %vm1512_vm0 = vcmp.ge.f32.partialorder %v1496_v23, 0.0  ;;  %v1528_v25 = vmul.f32 0.01, %v1496_v23 }
 0x190   :  { %v1543_v60 = vsel %vm1511_vm15, %v1495_v58, %v1527_v59 }
 0x191   :  { %v1788_v61 = vpack.c.bf16 %v1543_v60, %v1543_v60  ;;  %v1544_v16 = vsel %vm1512_vm0, %v1496_v23, %v1528_v25 }
 0x192   :  { %v1789_v17 = vpack.c.bf16 %v1544_v16, %v1544_v16 }
 0x193   :  { %1624 = vst.msk [vmem:[%s2887_s5 + $0x38] sm:$0xf] %vm1609_vm1, %v1788_v61 }
 0x194   :  { %1625 = vst.msk [vmem:[%s2887_s5 + $0x3c] sm:$0xf] %vm1609_vm1, %v1789_v17 }

// kernel: _lambda_.18
= control target key start
LH: loop header
LB: loop body
LE: loop exit
PB: predicated region body
PF: predicated region fallthrough
CT: control target
= control target key end

     0   :  { %v1959_v1 = vmov 0   ;;  %vm1194_vm0 = vcmask 31744   ;;  %vm1467_vm2 = vcmask 27648   ;;  %s2489_s0 = inlined_call_operand.vmem [shape: bf16[1152,4], index: 0, kind: input, shape index: {}]   ;;  %s2490_s1 = inlined_call_operand.vmem [shape: bf16[64,1152], index: 1, kind: input, shape index: {}]   ;;  %s2491_s2 = inlined_call_operand.vmem [shape: f32[64,1], index: 2, kind: input, shape index: {}, may-alias: {2,4}]   ;;  %s2492_s4 = inlined_call_operand.vmem [shape: f32[64,1], index: 4, kind: input, shape index: {}, may-alias: {2,4}]   ;;  %s2493_s3 = inlined_call_operand.vmem [shape: f32[64,1], index: 3, kind: input, shape index: {}]   ;;  %s2494_s5 = inlined_call_operand.vmem [shape: bf16[64,4], index: 5, kind: output, shape index: {}]  }
   0x1   :  { %v1819_v0 = vld [vmem:[%s2489_s0 + $0x40] sm:$0xff]   ;;  %1817 = vset.pattern.permute.xlu0 %v1959_v1  ;;  %1818 = vset.pattern.permute.xlu1 %v1959_v1  ;;  %v1823_v5 = vld [vmem:[%s2489_s0 + $0x48] sm:$0xff]   ;;  %v1827_v9 = vld [vmem:[%s2489_s0 + $0x50] sm:$0xff]  }
   0x2   :  { %v1820_v2 = vld [vmem:[%s2489_s0 + $0xc0] sm:$0xff]   ;;  %1604 = vmatprep.subr.bf16.mxu0 %v1819_v0  ;;  %v1824_v6 = vld [vmem:[%s2489_s0 + $0xc8] sm:$0xff]   ;;  %v1828_v10 = vld [vmem:[%s2489_s0 + $0xd0] sm:$0xff]  }
   0x3   :  { %v1821_v3 = vld [vmem:[%s2489_s0] sm:$0xff]   ;;  %1644 = vmatprep.subr.bf16.mxu1 %v1820_v2  ;;  %v1825_v7 = vld [vmem:[%s2489_s0 + $0x8] sm:$0xff]   ;;  %v1829_v11 = vld [vmem:[%s2489_s0 + $0x10] sm:$0xff]  }
   0x4   :  { %v1822_v4 = vld [vmem:[%s2489_s0 + $0x80] sm:$0xff]   ;;  %1605 = vmatpush3.bf16.msra.mxu0 %v1821_v3  ;;  %v1826_v8 = vld [vmem:[%s2489_s0 + $0x88] sm:$0xff]   ;;  %v1830_v12 = vld [vmem:[%s2489_s0 + $0x90] sm:$0xff]  }
   0x5   :  { %1645 = vmatpush3.bf16.msra.mxu1 %v1822_v4  ;;  %1606 = vmatprep.subr.bf16.mxu0 %v1823_v5  ;;  %v1831_v13 = vld [vmem:[%s2489_s0 + $0x58] sm:$0xff]   ;;  %v1835_v17 = vld [vmem:[%s2489_s0 + $0x60] sm:$0xff]   ;;  %v1839_v21 = vld [vmem:[%s2489_s0 + $0x68] sm:$0xff]  }
   0x6   :  { %1646 = vmatprep.subr.bf16.mxu1 %v1824_v6  ;;  %v1832_v14 = vld [vmem:[%s2489_s0 + $0xd8] sm:$0xff]   ;;  %v1836_v18 = vld [vmem:[%s2489_s0 + $0xe0] sm:$0xff]   ;;  %v1840_v22 = vld [vmem:[%s2489_s0 + $0xe8] sm:$0xff]  }
   0x7   :  { %v1833_v15 = vld [vmem:[%s2489_s0 + $0x18] sm:$0xff]   ;;  %v1837_v19 = vld [vmem:[%s2489_s0 + $0x20] sm:$0xff]   ;;  %v1841_v23 = vld [vmem:[%s2489_s0 + $0x28] sm:$0xff]  }
   0x8   :  { %1607 = vmatpush3.bf16.msra.mxu0 %v1825_v7  ;;  %v1834_v16 = vld [vmem:[%s2489_s0 + $0x98] sm:$0xff]   ;;  %v1838_v20 = vld [vmem:[%s2489_s0 + $0xa0] sm:$0xff]   ;;  %v1842_v24 = vld [vmem:[%s2489_s0 + $0xa8] sm:$0xff]  }
   0x9   :  { %1647 = vmatpush3.bf16.msra.mxu1 %v1826_v8  ;;  %1608 = vmatprep.subr.bf16.mxu0 %v1827_v9  ;;  %v1843_v25 = vld [vmem:[%s2489_s0 + $0x70] sm:$0xff]   ;;  %v1847_v29 = vld [vmem:[%s2489_s0 + $0x78] sm:$0xff]   ;;  %v1851_v33 = vld [vmem:[%s2490_s1] ss:$36 sps:$4 sm:$0xff]  }
   0xa   :  { %1648 = vmatprep.subr.bf16.mxu1 %v1828_v10  ;;  %v1844_v26 = vld [vmem:[%s2489_s0 + $0xf0] sm:$0xff]   ;;  %v1848_v30 = vld [vmem:[%s2489_s0 + $0xf8] sm:$0xff]   ;;  %v1853_v34 = vld [vmem:[%s2490_s1 + $0x4] ss:$36 sps:$4 sm:$0xff]  }
   0xb   :  { %v1845_v27 = vld [vmem:[%s2489_s0 + $0x30] sm:$0xff]   ;;  %v1849_v31 = vld [vmem:[%s2489_s0 + $0x38] sm:$0xff]   ;;  %v1854_v35 = vld [vmem:[%s2490_s1 + $0x8] ss:$36 sps:$4 sm:$0xff]   ;;  %901 = vmatprep.mubr.bf16.mxu0 %v1853_v34 }
   0xc   :  { %1609 = vmatpush3.bf16.msra.mxu0 %v1829_v11  ;;  %v1846_v28 = vld [vmem:[%s2489_s0 + $0xb0] sm:$0xff]   ;;  %v1850_v32 = vld [vmem:[%s2489_s0 + $0xb8] sm:$0xff]   ;;  %v1857_v37 = vld [vmem:[%s2489_s0 + $0x140] sm:$0xff]  }
   0xd   :  { %1649 = vmatpush3.bf16.msra.mxu1 %v1830_v12  ;;  %1610 = vmatprep.subr.bf16.mxu0 %v1831_v13  ;;  %v1856_v36 = vld [vmem:[%s2490_s1 + $0xc] ss:$36 sps:$4 sm:$0xff]   ;;  %v1858_v38 = vld [vmem:[%s2489_s0 + $0x1c0] sm:$0xff]   ;;  %v1867_v46 = vld [vmem:[%s2490_s1 + $0x54] ss:$36 sps:$4 sm:$0xff]  }
   0xe   :  { %1650 = vmatprep.subr.bf16.mxu1 %v1832_v14  ;;  %966 = vmatprep.mubr.bf16.mxu1 %v1856_v36  ;;  %v1859_v39 = vld [vmem:[%s2489_s0 + $0x100] sm:$0xff]   ;;  %v1861_v41 = vld [vmem:[%s2489_s0 + $0x148] sm:$0xff]   ;;  %v1870_v48 = vld [vmem:[%s2490_s1 + $0x50] ss:$36 sps:$4 sm:$0xff]  }
   0xf   :  { %v1860_v40 = vld [vmem:[%s2489_s0 + $0x180] sm:$0xff]   ;;  %v1862_v42 = vld [vmem:[%s2489_s0 + $0x1c8] sm:$0xff]   ;;  %v1871_v49 = vld [vmem:[%s2489_s0 + $0x150] sm:$0xff]  }
  0x10   :  { %1611 = vmatpush3.bf16.msra.mxu0 %v1833_v15  ;;  %v1863_v43 = vld [vmem:[%s2489_s0 + $0x108] sm:$0xff]   ;;  %v1872_v50 = vld [vmem:[%s2489_s0 + $0x1d0] sm:$0xff]   ;;  %v1875_v53 = vld [vmem:[%s2489_s0 + $0x158] sm:$0xff]  }
  0x11   :  { %1651 = vmatpush3.bf16.msra.mxu1 %v1834_v16  ;;  %1612 = vmatprep.subr.bf16.mxu0 %v1835_v17  ;;  %v1864_v44 = vld [vmem:[%s2489_s0 + $0x188] sm:$0xff]   ;;  %v1873_v51 = vld [vmem:[%s2489_s0 + $0x110] sm:$0xff]   ;;  %v1876_v54 = vld [vmem:[%s2489_s0 + $0x1d8] sm:$0xff]  }
  0x12   :  { %1652 = vmatprep.subr.bf16.mxu1 %v1836_v18  ;;  %v1865_v45 = vld [vmem:[%s2490_s1 + $0x4c] ss:$36 sps:$4 sm:$0xff]   ;;  %v1877_v55 = vld [vmem:[%s2489_s0 + $0x118] sm:$0xff]   ;;  %v1885_v61 = vld [vmem:[%s2489_s0 + $0x160] sm:$0xff]  }
  0x13   :  { %v1869_v47 = vld [vmem:[%s2490_s1 + $0x48] ss:$36 sps:$4 sm:$0xff]   ;;  %v1874_v52 = vld [vmem:[%s2489_s0 + $0x190] sm:$0xff]   ;;  %v1878_v56 = vld [vmem:[%s2489_s0 + $0x198] sm:$0xff]  }
  0x14   :  { %1613 = vmatpush3.bf16.msra.mxu0 %v1837_v19  ;;  %v1879_v57 = vld [vmem:[%s2490_s1 + $0x94] ss:$36 sps:$4 sm:$0xff]   ;;  %v1881_v58 = vld [vmem:[%s2490_s1 + $0x9c] ss:$36 sps:$4 sm:$0xff]   ;;  %v1889_v1 = vld [vmem:[%s2489_s0 + $0x168] sm:$0xff]  }
  0x15   :  { %1653 = vmatpush3.bf16.msra.mxu1 %v1838_v20  ;;  %1614 = vmatprep.subr.bf16.mxu0 %v1839_v21  ;;  %v1883_v59 = vld [vmem:[%s2490_s1 + $0x90] ss:$36 sps:$4 sm:$0xff]   ;;  %v1884_v60 = vld [vmem:[%s2490_s1 + $0x98] ss:$36 sps:$4 sm:$0xff]   ;;  %v1886_v62 = vld [vmem:[%s2489_s0 + $0x1e0] sm:$0xff]  }
  0x16   :  { %1654 = vmatprep.subr.bf16.mxu1 %v1840_v22  ;;  %v1887_v63 = vld [vmem:[%s2489_s0 + $0x120] sm:$0xff]   ;;  %v1890_v2 = vld [vmem:[%s2489_s0 + $0x1e8] sm:$0xff]   ;;  %v1897_v7 = vld [vmem:[%s2490_s1 + $0xd8] ss:$36 sps:$4 sm:$0xff]  }
  0x17   :  { %v1888_v0 = vld [vmem:[%s2489_s0 + $0x1a0] sm:$0xff]   ;;  %v1891_v3 = vld [vmem:[%s2489_s0 + $0x128] sm:$0xff]   ;;  %v1899_v9 = vld [vmem:[%s2489_s0 + $0x170] sm:$0xff]  }
  0x18   :  { %1615 = vmatpush3.bf16.msra.mxu0 %v1841_v23  ;;  %v1892_v4 = vld [vmem:[%s2489_s0 + $0x1a8] sm:$0xff]   ;;  %v1893_v5 = vld [vmem:[%s2490_s1 + $0xdc] ss:$36 sps:$4 sm:$0xff]   ;;  %v1900_v10 = vld [vmem:[%s2489_s0 + $0x1f0] sm:$0xff]  }
  0x19   :  { %1655 = vmatpush3.bf16.msra.mxu1 %v1842_v24  ;;  %1616 = vmatprep.subr.bf16.mxu0 %v1843_v25  ;;  %v1895_v6 = vld [vmem:[%s2490_s1 + $0xe4] ss:$36 sps:$4 sm:$0xff]   ;;  %v1901_v11 = vld [vmem:[%s2489_s0 + $0x130] sm:$0xff]   ;;  %v1903_v13 = vld [vmem:[%s2489_s0 + $0x178] sm:$0xff]  }
  0x1a   :  { %1656 = vmatprep.subr.bf16.mxu1 %v1844_v26  ;;  %v1898_v8 = vld [vmem:[%s2490_s1 + $0xe0] ss:$36 sps:$4 sm:$0xff]   ;;  %v1902_v12 = vld [vmem:[%s2489_s0 + $0x1b0] sm:$0xff]   ;;  %v1904_v14 = vld [vmem:[%s2489_s0 + $0x1f8] sm:$0xff]  }
  0x1b   :  { %v1905_v15 = vld [vmem:[%s2489_s0 + $0x138] sm:$0xff]   ;;  %v1907_v17 = vld [vmem:[%s2490_s1 + $0x10] ss:$36 sps:$4 sm:$0xff]   ;;  %v1913_v21 = vld [vmem:[%s2489_s0 + $0x200] sm:$0xff]  }
  0x1c   :  { %1617 = vmatpush3.bf16.msra.mxu0 %v1845_v27  ;;  %v1906_v16 = vld [vmem:[%s2489_s0 + $0x1b8] sm:$0xff]   ;;  %v1914_v22 = vld [vmem:[%s2489_s0 + $0x208] sm:$0xff]   ;;  %v1920_v26 = vld [vmem:[%s2490_s1 + $0x60] ss:$36 sps:$4 sm:$0xff]  }
  0x1d   :  { %1657 = vmatpush3.bf16.msra.mxu1 %v1846_v28  ;;  %1618 = vmatprep.subr.bf16.mxu0 %v1847_v29  ;;  %v1909_v18 = vld [vmem:[%s2490_s1 + $0x14] ss:$36 sps:$4 sm:$0xff]   ;;  %v1912_v20 = vld [vmem:[%s2490_s1 + $0x1c] ss:$36 sps:$4 sm:$0xff]   ;;  %v1917_v24 = vld [vmem:[%s2490_s1 + $0x64] ss:$36 sps:$4 sm:$0xff]  }
  0x1e   :  { %1658 = vmatprep.subr.bf16.mxu1 %v1848_v30  ;;  %v1910_v19 = vld [vmem:[%s2490_s1 + $0x18] ss:$36 sps:$4 sm:$0xff]   ;;  %v1921_v27 = vld [vmem:[%s2489_s0 + $0x210] sm:$0xff]   ;;  %v1923_v28 = vld [vmem:[%s2490_s1 + $0xa4] ss:$36 sps:$4 sm:$0xff]  }
  0x1f   :  { %v1915_v23 = vld [vmem:[%s2490_s1 + $0x5c] ss:$36 sps:$4 sm:$0xff]   ;;  %v1925_v29 = vld [vmem:[%s2490_s1 + $0xac] ss:$36 sps:$4 sm:$0xff]  }
  0x20   :  { %1619 = vmatpush3.bf16.msra.mxu0 %v1849_v31  ;;  %v1919_v25 = vld [vmem:[%s2490_s1 + $0x58] ss:$36 sps:$4 sm:$0xff]   ;;  %v1927_v31 = vld [vmem:[%s2490_s1 + $0xa0] ss:$36 sps:$4 sm:$0xff]   ;;  %v1931_v34 = vld [vmem:[%s2490_s1 + $0xec] ss:$36 sps:$4 sm:$0xff]  }
  0x21   :  { %1659 = vmatpush3.bf16.msra.mxu1 %v1850_v32  ;;  %1684 = vmatprep.subr.bf16.mxu0 %v1857_v37  ;;  %v1922_v30 = vld [vmem:[%s2489_s0 + $0x218] sm:$0xff]   ;;  %v1928_v32 = vld [vmem:[%s2490_s1 + $0xa8] ss:$36 sps:$4 sm:$0xff]   ;;  %v205_v37 = vld [vmem:[%s2491_s2] sm:$0xff] }
  0x22   :  { %1724 = vmatprep.subr.bf16.mxu1 %v1858_v38  ;;  %v1930_v36 = vld [vmem:[%s2489_s0 + $0x228] sm:$0xff]   ;;  %215 = vperm.xlu0 %1817, %v205_v37  }
  0x23   :  { %902 = vmatmul.mubr.bf16.vlgmr.msra.gmra.mrb[0].mxu0 %v1851_v33  ;;  %v1929_v33 = vld [vmem:[%s2489_s0 + $0x220] sm:$0xff]   ;;  %v1935_v38 = vld [vmem:[%s2490_s1 + $0xe8] ss:$36 sps:$4 sm:$0xff]  }
  0x24   :  { %967 = vmatmul.mubr.bf16.vlgmr.msra.gmra.mrb[0].mxu1 %v1854_v35  ;;  %1685 = vmatpush3.bf16.msra.mxu0 %v1859_v39  ;;  %v1933_v35 = vld [vmem:[%s2490_s1 + $0xf4] ss:$36 sps:$4 sm:$0xff]  }
  0x25   :  { %1725 = vmatpush3.bf16.msra.mxu1 %v1860_v40  ;;  %1686 = vmatprep.subr.bf16.mxu0 %v1861_v41  ;;  %v207_v39 = vld [vmem:[%s2491_s2 + $0x10] sm:$0xff] }
  0x26   :  { %1726 = vmatprep.subr.bf16.mxu1 %v1862_v42  ;;  %909 = vmatprep.mubr.bf16.mxu0 %v1865_v45  ;;  %v1937_v40 = vld [vmem:[%s2489_s0 + $0x230] sm:$0xff]   ;;  %v1939_v42 = vld [vmem:[%s2490_s1 + $0x20] ss:$36 sps:$4 sm:$0xff]   ;;  %v206_v45 = vld [vmem:[%s2491_s2 + $0x8] sm:$0xff] }
  0x27   :  { %974 = vmatprep.mubr.bf16.mxu1 %v1867_v46  ;;  %v1936_v41 = vld [vmem:[%s2490_s1 + $0xf0] ss:$36 sps:$4 sm:$0xff]   ;;  %225 = vperm.xlu1 %1818, %v207_v39   ;;  %v208_v46 = vld [vmem:[%s2491_s2 + $0x18] sm:$0xff] }
  0x28   :  { %1687 = vmatpush3.bf16.msra.mxu0 %v1863_v43  ;;  %v1940_v43 = vld [vmem:[%s2490_s1 + $0xb0] ss:$36 sps:$4 sm:$0xff]   ;;  %220 = vperm.xlu0 %1817, %v206_v45  }
  0x29   :  { %1727 = vmatpush3.bf16.msra.mxu1 %v1864_v44  ;;  %1688 = vmatprep.subr.bf16.mxu0 %v1871_v49  ;;  %v1938_v44 = vld [vmem:[%s2489_s0 + $0x238] sm:$0xff]  }
  0x2a   :  { %1728 = vmatprep.subr.bf16.mxu1 %v1872_v50  ;;  %v1942_v49 = vld [vmem:[%s2490_s1 + $0xf8] ss:$36 sps:$4 sm:$0xff]   ;;  %v210_v50 = vld [vmem:[%s2491_s2 + $0x28] sm:$0xff] }
  0x2b   :  { %910 = vmatmul.mubr.bf16.gmra.mrb[4].mxu0 %v1869_v47  ;;  %v1941_v47 = vld [vmem:[%s2490_s1 + $0x68] ss:$36 sps:$4 sm:$0xff]   ;;  %230 = vperm.xlu1 %1818, %v208_v46  }
  0x2c   :  { %975 = vmatmul.mubr.bf16.gmra.mrb[4].mxu1 %v1870_v48  ;;  %1689 = vmatpush3.bf16.msra.mxu0 %v1873_v51  ;;  %v209_v48 = vld [vmem:[%s2491_s2 + $0x20] sm:$0xff]  ;;  %v211_v51 = vld [vmem:[%s2491_s2 + $0x30] sm:$0xff] }
  0x2d   :  { %1729 = vmatpush3.bf16.msra.mxu1 %v1874_v52  ;;  %1690 = vmatprep.subr.bf16.mxu0 %v1875_v53  ;;  %v212_v52 = vld [vmem:[%s2491_s2 + $0x38] sm:$0xff] }
  0x2e   :  { %1730 = vmatprep.subr.bf16.mxu1 %v1876_v54  ;;  %917 = vmatprep.mubr.bf16.mxu0 %v1879_v57 }
  0x2f   :  { %982 = vmatprep.mubr.bf16.mxu1 %v1881_v58  ;;  %235 = vperm.xlu0 %1817, %v209_v48  }
  0x30   :  { %1691 = vmatpush3.bf16.msra.mxu0 %v1877_v55  ;;  %240 = vperm.xlu1 %1818, %v210_v50  }
  0x31   :  { %1731 = vmatpush3.bf16.msra.mxu1 %v1878_v56  ;;  %1692 = vmatprep.subr.bf16.mxu0 %v1885_v61 }
  0x32   :  { %1732 = vmatprep.subr.bf16.mxu1 %v1886_v62 }
  0x33   :  { %918 = vmatmul.mubr.bf16.gmra.mrb[8].mxu0 %v1883_v59  ;;  %245 = vperm.xlu0 %1817, %v211_v51  }
  0x34   :  { %983 = vmatmul.mubr.bf16.gmra.mrb[8].mxu1 %v1884_v60  ;;  %1693 = vmatpush3.bf16.msra.mxu0 %v1887_v63 }
  0x35   :  { %1733 = vmatpush3.bf16.msra.mxu1 %v1888_v0  ;;  %1694 = vmatprep.subr.bf16.mxu0 %v1889_v1 }
  0x36   :  { %1734 = vmatprep.subr.bf16.mxu1 %v1890_v2  ;;  %925 = vmatprep.mubr.bf16.mxu0 %v1893_v5 }
  0x37   :  { %990 = vmatprep.mubr.bf16.mxu1 %v1895_v6  ;;  %250 = vperm.xlu1 %1818, %v212_v52  }
  0x38   :  { %1695 = vmatpush3.bf16.msra.mxu0 %v1891_v3 }
  0x39   :  { %1735 = vmatpush3.bf16.msra.mxu1 %v1892_v4  ;;  %1696 = vmatprep.subr.bf16.mxu0 %v1899_v9 }
  0x3a   :  { %1736 = vmatprep.subr.bf16.mxu1 %v1900_v10 }
  0x3b   :  { %926 = vmatmul.mubr.bf16.gmra.mrb[12].mxu0 %v1897_v7 }
  0x3c   :  { %991 = vmatmul.mubr.bf16.gmra.mrb[12].mxu1 %v1898_v8  ;;  %1697 = vmatpush3.bf16.msra.mxu0 %v1901_v11 }
  0x3d   :  { %1737 = vmatpush3.bf16.msra.mxu1 %v1902_v12  ;;  %1698 = vmatprep.subr.bf16.mxu0 %v1903_v13 }
  0x3e   :  { %1738 = vmatprep.subr.bf16.mxu1 %v1904_v14  ;;  %1031 = vmatprep.mubr.bf16.mxu0 %v1909_v18 }
  0x3f   :  { %1096 = vmatprep.mubr.bf16.mxu1 %v1912_v20 }
  0x40   :  { %1699 = vmatpush3.bf16.msra.mxu0 %v1905_v15 }
  0x41   :  { %1739 = vmatpush3.bf16.msra.mxu1 %v1906_v16  ;;  %1776 = vmatprep.subr.bf16.mxu0 %v1913_v21 }
  0x42   :  { %1800 = vmatprep.subr.bf16.mxu1 %v1913_v21 }
  0x43   :  { %1032 = vmatmul.mubr.bf16.vlgmr.msra.gmra.mrb[16].mxu0 %v1907_v17 }
  0x44   :  { %1097 = vmatmul.mubr.bf16.vlgmr.msra.gmra.mrb[16].mxu1 %v1910_v19  ;;  %1777 = vmatpush3.bf16.msra.mxu0 %v1913_v21 }
  0x45   :  { %1808 = vmatpush3.bf16.msra.mxu1 %v1913_v21  ;;  %1778 = vmatprep.subr.bf16.mxu0 %v1914_v22 }
  0x46   :  { %1801 = vmatprep.subr.bf16.mxu1 %v1914_v22  ;;  %1039 = vmatprep.mubr.bf16.mxu0 %v1915_v23 }
  0x47   :  { %1104 = vmatprep.mubr.bf16.mxu1 %v1917_v24 }
  0x48   :  { %1779 = vmatpush3.bf16.msra.mxu0 %v1914_v22 }
  0x49   :  { %1809 = vmatpush3.bf16.msra.mxu1 %v1914_v22  ;;  %1780 = vmatprep.subr.bf16.mxu0 %v1921_v27 }
  0x4a   :  { %1802 = vmatprep.subr.bf16.mxu1 %v1921_v27 }
  0x4b   :  { %1040 = vmatmul.mubr.bf16.gmra.mrb[20].mxu0 %v1919_v25 }
  0x4c   :  { %1105 = vmatmul.mubr.bf16.gmra.mrb[20].mxu1 %v1920_v26  ;;  %1047 = vmatprep.mubr.bf16.mxu0 %v1923_v28 }
  0x4d   :  { %1781 = vmatpush3.bf16.msra.mxu0 %v1921_v27  ;;  %1112 = vmatprep.mubr.bf16.mxu1 %v1925_v29 }
  0x4e   :  { %1810 = vmatpush3.bf16.msra.mxu1 %v1921_v27  ;;  %1782 = vmatprep.subr.bf16.mxu0 %v1922_v30 }
  0x4f   :  { %1803 = vmatprep.subr.bf16.mxu1 %v1922_v30 }
  0x51   :  { %1783 = vmatpush3.bf16.msra.mxu0 %v1922_v30 }
  0x52   :  { %1811 = vmatpush3.bf16.msra.mxu1 %v1922_v30  ;;  %1784 = vmatprep.subr.bf16.mxu0 %v1929_v33 }
  0x53   :  { %1048 = vmatmul.mubr.bf16.gmra.mrb[24].mxu0 %v1927_v31  ;;  %1804 = vmatprep.subr.bf16.mxu1 %v1929_v33 }
  0x54   :  { %1113 = vmatmul.mubr.bf16.gmra.mrb[24].mxu1 %v1928_v32  ;;  %1055 = vmatprep.mubr.bf16.mxu0 %v1931_v34 }
  0x55   :  { %1785 = vmatpush3.bf16.msra.mxu0 %v1929_v33  ;;  %1120 = vmatprep.mubr.bf16.mxu1 %v1933_v35 }
  0x56   :  { %1812 = vmatpush3.bf16.msra.mxu1 %v1929_v33  ;;  %1786 = vmatprep.subr.bf16.mxu0 %v1930_v36 }
  0x57   :  { %1805 = vmatprep.subr.bf16.mxu1 %v1930_v36 }
  0x59   :  { %1787 = vmatpush3.bf16.msra.mxu0 %v1930_v36 }
  0x5a   :  { %1813 = vmatpush3.bf16.msra.mxu1 %v1930_v36  ;;  %1788 = vmatprep.subr.bf16.mxu0 %v1937_v40 }
  0x5b   :  { %1056 = vmatmul.mubr.bf16.gmra.mrb[28].mxu0 %v1935_v38  ;;  %1806 = vmatprep.subr.bf16.mxu1 %v1937_v40 }
  0x5c   :  { %1121 = vmatmul.mubr.bf16.gmra.mrb[28].mxu1 %v1936_v41  ;;  %1792 = vmatprep.mubr.bf16.mxu0 %v1939_v42 }
  0x5d   :  { %1789 = vmatpush3.bf16.msra.mxu0 %v1937_v40  ;;  %1796 = vmatprep.mubr.bf16.mxu1 %v1940_v43 }
  0x5e   :  { %1814 = vmatpush3.bf16.msra.mxu1 %v1937_v40  ;;  %1790 = vmatprep.subr.bf16.mxu0 %v1938_v44 }
  0x5f   :  { %1807 = vmatprep.subr.bf16.mxu1 %v1938_v44 }
  0x61   :  { %1791 = vmatpush3.bf16.msra.mxu0 %v1938_v44 }
  0x62   :  { %1815 = vmatpush3.bf16.msra.mxu1 %v1938_v44 }
  0x64   :  { %1793 = vmatmul.mubr.bf16.vlgmr.msra.gmra.mrb[32].mxu0 %v1941_v47 }
  0x65   :  { %1797 = vmatmul.mubr.bf16.vlgmr.msra.gmra.mrb[32].mxu1 %v1942_v49 }
  0xa1   :  { %v216_v53 = vpop.permute.xlu0 %215 }
  0xa6   :  { %v226_v3 = vpop.permute.xlu1 %225 }
  0xa7   :  { %v221_v55 = vpop.permute.xlu0 %220 }
  0xaa   :  { %v231_v9 = vpop.permute.xlu1 %230 }
  0xae   :  { %v236_v25 = vpop.permute.xlu0 %235 }
  0xaf   :  { %v241_v27 = vpop.permute.xlu1 %240 }
  0xb2   :  { %v246_v43 = vpop.permute.xlu0 %245 }
  0xb6   :  { %v251_v44 = vpop.permute.xlu1 %250 }
  0xf6   :  { %v1620_v54 = vpop.f32.mrb[0].mxu0 }
  0xf7   :  { %v1621_v56 = vpop.f32.mrb[1].mxu0  ;;  %v1660_v57 = vpop.f32.mrb[0].mxu1 }
  0xf8   :  { %v1622_v58 = vadd.f32 %v1621_v56, %v1620_v54  ;;  %v1623_v59 = vpop.f32.mrb[2].mxu0  ;;  %v1661_v60 = vpop.f32.mrb[1].mxu1 }
  0xf9   :  { %v1624_v61 = vpop.f32.mrb[3].mxu0  ;;  %v1662_v62 = vadd.f32 %v1661_v60, %v1660_v57  ;;  %v1663_v63 = vpop.f32.mrb[2].mxu1 }
  0xfa   :  { %v904_v0 = vadd.f32 %v1622_v58, %v216_v53  ;;  %v1625_v1 = vadd.f32 %v1624_v61, %v1623_v59  ;;  %v1664_v2 = vpop.f32.mrb[3].mxu1 }
  0xfb   :  { %v1665_v4 = vadd.f32 %v1664_v2, %v1663_v63 }
  0xfc   :  { %v2338_v5 = vadd.f32 %v1662_v62, %v904_v0  ;;  %v907_v6 = vadd.f32 %v1625_v1, %v221_v55 }
  0xfe   :  { %v2340_v7 = vadd.f32 %v1665_v4, %v907_v6  ;;  %v1626_v8 = vpop.f32.mrb[4].mxu0 }
  0xff   :  { %v1627_v10 = vpop.f32.mrb[5].mxu0  ;;  %v1666_v11 = vpop.f32.mrb[4].mxu1 }
 0x100   :  { %v1628_v12 = vadd.f32 %v1627_v10, %v1626_v8  ;;  %v1629_v13 = vpop.f32.mrb[6].mxu0  ;;  %v1667_v14 = vpop.f32.mrb[5].mxu1 }
 0x101   :  { %v1630_v15 = vpop.f32.mrb[7].mxu0  ;;  %v1668_v16 = vadd.f32 %v1667_v14, %v1666_v11  ;;  %v1669_v17 = vpop.f32.mrb[6].mxu1 }
 0x102   :  { %v912_v18 = vadd.f32 %v1628_v12, %v226_v3  ;;  %v1631_v19 = vadd.f32 %v1630_v15, %v1629_v13  ;;  %v1670_v20 = vpop.f32.mrb[7].mxu1 }
 0x103   :  { %v1671_v21 = vadd.f32 %v1670_v20, %v1669_v17 }
 0x104   :  { %v977_v22 = vadd.f32 %v1668_v16, %v912_v18  ;;  %v915_v23 = vadd.f32 %v1631_v19, %v231_v9 }
 0x106   :  { %v2342_v24 = vadd.f32 %v1671_v21, %v915_v23  ;;  %v1632_v26 = vpop.f32.mrb[8].mxu0 }
 0x107   :  { %v1633_v28 = vpop.f32.mrb[9].mxu0  ;;  %v1672_v29 = vpop.f32.mrb[8].mxu1 }
 0x108   :  { %v1634_v30 = vadd.f32 %v1633_v28, %v1632_v26  ;;  %v1635_v31 = vpop.f32.mrb[10].mxu0  ;;  %v1673_v32 = vpop.f32.mrb[9].mxu1 }
 0x109   :  { %v1636_v33 = vpop.f32.mrb[11].mxu0  ;;  %v1674_v34 = vadd.f32 %v1673_v32, %v1672_v29  ;;  %v1675_v35 = vpop.f32.mrb[10].mxu1 }
 0x10a   :  { %v920_v36 = vadd.f32 %v1634_v30, %v236_v25  ;;  %v1637_v37 = vadd.f32 %v1636_v33, %v1635_v31  ;;  %v1676_v38 = vpop.f32.mrb[11].mxu1 }
 0x10b   :  { %v1677_v39 = vadd.f32 %v1676_v38, %v1675_v35 }
 0x10c   :  { %v985_v40 = vadd.f32 %v1674_v34, %v920_v36  ;;  %v923_v41 = vadd.f32 %v1637_v37, %v241_v27 }
 0x10e   :  { %v2344_v42 = vadd.f32 %v1677_v39, %v923_v41  ;;  %v1638_v45 = vpop.f32.mrb[12].mxu0 }
 0x10f   :  { %v1678_v46 = vpop.f32.mrb[12].mxu1  ;;  %v1639_v47 = vpop.f32.mrb[13].mxu0 }
 0x110   :  { %v1679_v48 = vpop.f32.mrb[13].mxu1  ;;  %v1640_v49 = vadd.f32 %v1639_v47, %v1638_v45  ;;  %v1641_v50 = vpop.f32.mrb[14].mxu0 }
 0x111   :  { %v1680_v51 = vadd.f32 %v1679_v48, %v1678_v46  ;;  %v1681_v52 = vpop.f32.mrb[14].mxu1  ;;  %v1642_v53 = vpop.f32.mrb[15].mxu0 }
 0x112   :  { %v1682_v54 = vpop.f32.mrb[15].mxu1  ;;  %v928_v55 = vadd.f32 %v1640_v49, %v246_v43  ;;  %v1643_v56 = vadd.f32 %v1642_v53, %v1641_v50 }
 0x113   :  { %v1683_v57 = vadd.f32 %v1682_v54, %v1681_v52 }
 0x114   :  { %v993_v58 = vadd.f32 %v1680_v51, %v928_v55  ;;  %v931_v59 = vadd.f32 %v1643_v56, %v251_v44 }
 0x116   :  { %v996_v60 = vadd.f32 %v1683_v57, %v931_v59  ;;  %v1700_v61 = vpop.f32.mrb[16].mxu0 }
 0x117   :  { %v1701_v62 = vpop.f32.mrb[17].mxu0  ;;  %v1740_v1 = vpop.f32.mrb[16].mxu1 }
 0x118   :  { %v1702_v63 = vadd.f32 %v1701_v62, %v1700_v61  ;;  %v1703_v0 = vpop.f32.mrb[18].mxu0  ;;  %v1741_v3 = vpop.f32.mrb[17].mxu1 }
 0x119   :  { %v1704_v2 = vpop.f32.mrb[19].mxu0  ;;  %v1742_v8 = vadd.f32 %v1741_v3, %v1740_v1  ;;  %v1743_v9 = vpop.f32.mrb[18].mxu1 }
 0x11a   :  { %v1034_v4 = vadd.f32 %v1702_v63, %v2338_v5  ;;  %v1705_v6 = vadd.f32 %v1704_v2, %v1703_v0  ;;  %v1744_v10 = vpop.f32.mrb[19].mxu1 }
 0x11b   :  { %v1745_v12 = vadd.f32 %v1744_v10, %v1743_v9 }
 0x11c   :  { %v1037_v11 = vadd.f32 %v1705_v6, %v2340_v7  ;;  %v1099_v13 = vadd.f32 %v1742_v8, %v1034_v4 }
 0x11e   :  { %v1706_v14 = vpop.f32.mrb[20].mxu0  ;;  %v2348_v15 = vadd.f32 %v1745_v12, %v1037_v11 }
 0x11f   :  { %v1707_v16 = vpop.f32.mrb[21].mxu0  ;;  %v1746_v19 = vpop.f32.mrb[20].mxu1 }
 0x120   :  { %v1708_v17 = vadd.f32 %v1707_v16, %v1706_v14  ;;  %v1709_v18 = vpop.f32.mrb[22].mxu0  ;;  %v1747_v21 = vpop.f32.mrb[21].mxu1 }
 0x121   :  { %v1710_v20 = vpop.f32.mrb[23].mxu0  ;;  %v1748_v5 = vadd.f32 %v1747_v21, %v1746_v19  ;;  %v1749_v26 = vpop.f32.mrb[22].mxu1 }
 0x122   :  { %v1042_v23 = vadd.f32 %v1708_v17, %v977_v22  ;;  %v1711_v25 = vadd.f32 %v1710_v20, %v1709_v18  ;;  %v1750_v27 = vpop.f32.mrb[23].mxu1 }
 0x123   :  { %v1751_v29 = vadd.f32 %v1750_v27, %v1749_v26 }
 0x124   :  { %v1045_v28 = vadd.f32 %v1711_v25, %v2342_v24  ;;  %v1107_v7 = vadd.f32 %v1748_v5, %v1042_v23 }
 0x126   :  { %v1712_v30 = vpop.f32.mrb[24].mxu0  ;;  %v1110_v31 = vadd.f32 %v1751_v29, %v1045_v28 }
 0x127   :  { %v1713_v32 = vpop.f32.mrb[25].mxu0  ;;  %v1752_v35 = vpop.f32.mrb[24].mxu1 }
 0x128   :  { %v1714_v33 = vadd.f32 %v1713_v32, %v1712_v30  ;;  %v1715_v34 = vpop.f32.mrb[26].mxu0  ;;  %v1753_v37 = vpop.f32.mrb[25].mxu1 }
 0x129   :  { %v1716_v36 = vpop.f32.mrb[27].mxu0  ;;  %v1754_v41 = vadd.f32 %v1753_v37, %v1752_v35  ;;  %v1755_v22 = vpop.f32.mrb[26].mxu1 }
 0x12a   :  { %v1050_v38 = vadd.f32 %v1714_v33, %v985_v40  ;;  %v1717_v39 = vadd.f32 %v1716_v36, %v1715_v34  ;;  %v1756_v43 = vpop.f32.mrb[27].mxu1 }
 0x12b   :  { %v1757_v45 = vadd.f32 %v1756_v43, %v1755_v22 }
 0x12c   :  { %v1053_v44 = vadd.f32 %v1717_v39, %v2344_v42  ;;  %v1115_v46 = vadd.f32 %v1754_v41, %v1050_v38 }
 0x12e   :  { %v1718_v24 = vpop.f32.mrb[28].mxu0  ;;  %v1118_v47 = vadd.f32 %v1757_v45, %v1053_v44 }
 0x12f   :  { %v1719_v48 = vpop.f32.mrb[29].mxu0  ;;  %v1758_v51 = vpop.f32.mrb[28].mxu1 }
 0x130   :  { %v1720_v49 = vadd.f32 %v1719_v48, %v1718_v24  ;;  %v1721_v50 = vpop.f32.mrb[30].mxu0  ;;  %v1759_v53 = vpop.f32.mrb[29].mxu1 }
 0x131   :  { %v1722_v52 = vpop.f32.mrb[31].mxu0  ;;  %v1760_v56 = vadd.f32 %v1759_v53, %v1758_v51  ;;  %v1761_v40 = vpop.f32.mrb[30].mxu1 }
 0x132   :  { %v1058_v54 = vadd.f32 %v1720_v49, %v993_v58  ;;  %v1723_v55 = vadd.f32 %v1722_v52, %v1721_v50  ;;  %v1762_v57 = vpop.f32.mrb[31].mxu1 }
 0x133   :  { %v1763_v61 = vadd.f32 %v1762_v57, %v1761_v40 }
 0x134   :  { %v1061_v59 = vadd.f32 %v1723_v55, %v996_v60  ;;  %v1123_v62 = vadd.f32 %v1760_v56, %v1058_v54 }
 0x136   :  { %v1126_v63 = vadd.f32 %v1763_v61, %v1061_v59 }
 0x137   :  { %v1794_v42 = vpop.f32.mrb[32].mxu0 }
 0x138   :  { %v1172_v0 = vadd.f32 %v1794_v42, %v1107_v7  ;;  %v1798_v1 = vpop.f32.mrb[32].mxu1  ;;  %v1163_v2 = vpop.f32.mrb[33].mxu0  ;;  %v1356_v42 = vld [vmem:[%s2492_s4 + $0x8] sm:$0xff] }
 0x139   :  { %v1188_v3 = vadd.f32 %v1798_v1, %v1123_v62  ;;  %v1164_v4 = vadd.f32 %v1163_v2, %v1099_v13  ;;  %v1179_v6 = vpop.f32.mrb[33].mxu1  ;;  %v1795_v8 = vpop.f32.mrb[34].mxu0  ;;  %v1360_v1 = vld [vmem:[%s2492_s4 + $0x28] sm:$0xff]  ;;  %v1355_v2 = vld [vmem:[%s2492_s4] sm:$0xff] }
 0x13a   :  { %v1180_v9 = vadd.f32 %v1179_v6, %v1115_v46  ;;  %v1175_v10 = vadd.f32 %v1795_v8, %v1110_v31  ;;  %v1799_v58 = vpop.f32.mrb[34].mxu1  ;;  %v1166_v11 = vpop.f32.mrb[35].mxu0  ;;  %v1201_v12 = vsel %vm1194_vm0, %v1172_v0, 0.0 }
 0x13b   :  { %v1191_v14 = vadd.f32 %v1799_v58, %v1126_v63  ;;  %v1167_v60 = vadd.f32 %v1166_v11, %v2348_v15  ;;  %v1182_v16 = vpop.f32.mrb[35].mxu1  ;;  %1202 = vadd.xlane.f32.xlu0 %v1201_v12  ;;  %v1195_v19 = vsel %vm1194_vm0, %v1164_v4, 0.0  ;;  %v1213_v21 = vsel %vm1194_vm0, %v1188_v3, 0.0 }
 0x13c   :  { %v1183_v17 = vadd.f32 %v1182_v16, %v1118_v47  ;;  %v1207_v18 = vsel %vm1194_vm0, %v1180_v9, 0.0  ;;  %v1204_v20 = vsel %vm1194_vm0, %v1175_v10, 0.0 }
 0x13d   :  { %1208 = vadd.xlane.f32.xlu1 %v1207_v18  ;;  %v1198_v13 = vsel %vm1194_vm0, %v1167_v60, 0.0  ;;  %v1216_v23 = vsel %vm1194_vm0, %v1191_v14, 0.0 }
 0x13e   :  { %v1210_v15 = vsel %vm1194_vm0, %v1183_v17, 0.0 }
 0x13f   :  { %1196 = vadd.xlane.f32.xlu0 %v1195_v19 }
 0x141   :  { %1199 = vadd.xlane.f32.xlu1 %v1198_v13 }
 0x143   :  { %1205 = vadd.xlane.f32.xlu0 %v1204_v20  ;;  %v1277_v20 = vld [vmem:[%s2493_s3 + $0x10] sm:$0xff] }
 0x145   :  { %1214 = vadd.xlane.f32.xlu1 %v1213_v21 }
 0x147   :  { %1211 = vadd.xlane.f32.xlu0 %v1210_v15 }
 0x14b   :  { %1217 = vadd.xlane.f32.xlu0 %v1216_v23 }
 0x1c8   :  { %v1203_v25 = vpop.xlane.xlu0 %1202 }
 0x1c9   :  { %v1221_v5 = vmul.f32 0.25, %v1203_v25 }
 0x1ca   :  { %v1209_v26 = vpop.xlane.xlu1 %1208 }
 0x1cb   :  { %v2361_v27 = vsub.f32 %v1172_v0, %v1221_v5  ;;  %v1223_v28 = vmul.f32 0.25, %v1209_v26  ;;  %v1358_v0 = vld [vmem:[%s2492_s4 + $0x18] sm:$0xff] }
 0x1cc   :  { %v1197_v29 = vpop.xlane.xlu0 %1196 }
 0x1cd   :  { %v1219_v7 = vmul.f32 0.25, %v1197_v29  ;;  %v1237_v30 = vmul.f32 %v2361_v27, %v2361_v27  ;;  %v2365_v31 = vsub.f32 %v1180_v9, %v1223_v28  ;;  %v1275_v28 = vld [vmem:[%s2493_s3] sm:$0xff] }
 0x1ce   :  { %v1200_v32 = vpop.xlane.xlu1 %1199 }
 0x1cf   :  { %v2367_v33 = vsub.f32 %v1164_v4, %v1219_v7  ;;  %v1220_v34 = vmul.f32 0.25, %v1200_v32  ;;  %v1249_v35 = vsel %vm1194_vm0, %v1237_v30, 0.0  ;;  %v1239_v41 = vmul.f32 %v2365_v31, %v2365_v31  ;;  %v1359_v4 = vld [vmem:[%s2492_s4 + $0x20] sm:$0xff] }
 0x1d0   :  { %1250 = vadd.xlane.f32.xlu1 %v1249_v35  ;;  %v1206_v36 = vpop.xlane.xlu0 %1205 }
 0x1d1   :  { %v1222_v37 = vmul.f32 0.25, %v1206_v36  ;;  %v1235_v38 = vmul.f32 %v2367_v33, %v2367_v33  ;;  %v2374_v22 = vsub.f32 %v1167_v60, %v1220_v34  ;;  %v1255_v49 = vsel %vm1194_vm0, %v1239_v41, 0.0  ;;  %v1278_v36 = vld [vmem:[%s2493_s3 + $0x18] sm:$0xff] }
 0x1d2   :  { %v1215_v39 = vpop.xlane.xlu1 %1214 }
 0x1d3   :  { %v2376_v43 = vsub.f32 %v1175_v10, %v1222_v37  ;;  %v1225_v44 = vmul.f32 0.25, %v1215_v39  ;;  %v1243_v45 = vsel %vm1194_vm0, %v1235_v38, 0.0  ;;  %v1236_v53 = vmul.f32 %v2374_v22, %v2374_v22 }
 0x1d4   :  { %1244 = vadd.xlane.f32.xlu1 %v1243_v45  ;;  %v1212_v46 = vpop.xlane.xlu0 %1211 }
 0x1d5   :  { %v2379_v24 = vsub.f32 %v1188_v3, %v1225_v44  ;;  %v1224_v47 = vmul.f32 0.25, %v1212_v46  ;;  %v1238_v48 = vmul.f32 %v2376_v43, %v2376_v43  ;;  %v1246_v57 = vsel %vm1194_vm0, %v1236_v53, 0.0  ;;  %v1357_v3 = vld [vmem:[%s2492_s4 + $0x10] sm:$0xff]  ;;  %v1282_v53 = vld [vmem:[%s2493_s3 + $0x38] sm:$0xff] }
 0x1d6   :  { %v1281_v44 = vld [vmem:[%s2493_s3 + $0x30] sm:$0xff] }
 0x1d7   :  { %v2384_v50 = vsub.f32 %v1183_v17, %v1224_v47  ;;  %v1252_v51 = vsel %vm1194_vm0, %v1238_v48, 0.0  ;;  %v1241_v52 = vmul.f32 %v2379_v24, %v2379_v24  ;;  %v1279_v48 = vld [vmem:[%s2493_s3 + $0x20] sm:$0xff] }
 0x1d8   :  { %1256 = vadd.xlane.f32.xlu1 %v1255_v49  ;;  %1253 = vadd.xlane.f32.xlu0 %v1252_v51  ;;  %v1218_v54 = vpop.xlane.xlu0 %1217 }
 0x1d9   :  { %v1226_v55 = vmul.f32 0.25, %v1218_v54  ;;  %v1261_v40 = vsel %vm1194_vm0, %v1241_v52, 0.0  ;;  %v1240_v59 = vmul.f32 %v2384_v50, %v2384_v50  ;;  %v1276_v52 = vld [vmem:[%s2493_s3 + $0x8] sm:$0xff] }
 0x1db   :  { %v2391_v56 = vsub.f32 %v1191_v14, %v1226_v55  ;;  %v1258_v61 = vsel %vm1194_vm0, %v1240_v59, 0.0  ;;  %v1280_v59 = vld [vmem:[%s2493_s3 + $0x28] sm:$0xff] }
 0x1dc   :  { %1262 = vadd.xlane.f32.xlu1 %v1261_v40  ;;  %1247 = vadd.xlane.f32.xlu0 %v1246_v57 }
 0x1dd   :  { %v1242_v62 = vmul.f32 %v2391_v56, %v2391_v56 }
 0x1df   :  { %v1264_v63 = vsel %vm1194_vm0, %v1242_v62, 0.0 }
 0x1e0   :  { %1259 = vadd.xlane.f32.xlu0 %v1258_v61  ;;  %v1361_v61 = vld [vmem:[%s2492_s4 + $0x30] sm:$0xff] }
 0x1e4   :  { %1265 = vadd.xlane.f32.xlu0 %v1264_v63  ;;  %v1362_v63 = vld [vmem:[%s2492_s4 + $0x38] sm:$0xff] }
 0x1ed   :  { %1370 = vperm.xlu1 %1818, %v1356_v42  }
 0x1f1   :  { %1380 = vperm.xlu1 %1818, %v1358_v0  }
 0x1f5   :  { %1390 = vperm.xlu1 %1818, %v1360_v1  }
 0x1fa   :  { %1365 = vperm.xlu0 %1817, %v1355_v2  }
 0x1fe   :  { %1375 = vperm.xlu0 %1817, %v1357_v3  }
 0x202   :  { %1385 = vperm.xlu0 %1817, %v1359_v4  }
 0x25d   :  { %v1251_v6 = vpop.xlane.xlu1 %1250 }
 0x25e   :  { %v1269_v8 = vmul.f32 0.25, %v1251_v6 }
 0x260   :  { %v1285_v9 = vadd.f32 1e-05, %v1269_v8 }
 0x261   :  { %v1245_v10 = vpop.xlane.xlu1 %1244 }
 0x262   :  { %1943 = vrsqrt.f32 %v1285_v9  ;;  %v1267_v58 = vmul.f32 0.25, %v1245_v10 }
 0x264   :  { %v1283_v11 = vadd.f32 1e-05, %v1267_v58 }
 0x265   :  { %v1257_v12 = vpop.xlane.xlu1 %1256  ;;  %v1254_v14 = vpop.xlane.xlu0 %1253 }
 0x266   :  { %1945 = vrsqrt.f32 %v1283_v11  ;;  %v1270_v60 = vmul.f32 0.25, %v1254_v14  ;;  %v1271_v16 = vmul.f32 0.25, %v1257_v12 }
 0x268   :  { %v1286_v17 = vadd.f32 1e-05, %v1270_v60  ;;  %v1287_v15 = vadd.f32 1e-05, %v1271_v16 }
 0x269   :  { %v1263_v18 = vpop.xlane.xlu1 %1262  ;;  %v1248_v19 = vpop.xlane.xlu0 %1247 }
 0x26a   :  { %v1273_v13 = vmul.f32 0.25, %v1263_v18  ;;  %1947 = vrsqrt.f32 %v1286_v17  ;;  %v1268_v25 = vmul.f32 0.25, %v1248_v19 }
 0x26c   :  { %v1944_v21 = vpop.eup %1943  ;;  %v1289_v23 = vadd.f32 1e-05, %v1273_v13  ;;  %v1284_v7 = vadd.f32 1e-05, %v1268_v25 }
 0x26d   :  { %v1260_v5 = vpop.xlane.xlu0 %1259  ;;  %v1301_v26 = vmul.f32 %v1944_v21, %v1277_v20  ;;  %v1371_v42 = vpop.permute.xlu1 %1370 }
 0x26e   :  { %1949 = vrsqrt.f32 %v1289_v23  ;;  %v1272_v30 = vmul.f32 0.25, %v1260_v5 }
 0x26f   :  { %1319 = vperm.xlu1 %1818, %v1301_v26   ;;  %1951 = vrsqrt.f32 %v1287_v15 }
 0x270   :  { %v1946_v29 = vpop.eup %1945  ;;  %1953 = vrsqrt.f32 %v1284_v7  ;;  %v1288_v37 = vadd.f32 1e-05, %v1272_v30 }
 0x271   :  { %v1266_v32 = vpop.xlane.xlu0 %1265  ;;  %v1299_v34 = vmul.f32 %v1946_v29, %v1275_v28  ;;  %v1381_v0 = vpop.permute.xlu1 %1380 }
 0x272   :  { %v1274_v35 = vmul.f32 0.25, %v1266_v32 }
 0x273   :  { %1309 = vperm.xlu1 %1818, %v1299_v34  }
 0x274   :  { %v1290_v38 = vadd.f32 1e-05, %v1274_v35  ;;  %v1948_v39 = vpop.eup %1947 }
 0x275   :  { %v1302_v41 = vmul.f32 %v1948_v39, %v1278_v36  ;;  %v1391_v1 = vpop.permute.xlu1 %1390 }
 0x276   :  { %1955 = vrsqrt.f32 %v1290_v38 }
 0x277   :  { %1957 = vrsqrt.f32 %v1288_v37  ;;  %1324 = vperm.xlu1 %1818, %v1302_v41  }
 0x278   :  { %v1950_v45 = vpop.eup %1949 }
 0x279   :  { %v1305_v46 = vmul.f32 %v1950_v45, %v1281_v44  ;;  %v1952_v47 = vpop.eup %1951  ;;  %v1366_v2 = vpop.permute.xlu0 %1365 }
 0x27a   :  { %v1303_v49 = vmul.f32 %v1952_v47, %v1279_v48  ;;  %v1954_v51 = vpop.eup %1953 }
 0x27b   :  { %1339 = vperm.xlu0 %1817, %v1305_v46   ;;  %v1300_v55 = vmul.f32 %v1954_v51, %v1276_v52 }
 0x27d   :  { %v1376_v6 = vpop.permute.xlu0 %1375 }
 0x27f   :  { %1329 = vperm.xlu0 %1817, %v1303_v49  }
 0x280   :  { %v1956_v54 = vpop.eup %1955 }
 0x281   :  { %v1306_v40 = vmul.f32 %v1956_v54, %v1282_v53  ;;  %v1958_v57 = vpop.eup %1957  ;;  %v1386_v14 = vpop.permute.xlu0 %1385 }
 0x282   :  { %v1304_v62 = vmul.f32 %v1958_v57, %v1280_v59 }
 0x283   :  { %1314 = vperm.xlu0 %1817, %v1300_v55   ;;  %1344 = vperm.xlu1 %1818, %v1306_v40  }
 0x287   :  { %1395 = vperm.xlu0 %1817, %v1361_v61   ;;  %1334 = vperm.xlu1 %1818, %v1304_v62  }
 0x28b   :  { %1400 = vperm.xlu1 %1818, %v1362_v63  }
 0x2ee   :  { %v1320_v3 = vpop.permute.xlu1 %1319 }
 0x2ef   :  { %v1349_v4 = vmul.f32 %v1320_v3, %v2361_v27 }
 0x2f1   :  { %v1405_v8 = vadd.f32 %v1376_v6, %v1349_v4 }
 0x2f2   :  { %v1310_v9 = vpop.permute.xlu1 %1309 }
 0x2f3   :  { %vm1413_vm1 = vcmp.ge.f32.partialorder %v1405_v8, 0.0  ;;  %v1421_v10 = vmul.f32 0.01, %v1405_v8  ;;  %v1347_v58 = vmul.f32 %v1310_v9, %v2367_v33 }
 0x2f5   :  { %v1429_v11 = vsel %vm1413_vm1, %v1405_v8, %v1421_v10  ;;  %v1403_v12 = vadd.f32 %v1366_v2, %v1347_v58 }
 0x2f6   :  { %v1598_v60 = vpack.c.bf16 %v1429_v11, %v1429_v11  ;;  %v1325_v17 = vpop.permute.xlu1 %1324 }
 0x2f7   :  { %vm1411_vm3 = vcmp.ge.f32.partialorder %v1403_v12, 0.0  ;;  %v1419_v16 = vmul.f32 0.01, %v1403_v12  ;;  %v1350_v27 = vmul.f32 %v1325_v17, %v2376_v43 }
 0x2f8   :  { %1470 = vst.msk [vmem:[%s2494_s5 + $0x8] sm:$0xf] %vm1467_vm2, %v1598_v60 }
 0x2f9   :  { %v1427_v18 = vsel %vm1411_vm3, %v1403_v12, %v1419_v16  ;;  %v1406_v13 = vadd.f32 %v1381_v0, %v1350_v27 }
 0x2fa   :  { %v1596_v19 = vpack.c.bf16 %v1427_v18, %v1427_v18  ;;  %v1340_v20 = vpop.permute.xlu0 %1339 }
 0x2fb   :  { %vm1414_vm4 = vcmp.ge.f32.partialorder %v1406_v13, 0.0  ;;  %v1422_v33 = vmul.f32 0.01, %v1406_v13  ;;  %v1353_v7 = vmul.f32 %v1340_v20, %v2379_v24 }
 0x2fc   :  { %1468 = vst.msk [vmem:[%s2494_s5] sm:$0xf] %vm1467_vm2, %v1596_v19 }
 0x2fd   :  { %v1430_v21 = vsel %vm1414_vm4, %v1406_v13, %v1422_v33 }
 0x2fe   :  { %v1330_v15 = vpop.permute.xlu0 %1329  ;;  %v1599_v23 = vpack.c.bf16 %v1430_v21, %v1430_v21 }
 0x2ff   :  { %v1351_v25 = vmul.f32 %v1330_v15, %v2365_v31 }
 0x300   :  { %1471 = vst.msk [vmem:[%s2494_s5 + $0xc] sm:$0xf] %vm1467_vm2, %v1599_v23 }
 0x301   :  { %v1407_v43 = vadd.f32 %v1386_v14, %v1351_v25 }
 0x302   :  { %v1345_v5 = vpop.permute.xlu1 %1344  ;;  %v1315_v26 = vpop.permute.xlu0 %1314 }
 0x303   :  { %vm1415_vm5 = vcmp.ge.f32.partialorder %v1407_v43, 0.0  ;;  %v1423_v28 = vmul.f32 0.01, %v1407_v43  ;;  %v1348_v29 = vmul.f32 %v1315_v26, %v2374_v22  ;;  %v1354_v39 = vmul.f32 %v1345_v5, %v2391_v56 }
 0x305   :  { %v1431_v30 = vsel %vm1415_vm5, %v1407_v43, %v1423_v28  ;;  %v1404_v32 = vadd.f32 %v1371_v42, %v1348_v29 }
 0x306   :  { %v1600_v34 = vpack.c.bf16 %v1431_v30, %v1431_v30  ;;  %v1335_v35 = vpop.permute.xlu1 %1334  ;;  %v1396_v36 = vpop.permute.xlu0 %1395 }
 0x307   :  { %vm1412_vm6 = vcmp.ge.f32.partialorder %v1404_v32, 0.0  ;;  %v1420_v31 = vmul.f32 0.01, %v1404_v32  ;;  %v1352_v37 = vmul.f32 %v1335_v35, %v2384_v50  ;;  %v1409_v38 = vadd.f32 %v1396_v36, %v1353_v7 }
 0x308   :  { %1472 = vst.msk [vmem:[%s2494_s5 + $0x10] sm:$0xf] %vm1467_vm2, %v1600_v34 }
 0x309   :  { %v1428_v22 = vsel %vm1412_vm6, %v1404_v32, %v1420_v31  ;;  %v1408_v41 = vadd.f32 %v1391_v1, %v1352_v37  ;;  %vm1417_vm7 = vcmp.ge.f32.partialorder %v1409_v38, 0.0  ;;  %v1425_v24 = vmul.f32 0.01, %v1409_v38 }
 0x30a   :  { %v1597_v44 = vpack.c.bf16 %v1428_v22, %v1428_v22  ;;  %v1401_v45 = vpop.permute.xlu1 %1400 }
 0x30b   :  { %vm1416_vm8 = vcmp.ge.f32.partialorder %v1408_v41, 0.0  ;;  %v1424_v46 = vmul.f32 0.01, %v1408_v41  ;;  %v1433_v47 = vsel %vm1417_vm7, %v1409_v38, %v1425_v24  ;;  %v1410_v48 = vadd.f32 %v1401_v45, %v1354_v39 }
 0x30c   :  { %1469 = vst.msk [vmem:[%s2494_s5 + $0x4] sm:$0xf] %vm1467_vm2, %v1597_v44  ;;  %v1602_v50 = vpack.c.bf16 %v1433_v47, %v1433_v47 }
 0x30d   :  { %v1432_v49 = vsel %vm1416_vm8, %v1408_v41, %v1424_v46  ;;  %vm1418_vm9 = vcmp.ge.f32.partialorder %v1410_v48, 0.0  ;;  %v1426_v51 = vmul.f32 0.01, %v1410_v48 }
 0x30e   :  { %v1601_v56 = vpack.c.bf16 %v1432_v49, %v1432_v49  ;;  %1474 = vst.msk [vmem:[%s2494_s5 + $0x18] sm:$0xf] %vm1467_vm2, %v1602_v50 }
 0x30f   :  { %v1434_v52 = vsel %vm1418_vm9, %v1410_v48, %v1426_v51 }
 0x310   :  { %1473 = vst.msk [vmem:[%s2494_s5 + $0x14] sm:$0xf] %vm1467_vm2, %v1601_v56  ;;  %v1603_v53 = vpack.c.bf16 %v1434_v52, %v1434_v52 }
 0x312   :  { %1475 = vst.msk [vmem:[%s2494_s5 + $0x1c] sm:$0xf] %vm1467_vm2, %v1603_v53 }

// kernel: _lambda_.19
= control target key start
LH: loop header
LB: loop body
LE: loop exit
PB: predicated region body
PF: predicated region fallthrough
CT: control target
= control target key end

     0   :  { %v2131_v2 = vmov 0   ;;  %vm535_vm0 = vcmask 523264   ;;  %vm1322_vm1 = vcmask 130048   ;;  %vm1595_vm3 = vcmask 125952   ;;  %s2720_s1 = inlined_call_operand.vmem [shape: bf16[576,16], index: 1, kind: input, shape index: {}]   ;;  %s2721_s3 = inlined_call_operand.vmem [shape: bf16[64,576], index: 3, kind: input, shape index: {}]   ;;  %s2722_s0 = inlined_call_operand.vmem [shape: bf16[576,16], index: 0, kind: input, shape index: {}]   ;;  %s2723_s2 = inlined_call_operand.vmem [shape: bf16[64,576], index: 2, kind: input, shape index: {}]   ;;  %s2724_s4 = inlined_call_operand.vmem [shape: f32[64,1], index: 4, kind: input, shape index: {}, may-alias: {4,6}]   ;;  %s2725_s6 = inlined_call_operand.vmem [shape: f32[64,1], index: 6, kind: input, shape index: {}, may-alias: {4,6}]   ;;  %s2726_s5 = inlined_call_operand.vmem [shape: f32[64,1], index: 5, kind: input, shape index: {}]   ;;  %s2727_s7 = inlined_call_operand.vmem [shape: bf16[64,16], index: 7, kind: output, shape index: {}]  }
   0x1   :  { %v1987_v0 = vld [vmem:[%s2720_s1 + $0x40] sm:$0xff]   ;;  %1985 = vset.pattern.permute.xlu0 %v2131_v2  ;;  %1986 = vset.pattern.permute.xlu1 %v2131_v2  ;;  %v1990_v4 = vld [vmem:[%s2720_s1 + $0x48] sm:$0xff]   ;;  %v1993_v7 = vld [vmem:[%s2720_s1 + $0x50] sm:$0xff]  }
   0x2   :  { %v1988_v1 = vld [vmem:[%s2720_s1 + $0x100] sm:$0xff]   ;;  %1744 = vmatprep.subr.bf16.mxu1 %v1987_v0  ;;  %v1991_v5 = vld [vmem:[%s2720_s1 + $0x108] sm:$0xff]   ;;  %v1994_v8 = vld [vmem:[%s2720_s1 + $0x110] sm:$0xff]  }
   0x3   :  { %v1989_v3 = vld [vmem:[%s2720_s1] sm:$0xff]   ;;  %1920 = vmatprep.subr.bf16.mxu0 %v1988_v1  ;;  %v1992_v6 = vld [vmem:[%s2720_s1 + $0x8] sm:$0xff]   ;;  %v1995_v9 = vld [vmem:[%s2720_s1 + $0x10] sm:$0xff]  }
   0x4   :  { %1745 = vmatpush3.bf16.msra.mxu1 %v1989_v3  ;;  %1921 = vmatpush3.bf16.msra.mxu0 %v1988_v1  ;;  %v1996_v10 = vld [vmem:[%s2720_s1 + $0x58] sm:$0xff]   ;;  %v1999_v13 = vld [vmem:[%s2720_s1 + $0x60] sm:$0xff]   ;;  %v2005_v19 = vld [vmem:[%s2720_s1 + $0x68] sm:$0xff]  }
   0x5   :  { %1746 = vmatprep.subr.bf16.mxu1 %v1990_v4  ;;  %1922 = vmatprep.subr.bf16.mxu0 %v1991_v5  ;;  %v1997_v11 = vld [vmem:[%s2720_s1 + $0x118] sm:$0xff]   ;;  %v2000_v14 = vld [vmem:[%s2721_s3 + $0x10] ss:$20 sps:$4 sm:$0xff]   ;;  %v2006_v20 = vld [vmem:[%s2722_s0 + $0xc8] sm:$0xff]  }
   0x6   :  { %v1998_v12 = vld [vmem:[%s2720_s1 + $0x18] sm:$0xff]   ;;  %v2001_v15 = vld [vmem:[%s2722_s0 + $0xc0] sm:$0xff]   ;;  %1928 = vmatprep.mubr.msk.bf16.mxu0 %vm535_vm0, %v2000_v14  ;;  %v2007_v21 = vld [vmem:[%s2720_s1 + $0x28] sm:$0xff]  }
   0x7   :  { %v2002_v16 = vld [vmem:[%s2720_s1 + $0x20] sm:$0xff]   ;;  %v2003_v17 = vld [vmem:[%s2721_s3 + $0x38] ss:$20 sps:$4 sm:$0xff]   ;;  %v2009_v23 = vld [vmem:[%s2720_s1 + $0x70] sm:$0xff]  }
   0x8   :  { %1747 = vmatpush3.bf16.msra.mxu1 %v1992_v6  ;;  %1923 = vmatpush3.bf16.msra.mxu0 %v1991_v5  ;;  %v2004_v18 = vld [vmem:[%s2722_s0 + $0x80] sm:$0xff]   ;;  %v2008_v22 = vld [vmem:[%s2722_s0 + $0x88] sm:$0xff]   ;;  %v2010_v24 = vld [vmem:[%s2722_s0 + $0xd0] sm:$0xff]  }
   0x9   :  { %1748 = vmatprep.subr.bf16.mxu1 %v1993_v7  ;;  %1924 = vmatprep.subr.bf16.mxu0 %v1994_v8  ;;  %v2011_v25 = vld [vmem:[%s2720_s1 + $0x30] sm:$0xff]   ;;  %v2013_v27 = vld [vmem:[%s2720_s1 + $0x78] sm:$0xff]   ;;  %v2020_v33 = vld [vmem:[%s2720_s1 + $0xc0] sm:$0xff]  }
   0xa   :  { %v2012_v26 = vld [vmem:[%s2722_s0 + $0x90] sm:$0xff]   ;;  %v2014_v28 = vld [vmem:[%s2722_s0 + $0xd8] sm:$0xff]   ;;  %v2021_v34 = vld [vmem:[%s2722_s0 + $0xe0] sm:$0xff]  }
   0xb   :  { %v2015_v29 = vld [vmem:[%s2720_s1 + $0x38] sm:$0xff]   ;;  %v2017_v31 = vld [vmem:[%s2721_s3] ss:$20 sps:$4 sm:$0xff]   ;;  %v2024_v37 = vld [vmem:[%s2720_s1 + $0xc8] sm:$0xff]  }
   0xc   :  { %1749 = vmatpush3.bf16.msra.mxu1 %v1995_v9  ;;  %1925 = vmatpush3.bf16.msra.mxu0 %v1994_v8  ;;  %v2016_v30 = vld [vmem:[%s2722_s0 + $0x98] sm:$0xff]   ;;  %v2022_v35 = vld [vmem:[%s2720_s1 + $0x80] sm:$0xff]   ;;  %v2025_v38 = vld [vmem:[%s2722_s0 + $0xe8] sm:$0xff]  }
   0xd   :  { %1750 = vmatprep.subr.bf16.mxu1 %v1996_v10  ;;  %1926 = vmatprep.subr.bf16.mxu0 %v1997_v11  ;;  %v2019_v32 = vld [vmem:[%s2721_s3 + $0x4] ss:$20 sps:$4 sm:$0xff]   ;;  %v2026_v39 = vld [vmem:[%s2720_s1 + $0x88] sm:$0xff]   ;;  %v2030_v42 = vld [vmem:[%s2721_s3 + $0x60] ss:$20 sps:$4 sm:$0xff]  }
   0xe   :  { %580 = vmatprep.mubr.bf16.mxu1 %v2019_v32  ;;  %v2023_v36 = vld [vmem:[%s2722_s0 + $0xa0] sm:$0xff]   ;;  %v2027_v40 = vld [vmem:[%s2722_s0 + $0xa8] sm:$0xff]   ;;  %v2032_v44 = vld [vmem:[%s2720_s1 + $0xd0] sm:$0xff]  }
   0xf   :  { %v2028_v41 = vld [vmem:[%s2721_s3 + $0x2c] ss:$20 sps:$4 sm:$0xff]   ;;  %v2031_v43 = vld [vmem:[%s2721_s3 + $0x28] ss:$20 sps:$4 sm:$0xff]   ;;  %v2034_v46 = vld [vmem:[%s2722_s0 + $0xf0] sm:$0xff]  }
  0x10   :  { %1751 = vmatpush3.bf16.msra.mxu1 %v1998_v12  ;;  %1927 = vmatpush3.bf16.msra.mxu0 %v1997_v11  ;;  %v2033_v45 = vld [vmem:[%s2721_s3 + $0x88] ss:$20 sps:$4 sm:$0xff]   ;;  %v2035_v47 = vld [vmem:[%s2720_s1 + $0x90] sm:$0xff]   ;;  %v2045_v55 = vld [vmem:[%s2723_s2 + $0xc] ss:$20 sps:$4 sm:$0xff]  }
  0x11   :  { %1752 = vmatprep.subr.bf16.mxu1 %v1999_v13  ;;  %1872 = vmatprep.subr.bf16.mxu0 %v2001_v15  ;;  %v2036_v48 = vld [vmem:[%s2722_s0 + $0xb0] sm:$0xff]   ;;  %v2037_v49 = vld [vmem:[%s2720_s1 + $0xd8] sm:$0xff]   ;;  %v2047_v57 = vld [vmem:[%s2720_s1 + $0xe0] sm:$0xff]  }
  0x12   :  { %v2038_v50 = vld [vmem:[%s2722_s0 + $0xf8] sm:$0xff]   ;;  %v2041_v53 = vld [vmem:[%s2721_s3 + $0x54] ss:$20 sps:$4 sm:$0xff]   ;;  %v2046_v56 = vld [vmem:[%s2721_s3 + $0x50] ss:$20 sps:$4 sm:$0xff]  }
  0x13   :  { %1929 = vmatmul.mubr.msk.bf16.vlgmr.msra.gmra.mrb[0].mxu0 %vm535_vm0, %v2003_v17  ;;  %v2039_v51 = vld [vmem:[%s2720_s1 + $0x98] sm:$0xff]   ;;  %v2048_v58 = vld [vmem:[%s2720_s1 + $0xa0] sm:$0xff]   ;;  %v2049_v59 = vld [vmem:[%s2720_s1 + $0xe8] sm:$0xff]  }
  0x14   :  { %1753 = vmatpush3.bf16.msra.mxu1 %v2002_v16  ;;  %1873 = vmatpush3.bf16.msra.mxu0 %v2004_v18  ;;  %v2040_v52 = vld [vmem:[%s2722_s0 + $0xb8] sm:$0xff]   ;;  %v2050_v60 = vld [vmem:[%s2720_s1 + $0xa8] sm:$0xff]   ;;  %v2056_v0 = vld [vmem:[%s2720_s1 + $0xf0] sm:$0xff]  }
  0x15   :  { %1754 = vmatprep.subr.bf16.mxu1 %v2005_v19  ;;  %1874 = vmatprep.subr.bf16.mxu0 %v2006_v20  ;;  %v2043_v54 = vld [vmem:[%s2723_s2 + $0x8] ss:$20 sps:$4 sm:$0xff]   ;;  %v2055_v63 = vld [vmem:[%s2721_s3 + $0x78] ss:$20 sps:$4 sm:$0xff]   ;;  %v2057_v1 = vld [vmem:[%s2723_s2 + $0x30] ss:$20 sps:$4 sm:$0xff]  }
  0x16   :  { %1932 = vmatprep.mubr.msk.bf16.mxu0 %vm535_vm0, %v2030_v42  ;;  %v2051_v61 = vld [vmem:[%s2721_s3 + $0x7c] ss:$20 sps:$4 sm:$0xff]   ;;  %v2053_v62 = vld [vmem:[%s2723_s2 + $0x34] ss:$20 sps:$4 sm:$0xff]   ;;  %v2063_v5 = vld [vmem:[%s2721_s3 + $0xc] ss:$20 sps:$4 sm:$0xff]  }
  0x17   :  { %v2058_v2 = vld [vmem:[%s2720_s1 + $0xb0] sm:$0xff]   ;;  %v2059_v3 = vld [vmem:[%s2720_s1 + $0xf8] sm:$0xff]   ;;  %v2066_v8 = vld [vmem:[%s2722_s0 + $0x40] sm:$0xff]  }
  0x18   :  { %1755 = vmatpush3.bf16.msra.mxu1 %v2007_v21  ;;  %1875 = vmatpush3.bf16.msra.mxu0 %v2008_v22  ;;  %v2060_v4 = vld [vmem:[%s2720_s1 + $0xb8] sm:$0xff]   ;;  %v2068_v10 = vld [vmem:[%s2722_s0 + $0x100] sm:$0xff]   ;;  %v2070_v12 = vld [vmem:[%s2722_s0 + $0x48] sm:$0xff]  }
  0x19   :  { %1756 = vmatprep.subr.bf16.mxu1 %v2009_v23  ;;  %1876 = vmatprep.subr.bf16.mxu0 %v2010_v24  ;;  %v2061_v6 = vld [vmem:[%s2721_s3 + $0x8] ss:$20 sps:$4 sm:$0xff]   ;;  %v2067_v9 = vld [vmem:[%s2723_s2 + $0x58] ss:$20 sps:$4 sm:$0xff]   ;;  %v2069_v11 = vld [vmem:[%s2722_s0] sm:$0xff]  }
  0x1a   :  { %v2064_v7 = vld [vmem:[%s2723_s2 + $0x5c] ss:$20 sps:$4 sm:$0xff]   ;;  %v2071_v13 = vld [vmem:[%s2722_s0 + $0x108] sm:$0xff]   ;;  %v2075_v16 = vld [vmem:[%s2723_s2 + $0x84] ss:$20 sps:$4 sm:$0xff]  }
  0x1b   :  { %1933 = vmatmul.mubr.msk.bf16.gmra.mrb[4].mxu0 %vm535_vm0, %v2033_v45  ;;  %v2072_v14 = vld [vmem:[%s2722_s0 + $0x8] sm:$0xff]   ;;  %v2077_v17 = vld [vmem:[%s2721_s3 + $0x30] ss:$20 sps:$4 sm:$0xff]   ;;  %v2079_v19 = vld [vmem:[%s2723_s2 + $0x80] ss:$20 sps:$4 sm:$0xff]  }
  0x1c   :  { %1757 = vmatpush3.bf16.msra.mxu1 %v2011_v25  ;;  %1877 = vmatpush3.bf16.msra.mxu0 %v2012_v26  ;;  %v2073_v15 = vld [vmem:[%s2721_s3 + $0x34] ss:$20 sps:$4 sm:$0xff]   ;;  %v2082_v22 = vld [vmem:[%s2722_s0 + $0x58] sm:$0xff]   ;;  %v2087_v26 = vld [vmem:[%s2723_s2 + $0x10] ss:$20 sps:$4 sm:$0xff]  }
  0x1d   :  { %1758 = vmatprep.subr.bf16.mxu1 %v2013_v27  ;;  %1878 = vmatprep.subr.bf16.mxu0 %v2014_v28  ;;  %v2078_v18 = vld [vmem:[%s2722_s0 + $0x50] sm:$0xff]   ;;  %v2083_v23 = vld [vmem:[%s2722_s0 + $0x118] sm:$0xff]   ;;  %v2089_v28 = vld [vmem:[%s2722_s0 + $0x60] sm:$0xff]  }
  0x1e   :  { %1168 = vmatprep.mubr.bf16.mxu0 %v2045_v55  ;;  %v2080_v20 = vld [vmem:[%s2722_s0 + $0x110] sm:$0xff]   ;;  %v2084_v24 = vld [vmem:[%s2722_s0 + $0x18] sm:$0xff]   ;;  %v2093_v32 = vld [vmem:[%s2722_s0 + $0x28] sm:$0xff]  }
  0x1f   :  { %v2081_v21 = vld [vmem:[%s2722_s0 + $0x10] sm:$0xff]   ;;  %v2088_v27 = vld [vmem:[%s2721_s3 + $0x58] ss:$20 sps:$4 sm:$0xff]  }
  0x20   :  { %1759 = vmatpush3.bf16.msra.mxu1 %v2015_v29  ;;  %1879 = vmatpush3.bf16.msra.mxu0 %v2016_v30  ;;  %v2085_v25 = vld [vmem:[%s2721_s3 + $0x5c] ss:$20 sps:$4 sm:$0xff]   ;;  %v2090_v29 = vld [vmem:[%s2723_s2 + $0x38] ss:$20 sps:$4 sm:$0xff]   ;;  %v2091_v30 = vld [vmem:[%s2722_s0 + $0x20] sm:$0xff]  }
  0x21   :  { %1784 = vmatprep.subr.bf16.mxu1 %v2020_v33  ;;  %1880 = vmatprep.subr.bf16.mxu0 %v2021_v34  ;;  %v2094_v33 = vld [vmem:[%s2721_s3 + $0x84] ss:$20 sps:$4 sm:$0xff]   ;;  %v2096_v34 = vld [vmem:[%s2723_s2 + $0x60] ss:$20 sps:$4 sm:$0xff]   ;;  %v2112_v55 = vld [vmem:[%s2723_s2 + $0x7c] ss:$20 sps:$4 sm:$0xff]  }
  0x22   :  { %v2103_v42 = vld [vmem:[%s2723_s2] ss:$20 sps:$4 sm:$0xff]  }
  0x23   :  { %581 = vmatmul.mubr.bf16.vlgmr.msra.gmra.mrb[0].mxu1 %v2017_v31  ;;  %v2092_v31 = vld [vmem:[%s2722_s0 + $0x68] sm:$0xff]   ;;  %v1268_v45 = vld [vmem:[%s2724_s4 + $0x10] sm:$0xff] }
  0x24   :  { %1785 = vmatpush3.bf16.msra.mxu1 %v2022_v35  ;;  %1881 = vmatpush3.bf16.msra.mxu0 %v2023_v36  ;;  %v2097_v35 = vld [vmem:[%s2721_s3 + $0x80] ss:$20 sps:$4 sm:$0xff]  }
  0x25   :  { %1786 = vmatprep.subr.bf16.mxu1 %v2024_v37  ;;  %1882 = vmatprep.subr.bf16.mxu0 %v2025_v38  ;;  %v2098_v36 = vld [vmem:[%s2722_s0 + $0x70] sm:$0xff]   ;;  %v2099_v37 = vld [vmem:[%s2723_s2 + $0x88] ss:$20 sps:$4 sm:$0xff]  }
  0x26   :  { %588 = vmatprep.mubr.bf16.mxu1 %v2028_v41  ;;  %v2100_v38 = vld [vmem:[%s2722_s0 + $0x30] sm:$0xff]   ;;  %v2105_v41 = vld [vmem:[%s2723_s2 + $0x4] ss:$20 sps:$4 sm:$0xff]   ;;  %1286 = vperm.xlu1 %1986, %v1268_v45  }
  0x28   :  { %1787 = vmatpush3.bf16.msra.mxu1 %v2026_v39  ;;  %1883 = vmatpush3.bf16.msra.mxu0 %v2027_v40  ;;  %v2101_v39 = vld [vmem:[%s2722_s0 + $0x78] sm:$0xff]  }
  0x29   :  { %1788 = vmatprep.subr.bf16.mxu1 %v2032_v44  ;;  %1884 = vmatprep.subr.bf16.mxu0 %v2034_v46  ;;  %v2102_v40 = vld [vmem:[%s2722_s0 + $0x38] sm:$0xff]   ;;  %v1266_v44 = vld [vmem:[%s2724_s4] sm:$0xff]  ;;  %v1267_v46 = vld [vmem:[%s2724_s4 + $0x8] sm:$0xff] }
  0x2a   :  { %1276 = vperm.xlu0 %1985, %v1266_v44  }
  0x2b   :  { %589 = vmatmul.mubr.bf16.gmra.mrb[4].mxu1 %v2031_v43  ;;  %v2106_v43 = vld [vmem:[%s2723_s2 + $0x2c] ss:$20 sps:$4 sm:$0xff]  }
  0x2c   :  { %1789 = vmatpush3.bf16.msra.mxu1 %v2035_v47  ;;  %1885 = vmatpush3.bf16.msra.mxu0 %v2036_v48  ;;  %v1269_v47 = vld [vmem:[%s2724_s4 + $0x18] sm:$0xff]  ;;  %v1270_v48 = vld [vmem:[%s2724_s4 + $0x20] sm:$0xff] }
  0x2d   :  { %1790 = vmatprep.subr.bf16.mxu1 %v2037_v49  ;;  %1886 = vmatprep.subr.bf16.mxu0 %v2038_v50  ;;  %v2108_v49 = vld [vmem:[%s2723_s2 + $0x28] ss:$20 sps:$4 sm:$0xff]  }
  0x2e   :  { %596 = vmatprep.mubr.bf16.mxu1 %v2041_v53  ;;  %1281 = vperm.xlu0 %1985, %v1267_v46   ;;  %v1271_v50 = vld [vmem:[%s2724_s4 + $0x28] sm:$0xff]  ;;  %v1273_v53 = vld [vmem:[%s2724_s4 + $0x38] sm:$0xff] }
  0x2f   :  { %1291 = vperm.xlu1 %1986, %v1269_v47  }
  0x30   :  { %1791 = vmatpush3.bf16.msra.mxu1 %v2039_v51  ;;  %1887 = vmatpush3.bf16.msra.mxu0 %v2040_v52  ;;  %v2109_v51 = vld [vmem:[%s2723_s2 + $0x54] ss:$20 sps:$4 sm:$0xff]  }
  0x31   :  { %1792 = vmatprep.subr.bf16.mxu1 %v2047_v57  ;;  %1936 = vmatprep.subr.bf16.mxu0 %v2068_v10  ;;  %v1272_v52 = vld [vmem:[%s2724_s4 + $0x30] sm:$0xff] }
  0x32   :  { %1296 = vperm.xlu0 %1985, %v1270_v48  }
  0x33   :  { %597 = vmatmul.mubr.bf16.gmra.mrb[8].mxu1 %v2046_v56  ;;  %1169 = vmatmul.mubr.bf16.vlgmr.msra.gmra.mrb[8].mxu0 %v2043_v54  ;;  %v2111_v54 = vld [vmem:[%s2723_s2 + $0x50] ss:$20 sps:$4 sm:$0xff]   ;;  %v2114_v56 = vld [vmem:[%s2723_s2 + $0x78] ss:$20 sps:$4 sm:$0xff]  }
  0x34   :  { %1793 = vmatpush3.bf16.msra.mxu1 %v2048_v58  ;;  %604 = vmatprep.mubr.bf16.mxu1 %v2051_v61 }
  0x35   :  { %1794 = vmatprep.subr.bf16.mxu1 %v2049_v59  ;;  %1176 = vmatprep.mubr.bf16.mxu0 %v2053_v62 }
  0x36   :  { %1937 = vmatpush3.bf16.msra.mxu0 %v2068_v10  ;;  %1301 = vperm.xlu1 %1986, %v1271_v50  }
  0x37   :  { %1938 = vmatprep.subr.bf16.mxu0 %v2071_v13  ;;  %1306 = vperm.xlu0 %1985, %v1272_v52  }
  0x38   :  { %1795 = vmatpush3.bf16.msra.mxu1 %v2050_v60 }
  0x39   :  { %1796 = vmatprep.subr.bf16.mxu1 %v2056_v0 }
  0x3a   :  { %1939 = vmatpush3.bf16.msra.mxu0 %v2071_v13  ;;  %1311 = vperm.xlu1 %1986, %v1273_v53  }
  0x3b   :  { %605 = vmatmul.mubr.bf16.gmra.mrb[12].mxu1 %v2055_v63  ;;  %1177 = vmatmul.mubr.bf16.gmra.mrb[12].mxu0 %v2057_v1 }
  0x3c   :  { %1797 = vmatpush3.bf16.msra.mxu1 %v2058_v2  ;;  %645 = vmatprep.mubr.bf16.mxu1 %v2063_v5 }
  0x3d   :  { %1798 = vmatprep.subr.bf16.mxu1 %v2059_v3  ;;  %1184 = vmatprep.mubr.bf16.mxu0 %v2064_v7 }
  0x3e   :  { %1940 = vmatprep.subr.bf16.mxu0 %v2080_v20 }
  0x3f   :  { %1941 = vmatpush3.bf16.msra.mxu0 %v2080_v20 }
  0x40   :  { %1799 = vmatpush3.bf16.msra.mxu1 %v2060_v4  ;;  %1942 = vmatprep.subr.bf16.mxu0 %v2083_v23 }
  0x41   :  { %1832 = vmatprep.subr.bf16.mxu1 %v2066_v8 }
  0x43   :  { %1185 = vmatmul.mubr.bf16.gmra.mrb[16].mxu0 %v2067_v9  ;;  %646 = vmatmul.mubr.bf16.vlgmr.msra.gmra.mrb[16].mxu1 %v2061_v6 }
  0x44   :  { %1833 = vmatpush3.bf16.msra.mxu1 %v2069_v11  ;;  %653 = vmatprep.mubr.bf16.mxu1 %v2073_v15 }
  0x45   :  { %1834 = vmatprep.subr.bf16.mxu1 %v2070_v12  ;;  %1192 = vmatprep.mubr.bf16.mxu0 %v2075_v16 }
  0x46   :  { %1943 = vmatpush3.bf16.msra.mxu0 %v2083_v23 }
  0x48   :  { %1835 = vmatpush3.bf16.msra.mxu1 %v2072_v14 }
  0x49   :  { %1836 = vmatprep.subr.bf16.mxu1 %v2078_v18 }
  0x4b   :  { %1193 = vmatmul.mubr.bf16.gmra.mrb[20].mxu0 %v2079_v19  ;;  %654 = vmatmul.mubr.bf16.gmra.mrb[20].mxu1 %v2077_v17 }
  0x4c   :  { %1837 = vmatpush3.bf16.msra.mxu1 %v2081_v21  ;;  %661 = vmatprep.mubr.bf16.mxu1 %v2085_v25 }
  0x4d   :  { %1838 = vmatprep.subr.bf16.mxu1 %v2082_v22  ;;  %1944 = vmatprep.mubr.msk.bf16.mxu0 %vm535_vm0, %v2087_v26 }
  0x50   :  { %1839 = vmatpush3.bf16.msra.mxu1 %v2084_v24 }
  0x51   :  { %1840 = vmatprep.subr.bf16.mxu1 %v2089_v28 }
  0x53   :  { %1945 = vmatmul.mubr.msk.bf16.vlgmr.msra.gmra.mrb[0].mxu0 %vm535_vm0, %v2090_v29  ;;  %662 = vmatmul.mubr.bf16.gmra.mrb[24].mxu1 %v2088_v27 }
  0x54   :  { %1841 = vmatpush3.bf16.msra.mxu1 %v2091_v30  ;;  %669 = vmatprep.mubr.bf16.mxu1 %v2094_v33 }
  0x55   :  { %1842 = vmatprep.subr.bf16.mxu1 %v2092_v31  ;;  %1948 = vmatprep.mubr.msk.bf16.mxu0 %vm535_vm0, %v2096_v34 }
  0x58   :  { %1843 = vmatpush3.bf16.msra.mxu1 %v2093_v32 }
  0x59   :  { %1844 = vmatprep.subr.bf16.mxu1 %v2098_v36 }
  0x5b   :  { %1949 = vmatmul.mubr.msk.bf16.gmra.mrb[4].mxu0 %vm535_vm0, %v2099_v37  ;;  %670 = vmatmul.mubr.bf16.gmra.mrb[28].mxu1 %v2097_v35 }
  0x5c   :  { %1845 = vmatpush3.bf16.msra.mxu1 %v2100_v38  ;;  %1103 = vmatprep.mubr.bf16.mxu1 %v2105_v41 }
  0x5d   :  { %1846 = vmatprep.subr.bf16.mxu1 %v2101_v39 }
  0x60   :  { %1847 = vmatpush3.bf16.msra.mxu1 %v2102_v40 }
  0x63   :  { %1104 = vmatmul.mubr.bf16.vlgmr.msra.gmra.mrb[32].mxu1 %v2103_v42 }
  0x64   :  { %1111 = vmatprep.mubr.bf16.mxu1 %v2106_v43 }
  0x6b   :  { %1112 = vmatmul.mubr.bf16.gmra.mrb[36].mxu1 %v2108_v49 }
  0x6c   :  { %1119 = vmatprep.mubr.bf16.mxu1 %v2109_v51 }
  0x73   :  { %1120 = vmatmul.mubr.bf16.gmra.mrb[40].mxu1 %v2111_v54 }
  0x74   :  { %1127 = vmatprep.mubr.bf16.mxu1 %v2112_v55 }
  0x7b   :  { %1128 = vmatmul.mubr.bf16.gmra.mrb[44].mxu1 %v2114_v56 }
  0xf6   :  { %v1760_v57 = vpop.f32.mrb[0].mxu1 }
  0xf7   :  { %v1761_v58 = vpop.f32.mrb[1].mxu1 }
  0xf8   :  { %v1762_v59 = vadd.f32 %v1761_v58, %v1760_v57  ;;  %v1763_v60 = vpop.f32.mrb[2].mxu1 }
  0xf9   :  { %v1764_v61 = vpop.f32.mrb[3].mxu1 }
  0xfa   :  { %v1765_v62 = vadd.f32 %v1764_v61, %v1763_v60 }
  0xfe   :  { %v1766_v63 = vpop.f32.mrb[4].mxu1 }
  0xff   :  { %v1767_v0 = vpop.f32.mrb[5].mxu1 }
 0x100   :  { %v1768_v1 = vadd.f32 %v1767_v0, %v1766_v63  ;;  %v1769_v2 = vpop.f32.mrb[6].mxu1 }
 0x101   :  { %v1770_v3 = vpop.f32.mrb[7].mxu1 }
 0x102   :  { %v1771_v4 = vadd.f32 %v1770_v3, %v1769_v2 }
 0x106   :  { %v1772_v5 = vpop.f32.mrb[8].mxu1  ;;  %v1888_v6 = vpop.f32.mrb[8].mxu0 }
 0x107   :  { %v1773_v7 = vpop.f32.mrb[9].mxu1  ;;  %v1889_v8 = vpop.f32.mrb[9].mxu0 }
 0x108   :  { %v1774_v9 = vadd.f32 %v1773_v7, %v1772_v5  ;;  %v1775_v10 = vpop.f32.mrb[10].mxu1  ;;  %v2540_v11 = vadd.f32 %v1889_v8, %v1888_v6  ;;  %v1891_v12 = vpop.f32.mrb[10].mxu0 }
 0x109   :  { %v1776_v13 = vpop.f32.mrb[11].mxu1  ;;  %v1892_v14 = vpop.f32.mrb[11].mxu0 }
 0x10a   :  { %v1777_v15 = vadd.f32 %v1776_v13, %v1775_v10  ;;  %v2542_v16 = vadd.f32 %v1892_v14, %v1891_v12 }
 0x10e   :  { %v1778_v17 = vpop.f32.mrb[12].mxu1  ;;  %v1894_v18 = vpop.f32.mrb[12].mxu0 }
 0x10f   :  { %v1779_v19 = vpop.f32.mrb[13].mxu1  ;;  %v1895_v20 = vpop.f32.mrb[13].mxu0 }
 0x110   :  { %v1780_v21 = vadd.f32 %v1779_v19, %v1778_v17  ;;  %v1781_v22 = vpop.f32.mrb[14].mxu1  ;;  %v2544_v23 = vadd.f32 %v1895_v20, %v1894_v18  ;;  %v1897_v24 = vpop.f32.mrb[14].mxu0 }
 0x111   :  { %v1782_v25 = vpop.f32.mrb[15].mxu1  ;;  %v1898_v26 = vpop.f32.mrb[15].mxu0 }
 0x112   :  { %v1783_v27 = vadd.f32 %v1782_v25, %v1781_v22  ;;  %v2546_v28 = vadd.f32 %v1898_v26, %v1897_v24  ;;  %v1277_v26 = vpop.permute.xlu0 %1276 }
 0x116   :  { %v1900_v29 = vpop.f32.mrb[16].mxu0  ;;  %v1800_v30 = vpop.f32.mrb[16].mxu1 }
 0x117   :  { %v1901_v31 = vpop.f32.mrb[17].mxu0  ;;  %v1801_v32 = vpop.f32.mrb[17].mxu1 }
 0x118   :  { %v2548_v33 = vadd.f32 %v1901_v31, %v1900_v29  ;;  %v1903_v34 = vpop.f32.mrb[18].mxu0  ;;  %v1802_v35 = vadd.f32 %v1801_v32, %v1800_v30  ;;  %v1803_v36 = vpop.f32.mrb[18].mxu1 }
 0x119   :  { %v1904_v37 = vpop.f32.mrb[19].mxu0  ;;  %v1804_v38 = vpop.f32.mrb[19].mxu1 }
 0x11a   :  { %v2550_v39 = vadd.f32 %v1904_v37, %v1903_v34  ;;  %v648_v40 = vadd.f32 %v1802_v35, %v1762_v59  ;;  %v1805_v41 = vadd.f32 %v1804_v38, %v1803_v36  ;;  %v1282_v37 = vpop.permute.xlu0 %1281 }
 0x11c   :  { %v651_v42 = vadd.f32 %v1805_v41, %v1765_v62 }
 0x11e   :  { %v1906_v43 = vpop.f32.mrb[20].mxu0  ;;  %v1806_v44 = vpop.f32.mrb[20].mxu1 }
 0x11f   :  { %v1907_v45 = vpop.f32.mrb[21].mxu0  ;;  %v1807_v46 = vpop.f32.mrb[21].mxu1 }
 0x120   :  { %v2552_v47 = vadd.f32 %v1907_v45, %v1906_v43  ;;  %v1909_v48 = vpop.f32.mrb[22].mxu0  ;;  %v1808_v49 = vadd.f32 %v1807_v46, %v1806_v44  ;;  %v1809_v50 = vpop.f32.mrb[22].mxu1 }
 0x121   :  { %v1910_v51 = vpop.f32.mrb[23].mxu0  ;;  %v1810_v52 = vpop.f32.mrb[23].mxu1 }
 0x122   :  { %v2554_v53 = vadd.f32 %v1910_v51, %v1909_v48  ;;  %v656_v54 = vadd.f32 %v1808_v49, %v1768_v1  ;;  %v1811_v55 = vadd.f32 %v1810_v52, %v1809_v50 }
 0x124   :  { %v659_v56 = vadd.f32 %v1811_v55, %v1771_v4 }
 0x126   :  { %v1946_v57 = vpop.f32.mrb[0].mxu0  ;;  %v1812_v58 = vpop.f32.mrb[24].mxu1 }
 0x127   :  { %v1235_v59 = vpop.f32.mrb[1].mxu0  ;;  %v1813_v60 = vpop.f32.mrb[25].mxu1 }
 0x128   :  { %v1947_v61 = vpop.f32.mrb[2].mxu0  ;;  %v1814_v62 = vadd.f32 %v1813_v60, %v1812_v58  ;;  %v1815_v63 = vpop.f32.mrb[26].mxu1 }
 0x129   :  { %v1238_v0 = vpop.f32.mrb[3].mxu0  ;;  %v1816_v2 = vpop.f32.mrb[27].mxu1 }
 0x12a   :  { %v664_v3 = vadd.f32 %v1814_v62, %v1774_v9  ;;  %v1817_v5 = vadd.f32 %v1816_v2, %v1815_v63 }
 0x12c   :  { %v667_v6 = vadd.f32 %v1817_v5, %v1777_v15 }
 0x12e   :  { %v2556_v7 = vpop.f32.mrb[4].mxu0  ;;  %v1818_v8 = vpop.f32.mrb[28].mxu1 }
 0x12f   :  { %v1251_v10 = vpop.f32.mrb[5].mxu0  ;;  %v1819_v12 = vpop.f32.mrb[29].mxu1 }
 0x130   :  { %v2558_v1 = vpop.f32.mrb[6].mxu0  ;;  %v1820_v4 = vadd.f32 %v1819_v12, %v1818_v8  ;;  %v1821_v13 = vpop.f32.mrb[30].mxu1 }
 0x131   :  { %v1254_v14 = vpop.f32.mrb[7].mxu0  ;;  %v1822_v17 = vpop.f32.mrb[31].mxu1 }
 0x132   :  { %v2560_v18 = vadd.f32 %v1820_v4, %v1780_v21  ;;  %v1823_v19 = vadd.f32 %v1822_v17, %v1821_v13 }
 0x134   :  { %v2562_v20 = vadd.f32 %v1823_v19, %v1783_v27 }
 0x136   :  { %v1848_v22 = vpop.f32.mrb[32].mxu1 }
 0x137   :  { %v1849_v9 = vpop.f32.mrb[33].mxu1 }
 0x138   :  { %v1850_v24 = vadd.f32 %v1849_v9, %v1848_v22  ;;  %v1851_v15 = vpop.f32.mrb[34].mxu1 }
 0x139   :  { %v1852_v25 = vpop.f32.mrb[35].mxu1 }
 0x13a   :  { %v1955_v29 = vadd.f32 %v1850_v24, %v648_v40  ;;  %v1853_v30 = vadd.f32 %v1852_v25, %v1851_v15 }
 0x13c   :  { %v1961_v31 = vadd.f32 %v1853_v30, %v651_v42  ;;  %v1956_v32 = vadd.f32 %v1955_v29, %v2540_v11  ;;  %v1287_v42 = vpop.permute.xlu1 %1286 }
 0x13e   :  { %v1957_v34 = vadd.f32 %v1956_v32, %v1235_v59  ;;  %v1854_v35 = vpop.f32.mrb[36].mxu1  ;;  %v1962_v36 = vadd.f32 %v1961_v31, %v2542_v16 }
 0x13f   :  { %v1855_v21 = vpop.f32.mrb[37].mxu1 }
 0x140   :  { %v2566_v27 = vadd.f32 %v1957_v34, %v1277_v26  ;;  %v1856_v38 = vadd.f32 %v1855_v21, %v1854_v35  ;;  %v1857_v41 = vpop.f32.mrb[38].mxu1  ;;  %v1963_v43 = vadd.f32 %v1962_v36, %v1238_v0  ;;  %v1292_v62 = vpop.permute.xlu1 %1291 }
 0x141   :  { %v1858_v44 = vpop.f32.mrb[39].mxu1 }
 0x142   :  { %v1952_v45 = vadd.f32 %v1856_v38, %v656_v54  ;;  %v2568_v46 = vadd.f32 %v1963_v43, %v1282_v37  ;;  %v1859_v40 = vadd.f32 %v1858_v44, %v1857_v41  ;;  %v1323_v11 = vsel %vm1322_vm1, %v2566_v27, 0.0 }
 0x143   :  { %1324 = vadd.xlane.f32.xlu0 %v1323_v11 }
 0x144   :  { %v1958_v48 = vadd.f32 %v1859_v40, %v659_v56  ;;  %v1953_v16 = vadd.f32 %v1952_v45, %v2544_v23  ;;  %v1326_v49 = vsel %vm1322_vm1, %v2568_v46, 0.0  ;;  %v1302_v9 = vpop.permute.xlu1 %1301 }
 0x145   :  { %1327 = vadd.xlane.f32.xlu1 %v1326_v49 }
 0x146   :  { %v1954_v50 = vadd.f32 %v1953_v16, %v1946_v57  ;;  %v1959_v51 = vadd.f32 %v1958_v48, %v2546_v28  ;;  %v1860_v52 = vpop.f32.mrb[40].mxu1 }
 0x147   :  { %v1861_v54 = vpop.f32.mrb[41].mxu1 }
 0x148   :  { %v1316_v55 = vadd.f32 %v1954_v50, %v1287_v42  ;;  %v1960_v58 = vadd.f32 %v1959_v51, %v1947_v61  ;;  %v1862_v59 = vadd.f32 %v1861_v54, %v1860_v52  ;;  %v1863_v60 = vpop.f32.mrb[42].mxu1  ;;  %v1297_v61 = vpop.permute.xlu0 %1296 }
 0x149   :  { %v1864_v63 = vpop.f32.mrb[43].mxu1 }
 0x14a   :  { %v1317_v0 = vadd.f32 %v1960_v58, %v1292_v62  ;;  %v1967_v2 = vadd.f32 %v1862_v59, %v664_v3  ;;  %v1865_v56 = vadd.f32 %v1864_v63, %v1863_v60  ;;  %v1329_v23 = vsel %vm1322_vm1, %v1316_v55, 0.0 }
 0x14b   :  { %1330 = vadd.xlane.f32.xlu0 %v1329_v23 }
 0x14c   :  { %v1968_v5 = vadd.f32 %v1967_v2, %v2548_v33  ;;  %v1973_v8 = vadd.f32 %v1865_v56, %v667_v6  ;;  %v1332_v12 = vsel %vm1322_vm1, %v1317_v0, 0.0  ;;  %v1307_v30 = vpop.permute.xlu0 %1306 }
 0x14e   :  { %v1974_v57 = vadd.f32 %v1973_v8, %v2550_v39  ;;  %v1866_v28 = vpop.f32.mrb[44].mxu1  ;;  %v1969_v4 = vadd.f32 %v1968_v5, %v1251_v10 }
 0x14f   :  { %v1867_v13 = vpop.f32.mrb[45].mxu1  ;;  %1333 = vadd.xlane.f32.xlu0 %v1332_v12 }
 0x150   :  { %v1975_v17 = vadd.f32 %v1974_v57, %v1254_v14  ;;  %v1868_v19 = vadd.f32 %v1867_v13, %v1866_v28  ;;  %v1869_v22 = vpop.f32.mrb[46].mxu1  ;;  %v1318_v3 = vadd.f32 %v1969_v4, %v1297_v61  ;;  %v1484_v61 = vld [vmem:[%s2725_s6 + $0x8] sm:$0xff]  ;;  %v1486_v13 = vld [vmem:[%s2725_s6 + $0x18] sm:$0xff] }
 0x151   :  { %v1870_v24 = vpop.f32.mrb[47].mxu1 }
 0x152   :  { %v1319_v15 = vadd.f32 %v1975_v17, %v1302_v9  ;;  %v1964_v25 = vadd.f32 %v1868_v19, %v2560_v18  ;;  %v1871_v33 = vadd.f32 %v1870_v24, %v1869_v22  ;;  %v1335_v6 = vsel %vm1322_vm1, %v1318_v3, 0.0  ;;  %v1312_v18 = vpop.permute.xlu1 %1311  ;;  %v1483_v17 = vld [vmem:[%s2725_s6] sm:$0xff]  ;;  %v1488_v19 = vld [vmem:[%s2725_s6 + $0x28] sm:$0xff]  ;;  %v1485_v22 = vld [vmem:[%s2725_s6 + $0x10] sm:$0xff] }
 0x153   :  { %1336 = vadd.xlane.f32.xlu1 %v1335_v6 }
 0x154   :  { %v1965_v39 = vadd.f32 %v1964_v25, %v2552_v47  ;;  %v1970_v10 = vadd.f32 %v1871_v33, %v2562_v20  ;;  %v1338_v26 = vsel %vm1322_vm1, %v1319_v15, 0.0 }
 0x155   :  { %1339 = vadd.xlane.f32.xlu0 %v1338_v26 }
 0x156   :  { %v1971_v14 = vadd.f32 %v1970_v10, %v2554_v53  ;;  %v1966_v29 = vadd.f32 %v1965_v39, %v2556_v7 }
 0x158   :  { %v1320_v31 = vadd.f32 %v1966_v29, %v1307_v30  ;;  %v1972_v32 = vadd.f32 %v1971_v14, %v2558_v1  ;;  %v1403_v30 = vld [vmem:[%s2726_s5] sm:$0xff] }
 0x15a   :  { %v1341_v34 = vsel %vm1322_vm1, %v1320_v31, 0.0  ;;  %v1321_v35 = vadd.f32 %v1972_v32, %v1312_v18  ;;  %v1404_v18 = vld [vmem:[%s2726_s5 + $0x8] sm:$0xff] }
 0x15b   :  { %1342 = vadd.xlane.f32.xlu1 %v1341_v34 }
 0x15c   :  { %v1344_v47 = vsel %vm1322_vm1, %v1321_v35, 0.0 }
 0x15d   :  { %1345 = vadd.xlane.f32.xlu0 %v1344_v47 }
 0x1d0   :  { %v1325_v20 = vpop.xlane.xlu0 %1324 }
 0x1d1   :  { %v1347_v36 = vmul.f32 0.0625, %v1325_v20 }
 0x1d2   :  { %v1328_v21 = vpop.xlane.xlu1 %1327 }
 0x1d3   :  { %v2591_v37 = vsub.f32 %v2566_v27, %v1347_v36  ;;  %v1348_v53 = vmul.f32 0.0625, %v1328_v21 }
 0x1d5   :  { %v2594_v7 = vsub.f32 %v2568_v46, %v1348_v53  ;;  %v1363_v1 = vmul.f32 %v2591_v37, %v2591_v37 }
 0x1d7   :  { %v1371_v38 = vsel %vm1322_vm1, %v1363_v1, 0.0  ;;  %v1364_v41 = vmul.f32 %v2594_v7, %v2594_v7 }
 0x1d8   :  { %1372 = vadd.xlane.f32.xlu1 %v1371_v38  ;;  %v1331_v43 = vpop.xlane.xlu0 %1330 }
 0x1d9   :  { %v1349_v44 = vmul.f32 0.0625, %v1331_v43  ;;  %v1374_v45 = vsel %vm1322_vm1, %v1364_v41, 0.0  ;;  %v1405_v41 = vld [vmem:[%s2726_s5 + $0x10] sm:$0xff] }
 0x1da   :  { %1375 = vadd.xlane.f32.xlu0 %v1374_v45 }
 0x1db   :  { %v2602_v27 = vsub.f32 %v1316_v55, %v1349_v44 }
 0x1dc   :  { %v1334_v40 = vpop.xlane.xlu0 %1333 }
 0x1dd   :  { %v1350_v11 = vmul.f32 0.0625, %v1334_v40  ;;  %v1365_v46 = vmul.f32 %v2602_v27, %v2602_v27 }
 0x1df   :  { %v2606_v42 = vsub.f32 %v1317_v0, %v1350_v11  ;;  %v1377_v48 = vsel %vm1322_vm1, %v1365_v46, 0.0  ;;  %v1406_v11 = vld [vmem:[%s2726_s5 + $0x18] sm:$0xff] }
 0x1e0   :  { %v1337_v16 = vpop.xlane.xlu1 %1336  ;;  %1378 = vadd.xlane.f32.xlu1 %v1377_v48 }
 0x1e1   :  { %v1351_v49 = vmul.f32 0.0625, %v1337_v16  ;;  %v1366_v50 = vmul.f32 %v2606_v42, %v2606_v42 }
 0x1e2   :  { %v1340_v51 = vpop.xlane.xlu0 %1339 }
 0x1e3   :  { %v2611_v52 = vsub.f32 %v1318_v3, %v1351_v49  ;;  %v1352_v54 = vmul.f32 0.0625, %v1340_v51  ;;  %v1380_v55 = vsel %vm1322_vm1, %v1366_v50, 0.0  ;;  %v1487_v3 = vld [vmem:[%s2725_s6 + $0x20] sm:$0xff] }
 0x1e4   :  { %1381 = vadd.xlane.f32.xlu0 %v1380_v55 }
 0x1e5   :  { %v2614_v58 = vsub.f32 %v1319_v15, %v1352_v54  ;;  %v1367_v59 = vmul.f32 %v2611_v52, %v2611_v52  ;;  %v1407_v54 = vld [vmem:[%s2726_s5 + $0x20] sm:$0xff] }
 0x1e7   :  { %v1383_v60 = vsel %vm1322_vm1, %v1367_v59, 0.0  ;;  %v1368_v62 = vmul.f32 %v2614_v58, %v2614_v58  ;;  %v1408_v59 = vld [vmem:[%s2726_s5 + $0x28] sm:$0xff] }
 0x1e8   :  { %v1343_v63 = vpop.xlane.xlu1 %1342  ;;  %1384 = vadd.xlane.f32.xlu1 %v1383_v60 }
 0x1e9   :  { %v1353_v0 = vmul.f32 0.0625, %v1343_v63  ;;  %v1386_v2 = vsel %vm1322_vm1, %v1368_v62, 0.0 }
 0x1ea   :  { %1387 = vadd.xlane.f32.xlu0 %v1386_v2  ;;  %v1346_v56 = vpop.xlane.xlu0 %1345 }
 0x1eb   :  { %v2622_v23 = vsub.f32 %v1320_v31, %v1353_v0  ;;  %v1354_v5 = vmul.f32 0.0625, %v1346_v56  ;;  %v1409_v0 = vld [vmem:[%s2726_s5 + $0x30] sm:$0xff]  ;;  %v1410_v56 = vld [vmem:[%s2726_s5 + $0x38] sm:$0xff] }
 0x1ed   :  { %v2624_v8 = vsub.f32 %v1321_v35, %v1354_v5  ;;  %v1369_v57 = vmul.f32 %v2622_v23, %v2622_v23 }
 0x1ef   :  { %v1389_v28 = vsel %vm1322_vm1, %v1369_v57, 0.0  ;;  %v1370_v12 = vmul.f32 %v2624_v8, %v2624_v8 }
 0x1f0   :  { %1390 = vadd.xlane.f32.xlu1 %v1389_v28 }
 0x1f1   :  { %v1392_v4 = vsel %vm1322_vm1, %v1370_v12, 0.0  ;;  %v1489_v12 = vld [vmem:[%s2725_s6 + $0x30] sm:$0xff] }
 0x1f2   :  { %1393 = vadd.xlane.f32.xlu0 %v1392_v4  ;;  %v1490_v4 = vld [vmem:[%s2725_s6 + $0x38] sm:$0xff] }
 0x201   :  { %1498 = vperm.xlu1 %1986, %v1484_v61  }
 0x205   :  { %1508 = vperm.xlu1 %1986, %v1486_v13  }
 0x208   :  { %1493 = vperm.xlu0 %1985, %v1483_v17  }
 0x209   :  { %1518 = vperm.xlu1 %1986, %v1488_v19  }
 0x20c   :  { %1503 = vperm.xlu0 %1985, %v1485_v22  }
 0x210   :  { %1513 = vperm.xlu0 %1985, %v1487_v3  }
 0x265   :  { %v1373_v9 = vpop.xlane.xlu1 %1372 }
 0x266   :  { %v1395_v24 = vmul.f32 0.0625, %v1373_v9 }
 0x267   :  { %v1376_v15 = vpop.xlane.xlu0 %1375 }
 0x268   :  { %v1411_v25 = vadd.f32 1e-05, %v1395_v24  ;;  %v1396_v33 = vmul.f32 0.0625, %v1376_v15 }
 0x26a   :  { %2115 = vrsqrt.f32 %v1411_v25  ;;  %v1412_v6 = vadd.f32 1e-05, %v1396_v33 }
 0x26c   :  { %2117 = vrsqrt.f32 %v1412_v6 }
 0x26d   :  { %v1379_v39 = vpop.xlane.xlu1 %1378 }
 0x26e   :  { %v1397_v10 = vmul.f32 0.0625, %v1379_v39 }
 0x270   :  { %v1413_v26 = vadd.f32 1e-05, %v1397_v10 }
 0x271   :  { %v1382_v14 = vpop.xlane.xlu0 %1381 }
 0x272   :  { %2119 = vrsqrt.f32 %v1413_v26  ;;  %v1398_v29 = vmul.f32 0.0625, %v1382_v14 }
 0x274   :  { %v2116_v31 = vpop.eup %2115  ;;  %v1414_v32 = vadd.f32 1e-05, %v1398_v29 }
 0x275   :  { %v1385_v34 = vpop.xlane.xlu1 %1384  ;;  %v1427_v35 = vmul.f32 %v2116_v31, %v1403_v30 }
 0x276   :  { %v2118_v47 = vpop.eup %2117  ;;  %2121 = vrsqrt.f32 %v1414_v32  ;;  %v1399_v20 = vmul.f32 0.0625, %v1385_v34 }
 0x277   :  { %1437 = vperm.xlu1 %1986, %v1427_v35   ;;  %v1388_v36 = vpop.xlane.xlu0 %1387  ;;  %v1428_v21 = vmul.f32 %v2118_v47, %v1404_v18 }
 0x278   :  { %v1415_v53 = vadd.f32 1e-05, %v1399_v20  ;;  %v1400_v1 = vmul.f32 0.0625, %v1388_v36 }
 0x279   :  { %1442 = vperm.xlu0 %1985, %v1428_v21  }
 0x27a   :  { %2123 = vrsqrt.f32 %v1415_v53  ;;  %v1416_v38 = vadd.f32 1e-05, %v1400_v1 }
 0x27c   :  { %v2120_v43 = vpop.eup %2119  ;;  %2125 = vrsqrt.f32 %v1416_v38 }
 0x27d   :  { %v1391_v44 = vpop.xlane.xlu1 %1390  ;;  %v1429_v45 = vmul.f32 %v2120_v43, %v1405_v41 }
 0x27e   :  { %v1401_v40 = vmul.f32 0.0625, %v1391_v44 }
 0x27f   :  { %1447 = vperm.xlu1 %1986, %v1429_v45   ;;  %v1394_v46 = vpop.xlane.xlu0 %1393 }
 0x280   :  { %v2122_v48 = vpop.eup %2121  ;;  %v1417_v16 = vadd.f32 1e-05, %v1401_v40  ;;  %v1402_v49 = vmul.f32 0.0625, %v1394_v46 }
 0x281   :  { %v1430_v50 = vmul.f32 %v2122_v48, %v1406_v11  ;;  %v1499_v61 = vpop.permute.xlu1 %1498 }
 0x282   :  { %2127 = vrsqrt.f32 %v1417_v16  ;;  %v1418_v51 = vadd.f32 1e-05, %v1402_v49 }
 0x283   :  { %1452 = vperm.xlu1 %1986, %v1430_v50  }
 0x284   :  { %v2124_v55 = vpop.eup %2123  ;;  %2129 = vrsqrt.f32 %v1418_v51 }
 0x285   :  { %v1431_v60 = vmul.f32 %v2124_v55, %v1407_v54  ;;  %v1509_v17 = vpop.permute.xlu1 %1508 }
 0x286   :  { %v2126_v62 = vpop.eup %2125 }
 0x287   :  { %1457 = vperm.xlu0 %1985, %v1431_v60   ;;  %v1432_v63 = vmul.f32 %v2126_v62, %v1408_v59  ;;  %v1494_v13 = vpop.permute.xlu0 %1493 }
 0x289   :  { %1462 = vperm.xlu1 %1986, %v1432_v63   ;;  %v1519_v22 = vpop.permute.xlu1 %1518 }
 0x28b   :  { %v1504_v19 = vpop.permute.xlu0 %1503 }
 0x28c   :  { %v2128_v2 = vpop.eup %2127 }
 0x28d   :  { %v1433_v5 = vmul.f32 %v2128_v2, %v1409_v0 }
 0x28e   :  { %v2130_v57 = vpop.eup %2129 }
 0x28f   :  { %1467 = vperm.xlu0 %1985, %v1433_v5   ;;  %v1434_v28 = vmul.f32 %v2130_v57, %v1410_v56  ;;  %v1514_v3 = vpop.permute.xlu0 %1513 }
 0x291   :  { %1472 = vperm.xlu1 %1986, %v1434_v28  }
 0x293   :  { %1523 = vperm.xlu0 %1985, %v1489_v12  }
 0x295   :  { %1528 = vperm.xlu1 %1986, %v1490_v4  }
 0x2f6   :  { %v1438_v9 = vpop.permute.xlu1 %1437 }
 0x2f7   :  { %v1475_v24 = vmul.f32 %v1438_v9, %v2591_v37 }
 0x2f8   :  { %v1443_v15 = vpop.permute.xlu0 %1442 }
 0x2f9   :  { %v1531_v25 = vadd.f32 %v1494_v13, %v1475_v24  ;;  %v1476_v33 = vmul.f32 %v1443_v15, %v2594_v7 }
 0x2fb   :  { %vm1539_vm2 = vcmp.ge.f32.partialorder %v1531_v25, 0.0  ;;  %v1547_v6 = vmul.f32 0.01, %v1531_v25  ;;  %v1532_v39 = vadd.f32 %v1499_v61, %v1476_v33 }
 0x2fd   :  { %v1555_v10 = vsel %vm1539_vm2, %v1531_v25, %v1547_v6  ;;  %vm1540_vm4 = vcmp.ge.f32.partialorder %v1532_v39, 0.0  ;;  %v1548_v26 = vmul.f32 0.01, %v1532_v39 }
 0x2fe   :  { %v1736_v14 = vpack.c.bf16 %v1555_v10, %v1555_v10  ;;  %v1448_v29 = vpop.permute.xlu1 %1447 }
 0x2ff   :  { %v1556_v30 = vsel %vm1540_vm4, %v1532_v39, %v1548_v26  ;;  %v1477_v31 = vmul.f32 %v1448_v29, %v2602_v27 }
 0x300   :  { %1596 = vst.msk [vmem:[%s2727_s7] sm:$0xf] %vm1595_vm3, %v1736_v14  ;;  %v1737_v37 = vpack.c.bf16 %v1556_v30, %v1556_v30 }
 0x301   :  { %v1533_v32 = vadd.f32 %v1504_v19, %v1477_v31 }
 0x302   :  { %1597 = vst.msk [vmem:[%s2727_s7 + $0x4] sm:$0xf] %vm1595_vm3, %v1737_v37  ;;  %v1453_v7 = vpop.permute.xlu1 %1452 }
 0x303   :  { %vm1541_vm5 = vcmp.ge.f32.partialorder %v1533_v32, 0.0  ;;  %v1549_v18 = vmul.f32 0.01, %v1533_v32  ;;  %v1478_v34 = vmul.f32 %v1453_v7, %v2606_v42 }
 0x305   :  { %v1557_v35 = vsel %vm1541_vm5, %v1533_v32, %v1549_v18  ;;  %v1534_v47 = vadd.f32 %v1509_v17, %v1478_v34 }
 0x306   :  { %v1738_v27 = vpack.c.bf16 %v1557_v35, %v1557_v35  ;;  %v1458_v20 = vpop.permute.xlu0 %1457 }
 0x307   :  { %vm1542_vm6 = vcmp.ge.f32.partialorder %v1534_v47, 0.0  ;;  %v1550_v36 = vmul.f32 0.01, %v1534_v47  ;;  %v1479_v21 = vmul.f32 %v1458_v20, %v2611_v52 }
 0x308   :  { %1598 = vst.msk [vmem:[%s2727_s7 + $0x8] sm:$0xf] %vm1595_vm3, %v1738_v27  ;;  %v1463_v53 = vpop.permute.xlu1 %1462 }
 0x309   :  { %v1558_v1 = vsel %vm1542_vm6, %v1534_v47, %v1550_v36  ;;  %v1535_v38 = vadd.f32 %v1514_v3, %v1479_v21  ;;  %v1480_v41 = vmul.f32 %v1463_v53, %v2614_v58 }
 0x30a   :  { %v1739_v43 = vpack.c.bf16 %v1558_v1, %v1558_v1 }
 0x30b   :  { %vm1543_vm7 = vcmp.ge.f32.partialorder %v1535_v38, 0.0  ;;  %v1551_v42 = vmul.f32 0.01, %v1535_v38  ;;  %v1536_v44 = vadd.f32 %v1519_v22, %v1480_v41 }
 0x30c   :  { %1599 = vst.msk [vmem:[%s2727_s7 + $0xc] sm:$0xf] %vm1595_vm3, %v1739_v43 }
 0x30d   :  { %v1559_v52 = vsel %vm1543_vm7, %v1535_v38, %v1551_v42  ;;  %vm1544_vm8 = vcmp.ge.f32.partialorder %v1536_v44, 0.0  ;;  %v1552_v45 = vmul.f32 0.01, %v1536_v44 }
 0x30e   :  { %v1740_v40 = vpack.c.bf16 %v1559_v52, %v1559_v52  ;;  %v1468_v11 = vpop.permute.xlu0 %1467 }
 0x30f   :  { %v1560_v46 = vsel %vm1544_vm8, %v1536_v44, %v1552_v45  ;;  %v1481_v16 = vmul.f32 %v1468_v11, %v2622_v23 }
 0x310   :  { %1600 = vst.msk [vmem:[%s2727_s7 + $0x10] sm:$0xf] %vm1595_vm3, %v1740_v40  ;;  %v1741_v58 = vpack.c.bf16 %v1560_v46, %v1560_v46  ;;  %v1473_v48 = vpop.permute.xlu1 %1472 }
 0x311   :  { %v1482_v50 = vmul.f32 %v1473_v48, %v2624_v8 }
 0x312   :  { %1601 = vst.msk [vmem:[%s2727_s7 + $0x14] sm:$0xf] %vm1595_vm3, %v1741_v58  ;;  %v1524_v49 = vpop.permute.xlu0 %1523 }
 0x313   :  { %v1537_v51 = vadd.f32 %v1524_v49, %v1481_v16 }
 0x314   :  { %v1529_v54 = vpop.permute.xlu1 %1528 }
 0x315   :  { %vm1545_vm9 = vcmp.ge.f32.partialorder %v1537_v51, 0.0  ;;  %v1553_v55 = vmul.f32 0.01, %v1537_v51  ;;  %v1538_v59 = vadd.f32 %v1529_v54, %v1482_v50 }
 0x317   :  { %v1561_v60 = vsel %vm1545_vm9, %v1537_v51, %v1553_v55  ;;  %vm1546_vm10 = vcmp.ge.f32.partialorder %v1538_v59, 0.0  ;;  %v1554_v62 = vmul.f32 0.01, %v1538_v59 }
 0x318   :  { %v1742_v63 = vpack.c.bf16 %v1561_v60, %v1561_v60 }
 0x319   :  { %v1562_v0 = vsel %vm1546_vm10, %v1538_v59, %v1554_v62 }
 0x31a   :  { %1602 = vst.msk [vmem:[%s2727_s7 + $0x18] sm:$0xf] %vm1595_vm3, %v1742_v63  ;;  %v1743_v23 = vpack.c.bf16 %v1562_v0, %v1562_v0 }
 0x31c   :  { %1603 = vst.msk [vmem:[%s2727_s7 + $0x1c] sm:$0xf] %vm1595_vm3, %v1743_v23 }

// kernel: _lambda_.20
= control target key start
LH: loop header
LB: loop body
LE: loop exit
PB: predicated region body
PF: predicated region fallthrough
CT: control target
= control target key end

     0   :  { %v1586_v1 = vmov 0   ;;  %vm461_vm0 = vcmask 523264   ;;  %vm1198_vm2 = vcmask 519168   ;;  %s1987_s1 = inlined_call_operand.vmem [shape: bf16[576,64], index: 1, kind: input, shape index: {}]   ;;  %s1988_s3 = inlined_call_operand.vmem [shape: bf16[32,576], index: 3, kind: input, shape index: {}]   ;;  %s1989_s0 = inlined_call_operand.vmem [shape: bf16[576,64], index: 0, kind: input, shape index: {}]   ;;  %s1990_s2 = inlined_call_operand.vmem [shape: bf16[32,576], index: 2, kind: input, shape index: {}]   ;;  %s1991_s4 = inlined_call_operand.vmem [shape: f32[32,1], index: 4, kind: input, shape index: {}, may-alias: {4,6}]   ;;  %s1992_s6 = inlined_call_operand.vmem [shape: f32[32,1], index: 6, kind: input, shape index: {}, may-alias: {4,6}]   ;;  %s1993_s5 = inlined_call_operand.vmem [shape: f32[32,1], index: 5, kind: input, shape index: {}]   ;;  %s1994_s7 = inlined_call_operand.vmem [shape: bf16[32,64], index: 7, kind: output, shape index: {}]  }
   0x1   :  { %v1478_v0 = vld [vmem:[%s1987_s1 + $0x40] sm:$0xff]   ;;  %1476 = vset.pattern.permute.xlu0 %v1586_v1  ;;  %1477 = vset.pattern.permute.xlu1 %v1586_v1  ;;  %v1482_v5 = vld [vmem:[%s1987_s1 + $0x48] sm:$0xff]   ;;  %v1486_v9 = vld [vmem:[%s1987_s1 + $0x50] sm:$0xff]  }
   0x2   :  { %v1479_v2 = vld [vmem:[%s1987_s1 + $0xc0] sm:$0xff]   ;;  %1311 = vmatprep.subr.bf16.mxu0 %v1478_v0  ;;  %v1483_v6 = vld [vmem:[%s1987_s1 + $0xc8] sm:$0xff]   ;;  %v1487_v10 = vld [vmem:[%s1987_s1 + $0xd0] sm:$0xff]  }
   0x3   :  { %v1480_v3 = vld [vmem:[%s1987_s1] sm:$0xff]   ;;  %1339 = vmatprep.subr.bf16.mxu1 %v1479_v2  ;;  %v1484_v7 = vld [vmem:[%s1987_s1 + $0x8] sm:$0xff]   ;;  %v1488_v11 = vld [vmem:[%s1987_s1 + $0x10] sm:$0xff]  }
   0x4   :  { %v1481_v4 = vld [vmem:[%s1987_s1 + $0x80] sm:$0xff]   ;;  %1312 = vmatpush3.bf16.msra.mxu0 %v1480_v3  ;;  %v1485_v8 = vld [vmem:[%s1987_s1 + $0x88] sm:$0xff]   ;;  %v1489_v12 = vld [vmem:[%s1987_s1 + $0x90] sm:$0xff]  }
   0x5   :  { %1340 = vmatpush3.bf16.msra.mxu1 %v1481_v4  ;;  %1313 = vmatprep.subr.bf16.mxu0 %v1482_v5  ;;  %v1490_v13 = vld [vmem:[%s1987_s1 + $0x58] sm:$0xff]   ;;  %v1494_v17 = vld [vmem:[%s1987_s1 + $0x60] sm:$0xff]   ;;  %v1498_v21 = vld [vmem:[%s1987_s1 + $0x68] sm:$0xff]  }
   0x6   :  { %1341 = vmatprep.subr.bf16.mxu1 %v1483_v6  ;;  %v1491_v14 = vld [vmem:[%s1987_s1 + $0xd8] sm:$0xff]   ;;  %v1495_v18 = vld [vmem:[%s1987_s1 + $0xe0] sm:$0xff]   ;;  %v1499_v22 = vld [vmem:[%s1987_s1 + $0xe8] sm:$0xff]  }
   0x7   :  { %v1492_v15 = vld [vmem:[%s1987_s1 + $0x18] sm:$0xff]   ;;  %v1496_v19 = vld [vmem:[%s1987_s1 + $0x20] sm:$0xff]   ;;  %v1500_v23 = vld [vmem:[%s1987_s1 + $0x28] sm:$0xff]  }
   0x8   :  { %1314 = vmatpush3.bf16.msra.mxu0 %v1484_v7  ;;  %v1493_v16 = vld [vmem:[%s1987_s1 + $0x98] sm:$0xff]   ;;  %v1497_v20 = vld [vmem:[%s1987_s1 + $0xa0] sm:$0xff]   ;;  %v1501_v24 = vld [vmem:[%s1987_s1 + $0xa8] sm:$0xff]  }
   0x9   :  { %1342 = vmatpush3.bf16.msra.mxu1 %v1485_v8  ;;  %1315 = vmatprep.subr.bf16.mxu0 %v1486_v9  ;;  %v1502_v25 = vld [vmem:[%s1987_s1 + $0x70] sm:$0xff]   ;;  %v1506_v29 = vld [vmem:[%s1987_s1 + $0x78] sm:$0xff]   ;;  %v1515_v36 = vld [vmem:[%s1988_s3 + $0xc] ss:$20 sps:$4 sm:$0xff]  }
   0xa   :  { %1343 = vmatprep.subr.bf16.mxu1 %v1487_v10  ;;  %v1503_v26 = vld [vmem:[%s1987_s1 + $0xf0] sm:$0xff]   ;;  %v1507_v30 = vld [vmem:[%s1987_s1 + $0xf8] sm:$0xff]   ;;  %v1516_v37 = vld [vmem:[%s1987_s1 + $0x100] sm:$0xff]   ;;  %549 = vmatprep.mubr.bf16.mxu1 %v1515_v36 }
   0xb   :  { %v1504_v27 = vld [vmem:[%s1987_s1 + $0x30] sm:$0xff]   ;;  %v1508_v31 = vld [vmem:[%s1987_s1 + $0x38] sm:$0xff]   ;;  %v1517_v38 = vld [vmem:[%s1987_s1 + $0x108] sm:$0xff]  }
   0xc   :  { %1316 = vmatpush3.bf16.msra.mxu0 %v1488_v11  ;;  %v1505_v28 = vld [vmem:[%s1987_s1 + $0xb0] sm:$0xff]   ;;  %v1509_v32 = vld [vmem:[%s1987_s1 + $0xb8] sm:$0xff]   ;;  %v1518_v39 = vld [vmem:[%s1989_s0 + $0xc0] sm:$0xff]  }
   0xd   :  { %1344 = vmatpush3.bf16.msra.mxu1 %v1489_v12  ;;  %1317 = vmatprep.subr.bf16.mxu0 %v1490_v13  ;;  %v1510_v33 = vld [vmem:[%s1988_s3] ss:$20 sps:$4 sm:$0xff]   ;;  %v1512_v34 = vld [vmem:[%s1988_s3 + $0x4] ss:$20 sps:$4 sm:$0xff]   ;;  %v1513_v35 = vld [vmem:[%s1988_s3 + $0x8] ss:$20 sps:$4 sm:$0xff]  }
   0xe   :  { %1345 = vmatprep.subr.bf16.mxu1 %v1491_v14  ;;  %500 = vmatprep.mubr.bf16.mxu0 %v1512_v34  ;;  %v1519_v40 = vld [vmem:[%s1988_s3 + $0x2c] ss:$20 sps:$4 sm:$0xff]   ;;  %v1521_v41 = vld [vmem:[%s1988_s3 + $0x34] ss:$20 sps:$4 sm:$0xff]   ;;  %v1525_v44 = vld [vmem:[%s1988_s3 + $0x30] ss:$20 sps:$4 sm:$0xff]  }
   0xf   :  { %v1523_v42 = vld [vmem:[%s1989_s0 + $0x80] sm:$0xff]   ;;  %v1524_v43 = vld [vmem:[%s1988_s3 + $0x28] ss:$20 sps:$4 sm:$0xff]   ;;  %v1526_v45 = vld [vmem:[%s1987_s1 + $0x110] sm:$0xff]  }
  0x10   :  { %1318 = vmatpush3.bf16.msra.mxu0 %v1492_v15  ;;  %v1527_v46 = vld [vmem:[%s1989_s0 + $0xc8] sm:$0xff]   ;;  %v1529_v48 = vld [vmem:[%s1987_s1 + $0x118] sm:$0xff]   ;;  %v1530_v49 = vld [vmem:[%s1989_s0 + $0xd0] sm:$0xff]  }
  0x11   :  { %1346 = vmatpush3.bf16.msra.mxu1 %v1493_v16  ;;  %1319 = vmatprep.subr.bf16.mxu0 %v1494_v17  ;;  %v1528_v47 = vld [vmem:[%s1989_s0 + $0x88] sm:$0xff]   ;;  %v1531_v50 = vld [vmem:[%s1988_s3 + $0x10] ss:$20 sps:$4 sm:$0xff]   ;;  %v1536_v55 = vld [vmem:[%s1989_s0 + $0xd8] sm:$0xff]  }
  0x12   :  { %1347 = vmatprep.subr.bf16.mxu1 %v1495_v18  ;;  %v1532_v51 = vld [vmem:[%s1989_s0 + $0x90] sm:$0xff]   ;;  %v1533_v52 = vld [vmem:[%s1988_s3 + $0x38] ss:$20 sps:$4 sm:$0xff]   ;;  %v1534_v53 = vld [vmem:[%s1989_s0 + $0x40] sm:$0xff]  }
  0x13   :  { %v1535_v54 = vld [vmem:[%s1989_s0] sm:$0xff]   ;;  %v1537_v56 = vld [vmem:[%s1989_s0 + $0x98] sm:$0xff]   ;;  %v1538_v57 = vld [vmem:[%s1989_s0 + $0x48] sm:$0xff]  }
  0x14   :  { %1320 = vmatpush3.bf16.msra.mxu0 %v1496_v19  ;;  %v1539_v58 = vld [vmem:[%s1989_s0 + $0x8] sm:$0xff]   ;;  %v1540_v59 = vld [vmem:[%s1989_s0 + $0xe0] sm:$0xff]   ;;  %v1542_v61 = vld [vmem:[%s1989_s0 + $0x50] sm:$0xff]  }
  0x15   :  { %1348 = vmatpush3.bf16.msra.mxu1 %v1497_v20  ;;  %1321 = vmatprep.subr.bf16.mxu0 %v1498_v21  ;;  %v1541_v60 = vld [vmem:[%s1989_s0 + $0xa0] sm:$0xff]   ;;  %v1543_v62 = vld [vmem:[%s1989_s0 + $0x10] sm:$0xff]   ;;  %v1544_v63 = vld [vmem:[%s1989_s0 + $0xe8] sm:$0xff]  }
  0x16   :  { %1349 = vmatprep.subr.bf16.mxu1 %v1499_v22  ;;  %v1545_v0 = vld [vmem:[%s1989_s0 + $0xa8] sm:$0xff]   ;;  %v1546_v1 = vld [vmem:[%s1989_s0 + $0x58] sm:$0xff]   ;;  %v1548_v3 = vld [vmem:[%s1989_s0 + $0xf0] sm:$0xff]  }
  0x17   :  { %v1547_v2 = vld [vmem:[%s1989_s0 + $0x18] sm:$0xff]   ;;  %v1549_v4 = vld [vmem:[%s1989_s0 + $0xb0] sm:$0xff]   ;;  %v1550_v5 = vld [vmem:[%s1989_s0 + $0x60] sm:$0xff]  }
  0x18   :  { %1322 = vmatpush3.bf16.msra.mxu0 %v1500_v23  ;;  %v1551_v6 = vld [vmem:[%s1989_s0 + $0x20] sm:$0xff]   ;;  %v1552_v7 = vld [vmem:[%s1989_s0 + $0xf8] sm:$0xff]   ;;  %v1554_v9 = vld [vmem:[%s1989_s0 + $0x68] sm:$0xff]  }
  0x19   :  { %1350 = vmatpush3.bf16.msra.mxu1 %v1501_v24  ;;  %1323 = vmatprep.subr.bf16.mxu0 %v1502_v25  ;;  %v1553_v8 = vld [vmem:[%s1989_s0 + $0xb8] sm:$0xff]   ;;  %v1555_v10 = vld [vmem:[%s1989_s0 + $0x28] sm:$0xff]   ;;  %v1559_v13 = vld [vmem:[%s1989_s0 + $0x100] sm:$0xff]  }
  0x1a   :  { %1351 = vmatprep.subr.bf16.mxu1 %v1503_v26  ;;  %v1556_v11 = vld [vmem:[%s1990_s2 + $0x8] ss:$20 sps:$4 sm:$0xff]   ;;  %v1558_v12 = vld [vmem:[%s1990_s2 + $0xc] ss:$20 sps:$4 sm:$0xff]   ;;  %v1560_v14 = vld [vmem:[%s1989_s0 + $0x70] sm:$0xff]  }
  0x1b   :  { %v1561_v15 = vld [vmem:[%s1989_s0 + $0x30] sm:$0xff]   ;;  %v1562_v16 = vld [vmem:[%s1989_s0 + $0x108] sm:$0xff]   ;;  %v1563_v17 = vld [vmem:[%s1989_s0 + $0x78] sm:$0xff]  }
  0x1c   :  { %1324 = vmatpush3.bf16.msra.mxu0 %v1504_v27  ;;  %v1564_v18 = vld [vmem:[%s1989_s0 + $0x38] sm:$0xff]   ;;  %v1565_v19 = vld [vmem:[%s1990_s2 + $0x34] ss:$20 sps:$4 sm:$0xff]   ;;  %v1567_v20 = vld [vmem:[%s1990_s2 + $0x30] ss:$20 sps:$4 sm:$0xff]  }
  0x1d   :  { %1352 = vmatpush3.bf16.msra.mxu1 %v1505_v28  ;;  %1325 = vmatprep.subr.bf16.mxu0 %v1506_v29  ;;  %v1568_v21 = vld [vmem:[%s1989_s0 + $0x110] sm:$0xff]   ;;  %v1571_v23 = vld [vmem:[%s1990_s2 + $0x4] ss:$20 sps:$4 sm:$0xff]   ;;  %v1575_v26 = vld [vmem:[%s1990_s2 + $0x2c] ss:$20 sps:$4 sm:$0xff]  }
  0x1e   :  { %1353 = vmatprep.subr.bf16.mxu1 %v1507_v30  ;;  %v1569_v22 = vld [vmem:[%s1990_s2] ss:$20 sps:$4 sm:$0xff]   ;;  %v1572_v24 = vld [vmem:[%s1989_s0 + $0x118] sm:$0xff]   ;;  %v1573_v25 = vld [vmem:[%s1990_s2 + $0x10] ss:$20 sps:$4 sm:$0xff]  }
  0x1f   :  { %v1034_v27 = vld [vmem:[%s1991_s4] sm:$0xff]  ;;  %v1574_v28 = vld [vmem:[%s1990_s2 + $0x38] ss:$20 sps:$4 sm:$0xff]   ;;  %v1036_v29 = vld [vmem:[%s1991_s4 + $0x10] sm:$0xff] }
  0x20   :  { %1326 = vmatpush3.bf16.msra.mxu0 %v1508_v31  ;;  %1040 = vperm.xlu0 %1476, %v1034_v27   ;;  %v1035_v30 = vld [vmem:[%s1991_s4 + $0x8] sm:$0xff] }
  0x21   :  { %1354 = vmatpush3.bf16.msra.mxu1 %v1509_v32  ;;  %1401 = vmatprep.subr.bf16.mxu0 %v1518_v39  ;;  %v1577_v31 = vld [vmem:[%s1990_s2 + $0x28] ss:$20 sps:$4 sm:$0xff]  }
  0x22   :  { %1435 = vmatprep.subr.bf16.mxu1 %v1516_v37  ;;  %1050 = vperm.xlu1 %1477, %v1036_v29   ;;  %v1037_v32 = vld [vmem:[%s1991_s4 + $0x18] sm:$0xff] }
  0x23   :  { %501 = vmatmul.mubr.bf16.vlgmr.msra.gmra.mrb[0].mxu0 %v1510_v33 }
  0x24   :  { %550 = vmatmul.mubr.bf16.vlgmr.msra.gmra.mrb[0].mxu1 %v1513_v35  ;;  %508 = vmatprep.mubr.bf16.mxu0 %v1519_v40 }
  0x25   :  { %1436 = vmatpush3.bf16.msra.mxu1 %v1516_v37  ;;  %557 = vmatprep.mubr.bf16.mxu1 %v1521_v41 }
  0x26   :  { %1437 = vmatprep.subr.bf16.mxu1 %v1517_v38  ;;  %1402 = vmatpush3.bf16.msra.mxu0 %v1523_v42 }
  0x27   :  { %1403 = vmatprep.subr.bf16.mxu0 %v1527_v46  ;;  %1045 = vperm.xlu0 %1476, %v1035_v30  }
  0x28   :  { %1055 = vperm.xlu1 %1477, %v1037_v32  }
  0x29   :  { %1438 = vmatpush3.bf16.msra.mxu1 %v1517_v38 }
  0x2a   :  { %1439 = vmatprep.subr.bf16.mxu1 %v1526_v45  ;;  %1404 = vmatpush3.bf16.msra.mxu0 %v1528_v47 }
  0x2b   :  { %509 = vmatmul.mubr.bf16.gmra.mrb[4].mxu0 %v1524_v43  ;;  %1405 = vmatprep.subr.bf16.mxu0 %v1530_v49 }
  0x2c   :  { %558 = vmatmul.mubr.bf16.gmra.mrb[4].mxu1 %v1525_v44  ;;  %968 = vmatprep.mubr.bf16.mxu0 %v1558_v12 }
  0x2d   :  { %1440 = vmatpush3.bf16.msra.mxu1 %v1526_v45  ;;  %1443 = vmatprep.mubr.msk.bf16.mxu1 %vm461_vm0, %v1531_v50 }
  0x2e   :  { %1441 = vmatprep.subr.bf16.mxu1 %v1529_v48  ;;  %1406 = vmatpush3.bf16.msra.mxu0 %v1532_v51 }
  0x2f   :  { %1407 = vmatprep.subr.bf16.mxu0 %v1536_v55 }
  0x31   :  { %1442 = vmatpush3.bf16.msra.mxu1 %v1529_v48 }
  0x32   :  { %1373 = vmatprep.subr.bf16.mxu1 %v1534_v53  ;;  %1408 = vmatpush3.bf16.msra.mxu0 %v1537_v56 }
  0x33   :  { %1409 = vmatprep.subr.bf16.mxu0 %v1540_v59 }
  0x34   :  { %1444 = vmatmul.mubr.msk.bf16.vlgmr.msra.gmra.mrb[8].mxu1 %vm461_vm0, %v1533_v52 }
  0x35   :  { %1374 = vmatpush3.bf16.msra.mxu1 %v1535_v54  ;;  %919 = vmatprep.mubr.bf16.mxu1 %v1571_v23 }
  0x36   :  { %1375 = vmatprep.subr.bf16.mxu1 %v1538_v57  ;;  %1410 = vmatpush3.bf16.msra.mxu0 %v1541_v60 }
  0x37   :  { %1411 = vmatprep.subr.bf16.mxu0 %v1544_v63 }
  0x39   :  { %1376 = vmatpush3.bf16.msra.mxu1 %v1539_v58 }
  0x3a   :  { %1377 = vmatprep.subr.bf16.mxu1 %v1542_v61  ;;  %1412 = vmatpush3.bf16.msra.mxu0 %v1545_v0 }
  0x3b   :  { %1413 = vmatprep.subr.bf16.mxu0 %v1548_v3 }
  0x3d   :  { %1378 = vmatpush3.bf16.msra.mxu1 %v1543_v62 }
  0x3e   :  { %1379 = vmatprep.subr.bf16.mxu1 %v1546_v1  ;;  %1414 = vmatpush3.bf16.msra.mxu0 %v1549_v4 }
  0x3f   :  { %1415 = vmatprep.subr.bf16.mxu0 %v1552_v7 }
  0x41   :  { %1380 = vmatpush3.bf16.msra.mxu1 %v1547_v2 }
  0x42   :  { %1381 = vmatprep.subr.bf16.mxu1 %v1550_v5  ;;  %1416 = vmatpush3.bf16.msra.mxu0 %v1553_v8 }
  0x43   :  { %1447 = vmatprep.subr.bf16.mxu0 %v1559_v13 }
  0x45   :  { %1382 = vmatpush3.bf16.msra.mxu1 %v1551_v6  ;;  %969 = vmatmul.mubr.bf16.vlgmr.msra.gmra.mrb[8].mxu0 %v1556_v11 }
  0x46   :  { %1383 = vmatprep.subr.bf16.mxu1 %v1554_v9  ;;  %1448 = vmatpush3.bf16.msra.mxu0 %v1559_v13 }
  0x47   :  { %1449 = vmatprep.subr.bf16.mxu0 %v1562_v16  ;;  %976 = vmatprep.mubr.bf16.mxu0 %v1565_v19 }
  0x49   :  { %1384 = vmatpush3.bf16.msra.mxu1 %v1555_v10 }
  0x4a   :  { %1385 = vmatprep.subr.bf16.mxu1 %v1560_v14  ;;  %1450 = vmatpush3.bf16.msra.mxu0 %v1562_v16 }
  0x4b   :  { %1451 = vmatprep.subr.bf16.mxu0 %v1568_v21 }
  0x4d   :  { %1386 = vmatpush3.bf16.msra.mxu1 %v1561_v15  ;;  %977 = vmatmul.mubr.bf16.gmra.mrb[12].mxu0 %v1567_v20 }
  0x4e   :  { %1387 = vmatprep.subr.bf16.mxu1 %v1563_v17  ;;  %1452 = vmatpush3.bf16.msra.mxu0 %v1568_v21 }
  0x4f   :  { %1453 = vmatprep.subr.bf16.mxu0 %v1572_v24  ;;  %1455 = vmatprep.mubr.msk.bf16.mxu0 %vm461_vm0, %v1573_v25 }
  0x51   :  { %1388 = vmatpush3.bf16.msra.mxu1 %v1564_v18 }
  0x52   :  { %1454 = vmatpush3.bf16.msra.mxu0 %v1572_v24 }
  0x54   :  { %920 = vmatmul.mubr.bf16.vlgmr.msra.gmra.mrb[12].mxu1 %v1569_v22 }
  0x55   :  { %927 = vmatprep.mubr.bf16.mxu1 %v1575_v26  ;;  %1456 = vmatmul.mubr.msk.bf16.vlgmr.msra.gmra.mrb[16].mxu0 %vm461_vm0, %v1574_v28 }
  0x5c   :  { %928 = vmatmul.mubr.bf16.gmra.mrb[16].mxu1 %v1577_v31 }
  0x9f   :  { %v1041_v13 = vpop.permute.xlu0 %1040 }
  0xa6   :  { %v1046_v29 = vpop.permute.xlu0 %1045 }
  0xf6   :  { %v1327_v33 = vpop.f32.mrb[0].mxu0 }
  0xf7   :  { %v1355_v34 = vpop.f32.mrb[0].mxu1  ;;  %v1328_v35 = vpop.f32.mrb[1].mxu0 }
  0xf8   :  { %v1329_v36 = vadd.f32 %v1328_v35, %v1327_v33  ;;  %v1356_v37 = vpop.f32.mrb[1].mxu1  ;;  %v1330_v38 = vpop.f32.mrb[2].mxu0 }
  0xf9   :  { %v1357_v39 = vadd.f32 %v1356_v37, %v1355_v34  ;;  %v1358_v40 = vpop.f32.mrb[2].mxu1  ;;  %v1331_v41 = vpop.f32.mrb[3].mxu0 }
  0xfa   :  { %v1332_v42 = vadd.f32 %v1331_v41, %v1330_v38  ;;  %v1359_v43 = vpop.f32.mrb[3].mxu1 }
  0xfb   :  { %v1360_v44 = vadd.f32 %v1359_v43, %v1358_v40  ;;  %v552_v45 = vadd.f32 %v1357_v39, %v1329_v36 }
  0xfd   :  { %v555_v46 = vadd.f32 %v1360_v44, %v1332_v42 }
  0xfe   :  { %v1333_v47 = vpop.f32.mrb[4].mxu0 }
  0xff   :  { %v1361_v48 = vpop.f32.mrb[4].mxu1  ;;  %v1334_v49 = vpop.f32.mrb[5].mxu0 }
 0x100   :  { %v1335_v50 = vadd.f32 %v1334_v49, %v1333_v47  ;;  %v1362_v51 = vpop.f32.mrb[5].mxu1  ;;  %v1336_v52 = vpop.f32.mrb[6].mxu0 }
 0x101   :  { %v1363_v53 = vadd.f32 %v1362_v51, %v1361_v48  ;;  %v1364_v54 = vpop.f32.mrb[6].mxu1  ;;  %v1337_v55 = vpop.f32.mrb[7].mxu0 }
 0x102   :  { %v1338_v56 = vadd.f32 %v1337_v55, %v1336_v52  ;;  %v1365_v57 = vpop.f32.mrb[7].mxu1 }
 0x103   :  { %v1366_v58 = vadd.f32 %v1365_v57, %v1364_v54  ;;  %v560_v59 = vadd.f32 %v1363_v53, %v1335_v50 }
 0x105   :  { %v563_v60 = vadd.f32 %v1366_v58, %v1338_v56 }
 0x107   :  { %v1445_v61 = vpop.f32.mrb[8].mxu1 }
 0x108   :  { %v609_v62 = vadd.f32 %v1445_v61, %v560_v59  ;;  %v600_v63 = vpop.f32.mrb[9].mxu1 }
 0x109   :  { %v601_v0 = vadd.f32 %v600_v63, %v552_v45  ;;  %v1446_v1 = vpop.f32.mrb[10].mxu1  ;;  %v1051_v45 = vpop.permute.xlu1 %1050 }
 0x10a   :  { %v612_v2 = vadd.f32 %v1446_v1, %v563_v60  ;;  %v603_v3 = vpop.f32.mrb[11].mxu1 }
 0x10b   :  { %v604_v4 = vadd.f32 %v603_v3, %v555_v46 }
 0x10d   :  { %v1056_v53 = vpop.permute.xlu1 %1055 }
 0x118   :  { %v1417_v5 = vpop.f32.mrb[8].mxu0 }
 0x119   :  { %v1418_v6 = vpop.f32.mrb[9].mxu0 }
 0x11a   :  { %v1419_v7 = vadd.f32 %v1418_v6, %v1417_v5  ;;  %v1420_v8 = vpop.f32.mrb[10].mxu0 }
 0x11b   :  { %v1421_v9 = vpop.f32.mrb[11].mxu0 }
 0x11c   :  { %v1422_v10 = vadd.f32 %v1421_v9, %v1420_v8 }
 0x120   :  { %v1423_v11 = vpop.f32.mrb[12].mxu0 }
 0x121   :  { %v1424_v12 = vpop.f32.mrb[13].mxu0 }
 0x122   :  { %v1425_v15 = vadd.f32 %v1424_v12, %v1423_v11  ;;  %v1426_v16 = vpop.f32.mrb[14].mxu0 }
 0x123   :  { %v1427_v18 = vpop.f32.mrb[15].mxu0 }
 0x124   :  { %v1428_v21 = vadd.f32 %v1427_v18, %v1426_v16 }
 0x127   :  { %v1389_v14 = vpop.f32.mrb[12].mxu1 }
 0x128   :  { %v1390_v17 = vpop.f32.mrb[13].mxu1  ;;  %v1457_v26 = vpop.f32.mrb[16].mxu0 }
 0x129   :  { %v1391_v19 = vadd.f32 %v1390_v17, %v1389_v14  ;;  %v1392_v20 = vpop.f32.mrb[14].mxu1  ;;  %v1019_v28 = vpop.f32.mrb[17].mxu0  ;;  %v1142_v14 = vld [vmem:[%s1992_s6] sm:$0xff] }
 0x12a   :  { %v1393_v22 = vpop.f32.mrb[15].mxu1  ;;  %v1458_v32 = vpop.f32.mrb[18].mxu0 }
 0x12b   :  { %v922_v23 = vadd.f32 %v1391_v19, %v601_v0  ;;  %v1394_v24 = vadd.f32 %v1393_v22, %v1392_v20  ;;  %v1022_v35 = vpop.f32.mrb[19].mxu0 }
 0x12d   :  { %v925_v25 = vadd.f32 %v1394_v24, %v604_v4  ;;  %v971_v27 = vadd.f32 %v1419_v7, %v922_v23 }
 0x12f   :  { %v1020_v30 = vadd.f32 %v1019_v28, %v971_v27  ;;  %v1395_v31 = vpop.f32.mrb[16].mxu1  ;;  %v974_v33 = vadd.f32 %v1422_v10, %v925_v25 }
 0x130   :  { %v1396_v34 = vpop.f32.mrb[17].mxu1 }
 0x131   :  { %v1397_v36 = vadd.f32 %v1396_v34, %v1395_v31  ;;  %v1023_v37 = vadd.f32 %v1022_v35, %v974_v33  ;;  %v1398_v38 = vpop.f32.mrb[18].mxu1  ;;  %v1058_v39 = vadd.f32 %v1041_v13, %v1020_v30  ;;  %v1143_v13 = vld [vmem:[%s1992_s6 + $0x8] sm:$0xff]  ;;  %v1144_v33 = vld [vmem:[%s1992_s6 + $0x10] sm:$0xff] }
 0x132   :  { %v1399_v40 = vpop.f32.mrb[19].mxu1  ;;  %v1104_v34 = vld [vmem:[%s1993_s5 + $0x10] sm:$0xff] }
 0x133   :  { %v930_v41 = vadd.f32 %v1397_v36, %v609_v62  ;;  %v1059_v42 = vadd.f32 %v1046_v29, %v1023_v37  ;;  %v1400_v43 = vadd.f32 %v1399_v40, %v1398_v38  ;;  %v1062_v44 = vsel %vm461_vm0, %v1058_v39, 0.0  ;;  %v1103_v29 = vld [vmem:[%s1993_s5 + $0x8] sm:$0xff]  ;;  %v1105_v37 = vld [vmem:[%s1993_s5 + $0x18] sm:$0xff] }
 0x134   :  { %1063 = vadd.xlane.f32.xlu0 %v1062_v44  ;;  %v1145_v40 = vld [vmem:[%s1992_s6 + $0x18] sm:$0xff] }
 0x135   :  { %v933_v46 = vadd.f32 %v1400_v43, %v612_v2  ;;  %v979_v47 = vadd.f32 %v1425_v15, %v930_v41  ;;  %v1065_v48 = vsel %vm461_vm0, %v1059_v42, 0.0 }
 0x136   :  { %1066 = vadd.xlane.f32.xlu1 %v1065_v48 }
 0x137   :  { %v1028_v49 = vadd.f32 %v1457_v26, %v979_v47  ;;  %v982_v50 = vadd.f32 %v1428_v21, %v933_v46  ;;  %v1102_v26 = vld [vmem:[%s1993_s5] sm:$0xff] }
 0x139   :  { %v1060_v51 = vadd.f32 %v1051_v45, %v1028_v49  ;;  %v1031_v52 = vadd.f32 %v1458_v32, %v982_v50 }
 0x13b   :  { %v1061_v54 = vadd.f32 %v1056_v53, %v1031_v52  ;;  %v1068_v55 = vsel %vm461_vm0, %v1060_v51, 0.0 }
 0x13c   :  { %1069 = vadd.xlane.f32.xlu0 %v1068_v55 }
 0x13d   :  { %v1071_v56 = vsel %vm461_vm0, %v1061_v54, 0.0 }
 0x140   :  { %1072 = vadd.xlane.f32.xlu0 %v1071_v56 }
 0x1c1   :  { %v1064_v57 = vpop.xlane.xlu0 %1063 }
 0x1c2   :  { %v1074_v58 = vmul.f32 0.015625, %v1064_v57 }
 0x1c3   :  { %v1067_v59 = vpop.xlane.xlu1 %1066 }
 0x1c4   :  { %v1923_v60 = vsub.f32 %v1058_v39, %v1074_v58  ;;  %v1075_v61 = vmul.f32 0.015625, %v1067_v59 }
 0x1c6   :  { %v1925_v62 = vsub.f32 %v1059_v42, %v1075_v61  ;;  %v1082_v63 = vmul.f32 %v1923_v60, %v1923_v60 }
 0x1c8   :  { %v1086_v0 = vsel %vm461_vm0, %v1082_v63, 0.0  ;;  %v1083_v1 = vmul.f32 %v1925_v62, %v1925_v62 }
 0x1c9   :  { %1087 = vadd.xlane.f32.xlu1 %v1086_v0  ;;  %v1070_v2 = vpop.xlane.xlu0 %1069 }
 0x1ca   :  { %v1076_v3 = vmul.f32 0.015625, %v1070_v2  ;;  %v1089_v4 = vsel %vm461_vm0, %v1083_v1, 0.0 }
 0x1cb   :  { %1090 = vadd.xlane.f32.xlu0 %v1089_v4 }
 0x1cc   :  { %v1933_v5 = vsub.f32 %v1060_v51, %v1076_v3 }
 0x1cd   :  { %v1073_v6 = vpop.xlane.xlu0 %1072 }
 0x1ce   :  { %v1077_v7 = vmul.f32 0.015625, %v1073_v6  ;;  %v1084_v8 = vmul.f32 %v1933_v5, %v1933_v5 }
 0x1d0   :  { %v1937_v9 = vsub.f32 %v1061_v54, %v1077_v7  ;;  %v1092_v10 = vsel %vm461_vm0, %v1084_v8, 0.0 }
 0x1d1   :  { %1093 = vadd.xlane.f32.xlu1 %v1092_v10 }
 0x1d2   :  { %v1085_v11 = vmul.f32 %v1937_v9, %v1937_v9 }
 0x1d4   :  { %v1095_v12 = vsel %vm461_vm0, %v1085_v11, 0.0 }
 0x1d5   :  { %1096 = vadd.xlane.f32.xlu0 %v1095_v12 }
 0x1e2   :  { %1153 = vperm.xlu1 %1477, %v1143_v13  }
 0x1eb   :  { %1148 = vperm.xlu0 %1476, %v1142_v14  }
 0x256   :  { %v1088_v15 = vpop.xlane.xlu1 %1087 }
 0x257   :  { %v1098_v16 = vmul.f32 0.015625, %v1088_v15 }
 0x258   :  { %v1091_v17 = vpop.xlane.xlu0 %1090 }
 0x259   :  { %v1106_v18 = vadd.f32 1e-05, %v1098_v16  ;;  %v1099_v19 = vmul.f32 0.015625, %v1091_v17 }
 0x25b   :  { %1578 = vrsqrt.f32 %v1106_v18  ;;  %v1107_v20 = vadd.f32 1e-05, %v1099_v19 }
 0x25d   :  { %1580 = vrsqrt.f32 %v1107_v20 }
 0x25e   :  { %v1094_v21 = vpop.xlane.xlu1 %1093 }
 0x25f   :  { %v1100_v22 = vmul.f32 0.015625, %v1094_v21 }
 0x261   :  { %v1108_v23 = vadd.f32 1e-05, %v1100_v22 }
 0x262   :  { %v1097_v24 = vpop.xlane.xlu0 %1096  ;;  %v1154_v41 = vpop.permute.xlu1 %1153 }
 0x263   :  { %1582 = vrsqrt.f32 %v1108_v23  ;;  %v1101_v25 = vmul.f32 0.015625, %v1097_v24 }
 0x265   :  { %v1579_v27 = vpop.eup %1578  ;;  %v1109_v28 = vadd.f32 1e-05, %v1101_v25 }
 0x266   :  { %v1114_v30 = vmul.f32 %v1579_v27, %v1102_v26 }
 0x267   :  { %v1581_v31 = vpop.eup %1580  ;;  %1584 = vrsqrt.f32 %v1109_v28 }
 0x268   :  { %1120 = vperm.xlu1 %1477, %v1114_v30   ;;  %v1115_v32 = vmul.f32 %v1581_v31, %v1103_v29 }
 0x26a   :  { %1125 = vperm.xlu0 %1476, %v1115_v32   ;;  %v1149_v42 = vpop.permute.xlu0 %1148 }
 0x26d   :  { %v1583_v35 = vpop.eup %1582 }
 0x26e   :  { %1158 = vperm.xlu0 %1476, %v1144_v33   ;;  %v1116_v36 = vmul.f32 %v1583_v35, %v1104_v34 }
 0x270   :  { %1130 = vperm.xlu1 %1477, %v1116_v36  }
 0x271   :  { %v1585_v38 = vpop.eup %1584 }
 0x272   :  { %v1117_v39 = vmul.f32 %v1585_v38, %v1105_v37 }
 0x274   :  { %1135 = vperm.xlu1 %1477, %v1117_v39  }
 0x278   :  { %1163 = vperm.xlu1 %1477, %v1145_v40  }
 0x2e7   :  { %v1121_v43 = vpop.permute.xlu1 %1120 }
 0x2e8   :  { %v1138_v44 = vmul.f32 %v1121_v43, %v1923_v60 }
 0x2e9   :  { %v1126_v45 = vpop.permute.xlu0 %1125 }
 0x2ea   :  { %v1166_v46 = vadd.f32 %v1149_v42, %v1138_v44  ;;  %v1139_v47 = vmul.f32 %v1126_v45, %v1925_v62 }
 0x2ec   :  { %vm1170_vm1 = vcmp.ge.f32.partialorder %v1166_v46, 0.0  ;;  %v1174_v48 = vmul.f32 0.01, %v1166_v46  ;;  %v1167_v49 = vadd.f32 %v1154_v41, %v1139_v47 }
 0x2ed   :  { %v1159_v57 = vpop.permute.xlu0 %1158 }
 0x2ee   :  { %v1178_v50 = vsel %vm1170_vm1, %v1166_v46, %v1174_v48  ;;  %vm1171_vm3 = vcmp.ge.f32.partialorder %v1167_v49, 0.0  ;;  %v1175_v51 = vmul.f32 0.01, %v1167_v49 }
 0x2ef   :  { %v1307_v52 = vpack.c.bf16 %v1178_v50, %v1178_v50  ;;  %v1131_v53 = vpop.permute.xlu1 %1130 }
 0x2f0   :  { %v1179_v54 = vsel %vm1171_vm3, %v1167_v49, %v1175_v51  ;;  %v1140_v55 = vmul.f32 %v1131_v53, %v1933_v5 }
 0x2f1   :  { %1199 = vst.msk [vmem:[%s1994_s7] sm:$0xf] %vm1198_vm2, %v1307_v52  ;;  %v1308_v56 = vpack.c.bf16 %v1179_v54, %v1179_v54 }
 0x2f2   :  { %v1168_v58 = vadd.f32 %v1159_v57, %v1140_v55 }
 0x2f3   :  { %1200 = vst.msk [vmem:[%s1994_s7 + $0x4] sm:$0xf] %vm1198_vm2, %v1308_v56  ;;  %v1136_v59 = vpop.permute.xlu1 %1135 }
 0x2f4   :  { %vm1172_vm4 = vcmp.ge.f32.partialorder %v1168_v58, 0.0  ;;  %v1176_v60 = vmul.f32 0.01, %v1168_v58  ;;  %v1141_v62 = vmul.f32 %v1136_v59, %v1937_v9 }
 0x2f6   :  { %v1180_v61 = vsel %vm1172_vm4, %v1168_v58, %v1176_v60 }
 0x2f7   :  { %v1309_v63 = vpack.c.bf16 %v1180_v61, %v1180_v61  ;;  %v1164_v0 = vpop.permute.xlu1 %1163 }
 0x2f8   :  { %v1169_v1 = vadd.f32 %v1164_v0, %v1141_v62 }
 0x2f9   :  { %1201 = vst.msk [vmem:[%s1994_s7 + $0x8] sm:$0xf] %vm1198_vm2, %v1309_v63 }
 0x2fa   :  { %vm1173_vm5 = vcmp.ge.f32.partialorder %v1169_v1, 0.0  ;;  %v1177_v2 = vmul.f32 0.01, %v1169_v1 }
 0x2fc   :  { %v1181_v3 = vsel %vm1173_vm5, %v1169_v1, %v1177_v2 }
 0x2fd   :  { %v1310_v4 = vpack.c.bf16 %v1181_v3, %v1181_v3 }
 0x2ff   :  { %1202 = vst.msk [vmem:[%s1994_s7 + $0xc] sm:$0xf] %vm1198_vm2, %v1310_v4 }

// kernel: _lambda_.21
= control target key start
LH: loop header
LB: loop body
LE: loop exit
PB: predicated region body
PF: predicated region fallthrough
CT: control target
= control target key end

     0   :  { %v1003_v1 = vmov 0   ;;  %vm302_vm0 = vcmask 261120   ;;  %s1306_s1 = inlined_call_operand.vmem [shape: bf16[288,256], index: 1, kind: input, shape index: {}]   ;;  %s1307_s0 = inlined_call_operand.vmem [shape: bf16[288,256], index: 0, kind: input, shape index: {}]   ;;  %s1308_s3 = inlined_call_operand.vmem [shape: bf16[16,288], index: 3, kind: input, shape index: {}]   ;;  %s1309_s2 = inlined_call_operand.vmem [shape: bf16[16,288], index: 2, kind: input, shape index: {}]   ;;  %s1310_s4 = inlined_call_operand.vmem [shape: f32[16,1], index: 4, kind: input, shape index: {}, may-alias: {4,6}]   ;;  %s1311_s6 = inlined_call_operand.vmem [shape: f32[16,1], index: 6, kind: input, shape index: {}, may-alias: {4,6}]   ;;  %s1312_s5 = inlined_call_operand.vmem [shape: f32[16,1], index: 5, kind: input, shape index: {}]   ;;  %s1313_s7 = inlined_call_operand.vmem [shape: bf16[16,256], index: 7, kind: output, shape index: {}]  }
   0x1   :  { %v883_v0 = vld [vmem:[%s1306_s1 + $0x4] ss:$8 sps:$4 sm:$0xff]   ;;  %881 = vset.pattern.permute.xlu0 %v1003_v1  ;;  %882 = vset.pattern.permute.xlu1 %v1003_v1  ;;  %v887_v3 = vld [vmem:[%s1306_s1] ss:$8 sps:$4 sm:$0xff]   ;;  %v889_v5 = vld [vmem:[%s1306_s1 + $0x14] ss:$8 sps:$4 sm:$0xff]  }
   0x2   :  { %v885_v2 = vld [vmem:[%s1307_s0 + $0x4] ss:$8 sps:$4 sm:$0xff]   ;;  %306 = vmatprep.subr.bf16.mxu1 %v883_v0  ;;  %v888_v4 = vld [vmem:[%s1307_s0] ss:$8 sps:$4 sm:$0xff]   ;;  %v891_v6 = vld [vmem:[%s1307_s0 + $0x14] ss:$8 sps:$4 sm:$0xff]  }
   0x3   :  { %590 = vmatprep.subr.bf16.mxu0 %v885_v2  ;;  %307 = vmatpush1.bf16.msra.mxu1 %v887_v3  ;;  %v893_v7 = vld [vmem:[%s1306_s1 + $0x10] ss:$8 sps:$4 sm:$0xff]   ;;  %v895_v9 = vld [vmem:[%s1306_s1 + $0x24] ss:$8 sps:$4 sm:$0xff]   ;;  %v899_v11 = vld [vmem:[%s1306_s1 + $0x20] ss:$8 sps:$4 sm:$0xff]  }
   0x4   :  { %591 = vmatpush1.bf16.msra.mxu0 %v888_v4  ;;  %308 = vmatprep.subr.bf16.mxu1 %v889_v5  ;;  %v894_v8 = vld [vmem:[%s1307_s0 + $0x10] ss:$8 sps:$4 sm:$0xff]   ;;  %v897_v10 = vld [vmem:[%s1307_s0 + $0x24] ss:$8 sps:$4 sm:$0xff]   ;;  %v900_v12 = vld [vmem:[%s1307_s0 + $0x20] ss:$8 sps:$4 sm:$0xff]  }
   0x5   :  { %592 = vmatprep.subr.bf16.mxu0 %v891_v6  ;;  %v901_v13 = vld [vmem:[%s1306_s1 + $0x34] ss:$8 sps:$4 sm:$0xff]   ;;  %v905_v15 = vld [vmem:[%s1306_s1 + $0x30] ss:$8 sps:$4 sm:$0xff]   ;;  %v907_v17 = vld [vmem:[%s1306_s1 + $0x44] ss:$8 sps:$4 sm:$0xff]  }
   0x6   :  { %v903_v14 = vld [vmem:[%s1307_s0 + $0x34] ss:$8 sps:$4 sm:$0xff]   ;;  %v906_v16 = vld [vmem:[%s1307_s0 + $0x30] ss:$8 sps:$4 sm:$0xff]   ;;  %v909_v18 = vld [vmem:[%s1307_s0 + $0x44] ss:$8 sps:$4 sm:$0xff]  }
   0x7   :  { %309 = vmatpush1.bf16.msra.mxu1 %v893_v7  ;;  %v911_v19 = vld [vmem:[%s1306_s1 + $0x40] ss:$8 sps:$4 sm:$0xff]   ;;  %v913_v21 = vld [vmem:[%s1306_s1 + $0x54] ss:$8 sps:$4 sm:$0xff]   ;;  %v917_v23 = vld [vmem:[%s1306_s1 + $0x50] ss:$8 sps:$4 sm:$0xff]  }
   0x8   :  { %593 = vmatpush1.bf16.msra.mxu0 %v894_v8  ;;  %310 = vmatprep.subr.bf16.mxu1 %v895_v9  ;;  %v912_v20 = vld [vmem:[%s1307_s0 + $0x40] ss:$8 sps:$4 sm:$0xff]   ;;  %v915_v22 = vld [vmem:[%s1307_s0 + $0x54] ss:$8 sps:$4 sm:$0xff]   ;;  %v918_v24 = vld [vmem:[%s1307_s0 + $0x50] ss:$8 sps:$4 sm:$0xff]  }
   0x9   :  { %594 = vmatprep.subr.bf16.mxu0 %v897_v10  ;;  %v919_v25 = vld [vmem:[%s1306_s1 + $0x64] ss:$8 sps:$4 sm:$0xff]   ;;  %v923_v27 = vld [vmem:[%s1306_s1 + $0x60] ss:$8 sps:$4 sm:$0xff]   ;;  %v925_v29 = vld [vmem:[%s1306_s1 + $0x74] ss:$8 sps:$4 sm:$0xff]  }
   0xa   :  { %v921_v26 = vld [vmem:[%s1307_s0 + $0x64] ss:$8 sps:$4 sm:$0xff]   ;;  %v924_v28 = vld [vmem:[%s1307_s0 + $0x60] ss:$8 sps:$4 sm:$0xff]   ;;  %v927_v30 = vld [vmem:[%s1307_s0 + $0x74] ss:$8 sps:$4 sm:$0xff]  }
   0xb   :  { %311 = vmatpush1.bf16.msra.mxu1 %v899_v11  ;;  %v929_v31 = vld [vmem:[%s1306_s1 + $0x70] ss:$8 sps:$4 sm:$0xff]   ;;  %v931_v33 = vld [vmem:[%s1306_s1 + $0x84] ss:$8 sps:$4 sm:$0xff]   ;;  %v935_v35 = vld [vmem:[%s1306_s1 + $0x80] ss:$8 sps:$4 sm:$0xff]  }
   0xc   :  { %595 = vmatpush1.bf16.msra.mxu0 %v900_v12  ;;  %312 = vmatprep.subr.bf16.mxu1 %v901_v13  ;;  %v930_v32 = vld [vmem:[%s1307_s0 + $0x70] ss:$8 sps:$4 sm:$0xff]   ;;  %v933_v34 = vld [vmem:[%s1307_s0 + $0x84] ss:$8 sps:$4 sm:$0xff]   ;;  %v936_v36 = vld [vmem:[%s1307_s0 + $0x80] ss:$8 sps:$4 sm:$0xff]  }
   0xd   :  { %596 = vmatprep.subr.bf16.mxu0 %v903_v14  ;;  %v937_v37 = vld [vmem:[%s1306_s1 + $0x94] ss:$8 sps:$4 sm:$0xff]   ;;  %v941_v39 = vld [vmem:[%s1306_s1 + $0x90] ss:$8 sps:$4 sm:$0xff]   ;;  %v943_v41 = vld [vmem:[%s1306_s1 + $0xa4] ss:$8 sps:$4 sm:$0xff]  }
   0xe   :  { %v939_v38 = vld [vmem:[%s1307_s0 + $0x94] ss:$8 sps:$4 sm:$0xff]   ;;  %v942_v40 = vld [vmem:[%s1307_s0 + $0x90] ss:$8 sps:$4 sm:$0xff]   ;;  %v945_v42 = vld [vmem:[%s1307_s0 + $0xa4] ss:$8 sps:$4 sm:$0xff]  }
   0xf   :  { %313 = vmatpush1.bf16.msra.mxu1 %v905_v15  ;;  %v947_v43 = vld [vmem:[%s1306_s1 + $0xa0] ss:$8 sps:$4 sm:$0xff]   ;;  %v949_v45 = vld [vmem:[%s1306_s1 + $0xb4] ss:$8 sps:$4 sm:$0xff]   ;;  %v953_v47 = vld [vmem:[%s1306_s1 + $0xb0] ss:$8 sps:$4 sm:$0xff]  }
  0x10   :  { %597 = vmatpush1.bf16.msra.mxu0 %v906_v16  ;;  %314 = vmatprep.subr.bf16.mxu1 %v907_v17  ;;  %v948_v44 = vld [vmem:[%s1307_s0 + $0xa0] ss:$8 sps:$4 sm:$0xff]   ;;  %v951_v46 = vld [vmem:[%s1307_s0 + $0xb4] ss:$8 sps:$4 sm:$0xff]   ;;  %v954_v48 = vld [vmem:[%s1307_s0 + $0xb0] ss:$8 sps:$4 sm:$0xff]  }
  0x11   :  { %598 = vmatprep.subr.bf16.mxu0 %v909_v18  ;;  %v955_v49 = vld [vmem:[%s1306_s1 + $0xc4] ss:$8 sps:$4 sm:$0xff]   ;;  %v959_v53 = vld [vmem:[%s1306_s1 + $0xc0] ss:$8 sps:$4 sm:$0xff]   ;;  %v961_v55 = vld [vmem:[%s1306_s1 + $0xd4] ss:$8 sps:$4 sm:$0xff]  }
  0x12   :  { %v957_v50 = vld [vmem:[%s1307_s0 + $0xc4] ss:$8 sps:$4 sm:$0xff]   ;;  %v960_v54 = vld [vmem:[%s1307_s0 + $0xc0] ss:$8 sps:$4 sm:$0xff]   ;;  %v963_v56 = vld [vmem:[%s1307_s0 + $0xd4] ss:$8 sps:$4 sm:$0xff]  }
  0x13   :  { %315 = vmatpush1.bf16.msra.mxu1 %v911_v19  ;;  %v981_v51 = vld [vmem:[%s1308_s3 + $0x4] ss:$12 sps:$4 sm:$0xff]   ;;  %v677_v62 = vld [vmem:[%s1310_s4 + $0x8] sm:$0xff]  ;;  %v973_v2 = vld [vmem:[%s1306_s1 + $0xf4] ss:$8 sps:$4 sm:$0xff]  }
  0x14   :  { %599 = vmatpush1.bf16.msra.mxu0 %v912_v20  ;;  %316 = vmatprep.subr.bf16.mxu1 %v913_v21  ;;  %v985_v52 = vld [vmem:[%s1309_s2 + $0x4] ss:$12 sps:$4 sm:$0xff]   ;;  %v971_v63 = vld [vmem:[%s1306_s1 + $0xe0] ss:$8 sps:$4 sm:$0xff]   ;;  %v975_v3 = vld [vmem:[%s1307_s0 + $0xf4] ss:$8 sps:$4 sm:$0xff]  }
  0x15   :  { %600 = vmatprep.subr.bf16.mxu0 %v915_v22  ;;  %338 = vmatprep.mubr.bf16.mxu1 %v981_v51  ;;  %v965_v57 = vld [vmem:[%s1306_s1 + $0xd0] ss:$8 sps:$4 sm:$0xff]   ;;  %v676_v59 = vld [vmem:[%s1310_s4] sm:$0xff]  ;;  %v995_v12 = vld [vmem:[%s1306_s1 + $0x114] ss:$8 sps:$4 sm:$0xff]  }
  0x16   :  { %622 = vmatprep.mubr.bf16.mxu0 %v985_v52  ;;  %v966_v58 = vld [vmem:[%s1307_s0 + $0xd0] ss:$8 sps:$4 sm:$0xff]   ;;  %v967_v60 = vld [vmem:[%s1306_s1 + $0xe4] ss:$8 sps:$4 sm:$0xff]   ;;  %680 = vperm.xlu0 %881, %v676_v59   ;;  %v972_v0 = vld [vmem:[%s1307_s0 + $0xe0] ss:$8 sps:$4 sm:$0xff]  }
  0x17   :  { %317 = vmatpush1.bf16.msra.mxu1 %v917_v23  ;;  %v969_v61 = vld [vmem:[%s1307_s0 + $0xe4] ss:$8 sps:$4 sm:$0xff]   ;;  %v977_v4 = vld [vmem:[%s1306_s1 + $0xf0] ss:$8 sps:$4 sm:$0xff]   ;;  %v987_v10 = vld [vmem:[%s1306_s1 + $0x100] ss:$8 sps:$4 sm:$0xff]  }
  0x18   :  { %601 = vmatpush1.bf16.msra.mxu0 %v918_v24  ;;  %318 = vmatprep.subr.bf16.mxu1 %v919_v25  ;;  %v978_v5 = vld [vmem:[%s1307_s0 + $0xf0] ss:$8 sps:$4 sm:$0xff]   ;;  %v989_v6 = vld [vmem:[%s1306_s1 + $0x104] ss:$8 sps:$4 sm:$0xff]   ;;  %v990_v11 = vld [vmem:[%s1307_s0 + $0x100] ss:$8 sps:$4 sm:$0xff]  }
  0x19   :  { %602 = vmatprep.subr.bf16.mxu0 %v921_v26  ;;  %v992_v7 = vld [vmem:[%s1307_s0 + $0x104] ss:$8 sps:$4 sm:$0xff]   ;;  %v998_v13 = vld [vmem:[%s1307_s0 + $0x114] ss:$8 sps:$4 sm:$0xff]   ;;  %v993_v14 = vld [vmem:[%s1306_s1 + $0x110] ss:$8 sps:$4 sm:$0xff]  }
  0x1a   :  { %685 = vperm.xlu0 %881, %v677_v62   ;;  %v979_v8 = vld [vmem:[%s1308_s3] ss:$12 sps:$4 sm:$0xff]   ;;  %v996_v15 = vld [vmem:[%s1307_s0 + $0x110] ss:$8 sps:$4 sm:$0xff]   ;;  %v982_v16 = vld [vmem:[%s1308_s3 + $0x8] ss:$12 sps:$4 sm:$0xff]  }
  0x1b   :  { %319 = vmatpush1.bf16.msra.mxu1 %v923_v27  ;;  %v983_v9 = vld [vmem:[%s1309_s2] ss:$12 sps:$4 sm:$0xff]   ;;  %v986_v17 = vld [vmem:[%s1309_s2 + $0x8] ss:$12 sps:$4 sm:$0xff]  }
  0x1c   :  { %603 = vmatpush1.bf16.msra.mxu0 %v924_v28  ;;  %320 = vmatprep.subr.bf16.mxu1 %v925_v29  ;;  %v738_v51 = vld [vmem:[%s1311_s6] sm:$0xff] }
  0x1d   :  { %604 = vmatprep.subr.bf16.mxu0 %v927_v30 }
  0x1f   :  { %321 = vmatpush1.bf16.msra.mxu1 %v929_v31 }
  0x20   :  { %605 = vmatpush1.bf16.msra.mxu0 %v930_v32  ;;  %322 = vmatprep.subr.bf16.mxu1 %v931_v33 }
  0x21   :  { %606 = vmatprep.subr.bf16.mxu0 %v933_v34 }
  0x23   :  { %323 = vmatpush1.bf16.msra.mxu1 %v935_v35 }
  0x24   :  { %607 = vmatpush1.bf16.msra.mxu0 %v936_v36  ;;  %324 = vmatprep.subr.bf16.mxu1 %v937_v37 }
  0x25   :  { %608 = vmatprep.subr.bf16.mxu0 %v939_v38 }
  0x27   :  { %325 = vmatpush1.bf16.msra.mxu1 %v941_v39 }
  0x28   :  { %609 = vmatpush1.bf16.msra.mxu0 %v942_v40  ;;  %326 = vmatprep.subr.bf16.mxu1 %v943_v41 }
  0x29   :  { %610 = vmatprep.subr.bf16.mxu0 %v945_v42 }
  0x2b   :  { %327 = vmatpush1.bf16.msra.mxu1 %v947_v43 }
  0x2c   :  { %611 = vmatpush1.bf16.msra.mxu0 %v948_v44  ;;  %328 = vmatprep.subr.bf16.mxu1 %v949_v45 }
  0x2d   :  { %612 = vmatprep.subr.bf16.mxu0 %v951_v46 }
  0x2f   :  { %329 = vmatpush1.bf16.msra.mxu1 %v953_v47 }
  0x30   :  { %613 = vmatpush1.bf16.msra.mxu0 %v954_v48  ;;  %330 = vmatprep.subr.bf16.mxu1 %v955_v49 }
  0x31   :  { %614 = vmatprep.subr.bf16.mxu0 %v957_v50 }
  0x33   :  { %331 = vmatpush1.bf16.msra.mxu1 %v959_v53 }
  0x34   :  { %615 = vmatpush1.bf16.msra.mxu0 %v960_v54  ;;  %332 = vmatprep.subr.bf16.mxu1 %v961_v55 }
  0x35   :  { %616 = vmatprep.subr.bf16.mxu0 %v963_v56 }
  0x37   :  { %333 = vmatpush1.bf16.msra.mxu1 %v965_v57 }
  0x38   :  { %617 = vmatpush1.bf16.msra.mxu0 %v966_v58  ;;  %334 = vmatprep.subr.bf16.mxu1 %v967_v60  ;;  %v716_v58 = vld [vmem:[%s1312_s5] sm:$0xff] }
  0x39   :  { %618 = vmatprep.subr.bf16.mxu0 %v969_v61  ;;  %v717_v61 = vld [vmem:[%s1312_s5 + $0x8] sm:$0xff] }
  0x3b   :  { %335 = vmatpush1.bf16.msra.mxu1 %v971_v63 }
  0x3c   :  { %619 = vmatpush1.bf16.msra.mxu0 %v972_v0  ;;  %336 = vmatprep.subr.bf16.mxu1 %v973_v2  ;;  %v739_v0 = vld [vmem:[%s1311_s6 + $0x8] sm:$0xff] }
  0x3d   :  { %620 = vmatprep.subr.bf16.mxu0 %v975_v3 }
  0x3f   :  { %337 = vmatpush1.bf16.msra.mxu1 %v977_v4 }
  0x40   :  { %621 = vmatpush1.bf16.msra.mxu0 %v978_v5  ;;  %349 = vmatprep.subr.bf16.mxu1 %v989_v6 }
  0x41   :  { %633 = vmatprep.subr.bf16.mxu0 %v992_v7 }
  0x42   :  { %339 = vmatmul.mubr.bf16.vlgmr.msra.gmra.mrb[0].mxu1 %v979_v8 }
  0x43   :  { %623 = vmatmul.mubr.bf16.vlgmr.msra.gmra.mrb[0].mxu0 %v983_v9  ;;  %350 = vmatpush1.bf16.msra.mxu1 %v987_v10 }
  0x44   :  { %634 = vmatpush1.bf16.msra.mxu0 %v990_v11  ;;  %351 = vmatprep.subr.bf16.mxu1 %v995_v12 }
  0x45   :  { %635 = vmatprep.subr.bf16.mxu0 %v998_v13  ;;  %381 = vmatprep.mubr.bf16.mxu1 %v1003_v1 }
  0x46   :  { %665 = vmatprep.mubr.bf16.mxu0 %v1003_v1 }
  0x47   :  { %352 = vmatpush1.bf16.msra.mxu1 %v993_v14 }
  0x48   :  { %636 = vmatpush1.bf16.msra.mxu0 %v996_v15 }
  0x4e   :  { %823 = vmatmul.mubr.msk.bf16.vlgmr.msra.gmra.mrb[0].mxu1 %vm302_vm0, %v982_v16 }
  0x4f   :  { %863 = vmatmul.mubr.msk.bf16.vlgmr.msra.gmra.mrb[0].mxu0 %vm302_vm0, %v986_v17 }
  0x95   :  { %v681_v18 = vpop.permute.xlu0 %680 }
  0x99   :  { %v686_v19 = vpop.permute.xlu0 %685 }
 0x121   :  { %v383_v20 = vpop.f32.mrb[0].mxu1 }
 0x122   :  { %v667_v21 = vpop.f32.mrb[0].mxu0  ;;  %v385_v23 = vpop.f32.mrb[1].mxu1 }
 0x123   :  { %v868_v22 = vadd.f32 %v667_v21, %v383_v20  ;;  %v669_v1 = vpop.f32.mrb[1].mxu0  ;;  %v387_v25 = vpop.f32.mrb[2].mxu1 }
 0x124   :  { %v869_v24 = vadd.f32 %v669_v1, %v385_v23  ;;  %v671_v26 = vpop.f32.mrb[2].mxu0  ;;  %v389_v28 = vpop.f32.mrb[3].mxu1 }
 0x125   :  { %v870_v27 = vadd.f32 %v671_v26, %v387_v25  ;;  %v673_v29 = vpop.f32.mrb[3].mxu0  ;;  %v688_v30 = vadd.f32 %v868_v22, %v681_v18 }
 0x126   :  { %v871_v31 = vadd.f32 %v673_v29, %v389_v28  ;;  %v689_v32 = vadd.f32 %v869_v24, %v681_v18 }
 0x127   :  { %v690_v33 = vadd.f32 %v870_v27, %v686_v19 }
 0x128   :  { %v691_v34 = vadd.f32 %v871_v31, %v686_v19  ;;  %v692_v35 = vadd.f32 %v689_v32, %v688_v30 }
 0x12a   :  { %693 = vadd.xlane.f32.xlu1 %v692_v35  ;;  %v695_v36 = vadd.f32 %v691_v34, %v690_v33 }
 0x12e   :  { %696 = vadd.xlane.f32.xlu1 %v695_v36 }
 0x1b7   :  { %v694_v37 = vpop.xlane.xlu1 %693 }
 0x1b8   :  { %v698_v38 = vmul.f32 0.00390625, %v694_v37 }
 0x1ba   :  { %v700_v39 = vsub.f32 %v688_v30, %v698_v38  ;;  %v701_v40 = vsub.f32 %v689_v32, %v698_v38 }
 0x1bb   :  { %v697_v41 = vpop.xlane.xlu1 %696 }
 0x1bc   :  { %v699_v42 = vmul.f32 0.00390625, %v697_v41  ;;  %v704_v43 = vmul.f32 %v700_v39, %v700_v39  ;;  %v705_v44 = vmul.f32 %v701_v40, %v701_v40 }
 0x1be   :  { %v702_v45 = vsub.f32 %v690_v33, %v699_v42  ;;  %v703_v46 = vsub.f32 %v691_v34, %v699_v42  ;;  %v708_v47 = vadd.f32 %v705_v44, %v704_v43 }
 0x1c0   :  { %709 = vadd.xlane.f32.xlu0 %v708_v47  ;;  %v706_v48 = vmul.f32 %v702_v45, %v702_v45  ;;  %v707_v49 = vmul.f32 %v703_v46, %v703_v46 }
 0x1c2   :  { %v711_v50 = vadd.f32 %v707_v49, %v706_v48 }
 0x1c4   :  { %712 = vadd.xlane.f32.xlu1 %v711_v50 }
 0x1d5   :  { %742 = vperm.xlu1 %882, %v738_v51  }
 0x24d   :  { %v710_v52 = vpop.xlane.xlu0 %709 }
 0x24e   :  { %v714_v53 = vmul.f32 0.00390625, %v710_v52 }
 0x250   :  { %v718_v54 = vadd.f32 1e-05, %v714_v53 }
 0x251   :  { %v713_v55 = vpop.xlane.xlu1 %712 }
 0x252   :  { %999 = vrsqrt.f32 %v718_v54  ;;  %v715_v56 = vmul.f32 0.00390625, %v713_v55 }
 0x254   :  { %v719_v57 = vadd.f32 1e-05, %v715_v56 }
 0x255   :  { %v743_v2 = vpop.permute.xlu1 %742 }
 0x256   :  { %1001 = vrsqrt.f32 %v719_v57 }
 0x25c   :  { %v1000_v59 = vpop.eup %999 }
 0x25d   :  { %v722_v60 = vmul.f32 %v1000_v59, %v716_v58 }
 0x25f   :  { %726 = vperm.xlu1 %882, %v722_v60  }
 0x260   :  { %v1002_v62 = vpop.eup %1001 }
 0x261   :  { %v723_v63 = vmul.f32 %v1002_v62, %v717_v61 }
 0x263   :  { %731 = vperm.xlu1 %882, %v723_v63  }
 0x267   :  { %747 = vperm.xlu1 %882, %v739_v0  }
 0x2de   :  { %v727_v3 = vpop.permute.xlu1 %726 }
 0x2df   :  { %v734_v4 = vmul.f32 %v727_v3, %v700_v39  ;;  %v735_v5 = vmul.f32 %v727_v3, %v701_v40 }
 0x2e1   :  { %v750_v6 = vadd.f32 %v743_v2, %v734_v4  ;;  %v751_v7 = vadd.f32 %v743_v2, %v735_v5 }
 0x2e2   :  { %v732_v8 = vpop.permute.xlu1 %731 }
 0x2e3   :  { %vm754_vm1 = vcmp.ge.f32.partialorder %v750_v6, 0.0  ;;  %vm755_vm2 = vcmp.ge.f32.partialorder %v751_v7, 0.0  ;;  %v758_v9 = vmul.f32 0.01, %v750_v6  ;;  %v759_v10 = vmul.f32 0.01, %v751_v7 }
 0x2e4   :  { %v736_v13 = vmul.f32 %v732_v8, %v702_v45  ;;  %v737_v14 = vmul.f32 %v732_v8, %v703_v46 }
 0x2e5   :  { %v762_v11 = vsel %vm754_vm1, %v750_v6, %v758_v9  ;;  %v763_v12 = vsel %vm755_vm2, %v751_v7, %v759_v10 }
 0x2e6   :  { %v866_v15 = vpack.c.bf16 %v763_v12, %v762_v11  ;;  %v748_v16 = vpop.permute.xlu1 %747 }
 0x2e7   :  { %v752_v17 = vadd.f32 %v748_v16, %v736_v13  ;;  %v753_v18 = vadd.f32 %v748_v16, %v737_v14 }
 0x2e8   :  { %778 = vst [vmem:[%s1313_s7] sm:$0xff] %v866_v15 }
 0x2e9   :  { %vm756_vm3 = vcmp.ge.f32.partialorder %v752_v17, 0.0  ;;  %vm757_vm4 = vcmp.ge.f32.partialorder %v753_v18, 0.0  ;;  %v760_v19 = vmul.f32 0.01, %v752_v17  ;;  %v761_v20 = vmul.f32 0.01, %v753_v18 }
 0x2eb   :  { %v764_v21 = vsel %vm756_vm3, %v752_v17, %v760_v19  ;;  %v765_v22 = vsel %vm757_vm4, %v753_v18, %v761_v20 }
 0x2ec   :  { %v867_v23 = vpack.c.bf16 %v765_v22, %v764_v21 }
 0x2ee   :  { %779 = vst [vmem:[%s1313_s7 + $0x8] sm:$0xff] %v867_v23 }

// kernel: _lambda_.22
= control target key start
LH: loop header
LB: loop body
LE: loop exit
PB: predicated region body
PF: predicated region fallthrough
CT: control target
= control target key end

     0   :  { %vm539_vm0 = vcmask 130048   ;;  %v1558_v58 = vmov 0   ;;  %s2110_s1 = inlined_call_operand.vmem [shape: bf16[144,1024], index: 1, kind: input, shape index: {}]   ;;  %s2111_s3 = inlined_call_operand.vmem [shape: bf16[8,144], index: 3, kind: input, shape index: {}]   ;;  %s2112_s4 = inlined_call_operand.vmem [shape: f32[8,1], index: 4, kind: input, shape index: {}, may-alias: {4,6}]   ;;  %s2113_s0 = inlined_call_operand.vmem [shape: bf16[144,1024], index: 0, kind: input, shape index: {}]   ;;  %s2114_s2 = inlined_call_operand.vmem [shape: bf16[8,144], index: 2, kind: input, shape index: {}]   ;;  %s2115_s5 = inlined_call_operand.vmem [shape: f32[8,1], index: 5, kind: input, shape index: {}]   ;;  %s2116_s6 = inlined_call_operand.vmem [shape: f32[8,1], index: 6, kind: input, shape index: {}, may-alias: {4,6}]   ;;  %s2117_s7 = inlined_call_operand.vmem [shape: bf16[8,1024], index: 7, kind: output, shape index: {}]  }
   0x1   :  { %v101_v0 = vld [vmem:[%s2110_s1] sm:$0xff]  ;;  %v102_v2 = vld [vmem:[%s2110_s1 + $0x8] sm:$0xff]  ;;  %1550 = vset.pattern.permute.xlu0 %v1558_v58  ;;  %1551 = vset.pattern.permute.xlu1 %v1558_v58 }
   0x2   :  { %v105_v1 = vld [vmem:[%s2110_s1 + $0x20] sm:$0xff]  ;;  %v106_v4 = vld [vmem:[%s2110_s1 + $0x28] sm:$0xff] }
   0x3   :  { %v1388_v3 = vcombine.high %v101_v0, %v105_v1  ;;  %v1387_v5 = vcombine.low %v101_v0, %v105_v1  ;;  %v109_v6 = vld [vmem:[%s2110_s1 + $0x40] sm:$0xff]  ;;  %v1390_v8 = vcombine.high %v102_v2, %v106_v4  ;;  %v1389_v9 = vcombine.low %v102_v2, %v106_v4  ;;  %v110_v11 = vld [vmem:[%s2110_s1 + $0x48] sm:$0xff] }
   0x4   :  { %v113_v7 = vld [vmem:[%s2110_s1 + $0x60] sm:$0xff]  ;;  %v114_v12 = vld [vmem:[%s2110_s1 + $0x68] sm:$0xff] }
   0x5   :  { %v1396_v10 = vcombine.high %v109_v6, %v113_v7  ;;  %v117_v13 = vld [vmem:[%s2110_s1 + $0x80] sm:$0xff]  ;;  %543 = vmatprep.subr.bf16.mxu0 %v1388_v3  ;;  %v1398_v14 = vcombine.high %v110_v11, %v114_v12  ;;  %v118_v16 = vld [vmem:[%s2110_s1 + $0x88] sm:$0xff]  ;;  %584 = vmatprep.subr.bf16.mxu1 %v1390_v8  ;;  %v1395_v18 = vcombine.low %v109_v6, %v113_v7 }
   0x6   :  { %v121_v15 = vld [vmem:[%s2110_s1 + $0xa0] sm:$0xff]  ;;  %v122_v17 = vld [vmem:[%s2110_s1 + $0xa8] sm:$0xff]  ;;  %544 = vmatpush1.bf16.msra.mxu0 %v1387_v5  ;;  %585 = vmatpush1.bf16.msra.mxu1 %v1389_v9  ;;  %v1397_v19 = vcombine.low %v110_v11, %v114_v12  ;;  %v103_v9 = vld [vmem:[%s2110_s1 + $0x10] sm:$0xff] }
   0x7   :  { %545 = vmatprep.subr.bf16.mxu0 %v1396_v10  ;;  %v1404_v20 = vcombine.high %v117_v13, %v121_v15  ;;  %586 = vmatprep.subr.bf16.mxu1 %v1398_v14  ;;  %v1406_v21 = vcombine.high %v118_v16, %v122_v17  ;;  %v125_v22 = vld [vmem:[%s2110_s1 + $0xc0] sm:$0xff]  ;;  %v126_v24 = vld [vmem:[%s2110_s1 + $0xc8] sm:$0xff]  ;;  %v1403_v26 = vcombine.low %v117_v13, %v121_v15  ;;  %v107_v10 = vld [vmem:[%s2110_s1 + $0x30] sm:$0xff] }
   0x8   :  { %v129_v23 = vld [vmem:[%s2110_s1 + $0xe0] sm:$0xff]  ;;  %v130_v25 = vld [vmem:[%s2110_s1 + $0xe8] sm:$0xff]  ;;  %v1405_v27 = vcombine.low %v118_v16, %v122_v17  ;;  %v104_v11 = vld [vmem:[%s2110_s1 + $0x18] sm:$0xff]  ;;  %v1392_v15 = vcombine.high %v103_v9, %v107_v10 }
   0x9   :  { %v1412_v28 = vcombine.high %v125_v22, %v129_v23  ;;  %v1414_v29 = vcombine.high %v126_v24, %v130_v25  ;;  %v133_v30 = vld [vmem:[%s2110_s1 + $0x100] sm:$0xff]  ;;  %v134_v32 = vld [vmem:[%s2110_s1 + $0x108] sm:$0xff]  ;;  %v1411_v34 = vcombine.low %v125_v22, %v129_v23  ;;  %v1413_v36 = vcombine.low %v126_v24, %v130_v25  ;;  %v108_v12 = vld [vmem:[%s2110_s1 + $0x38] sm:$0xff] }
   0xa   :  { %546 = vmatpush1.bf16.msra.mxu0 %v1395_v18  ;;  %587 = vmatpush1.bf16.msra.mxu1 %v1397_v19  ;;  %v137_v31 = vld [vmem:[%s2110_s1 + $0x120] sm:$0xff]  ;;  %v138_v33 = vld [vmem:[%s2110_s1 + $0x128] sm:$0xff]  ;;  %v1394_v16 = vcombine.high %v104_v11, %v108_v12  ;;  %v111_v17 = vld [vmem:[%s2110_s1 + $0x50] sm:$0xff]  ;;  %v1391_v22 = vcombine.low %v103_v9, %v107_v10  ;;  %v1393_v23 = vcombine.low %v104_v11, %v108_v12 }
   0xb   :  { %547 = vmatprep.subr.bf16.mxu0 %v1404_v20  ;;  %588 = vmatprep.subr.bf16.mxu1 %v1406_v21  ;;  %v1662_v35 = vld [vmem:[%s2111_s3] sm:$0xff]  ;;  %v1420_v37 = vcombine.high %v133_v30, %v137_v31  ;;  %v1422_v39 = vcombine.high %v134_v32, %v138_v33  ;;  %v142_v42 = vld [vmem:[%s2110_s1 + $0x148] sm:$0xff]  ;;  %v1419_v44 = vcombine.low %v133_v30, %v137_v31  ;;  %v115_v18 = vld [vmem:[%s2110_s1 + $0x70] sm:$0xff] }
   0xc   :  { %v1666_v38 = vcombine.high %v1662_v35, %v1662_v35  ;;  %v141_v40 = vld [vmem:[%s2110_s1 + $0x140] sm:$0xff]  ;;  %v146_v43 = vld [vmem:[%s2110_s1 + $0x168] sm:$0xff]  ;;  %v1421_v45 = vcombine.low %v134_v32, %v138_v33  ;;  %v1740_v19 = vcombine.low %v1662_v35, %v1662_v35  ;;  %v112_v20 = vld [vmem:[%s2110_s1 + $0x58] sm:$0xff]  ;;  %v1400_v24 = vcombine.high %v111_v17, %v115_v18 }
   0xd   :  { %v145_v41 = vld [vmem:[%s2110_s1 + $0x160] sm:$0xff]  ;;  %v1430_v47 = vcombine.high %v142_v42, %v146_v43  ;;  %v150_v50 = vld [vmem:[%s2110_s1 + $0x188] sm:$0xff]  ;;  %v1429_v53 = vcombine.low %v142_v42, %v146_v43  ;;  %v116_v21 = vld [vmem:[%s2110_s1 + $0x78] sm:$0xff]  ;;  %v1399_v30 = vcombine.low %v111_v17, %v115_v18 }
   0xe   :  { %548 = vmatpush1.bf16.msra.mxu0 %v1403_v26  ;;  %589 = vmatpush1.bf16.msra.mxu1 %v1405_v27  ;;  %v1428_v46 = vcombine.high %v141_v40, %v145_v41  ;;  %v149_v48 = vld [vmem:[%s2110_s1 + $0x180] sm:$0xff]  ;;  %v154_v51 = vld [vmem:[%s2110_s1 + $0x1a8] sm:$0xff]  ;;  %v1427_v52 = vcombine.low %v141_v40, %v145_v41  ;;  %v1402_v25 = vcombine.high %v112_v20, %v116_v21  ;;  %v119_v26 = vld [vmem:[%s2110_s1 + $0x90] sm:$0xff] }
   0xf   :  { %549 = vmatprep.subr.bf16.mxu0 %v1412_v28  ;;  %590 = vmatprep.subr.bf16.mxu1 %v1414_v29  ;;  %v153_v49 = vld [vmem:[%s2110_s1 + $0x1a0] sm:$0xff]  ;;  %v1438_v55 = vcombine.high %v150_v50, %v154_v51  ;;  %v158_v59 = vld [vmem:[%s2110_s1 + $0x1c8] sm:$0xff]  ;;  %v1437_v62 = vcombine.low %v150_v50, %v154_v51  ;;  %v123_v27 = vld [vmem:[%s2110_s1 + $0xb0] sm:$0xff]  ;;  %v1401_v31 = vcombine.low %v112_v20, %v116_v21 }
  0x10   :  { %1459 = vmatprep.mubr.msk.bf16.mxu0 %vm539_vm0, %v1666_v38  ;;  %1460 = vmatprep.mubr.msk.bf16.mxu1 %vm539_vm0, %v1666_v38  ;;  %v1436_v54 = vcombine.high %v149_v48, %v153_v49  ;;  %v157_v56 = vld [vmem:[%s2110_s1 + $0x1c0] sm:$0xff]  ;;  %v162_v60 = vld [vmem:[%s2110_s1 + $0x1e8] sm:$0xff]  ;;  %v1435_v61 = vcombine.low %v149_v48, %v153_v49  ;;  %v120_v28 = vld [vmem:[%s2110_s1 + $0x98] sm:$0xff]  ;;  %v1408_v32 = vcombine.high %v119_v26, %v123_v27 }
  0x11   :  { %v161_v57 = vld [vmem:[%s2110_s1 + $0x1e0] sm:$0xff]  ;;  %v1446_v0 = vcombine.high %v158_v59, %v162_v60  ;;  %v166_v3 = vld [vmem:[%s2110_s1 + $0x208] sm:$0xff]  ;;  %v1445_v6 = vcombine.low %v158_v59, %v162_v60  ;;  %v124_v29 = vld [vmem:[%s2110_s1 + $0xb8] sm:$0xff] }
  0x12   :  { %550 = vmatpush1.bf16.msra.mxu0 %v1411_v34  ;;  %591 = vmatpush1.bf16.msra.mxu1 %v1413_v36  ;;  %v1444_v63 = vcombine.high %v157_v56, %v161_v57  ;;  %v165_v1 = vld [vmem:[%s2110_s1 + $0x200] sm:$0xff]  ;;  %v170_v4 = vld [vmem:[%s2110_s1 + $0x228] sm:$0xff]  ;;  %v1443_v5 = vcombine.low %v157_v56, %v161_v57  ;;  %v1410_v33 = vcombine.high %v120_v28, %v124_v29  ;;  %v127_v34 = vld [vmem:[%s2110_s1 + $0xd0] sm:$0xff] }
  0x13   :  { %551 = vmatprep.subr.bf16.mxu0 %v1420_v37  ;;  %592 = vmatprep.subr.bf16.mxu1 %v1422_v39  ;;  %v169_v2 = vld [vmem:[%s2110_s1 + $0x220] sm:$0xff]  ;;  %v1454_v8 = vcombine.high %v166_v3, %v170_v4  ;;  %v1453_v14 = vcombine.low %v166_v3, %v170_v4  ;;  %v131_v35 = vld [vmem:[%s2110_s1 + $0xf0] sm:$0xff]  ;;  %v128_v36 = vld [vmem:[%s2110_s1 + $0xd8] sm:$0xff]  ;;  %v1407_v39 = vcombine.low %v119_v26, %v123_v27 }
  0x14   :  { %v1452_v7 = vcombine.high %v165_v1, %v169_v2  ;;  %v1451_v13 = vcombine.low %v165_v1, %v169_v2  ;;  %v132_v37 = vld [vmem:[%s2110_s1 + $0xf8] sm:$0xff]  ;;  %v1409_v40 = vcombine.low %v120_v28, %v124_v29  ;;  %v1416_v41 = vcombine.high %v127_v34, %v131_v35  ;;  %v135_v43 = vld [vmem:[%s2110_s1 + $0x110] sm:$0xff]  ;;  %v28_v20 = vld [vmem:[%s2113_s0] sm:$0xff] }
  0x15   :  { %v1418_v42 = vcombine.high %v128_v36, %v132_v37  ;;  %v1417_v48 = vcombine.low %v128_v36, %v132_v37  ;;  %v143_v51 = vld [vmem:[%s2110_s1 + $0x150] sm:$0xff]  ;;  %v32_v21 = vld [vmem:[%s2113_s0 + $0x20] sm:$0xff] }
  0x16   :  { %552 = vmatpush1.bf16.msra.mxu0 %v1419_v44  ;;  %593 = vmatpush1.bf16.msra.mxu1 %v1421_v45  ;;  %v139_v44 = vld [vmem:[%s2110_s1 + $0x130] sm:$0xff]  ;;  %v140_v45 = vld [vmem:[%s2110_s1 + $0x138] sm:$0xff]  ;;  %v1466_v26 = vcombine.high %v28_v20, %v32_v21  ;;  %v36_v28 = vld [vmem:[%s2113_s0 + $0x40] sm:$0xff] }
  0x17   :  { %553 = vmatprep.subr.bf16.mxu0 %v1428_v46  ;;  %594 = vmatprep.subr.bf16.mxu1 %v1430_v47  ;;  %v1415_v46 = vcombine.low %v127_v34, %v131_v35  ;;  %v1240_v47 = vld [vmem:[%s2112_s4] sm:$0xff]  ;;  %v1424_v49 = vcombine.high %v135_v43, %v139_v44  ;;  %v151_v59 = vld [vmem:[%s2110_s1 + $0x190] sm:$0xff] }
  0x18   :  { %1243 = vperm.xlu0 %1550, %v1240_v47   ;;  %v155_v60 = vld [vmem:[%s2110_s1 + $0x1b0] sm:$0xff]  ;;  %v40_v29 = vld [vmem:[%s2113_s0 + $0x60] sm:$0xff] }
  0x19   :  { %v1440_v1 = vcombine.high %v151_v59, %v155_v60  ;;  %v159_v3 = vld [vmem:[%s2110_s1 + $0x1d0] sm:$0xff]  ;;  %v1474_v35 = vcombine.high %v36_v28, %v40_v29  ;;  %v44_v37 = vld [vmem:[%s2113_s0 + $0x80] sm:$0xff] }
  0x1a   :  { %554 = vmatpush1.bf16.msra.mxu0 %v1427_v52  ;;  %595 = vmatpush1.bf16.msra.mxu1 %v1429_v53  ;;  %v147_v52 = vld [vmem:[%s2110_s1 + $0x170] sm:$0xff]  ;;  %v144_v53 = vld [vmem:[%s2110_s1 + $0x158] sm:$0xff]  ;;  %v56_v47 = vld [vmem:[%s2113_s0 + $0xe0] sm:$0xff] }
  0x1b   :  { %555 = vmatprep.subr.bf16.mxu0 %v1436_v54  ;;  %596 = vmatprep.subr.bf16.mxu1 %v1438_v55  ;;  %v148_v54 = vld [vmem:[%s2110_s1 + $0x178] sm:$0xff]  ;;  %v1423_v55 = vcombine.low %v135_v43, %v139_v44  ;;  %v1432_v57 = vcombine.high %v143_v51, %v147_v52  ;;  %v163_v4 = vld [vmem:[%s2110_s1 + $0x1f0] sm:$0xff]  ;;  %v1473_v43 = vcombine.low %v36_v28, %v40_v29 }
  0x1c   :  { %v1434_v58 = vcombine.high %v144_v53, %v148_v54  ;;  %v1448_v9 = vcombine.high %v159_v3, %v163_v4  ;;  %v167_v11 = vld [vmem:[%s2110_s1 + $0x210] sm:$0xff] }
  0x1d   :  { %v171_v12 = vld [vmem:[%s2110_s1 + $0x230] sm:$0xff] }
  0x1e   :  { %556 = vmatpush1.bf16.msra.mxu0 %v1435_v61  ;;  %597 = vmatpush1.bf16.msra.mxu1 %v1437_v62  ;;  %v152_v61 = vld [vmem:[%s2110_s1 + $0x198] sm:$0xff]  ;;  %v1456_v17 = vcombine.high %v167_v11, %v171_v12 }
  0x1f   :  { %557 = vmatprep.subr.bf16.mxu0 %v1444_v63  ;;  %598 = vmatprep.subr.bf16.mxu1 %v1446_v0  ;;  %v156_v62 = vld [vmem:[%s2110_s1 + $0x1b8] sm:$0xff]  ;;  %v1431_v63 = vcombine.low %v143_v51, %v147_v52  ;;  %v1433_v0 = vcombine.low %v144_v53, %v148_v54  ;;  %v60_v53 = vld [vmem:[%s2113_s0 + $0x100] sm:$0xff] }
  0x20   :  { %v1442_v2 = vcombine.high %v152_v61, %v156_v62  ;;  %v64_v54 = vld [vmem:[%s2113_s0 + $0x120] sm:$0xff] }
  0x22   :  { %558 = vmatpush1.bf16.msra.mxu0 %v1443_v5  ;;  %599 = vmatpush1.bf16.msra.mxu1 %v1445_v6  ;;  %v160_v5 = vld [vmem:[%s2110_s1 + $0x1d8] sm:$0xff] }
  0x23   :  { %559 = vmatprep.subr.bf16.mxu0 %v1452_v7  ;;  %600 = vmatprep.subr.bf16.mxu1 %v1454_v8  ;;  %v164_v6 = vld [vmem:[%s2110_s1 + $0x1f8] sm:$0xff]  ;;  %v1439_v7 = vcombine.low %v151_v59, %v155_v60  ;;  %v1441_v8 = vcombine.low %v152_v61, %v156_v62  ;;  %v1498_v59 = vcombine.high %v60_v53, %v64_v54  ;;  %v68_v61 = vld [vmem:[%s2113_s0 + $0x140] sm:$0xff] }
  0x24   :  { %v1450_v10 = vcombine.high %v160_v5, %v164_v6  ;;  %v72_v62 = vld [vmem:[%s2113_s0 + $0x160] sm:$0xff] }
  0x26   :  { %560 = vmatpush1.bf16.msra.mxu0 %v1451_v13  ;;  %601 = vmatpush1.bf16.msra.mxu1 %v1453_v14  ;;  %v168_v13 = vld [vmem:[%s2110_s1 + $0x218] sm:$0xff] }
  0x27   :  { %625 = vmatprep.subr.bf16.mxu0 %v1392_v15  ;;  %666 = vmatprep.subr.bf16.mxu1 %v1394_v16  ;;  %v172_v14 = vld [vmem:[%s2110_s1 + $0x238] sm:$0xff]  ;;  %v1447_v15 = vcombine.low %v159_v3, %v163_v4  ;;  %v1449_v16 = vcombine.low %v160_v5, %v164_v6  ;;  %v1506_v3 = vcombine.high %v68_v61, %v72_v62  ;;  %v76_v5 = vld [vmem:[%s2113_s0 + $0x180] sm:$0xff] }
  0x28   :  { %v1458_v18 = vcombine.high %v168_v13, %v172_v14  ;;  %v80_v6 = vld [vmem:[%s2113_s0 + $0x1a0] sm:$0xff] }
  0x29   :  { %576 = vmatmul.mubr.bf16.vlgmr.msra.gmra.mrb[0].mxu0 %v1740_v19  ;;  %617 = vmatmul.mubr.bf16.vlgmr.msra.gmra.mrb[0].mxu1 %v1740_v19 }
  0x2a   :  { %626 = vmatpush1.bf16.msra.mxu0 %v1391_v22  ;;  %667 = vmatpush1.bf16.msra.mxu1 %v1393_v23  ;;  %v29_v22 = vld [vmem:[%s2113_s0 + $0x8] sm:$0xff] }
  0x2b   :  { %627 = vmatprep.subr.bf16.mxu0 %v1400_v24  ;;  %668 = vmatprep.subr.bf16.mxu1 %v1402_v25  ;;  %v33_v23 = vld [vmem:[%s2113_s0 + $0x28] sm:$0xff]  ;;  %v1455_v24 = vcombine.low %v167_v11, %v171_v12  ;;  %v1457_v25 = vcombine.low %v168_v13, %v172_v14  ;;  %v1514_v11 = vcombine.high %v76_v5, %v80_v6  ;;  %v84_v13 = vld [vmem:[%s2113_s0 + $0x1c0] sm:$0xff] }
  0x2c   :  { %1461 = vmatprep.mubr.msk.bf16.mxu0 %vm539_vm0, %v1666_v38  ;;  %1462 = vmatprep.mubr.msk.bf16.mxu1 %vm539_vm0, %v1666_v38  ;;  %v136_v38 = vld [vmem:[%s2110_s1 + $0x118] sm:$0xff]  ;;  %v1468_v27 = vcombine.high %v29_v22, %v33_v23  ;;  %v1467_v34 = vcombine.low %v29_v22, %v33_v23  ;;  %v88_v14 = vld [vmem:[%s2113_s0 + $0x1e0] sm:$0xff] }
  0x2d   :  { %v1426_v50 = vcombine.high %v136_v38, %v140_v45  ;;  %v1425_v56 = vcombine.low %v136_v38, %v140_v45  ;;  %v92_v22 = vld [vmem:[%s2113_s0 + $0x200] sm:$0xff] }
  0x2e   :  { %628 = vmatpush1.bf16.msra.mxu0 %v1399_v30  ;;  %669 = vmatpush1.bf16.msra.mxu1 %v1401_v31  ;;  %v37_v30 = vld [vmem:[%s2113_s0 + $0x48] sm:$0xff]  ;;  %v96_v23 = vld [vmem:[%s2113_s0 + $0x220] sm:$0xff] }
  0x2f   :  { %629 = vmatprep.subr.bf16.mxu0 %v1408_v32  ;;  %670 = vmatprep.subr.bf16.mxu1 %v1410_v33  ;;  %v41_v31 = vld [vmem:[%s2113_s0 + $0x68] sm:$0xff]  ;;  %v1868_v32 = vld [vmem:[%s2114_s2] sm:$0xff]  ;;  %v1465_v33 = vcombine.low %v28_v20, %v32_v21  ;;  %v1522_v20 = vcombine.high %v84_v13, %v88_v14  ;;  %v1530_v28 = vcombine.high %v92_v22, %v96_v23 }
  0x30   :  { %v1476_v36 = vcombine.high %v37_v30, %v41_v31  ;;  %v1475_v44 = vcombine.low %v37_v30, %v41_v31  ;;  %v30_v30 = vld [vmem:[%s2113_s0 + $0x10] sm:$0xff] }
  0x31   :  { %v34_v31 = vld [vmem:[%s2113_s0 + $0x30] sm:$0xff] }
  0x32   :  { %630 = vmatpush1.bf16.msra.mxu0 %v1407_v39  ;;  %671 = vmatpush1.bf16.msra.mxu1 %v1409_v40  ;;  %v48_v39 = vld [vmem:[%s2113_s0 + $0xa0] sm:$0xff]  ;;  %v1878_v40 = vcombine.high %v1868_v32, %v1868_v32 }
  0x33   :  { %631 = vmatprep.subr.bf16.mxu0 %v1416_v41  ;;  %672 = vmatprep.subr.bf16.mxu1 %v1418_v42  ;;  %v45_v41 = vld [vmem:[%s2113_s0 + $0x88] sm:$0xff]  ;;  %v1482_v38 = vcombine.high %v44_v37, %v48_v39 }
  0x34   :  { %v49_v42 = vld [vmem:[%s2113_s0 + $0xa8] sm:$0xff] }
  0x35   :  { %v1484_v45 = vcombine.high %v45_v41, %v49_v42 }
  0x36   :  { %632 = vmatpush1.bf16.msra.mxu0 %v1415_v46  ;;  %673 = vmatpush1.bf16.msra.mxu1 %v1417_v48  ;;  %v52_v46 = vld [vmem:[%s2113_s0 + $0xc0] sm:$0xff]  ;;  %v57_v48 = vld [vmem:[%s2113_s0 + $0xe8] sm:$0xff] }
  0x37   :  { %633 = vmatprep.subr.bf16.mxu0 %v1424_v49  ;;  %674 = vmatprep.subr.bf16.mxu1 %v1426_v50  ;;  %v1481_v49 = vcombine.low %v44_v37, %v48_v39  ;;  %v1483_v50 = vcombine.low %v45_v41, %v49_v42  ;;  %v1490_v51 = vcombine.high %v52_v46, %v56_v47  ;;  %v38_v41 = vld [vmem:[%s2113_s0 + $0x50] sm:$0xff] }
  0x38   :  { %v1470_v37 = vcombine.high %v30_v30, %v34_v31  ;;  %v42_v42 = vld [vmem:[%s2113_s0 + $0x70] sm:$0xff] }
  0x3a   :  { %634 = vmatpush1.bf16.msra.mxu0 %v1423_v55  ;;  %675 = vmatpush1.bf16.msra.mxu1 %v1425_v56  ;;  %v61_v55 = vld [vmem:[%s2113_s0 + $0x108] sm:$0xff] }
  0x3b   :  { %635 = vmatprep.subr.bf16.mxu0 %v1432_v57  ;;  %676 = vmatprep.subr.bf16.mxu1 %v1434_v58  ;;  %v65_v56 = vld [vmem:[%s2113_s0 + $0x128] sm:$0xff]  ;;  %v1489_v57 = vcombine.low %v52_v46, %v56_v47  ;;  %v1478_v47 = vcombine.high %v38_v41, %v42_v42 }
  0x3c   :  { %v1500_v60 = vcombine.high %v61_v55, %v65_v56 }
  0x3e   :  { %636 = vmatpush1.bf16.msra.mxu0 %v1431_v63  ;;  %677 = vmatpush1.bf16.msra.mxu1 %v1433_v0  ;;  %v69_v63 = vld [vmem:[%s2113_s0 + $0x148] sm:$0xff] }
  0x3f   :  { %637 = vmatprep.subr.bf16.mxu0 %v1440_v1  ;;  %678 = vmatprep.subr.bf16.mxu1 %v1442_v2  ;;  %v73_v0 = vld [vmem:[%s2113_s0 + $0x168] sm:$0xff]  ;;  %v1497_v1 = vcombine.low %v60_v53, %v64_v54  ;;  %v1499_v2 = vcombine.low %v61_v55, %v65_v56  ;;  %v54_v55 = vld [vmem:[%s2113_s0 + $0xd0] sm:$0xff] }
  0x40   :  { %v1508_v4 = vcombine.high %v69_v63, %v73_v0  ;;  %v58_v56 = vld [vmem:[%s2113_s0 + $0xf0] sm:$0xff] }
  0x42   :  { %638 = vmatpush1.bf16.msra.mxu0 %v1439_v7  ;;  %679 = vmatpush1.bf16.msra.mxu1 %v1441_v8  ;;  %v77_v7 = vld [vmem:[%s2113_s0 + $0x188] sm:$0xff] }
  0x43   :  { %639 = vmatprep.subr.bf16.mxu0 %v1448_v9  ;;  %680 = vmatprep.subr.bf16.mxu1 %v1450_v10  ;;  %v81_v8 = vld [vmem:[%s2113_s0 + $0x1a8] sm:$0xff]  ;;  %v1505_v9 = vcombine.low %v68_v61, %v72_v62  ;;  %v1507_v10 = vcombine.low %v69_v63, %v73_v0  ;;  %v1494_v61 = vcombine.high %v54_v55, %v58_v56  ;;  %v62_v63 = vld [vmem:[%s2113_s0 + $0x110] sm:$0xff] }
  0x44   :  { %v1516_v12 = vcombine.high %v77_v7, %v81_v8  ;;  %v66_v0 = vld [vmem:[%s2113_s0 + $0x130] sm:$0xff] }
  0x46   :  { %640 = vmatpush1.bf16.msra.mxu0 %v1447_v15  ;;  %681 = vmatpush1.bf16.msra.mxu1 %v1449_v16  ;;  %v85_v15 = vld [vmem:[%s2113_s0 + $0x1c8] sm:$0xff] }
  0x47   :  { %641 = vmatprep.subr.bf16.mxu0 %v1456_v17  ;;  %682 = vmatprep.subr.bf16.mxu1 %v1458_v18  ;;  %v89_v16 = vld [vmem:[%s2113_s0 + $0x1e8] sm:$0xff]  ;;  %v1513_v17 = vcombine.low %v76_v5, %v80_v6  ;;  %v1515_v18 = vcombine.low %v77_v7, %v81_v8  ;;  %v70_v6 = vld [vmem:[%s2113_s0 + $0x150] sm:$0xff]  ;;  %v71_v8 = vld [vmem:[%s2113_s0 + $0x158] sm:$0xff] }
  0x48   :  { %v1524_v21 = vcombine.high %v85_v15, %v89_v16  ;;  %v74_v7 = vld [vmem:[%s2113_s0 + $0x170] sm:$0xff] }
  0x4a   :  { %642 = vmatpush1.bf16.msra.mxu0 %v1455_v24  ;;  %683 = vmatpush1.bf16.msra.mxu1 %v1457_v25  ;;  %v93_v24 = vld [vmem:[%s2113_s0 + $0x208] sm:$0xff] }
  0x4b   :  { %1076 = vmatprep.subr.bf16.mxu0 %v1466_v26  ;;  %1117 = vmatprep.subr.bf16.mxu1 %v1468_v27  ;;  %v97_v25 = vld [vmem:[%s2113_s0 + $0x228] sm:$0xff]  ;;  %v1521_v26 = vcombine.low %v84_v13, %v88_v14  ;;  %v1523_v27 = vcombine.low %v85_v15, %v89_v16  ;;  %v78_v14 = vld [vmem:[%s2113_s0 + $0x190] sm:$0xff]  ;;  %v79_v16 = vld [vmem:[%s2113_s0 + $0x198] sm:$0xff] }
  0x4c   :  { %v1532_v29 = vcombine.high %v93_v24, %v97_v25  ;;  %v82_v15 = vld [vmem:[%s2113_s0 + $0x1b0] sm:$0xff] }
  0x4d   :  { %658 = vmatmul.mubr.bf16.vlgmr.msra.gmra.mrb[4].mxu0 %v1740_v19  ;;  %699 = vmatmul.mubr.bf16.vlgmr.msra.gmra.mrb[4].mxu1 %v1740_v19  ;;  %v53_v19 = vld [vmem:[%s2113_s0 + $0xc8] sm:$0xff] }
  0x4e   :  { %1077 = vmatpush1.bf16.msra.mxu0 %v1465_v33  ;;  %1118 = vmatpush1.bf16.msra.mxu1 %v1467_v34  ;;  %v1492_v52 = vcombine.high %v53_v19, %v57_v48  ;;  %v1491_v58 = vcombine.low %v53_v19, %v57_v48  ;;  %v31_v33 = vld [vmem:[%s2113_s0 + $0x18] sm:$0xff]  ;;  %v50_v48 = vld [vmem:[%s2113_s0 + $0xb0] sm:$0xff] }
  0x4f   :  { %1078 = vmatprep.subr.bf16.mxu0 %v1474_v35  ;;  %1119 = vmatprep.subr.bf16.mxu1 %v1476_v36  ;;  %v35_v34 = vld [vmem:[%s2113_s0 + $0x38] sm:$0xff]  ;;  %v1529_v35 = vcombine.low %v92_v22, %v96_v23  ;;  %v1531_v36 = vcombine.low %v93_v24, %v97_v25  ;;  %v86_v23 = vld [vmem:[%s2113_s0 + $0x1d0] sm:$0xff] }
  0x50   :  { %1537 = vmatprep.mubr.msk.bf16.mxu0 %vm539_vm0, %v1878_v40  ;;  %1538 = vmatprep.mubr.msk.bf16.mxu1 %vm539_vm0, %v1878_v40  ;;  %v1472_v39 = vcombine.high %v31_v33, %v35_v34  ;;  %v1471_v46 = vcombine.low %v31_v33, %v35_v34  ;;  %v90_v24 = vld [vmem:[%s2113_s0 + $0x1f0] sm:$0xff]  ;;  %v87_v25 = vld [vmem:[%s2113_s0 + $0x1d8] sm:$0xff] }
  0x51   :  { %v98_v33 = vld [vmem:[%s2113_s0 + $0x230] sm:$0xff]  ;;  %v95_v34 = vld [vmem:[%s2113_s0 + $0x218] sm:$0xff] }
  0x52   :  { %1079 = vmatpush1.bf16.msra.mxu0 %v1473_v43  ;;  %1120 = vmatpush1.bf16.msra.mxu1 %v1475_v44  ;;  %v1984_v43 = vcombine.low %v1868_v32, %v1868_v32  ;;  %v39_v44 = vld [vmem:[%s2113_s0 + $0x58] sm:$0xff]  ;;  %v46_v32 = vld [vmem:[%s2113_s0 + $0x90] sm:$0xff] }
  0x53   :  { %1080 = vmatprep.subr.bf16.mxu0 %v1482_v38  ;;  %1121 = vmatprep.subr.bf16.mxu1 %v1484_v45  ;;  %v43_v38 = vld [vmem:[%s2113_s0 + $0x78] sm:$0xff]  ;;  %v1469_v45 = vcombine.low %v30_v30, %v34_v31  ;;  %v1486_v53 = vcombine.high %v46_v32, %v50_v48  ;;  %v94_v31 = vld [vmem:[%s2113_s0 + $0x210] sm:$0xff] }
  0x54   :  { %v1480_v19 = vcombine.high %v39_v44, %v43_v38 }
  0x56   :  { %1081 = vmatpush1.bf16.msra.mxu0 %v1481_v49  ;;  %1122 = vmatpush1.bf16.msra.mxu1 %v1483_v50  ;;  %v47_v49 = vld [vmem:[%s2113_s0 + $0x98] sm:$0xff] }
  0x57   :  { %1082 = vmatprep.subr.bf16.mxu0 %v1490_v51  ;;  %1123 = vmatprep.subr.bf16.mxu1 %v1492_v52  ;;  %v51_v50 = vld [vmem:[%s2113_s0 + $0xb8] sm:$0xff]  ;;  %v1477_v51 = vcombine.low %v38_v41, %v42_v42  ;;  %v1479_v52 = vcombine.low %v39_v44, %v43_v38  ;;  %v1533_v42 = vcombine.low %v94_v31, %v98_v33 }
  0x58   :  { %v1488_v54 = vcombine.high %v47_v49, %v51_v50 }
  0x5a   :  { %1083 = vmatpush1.bf16.msra.mxu0 %v1489_v57  ;;  %1124 = vmatpush1.bf16.msra.mxu1 %v1491_v58  ;;  %v55_v57 = vld [vmem:[%s2113_s0 + $0xd8] sm:$0xff] }
  0x5b   :  { %1084 = vmatprep.subr.bf16.mxu0 %v1498_v59  ;;  %1125 = vmatprep.subr.bf16.mxu1 %v1500_v60  ;;  %v59_v58 = vld [vmem:[%s2113_s0 + $0xf8] sm:$0xff]  ;;  %v1485_v59 = vcombine.low %v46_v32, %v50_v48  ;;  %v1487_v60 = vcombine.low %v47_v49, %v51_v50 }
  0x5c   :  { %v1496_v62 = vcombine.high %v55_v57, %v59_v58 }
  0x5e   :  { %1085 = vmatpush1.bf16.msra.mxu0 %v1497_v1  ;;  %1126 = vmatpush1.bf16.msra.mxu1 %v1499_v2  ;;  %v67_v1 = vld [vmem:[%s2113_s0 + $0x138] sm:$0xff]  ;;  %v1493_v2 = vcombine.low %v54_v55, %v58_v56 }
  0x5f   :  { %1086 = vmatprep.subr.bf16.mxu0 %v1506_v3  ;;  %1127 = vmatprep.subr.bf16.mxu1 %v1508_v4  ;;  %v1495_v3 = vcombine.low %v55_v57, %v59_v58  ;;  %v1502_v4 = vcombine.high %v62_v63, %v66_v0 }
  0x62   :  { %1087 = vmatpush1.bf16.msra.mxu0 %v1505_v9  ;;  %1128 = vmatpush1.bf16.msra.mxu1 %v1507_v10  ;;  %v75_v9 = vld [vmem:[%s2113_s0 + $0x178] sm:$0xff]  ;;  %v1501_v10 = vcombine.low %v62_v63, %v66_v0 }
  0x63   :  { %1088 = vmatprep.subr.bf16.mxu0 %v1514_v11  ;;  %1129 = vmatprep.subr.bf16.mxu1 %v1516_v12  ;;  %v1510_v12 = vcombine.high %v70_v6, %v74_v7  ;;  %v1512_v13 = vcombine.high %v71_v8, %v75_v9 }
  0x66   :  { %1089 = vmatpush1.bf16.msra.mxu0 %v1513_v17  ;;  %1130 = vmatpush1.bf16.msra.mxu1 %v1515_v18  ;;  %v83_v17 = vld [vmem:[%s2113_s0 + $0x1b8] sm:$0xff]  ;;  %v1509_v18 = vcombine.low %v70_v6, %v74_v7 }
  0x67   :  { %1090 = vmatprep.subr.bf16.mxu0 %v1522_v20  ;;  %1131 = vmatprep.subr.bf16.mxu1 %v1524_v21  ;;  %v1511_v20 = vcombine.low %v71_v8, %v75_v9  ;;  %v1518_v21 = vcombine.high %v78_v14, %v82_v15  ;;  %v1520_v22 = vcombine.high %v79_v16, %v83_v17 }
  0x6a   :  { %1091 = vmatpush1.bf16.msra.mxu0 %v1521_v26  ;;  %1132 = vmatpush1.bf16.msra.mxu1 %v1523_v27  ;;  %v91_v26 = vld [vmem:[%s2113_s0 + $0x1f8] sm:$0xff]  ;;  %v1517_v27 = vcombine.low %v78_v14, %v82_v15 }
  0x6b   :  { %1092 = vmatprep.subr.bf16.mxu0 %v1530_v28  ;;  %1133 = vmatprep.subr.bf16.mxu1 %v1532_v29  ;;  %v1519_v28 = vcombine.low %v79_v16, %v83_v17  ;;  %v1526_v29 = vcombine.high %v86_v23, %v90_v24  ;;  %v1528_v30 = vcombine.high %v87_v25, %v91_v26 }
  0x6e   :  { %1093 = vmatpush1.bf16.msra.mxu0 %v1529_v35  ;;  %1134 = vmatpush1.bf16.msra.mxu1 %v1531_v36  ;;  %v99_v35 = vld [vmem:[%s2113_s0 + $0x238] sm:$0xff]  ;;  %v1525_v36 = vcombine.low %v86_v23, %v90_v24 }
  0x6f   :  { %1158 = vmatprep.subr.bf16.mxu0 %v1470_v37  ;;  %1199 = vmatprep.subr.bf16.mxu1 %v1472_v39  ;;  %v1527_v37 = vcombine.low %v87_v25, %v91_v26  ;;  %v1534_v39 = vcombine.high %v94_v31, %v98_v33  ;;  %v1536_v41 = vcombine.high %v95_v34, %v99_v35 }
  0x70   :  { %v1535_v44 = vcombine.low %v95_v34, %v99_v35 }
  0x71   :  { %1109 = vmatmul.mubr.bf16.vlgmr.msra.gmra.mrb[8].mxu0 %v1984_v43  ;;  %1150 = vmatmul.mubr.bf16.vlgmr.msra.gmra.mrb[8].mxu1 %v1984_v43 }
  0x72   :  { %1159 = vmatpush1.bf16.msra.mxu0 %v1469_v45  ;;  %1200 = vmatpush1.bf16.msra.mxu1 %v1471_v46 }
  0x73   :  { %1160 = vmatprep.subr.bf16.mxu0 %v1478_v47  ;;  %1201 = vmatprep.subr.bf16.mxu1 %v1480_v19 }
  0x74   :  { %1539 = vmatprep.mubr.msk.bf16.mxu0 %vm539_vm0, %v1878_v40  ;;  %1540 = vmatprep.mubr.msk.bf16.mxu1 %vm539_vm0, %v1878_v40  ;;  %v63_v40 = vld [vmem:[%s2113_s0 + $0x118] sm:$0xff] }
  0x75   :  { %v1504_v5 = vcombine.high %v63_v40, %v67_v1  ;;  %v1503_v11 = vcombine.low %v63_v40, %v67_v1 }
  0x76   :  { %1161 = vmatpush1.bf16.msra.mxu0 %v1477_v51  ;;  %1202 = vmatpush1.bf16.msra.mxu1 %v1479_v52 }
  0x77   :  { %1162 = vmatprep.subr.bf16.mxu0 %v1486_v53  ;;  %1203 = vmatprep.subr.bf16.mxu1 %v1488_v54 }
  0x7a   :  { %1163 = vmatpush1.bf16.msra.mxu0 %v1485_v59  ;;  %1204 = vmatpush1.bf16.msra.mxu1 %v1487_v60 }
  0x7b   :  { %1164 = vmatprep.subr.bf16.mxu0 %v1494_v61  ;;  %1205 = vmatprep.subr.bf16.mxu1 %v1496_v62 }
  0x7e   :  { %1165 = vmatpush1.bf16.msra.mxu0 %v1493_v2  ;;  %1206 = vmatpush1.bf16.msra.mxu1 %v1495_v3 }
  0x7f   :  { %1166 = vmatprep.subr.bf16.mxu0 %v1502_v4  ;;  %1207 = vmatprep.subr.bf16.mxu1 %v1504_v5 }
  0x82   :  { %1167 = vmatpush1.bf16.msra.mxu0 %v1501_v10  ;;  %1208 = vmatpush1.bf16.msra.mxu1 %v1503_v11 }
  0x83   :  { %1168 = vmatprep.subr.bf16.mxu0 %v1510_v12  ;;  %1209 = vmatprep.subr.bf16.mxu1 %v1512_v13 }
  0x86   :  { %1169 = vmatpush1.bf16.msra.mxu0 %v1509_v18  ;;  %1210 = vmatpush1.bf16.msra.mxu1 %v1511_v20 }
  0x87   :  { %1170 = vmatprep.subr.bf16.mxu0 %v1518_v21  ;;  %1211 = vmatprep.subr.bf16.mxu1 %v1520_v22 }
  0x8a   :  { %1171 = vmatpush1.bf16.msra.mxu0 %v1517_v27  ;;  %1212 = vmatpush1.bf16.msra.mxu1 %v1519_v28 }
  0x8b   :  { %1172 = vmatprep.subr.bf16.mxu0 %v1526_v29  ;;  %1213 = vmatprep.subr.bf16.mxu1 %v1528_v30 }
  0x8e   :  { %1173 = vmatpush1.bf16.msra.mxu0 %v1525_v36  ;;  %1214 = vmatpush1.bf16.msra.mxu1 %v1527_v37 }
  0x8f   :  { %1174 = vmatprep.subr.bf16.mxu0 %v1534_v39  ;;  %1215 = vmatprep.subr.bf16.mxu1 %v1536_v41 }
  0x92   :  { %1175 = vmatpush1.bf16.msra.mxu0 %v1533_v42  ;;  %1216 = vmatpush1.bf16.msra.mxu1 %v1535_v44 }
  0x95   :  { %1191 = vmatmul.mubr.bf16.vlgmr.msra.gmra.mrb[12].mxu0 %v1984_v43  ;;  %1232 = vmatmul.mubr.bf16.vlgmr.msra.gmra.mrb[12].mxu1 %v1984_v43 }
  0x97   :  { %v1244_v4 = vpop.permute.xlu0 %1243 }
  0xfc   :  { %v577_v38 = vpop.f32.mrb[0].mxu0  ;;  %v618_v46 = vpop.f32.mrb[0].mxu1 }
  0xfd   :  { %v579_v45 = vpop.f32.mrb[1].mxu0  ;;  %v620_v19 = vpop.f32.mrb[1].mxu1 }
  0xfe   :  { %v581_v47 = vpop.f32.mrb[2].mxu0  ;;  %v622_v48 = vpop.f32.mrb[2].mxu1 }
  0xff   :  { %v582_v32 = vpop.f32.mrb[3].mxu0  ;;  %v623_v49 = vpop.f32.mrb[3].mxu1 }
 0x120   :  { %v659_v50 = vpop.f32.mrb[4].mxu0  ;;  %v700_v52 = vpop.f32.mrb[4].mxu1 }
 0x121   :  { %v661_v51 = vpop.f32.mrb[5].mxu0  ;;  %v702_v54 = vpop.f32.mrb[5].mxu1 }
 0x122   :  { %v663_v53 = vpop.f32.mrb[6].mxu0  ;;  %v704_v56 = vpop.f32.mrb[6].mxu1 }
 0x123   :  { %v664_v55 = vpop.f32.mrb[7].mxu0  ;;  %v705_v57 = vpop.f32.mrb[7].mxu1 }
 0x144   :  { %v1110_v58 = vpop.f32.mrb[8].mxu0  ;;  %v1151_v60 = vpop.f32.mrb[8].mxu1 }
 0x145   :  { %v1111_v59 = vadd.f32 %v1110_v58, %v577_v38  ;;  %v1112_v43 = vpop.f32.mrb[9].mxu0  ;;  %v1152_v61 = vadd.f32 %v1151_v60, %v618_v46  ;;  %v1153_v63 = vpop.f32.mrb[9].mxu1 }
 0x146   :  { %v1113_v62 = vadd.f32 %v1112_v43, %v579_v45  ;;  %v1114_v0 = vpop.f32.mrb[10].mxu0  ;;  %v1154_v40 = vadd.f32 %v1153_v63, %v620_v19  ;;  %v1155_v2 = vpop.f32.mrb[10].mxu1 }
 0x147   :  { %v1115_v1 = vpop.f32.mrb[11].mxu0  ;;  %v1156_v3 = vpop.f32.mrb[11].mxu1  ;;  %v1246_v5 = vadd.f32 %v1244_v4, %v1111_v59  ;;  %v1248_v8 = vadd.f32 %v1244_v4, %v1152_v61  ;;  %v1290_v61 = vld [vmem:[%s2115_s5] sm:$0xff] }
 0x148   :  { %v1247_v6 = vadd.f32 %v1244_v4, %v1113_v62  ;;  %v1249_v12 = vadd.f32 %v1244_v4, %v1154_v40  ;;  %v1307_v0 = vld [vmem:[%s2116_s6] sm:$0xff] }
 0x14a   :  { %v1254_v7 = vadd.f32 %v1247_v6, %v1246_v5 }
 0x14c   :  { %v1255_v9 = vadd.f32 %v1254_v7, %v1248_v8 }
 0x14e   :  { %v1256_v21 = vadd.f32 %v1255_v9, %v1249_v12 }
 0x168   :  { %v1192_v10 = vpop.f32.mrb[12].mxu0  ;;  %v1233_v13 = vpop.f32.mrb[12].mxu1 }
 0x169   :  { %v1193_v11 = vadd.f32 %v1192_v10, %v659_v50  ;;  %v1194_v14 = vpop.f32.mrb[13].mxu0  ;;  %v1234_v15 = vadd.f32 %v1233_v13, %v700_v52  ;;  %v1235_v17 = vpop.f32.mrb[13].mxu1 }
 0x16a   :  { %v1195_v16 = vadd.f32 %v1194_v14, %v661_v51  ;;  %v1196_v18 = vpop.f32.mrb[14].mxu0  ;;  %v1236_v22 = vadd.f32 %v1235_v17, %v702_v54  ;;  %v1237_v24 = vpop.f32.mrb[14].mxu1 }
 0x16b   :  { %v1250_v20 = vadd.f32 %v1244_v4, %v1193_v11  ;;  %v1197_v23 = vpop.f32.mrb[15].mxu0  ;;  %v1238_v26 = vpop.f32.mrb[15].mxu1  ;;  %v1252_v28 = vadd.f32 %v1244_v4, %v1234_v15 }
 0x16c   :  { %v1251_v25 = vadd.f32 %v1244_v4, %v1195_v16  ;;  %v1253_v30 = vadd.f32 %v1244_v4, %v1236_v22 }
 0x16d   :  { %v1257_v27 = vadd.f32 %v1256_v21, %v1250_v20 }
 0x16f   :  { %v1258_v29 = vadd.f32 %v1257_v27, %v1251_v25 }
 0x171   :  { %v1259_v31 = vadd.f32 %v1258_v29, %v1252_v28 }
 0x173   :  { %v1260_v33 = vadd.f32 %v1259_v31, %v1253_v30 }
 0x175   :  { %1261 = vadd.xlane.f32.xlu0 %v1260_v33 }
 0x202   :  { %v1262_v34 = vpop.xlane.xlu0 %1261 }
 0x203   :  { %v1263_v35 = vmul.f32 0.0009765625, %v1262_v34 }
 0x205   :  { %v1264_v36 = vsub.f32 %v1246_v5, %v1263_v35  ;;  %v1265_v37 = vsub.f32 %v1247_v6, %v1263_v35  ;;  %v1266_v39 = vsub.f32 %v1248_v8, %v1263_v35  ;;  %v1267_v41 = vsub.f32 %v1249_v12, %v1263_v35 }
 0x206   :  { %v1268_v38 = vsub.f32 %v1250_v20, %v1263_v35  ;;  %v1269_v47 = vsub.f32 %v1251_v25, %v1263_v35  ;;  %v1270_v48 = vsub.f32 %v1252_v28, %v1263_v35  ;;  %v1271_v51 = vsub.f32 %v1253_v30, %v1263_v35 }
 0x207   :  { %v1272_v42 = vmul.f32 %v1264_v36, %v1264_v36  ;;  %v1273_v44 = vmul.f32 %v1265_v37, %v1265_v37  ;;  %v1274_v45 = vmul.f32 %v1266_v39, %v1266_v39  ;;  %v1275_v19 = vmul.f32 %v1267_v41, %v1267_v41 }
 0x208   :  { %v1276_v49 = vmul.f32 %v1268_v38, %v1268_v38  ;;  %v1277_v52 = vmul.f32 %v1269_v47, %v1269_v47  ;;  %v1278_v54 = vmul.f32 %v1270_v48, %v1270_v48  ;;  %v1279_v56 = vmul.f32 %v1271_v51, %v1271_v51 }
 0x209   :  { %v1280_v46 = vadd.f32 %v1273_v44, %v1272_v42 }
 0x20b   :  { %v1281_v32 = vadd.f32 %v1280_v46, %v1274_v45 }
 0x20d   :  { %v1282_v50 = vadd.f32 %v1281_v32, %v1275_v19 }
 0x20f   :  { %v1283_v53 = vadd.f32 %v1282_v50, %v1276_v49 }
 0x211   :  { %v1284_v55 = vadd.f32 %v1283_v53, %v1277_v52 }
 0x213   :  { %v1285_v57 = vadd.f32 %v1284_v55, %v1278_v54 }
 0x215   :  { %v1286_v58 = vadd.f32 %v1285_v57, %v1279_v56 }
 0x217   :  { %1287 = vadd.xlane.f32.xlu1 %v1286_v58 }
 0x2a4   :  { %v1288_v59 = vpop.xlane.xlu1 %1287 }
 0x2a5   :  { %v1289_v60 = vmul.f32 0.0009765625, %v1288_v59 }
 0x2a7   :  { %v1291_v43 = vadd.f32 1e-05, %v1289_v60 }
 0x2a9   :  { %1556 = vrsqrt.f32 %v1291_v43 }
 0x2b3   :  { %v1557_v62 = vpop.eup %1556 }
 0x2b4   :  { %v1293_v63 = vmul.f32 %v1557_v62, %v1290_v61 }
 0x2b6   :  { %1296 = vperm.xlu1 %1551, %v1293_v63  }
 0x2ba   :  { %1310 = vperm.xlu1 %1551, %v1307_v0  }
 0x335   :  { %v1297_v40 = vpop.permute.xlu1 %1296 }
 0x336   :  { %v1299_v1 = vmul.f32 %v1297_v40, %v1264_v36  ;;  %v1300_v2 = vmul.f32 %v1297_v40, %v1265_v37  ;;  %v1301_v3 = vmul.f32 %v1297_v40, %v1266_v39  ;;  %v1302_v4 = vmul.f32 %v1297_v40, %v1267_v41 }
 0x337   :  { %v1303_v5 = vmul.f32 %v1297_v40, %v1268_v38  ;;  %v1304_v6 = vmul.f32 %v1297_v40, %v1269_v47  ;;  %v1305_v7 = vmul.f32 %v1297_v40, %v1270_v48  ;;  %v1306_v8 = vmul.f32 %v1297_v40, %v1271_v51 }
 0x339   :  { %v1311_v9 = vpop.permute.xlu1 %1310 }
 0x33a   :  { %v1313_v10 = vadd.f32 %v1311_v9, %v1299_v1  ;;  %v1314_v11 = vadd.f32 %v1311_v9, %v1300_v2  ;;  %v1315_v12 = vadd.f32 %v1311_v9, %v1301_v3  ;;  %v1316_v13 = vadd.f32 %v1311_v9, %v1302_v4 }
 0x33b   :  { %v1317_v14 = vadd.f32 %v1311_v9, %v1303_v5  ;;  %v1318_v15 = vadd.f32 %v1311_v9, %v1304_v6  ;;  %v1319_v16 = vadd.f32 %v1311_v9, %v1305_v7  ;;  %v1320_v17 = vadd.f32 %v1311_v9, %v1306_v8 }
 0x33c   :  { %vm1321_vm1 = vcmp.ge.f32.partialorder %v1313_v10, 0.0  ;;  %vm1322_vm2 = vcmp.ge.f32.partialorder %v1314_v11, 0.0  ;;  %vm1323_vm3 = vcmp.ge.f32.partialorder %v1315_v12, 0.0  ;;  %vm1324_vm4 = vcmp.ge.f32.partialorder %v1316_v13, 0.0 }
 0x33d   :  { %vm1325_vm5 = vcmp.ge.f32.partialorder %v1317_v14, 0.0  ;;  %vm1326_vm6 = vcmp.ge.f32.partialorder %v1318_v15, 0.0  ;;  %vm1327_vm7 = vcmp.ge.f32.partialorder %v1319_v16, 0.0  ;;  %vm1328_vm8 = vcmp.ge.f32.partialorder %v1320_v17, 0.0 }
 0x33e   :  { %v1329_v18 = vmul.f32 0.01, %v1313_v10  ;;  %v1330_v20 = vmul.f32 0.01, %v1314_v11  ;;  %v1331_v21 = vmul.f32 0.01, %v1315_v12 }
 0x33f   :  { %v1332_v22 = vmul.f32 0.01, %v1316_v13  ;;  %v1333_v23 = vmul.f32 0.01, %v1317_v14  ;;  %v1334_v24 = vmul.f32 0.01, %v1318_v15 }
 0x340   :  { %v1335_v25 = vmul.f32 0.01, %v1319_v16  ;;  %v1336_v26 = vmul.f32 0.01, %v1320_v17  ;;  %v1337_v27 = vsel %vm1321_vm1, %v1313_v10, %v1329_v18  ;;  %v1338_v28 = vsel %vm1322_vm2, %v1314_v11, %v1330_v20 }
 0x341   :  { %v1339_v29 = vsel %vm1323_vm3, %v1315_v12, %v1331_v21  ;;  %v1340_v30 = vsel %vm1324_vm4, %v1316_v13, %v1332_v22  ;;  %v1341_v31 = vsel %vm1325_vm5, %v1317_v14, %v1333_v23  ;;  %v1342_v33 = vsel %vm1326_vm6, %v1318_v15, %v1334_v24 }
 0x342   :  { %v1343_v34 = vsel %vm1327_vm7, %v1319_v16, %v1335_v25  ;;  %v1344_v35 = vsel %vm1328_vm8, %v1320_v17, %v1336_v26  ;;  %v1545_v36 = vpack.c.bf16 %v1338_v28, %v1337_v27  ;;  %v1546_v37 = vpack.c.bf16 %v1340_v30, %v1339_v29 }
 0x343   :  { %v1547_v39 = vpack.c.bf16 %v1342_v33, %v1341_v31  ;;  %v1548_v41 = vpack.c.bf16 %v1344_v35, %v1343_v34 }
 0x344   :  { %1377 = vst [vmem:[%s2117_s7] sm:$0xff] %v1545_v36  ;;  %1378 = vst [vmem:[%s2117_s7 + $0x8] sm:$0xff] %v1546_v37 }
 0x345   :  { %1379 = vst [vmem:[%s2117_s7 + $0x10] sm:$0xff] %v1547_v39  ;;  %1380 = vst [vmem:[%s2117_s7 + $0x18] sm:$0xff] %v1548_v41 }

// kernel: _lambda_.23
= control target key start
LH: loop header
LB: loop body
LE: loop exit
PB: predicated region body
PF: predicated region fallthrough
CT: control target
= control target key end

     0   :  { %v537_v3 = vmov 0   ;;  %vm242_vm0 = vcmask 1043456   ;;  %vm238_vm1 = vcmask 588800   ;;  %s701_s0 = inlined_call_operand.vmem [shape: bf16[72,1024], index: 0, kind: input, shape index: {}]   ;;  %s702_s2 = inlined_call_operand.vmem [shape: f32[3,1], index: 2, kind: input, shape index: {}]   ;;  %s703_s1 = inlined_call_operand.vmem [shape: bf16[3,72], index: 1, kind: input, shape index: {}]   ;;  %s704_s3 = inlined_call_operand.vmem [shape: f32[3,1024], index: 3, kind: output, shape index: {}]  }
   0x1   :  { %v16_v0 = vld [vmem:[%s701_s0] sm:$0xff]  ;;  %v17_v2 = vld [vmem:[%s701_s0 + $0x8] sm:$0xff]  ;;  %299 = vmatprep.mubr.bf16.mxu0 %v537_v3  ;;  %340 = vmatprep.mubr.bf16.mxu1 %v537_v3  ;;  %v18_v40 = vld [vmem:[%s701_s0 + $0x10] sm:$0xff] }
   0x2   :  { %v20_v1 = vld [vmem:[%s701_s0 + $0x20] sm:$0xff]  ;;  %v21_v5 = vld [vmem:[%s701_s0 + $0x28] sm:$0xff]  ;;  %512 = vset.pattern.permute.xlu0 %v537_v3  ;;  %v22_v41 = vld [vmem:[%s701_s0 + $0x30] sm:$0xff] }
   0x3   :  { %v464_v4 = vcombine.high %v16_v0, %v20_v1  ;;  %v463_v6 = vcombine.low %v16_v0, %v20_v1  ;;  %v24_v7 = vld [vmem:[%s701_s0 + $0x40] sm:$0xff]  ;;  %v466_v9 = vcombine.high %v17_v2, %v21_v5  ;;  %v465_v10 = vcombine.low %v17_v2, %v21_v5  ;;  %v25_v12 = vld [vmem:[%s701_s0 + $0x48] sm:$0xff]  ;;  %v19_v42 = vld [vmem:[%s701_s0 + $0x18] sm:$0xff] }
   0x4   :  { %v28_v8 = vld [vmem:[%s701_s0 + $0x60] sm:$0xff]  ;;  %v29_v13 = vld [vmem:[%s701_s0 + $0x68] sm:$0xff]  ;;  %v23_v43 = vld [vmem:[%s701_s0 + $0x38] sm:$0xff]  ;;  %v468_v45 = vcombine.high %v18_v40, %v22_v41  ;;  %v467_v53 = vcombine.low %v18_v40, %v22_v41 }
   0x5   :  { %v472_v11 = vcombine.high %v24_v7, %v28_v8  ;;  %v32_v14 = vld [vmem:[%s701_s0 + $0x80] sm:$0xff]  ;;  %267 = vmatprep.subr.bf16.mxu0 %v464_v4  ;;  %v474_v15 = vcombine.high %v25_v12, %v29_v13  ;;  %v33_v17 = vld [vmem:[%s701_s0 + $0x88] sm:$0xff]  ;;  %308 = vmatprep.subr.bf16.mxu1 %v466_v9  ;;  %v471_v19 = vcombine.low %v24_v7, %v28_v8  ;;  %v26_v48 = vld [vmem:[%s701_s0 + $0x50] sm:$0xff] }
   0x6   :  { %v36_v16 = vld [vmem:[%s701_s0 + $0xa0] sm:$0xff]  ;;  %v37_v18 = vld [vmem:[%s701_s0 + $0xa8] sm:$0xff]  ;;  %268 = vmatpush1.bf16.msra.mxu0 %v463_v6  ;;  %309 = vmatpush1.bf16.msra.mxu1 %v465_v10  ;;  %v473_v20 = vcombine.low %v25_v12, %v29_v13  ;;  %v470_v47 = vcombine.high %v19_v42, %v23_v43  ;;  %v30_v49 = vld [vmem:[%s701_s0 + $0x70] sm:$0xff]  ;;  %v469_v54 = vcombine.low %v19_v42, %v23_v43 }
   0x7   :  { %269 = vmatprep.subr.bf16.mxu0 %v472_v11  ;;  %v480_v21 = vcombine.high %v32_v14, %v36_v16  ;;  %310 = vmatprep.subr.bf16.mxu1 %v474_v15  ;;  %v482_v22 = vcombine.high %v33_v17, %v37_v18  ;;  %v40_v23 = vld [vmem:[%s701_s0 + $0xc0] sm:$0xff]  ;;  %v41_v25 = vld [vmem:[%s701_s0 + $0xc8] sm:$0xff]  ;;  %v479_v27 = vcombine.low %v32_v14, %v36_v16  ;;  %v27_v50 = vld [vmem:[%s701_s0 + $0x58] sm:$0xff] }
   0x8   :  { %v44_v24 = vld [vmem:[%s701_s0 + $0xe0] sm:$0xff]  ;;  %v45_v26 = vld [vmem:[%s701_s0 + $0xe8] sm:$0xff]  ;;  %v481_v28 = vcombine.low %v33_v17, %v37_v18  ;;  %v31_v51 = vld [vmem:[%s701_s0 + $0x78] sm:$0xff]  ;;  %v476_v55 = vcombine.high %v26_v48, %v30_v49  ;;  %v475_v61 = vcombine.low %v26_v48, %v30_v49 }
   0x9   :  { %v488_v29 = vcombine.high %v40_v23, %v44_v24  ;;  %v490_v30 = vcombine.high %v41_v25, %v45_v26  ;;  %v48_v31 = vld [vmem:[%s701_s0 + $0x100] sm:$0xff]  ;;  %v49_v32 = vld [vmem:[%s701_s0 + $0x108] sm:$0xff]  ;;  %v487_v33 = vcombine.low %v40_v23, %v44_v24  ;;  %v489_v35 = vcombine.low %v41_v25, %v45_v26  ;;  %v34_v57 = vld [vmem:[%s701_s0 + $0x90] sm:$0xff] }
   0xa   :  { %270 = vmatpush1.bf16.msra.mxu0 %v471_v19  ;;  %311 = vmatpush1.bf16.msra.mxu1 %v473_v20  ;;  %v52_v34 = vld [vmem:[%s702_s2] sm:$0x7]  ;;  %v496_v36 = vcombine.high %v48_v31, %v48_v31  ;;  %v495_v37 = vcombine.low %v48_v31, %v48_v31  ;;  %v498_v38 = vcombine.high %v49_v32, %v49_v32  ;;  %v38_v58 = vld [vmem:[%s701_s0 + $0xb0] sm:$0xff]  ;;  %v35_v59 = vld [vmem:[%s701_s0 + $0x98] sm:$0xff] }
   0xb   :  { %271 = vmatprep.subr.bf16.mxu0 %v480_v21  ;;  %312 = vmatprep.subr.bf16.mxu1 %v482_v22  ;;  %v497_v39 = vcombine.low %v49_v32, %v49_v32  ;;  %v15_v52 = vld [vmem:[%s703_s1] sm:$0x3]  ;;  %v478_v56 = vcombine.high %v27_v50, %v31_v51  ;;  %v39_v60 = vld [vmem:[%s701_s0 + $0xb8] sm:$0xff]  ;;  %v477_v62 = vcombine.low %v27_v50, %v31_v51  ;;  %v42_v1 = vld [vmem:[%s701_s0 + $0xd0] sm:$0xff] }
   0xc   :  { %55 = vperm.xlu0 %512, %v52_v34   ;;  %v244_v44 = vsel %vm242_vm0, %v495_v37, 0  ;;  %v484_v63 = vcombine.high %v34_v57, %v38_v58  ;;  %v486_v0 = vcombine.high %v35_v59, %v39_v60  ;;  %v46_v2 = vld [vmem:[%s701_s0 + $0xf0] sm:$0xff]  ;;  %v43_v4 = vld [vmem:[%s701_s0 + $0xd8] sm:$0xff]  ;;  %v483_v6 = vcombine.low %v34_v57, %v38_v58 }
   0xd   :  { %v250_v46 = vsel %vm242_vm0, %v497_v39, 0  ;;  %v47_v5 = vld [vmem:[%s701_s0 + $0xf8] sm:$0xff]  ;;  %v485_v7 = vcombine.low %v35_v59, %v39_v60  ;;  %v492_v8 = vcombine.high %v42_v1, %v46_v2  ;;  %v50_v10 = vld [vmem:[%s701_s0 + $0x110] sm:$0xff]  ;;  %v491_v12 = vcombine.low %v42_v1, %v46_v2 }
   0xe   :  { %272 = vmatpush1.bf16.msra.mxu0 %v479_v27  ;;  %313 = vmatpush1.bf16.msra.mxu1 %v481_v28  ;;  %v494_v9 = vcombine.high %v43_v4, %v47_v5  ;;  %v51_v11 = vld [vmem:[%s701_s0 + $0x118] sm:$0xff]  ;;  %v500_v13 = vcombine.high %v50_v10, %v50_v10  ;;  %v499_v14 = vcombine.low %v50_v10, %v50_v10 }
   0xf   :  { %273 = vmatprep.subr.bf16.mxu0 %v488_v29  ;;  %314 = vmatprep.subr.bf16.mxu1 %v490_v30  ;;  %v502_v15 = vcombine.high %v51_v11, %v51_v11  ;;  %v501_v16 = vcombine.low %v51_v11, %v51_v11 }
  0x10   :  { %v256_v17 = vsel %vm242_vm0, %v499_v14, 0 }
  0x11   :  { %v262_v18 = vsel %vm242_vm0, %v501_v16, 0 }
  0x12   :  { %274 = vmatpush1.bf16.msra.mxu0 %v487_v33  ;;  %315 = vmatpush1.bf16.msra.mxu1 %v489_v35 }
  0x13   :  { %503 = vmatprep.subr.msk.bf16.mxu0 %vm242_vm0, %v496_v36  ;;  %505 = vmatprep.subr.msk.bf16.mxu1 %vm242_vm0, %v498_v38 }
  0x16   :  { %276 = vmatpush1.bf16.msra.mxu0 %v244_v44  ;;  %317 = vmatpush1.bf16.msra.mxu1 %v250_v46 }
  0x17   :  { %349 = vmatprep.subr.bf16.mxu0 %v468_v45  ;;  %390 = vmatprep.subr.bf16.mxu1 %v470_v47 }
  0x19   :  { %504 = vmatmul.mubr.msk.bf16.vlgmr.msra.gmra.mrb[0].mxu0 %vm238_vm1, %v15_v52  ;;  %506 = vmatmul.mubr.msk.bf16.vlgmr.msra.gmra.mrb[0].mxu1 %vm238_vm1, %v15_v52 }
  0x1a   :  { %350 = vmatpush1.bf16.msra.mxu0 %v467_v53  ;;  %391 = vmatpush1.bf16.msra.mxu1 %v469_v54 }
  0x1b   :  { %351 = vmatprep.subr.bf16.mxu0 %v476_v55  ;;  %392 = vmatprep.subr.bf16.mxu1 %v478_v56 }
  0x1c   :  { %381 = vmatprep.mubr.bf16.mxu0 %v537_v3  ;;  %422 = vmatprep.mubr.bf16.mxu1 %v537_v3  ;;  %v493_v3 = vcombine.low %v43_v4, %v47_v5 }
  0x1e   :  { %352 = vmatpush1.bf16.msra.mxu0 %v475_v61  ;;  %393 = vmatpush1.bf16.msra.mxu1 %v477_v62 }
  0x1f   :  { %353 = vmatprep.subr.bf16.mxu0 %v484_v63  ;;  %394 = vmatprep.subr.bf16.mxu1 %v486_v0 }
  0x22   :  { %354 = vmatpush1.bf16.msra.mxu0 %v483_v6  ;;  %395 = vmatpush1.bf16.msra.mxu1 %v485_v7 }
  0x23   :  { %355 = vmatprep.subr.bf16.mxu0 %v492_v8  ;;  %396 = vmatprep.subr.bf16.mxu1 %v494_v9 }
  0x26   :  { %356 = vmatpush1.bf16.msra.mxu0 %v491_v12  ;;  %397 = vmatpush1.bf16.msra.mxu1 %v493_v3 }
  0x27   :  { %507 = vmatprep.subr.msk.bf16.mxu0 %vm242_vm0, %v500_v13  ;;  %509 = vmatprep.subr.msk.bf16.mxu1 %vm242_vm0, %v502_v15 }
  0x2a   :  { %358 = vmatpush1.bf16.msra.mxu0 %v256_v17  ;;  %399 = vmatpush1.bf16.msra.mxu1 %v262_v18 }
  0x2d   :  { %508 = vmatmul.mubr.msk.bf16.vlgmr.msra.gmra.mrb[4].mxu0 %vm238_vm1, %v15_v52  ;;  %510 = vmatmul.mubr.msk.bf16.vlgmr.msra.gmra.mrb[4].mxu1 %vm238_vm1, %v15_v52 }
  0x8b   :  { %v56_v19 = vpop.permute.xlu0 %55 }
  0xec   :  { %v301_v20 = vpop.f32.mrb[0].mxu0  ;;  %v342_v21 = vpop.f32.mrb[0].mxu1 }
  0xed   :  { %v302_v22 = vadd.f32 %v301_v20, %v56_v19  ;;  %v303_v23 = vpop.f32.mrb[1].mxu0  ;;  %v343_v24 = vadd.f32 %v342_v21, %v56_v19  ;;  %v344_v26 = vpop.f32.mrb[1].mxu1 }
  0xee   :  { %v304_v25 = vadd.f32 %v303_v23, %v56_v19  ;;  %v305_v27 = vpop.f32.mrb[2].mxu0  ;;  %v345_v28 = vadd.f32 %v344_v26, %v56_v19  ;;  %v346_v29 = vpop.f32.mrb[2].mxu1 }
  0xef   :  { %521 = vtanh.f32 %v302_v22  ;;  %v306_v30 = vpop.f32.mrb[3].mxu0  ;;  %v347_v31 = vpop.f32.mrb[3].mxu1 }
  0xf0   :  { %523 = vtanh.f32 %v343_v24 }
  0xf1   :  { %525 = vtanh.f32 %v304_v25 }
  0xf2   :  { %527 = vtanh.f32 %v345_v28 }
  0xf9   :  { %v522_v32 = vpop.eup %521 }
  0xfa   :  { %v524_v33 = vpop.eup %523 }
  0xfb   :  { %v526_v34 = vpop.eup %525 }
  0xfc   :  { %v528_v35 = vpop.eup %527  ;;  %v447_v36 = vcombine.low %v522_v32, %v526_v34 }
  0xfd   :  { %v448_v37 = vcombine.low %v524_v33, %v528_v35 }
  0xfe   :  { %455 = vst [vmem:[%s704_s3] sm:$0x77] %v447_v36 }
  0xff   :  { %456 = vst [vmem:[%s704_s3 + $0x8] sm:$0x77] %v448_v37 }
 0x100   :  { %v383_v38 = vpop.f32.mrb[4].mxu0  ;;  %v424_v40 = vpop.f32.mrb[4].mxu1 }
 0x101   :  { %v384_v39 = vadd.f32 %v383_v38, %v56_v19  ;;  %v385_v41 = vpop.f32.mrb[5].mxu0  ;;  %v425_v42 = vadd.f32 %v424_v40, %v56_v19  ;;  %v426_v44 = vpop.f32.mrb[5].mxu1 }
 0x102   :  { %v386_v43 = vadd.f32 %v385_v41, %v56_v19  ;;  %v387_v45 = vpop.f32.mrb[6].mxu0  ;;  %v427_v46 = vadd.f32 %v426_v44, %v56_v19  ;;  %v428_v47 = vpop.f32.mrb[6].mxu1 }
 0x103   :  { %529 = vtanh.f32 %v384_v39  ;;  %v388_v48 = vpop.f32.mrb[7].mxu0  ;;  %v429_v49 = vpop.f32.mrb[7].mxu1 }
 0x104   :  { %531 = vtanh.f32 %v425_v42 }
 0x105   :  { %533 = vtanh.f32 %v386_v43 }
 0x106   :  { %535 = vtanh.f32 %v427_v46 }
 0x10d   :  { %v530_v50 = vpop.eup %529 }
 0x10e   :  { %v532_v51 = vpop.eup %531 }
 0x10f   :  { %v534_v52 = vpop.eup %533 }
 0x110   :  { %v536_v53 = vpop.eup %535  ;;  %v449_v54 = vcombine.low %v530_v50, %v534_v52 }
 0x111   :  { %v450_v55 = vcombine.low %v532_v51, %v536_v53 }
 0x112   :  { %457 = vst [vmem:[%s704_s3 + $0x10] sm:$0x77] %v449_v54 }
 0x113   :  { %458 = vst [vmem:[%s704_s3 + $0x18] sm:$0x77] %v450_v55 }

</bundles_post_ra>
